<compile_context>
chip_gen: v7x
topology: tpu7x:2x2x1
jax: 0.10.0
libtpu: 0.0.40
codegen_flags: <defaults>
</compile_context>

<pallas_src>
import functools

import jax
import jax.numpy as jnp
import numpy as np
from jax.experimental import pallas as pl
from jax.experimental.pallas import tpu as pltpu


def _round_up(x, m):
    return ((x + m - 1) // m) * m


def _geometry(H, W):
    """Static spatial geometry of the conv stack for an (H, W) input."""
    KH = KW = 5
    PK = 3            # maxpool kernel
    pad_top = 4       # conv1 padding=(4, 0)
    H0 = H + 2 * pad_top
    H1, W1 = H0 - (KH - 1), W - (KW - 1)
    H2, W2 = H1 - (KH - 1), W1 - (KW - 1)
    H3, W3 = H2 - (KH - 1), W2 - (KW - 1)
    h_pool, w_pool = H3 - (PK - 1), W3 - (PK - 1)
    assert h_pool >= 1 and w_pool >= 1, "input spatial dims too small for this net"
    return dict(KH=KH, KW=KW, PK=PK, pad_top=pad_top, H0=H0,
                H1=H1, W1=W1, H2=H2, W2=W2, H3=H3, W3=W3,
                h_pool=h_pool, w_pool=w_pool)


# ---------------------------------------------------------------------------
# Kernel 1: fused conv stack (conv0 -> conv1 -> conv2 -> conv3 -> maxpool)
# ---------------------------------------------------------------------------
def _conv_stack_kernel(x_ref, w0_ref, b0_ref,
                       w1_ref, s1_ref, b1_ref,
                       w2_ref, s2_ref, b2_ref,
                       w3_ref, s3_ref, b3_ref,
                       o_ref,
                       aw0_ref, aw1_ref, aw2_ref, a3_ref,
                       *, geom):
    (W, H, KH, KW, PK, PAD, R0, R1, R2, R3, Rp) = geom
    HW = H * W

    def leaky(v):
        return jnp.maximum(v, 0.01 * v)          # LeakyReLU(0.01), 2 VALU ops

    def widen(dst_ref, act_f32, base, r_out, c):
        """K-fold the width taps: dst[base + r, j*c:(j+1)*c] = act[r + j] (bf16).
        Rows that would reference act[>= r_out] are left stale; they are only read
        while computing wrap-around (invalid) output columns, never by valid ones."""
        for j in range(KW):
            dst_ref[base:base + r_out - j, j * c:(j + 1) * c] = (
                act_f32[j:r_out, :].astype(jnp.bfloat16))

    # conv1's zero padding (padding=(4,0)): only these two bands need defined zeros;
    # everything else that valid outputs read is rewritten below every grid step.
    zeros_pad = jnp.zeros((PAD, aw0_ref.shape[1]), aw0_ref.dtype)
    aw0_ref[0:PAD, :] = zeros_pad
    aw0_ref[PAD + HW:R0, :] = zeros_pad

    # conv0 (1x1, Cin=1) + folded BN + LeakyReLU, written straight into the widened
    # conv1 input buffer -- no base a0 buffer and no HBM round trip.
    x = x_ref[0]                                              # (H*W, 1) f32
    act0 = leaky(x * w0_ref[...] + b0_ref[...])               # (H*W, 64) f32
    widen(aw0_ref, act0, PAD, HW, 64)

    def conv5x5(src_ref, w_ref, s_ref, b_ref, r_out, c_in):
        """5x5 conv with the width taps folded into K: 5 matmuls with K = KW*c_in
        over the flattened (h*W + w, KW*c_in) layout; LHS starts are 8-aligned."""
        kwc = KW * c_in
        acc = jnp.dot(src_ref[0:r_out, :], w_ref[0:kwc, :],
                      preferred_element_type=jnp.float32)
        for i in range(1, KH):
            acc = acc + jnp.dot(src_ref[i * W:i * W + r_out, :],
                                w_ref[i * kwc:(i + 1) * kwc, :],
                                preferred_element_type=jnp.float32)
        return leaky(acc * s_ref[...] + b_ref[...])           # f32 epilogue

    act1 = conv5x5(aw0_ref, w1_ref, s1_ref, b1_ref, R1, 64)   # (R1, 128)
    widen(aw1_ref, act1, 0, R1, 128)
    act2 = conv5x5(aw1_ref, w2_ref, s2_ref, b2_ref, R2, 128)  # (R2, 128)
    widen(aw2_ref, act2, 0, R2, 128)
    act3 = conv5x5(aw2_ref, w3_ref, s3_ref, b3_ref, R3, 128)  # (R3, 128)
    a3_ref[0:R3, :] = act3

    # MaxPool2d(kernel=3, stride=1, ceil_mode=True) fused on the VMEM tile.
    p = a3_ref[0:Rp, :]
    for di in range(PK):
        for dj in range(PK):
            if di == 0 and dj == 0:
                continue
            p = jnp.maximum(p, a3_ref[di * W + dj:di * W + dj + Rp, :])

    # Single lane-dense bf16 store of the whole pooled slab; the host slices the
    # valid (h_pool, w_pool) window (wrap-around columns carry garbage by design).
    o_ref[0] = p.astype(jnp.bfloat16)


def run_conv_stack(x, p):
    """x: (B, 1, H, W) NCHW f32 -> pooled activations (B, h_pool*W, 128) bf16."""
    B, cin, H, W = x.shape
    assert cin == 1
    g = _geometry(H, W)
    KH, KW, PK = g['KH'], g['KW'], g['PK']
    PAD = g['pad_top'] * W
    R0 = g['H0'] * W
    R1 = g['H1'] * W
    R2 = g['H2'] * W
    R3 = g['H3'] * W
    Rp = g['h_pool'] * W
    A0 = _round_up(R0, 8)
    A1 = _round_up(R1, 8)
    A2 = _round_up(R2, 8)
    A3 = _round_up(R3 + 2 * W + PK, 8)

    # The (H*W, 1) column layout is produced by the HBM->VMEM DMA itself (sublane-major);
    # lane-sparse but negligible at these sizes.  TODO(synk): pass (B, H*W) lane-dense +
    # one in-kernel transpose once H*W is large.
    x_rows = x.reshape(B, H * W, 1).astype(jnp.float32)

    geom = (W, H, KH, KW, PK, PAD, R0, R1, R2, R3, Rp)
    kernel = functools.partial(_conv_stack_kernel, geom=geom)

    flops = 2 * B * (H * W * 64
                     + R1 * (KH * KW * 64) * 128
                     + (R2 + R3) * (KH * KW * 128) * 128)
    bytes_accessed = int(
        x_rows.size * 4
        + sum(int(np.prod(p[k].shape)) * jnp.dtype(p[k].dtype).itemsize
              for k in ('w0', 'b0', 'w1', 's1', 'b1',
                        'w2', 's2', 'b2', 'w3', 's3', 'b3'))
        + B * Rp * 128 * 2)

    const2 = lambda b: (0, 0)
    out = pl.pallas_call(
        kernel,
        out_shape=jax.ShapeDtypeStruct((B, Rp, 128), jnp.bfloat16),
        grid_spec=pltpu.PrefetchScalarGridSpec(
            num_scalar_prefetch=0,
            grid=(B,),
            in_specs=[
                pl.BlockSpec((1, H * W, 1), lambda b: (b, 0, 0)),
                pl.BlockSpec((1, 64), const2),
                pl.BlockSpec((1, 64), const2),
                pl.BlockSpec((KH * KW * 64, 128), const2),
                pl.BlockSpec((1, 128), const2),
                pl.BlockSpec((1, 128), const2),
                pl.BlockSpec((KH * KW * 128, 128), const2),
                pl.BlockSpec((1, 128), const2),
                pl.BlockSpec((1, 128), const2),
                pl.BlockSpec((KH * KW * 128, 128), const2),
                pl.BlockSpec((1, 128), const2),
                pl.BlockSpec((1, 128), const2),
            ],
            out_specs=pl.BlockSpec((1, Rp, 128), lambda b: (b, 0, 0)),
            scratch_shapes=[
                pltpu.VMEM((A0, KW * 64), jnp.bfloat16),    # widened conv1 input
                pltpu.VMEM((A1, KW * 128), jnp.bfloat16),   # widened conv2 input
                pltpu.VMEM((A2, KW * 128), jnp.bfloat16),   # widened conv3 input
                pltpu.VMEM((A3, 128), jnp.float32),         # conv3 output (pool input)
            ]),
        compiler_params=pltpu.CompilerParams(
            dimension_semantics=("parallel",),
            vmem_limit_bytes=32 * 1024 * 1024),
        cost_estimate=pl.CostEstimate(flops=int(flops), transcendentals=0,
                                      bytes_accessed=bytes_accessed),
    )(x_rows, p['w0'], p['b0'], p['w1'], p['s1'], p['b1'],
      p['w2'], p['s2'], p['b2'], p['w3'], p['s3'], p['b3'])
    return out, g


# ---------------------------------------------------------------------------
# Kernel 2: fused FC stack (fc1 -> fc1_r -> fc15 -> fc16 -> fc2)
# ---------------------------------------------------------------------------
def _fc_stack_kernel(x_ref,
                     w1_ref, s1_ref, b1_ref,
                     w2_ref, s2_ref, b2_ref,
                     w3_ref, s3_ref, b3_ref,
                     w4_ref, s4_ref, b4_ref,
                     w5_ref, b5_ref,
                     o_ref):
    def dense(h_bf16, w_ref, s_ref, b_ref):
        y = jnp.dot(h_bf16, w_ref[...], preferred_element_type=jnp.float32)
        y = y * s_ref[...] + b_ref[...]
        return jnp.maximum(y, 0.01 * y).astype(jnp.bfloat16)

    h = x_ref[...]                                   # bf16 straight from conv kernel
    h = dense(h, w1_ref, s1_ref, b1_ref)
    h = dense(h, w2_ref, s2_ref, b2_ref)
    h = dense(h, w3_ref, s3_ref, b3_ref)
    h = dense(h, w4_ref, s4_ref, b4_ref)
    # fc2: no BN, no ReLU in the reference forward
    o_ref[...] = (jnp.dot(h, w5_ref[...], preferred_element_type=jnp.float32)
                  + b5_ref[...])


def run_fc_stack(flat_bf16, p):
    """flat: (B_pad, num_features) bf16 (B_pad % 8 == 0) -> padded logits f32."""
    B, F = flat_bf16.shape
    assert B % 8 == 0
    n_out_pad = p['wfc2'].shape[1]
    # batch tile: largest multiple of 8 dividing B, capped at 256 (M sweet spot)
    tb = 8
    for cand in range(min(B, 256), 7, -8):
        if B % cand == 0:
            tb = cand
            break
    const2 = lambda i: (0, 0)
    flops = 2 * B * (F * 512 + 512 * 512 + 512 * 256 + 256 * 128 + 128 * n_out_pad)
    bytes_accessed = int(
        B * F * 2
        + sum(int(np.prod(p[k].shape)) * jnp.dtype(p[k].dtype).itemsize
              for k in ('wfc1', 'sfc1', 'bfc1', 'wfc1r', 'sfc1r', 'bfc1r',
                        'wfc15', 'sfc15', 'bfc15', 'wfc16', 'sfc16', 'bfc16',
                        'wfc2', 'bfc2'))
        + B * n_out_pad * 4)
    return pl.pallas_call(
        _fc_stack_kernel,
        out_shape=jax.ShapeDtypeStruct((B, n_out_pad), jnp.float32),
        grid=(B // tb,),
        in_specs=[
            pl.BlockSpec((tb, F), lambda i: (i, 0)),
            pl.BlockSpec((F, 512), const2),
            pl.BlockSpec((1, 512), const2),
            pl.BlockSpec((1, 512), const2),
            pl.BlockSpec((512, 512), const2),
            pl.BlockSpec((1, 512), const2),
            pl.BlockSpec((1, 512), const2),
            pl.BlockSpec((512, 256), const2),
            pl.BlockSpec((1, 256), const2),
            pl.BlockSpec((1, 256), const2),
            pl.BlockSpec((256, 128), const2),
            pl.BlockSpec((1, 128), const2),
            pl.BlockSpec((1, 128), const2),
            pl.BlockSpec((128, n_out_pad), const2),
            pl.BlockSpec((1, n_out_pad), const2),
        ],
        out_specs=pl.BlockSpec((tb, n_out_pad), lambda i: (i, 0)),
        compiler_params=pltpu.CompilerParams(
            dimension_semantics=("parallel",),
            vmem_limit_bytes=32 * 1024 * 1024),
        cost_estimate=pl.CostEstimate(flops=int(flops), transcendentals=0,
                                      bytes_accessed=bytes_accessed),
    )(flat_bf16, p['wfc1'], p['sfc1'], p['bfc1'],
      p['wfc1r'], p['sfc1r'], p['bfc1r'],
      p['wfc15'], p['sfc15'], p['bfc15'],
      p['wfc16'], p['sfc16'], p['bfc16'],
      p['wfc2'], p['bfc2'])


# ---------------------------------------------------------------------------
# Parameters (synthetic, deterministic).  BatchNorm is folded in eval mode.
# ---------------------------------------------------------------------------
def init_params(key, n_chars, h_pool, w_pool):
    eps = 1e-5
    ks = iter(jax.random.split(key, 64))

    def w_init(shape, scale=0.05):
        return scale * jax.random.normal(next(ks), shape, dtype=jnp.float32)

    def bn_init(c):
        gamma = 1.0 + 0.1 * jax.random.normal(next(ks), (c,), jnp.float32)
        beta = 0.05 * jax.random.normal(next(ks), (c,), jnp.float32)
        mean = 0.05 * jax.random.normal(next(ks), (c,), jnp.float32)
        var = jax.random.uniform(next(ks), (c,), jnp.float32,
                                 minval=0.5, maxval=1.5)
        return gamma, beta, mean, var

    def fold(lin_bias, gamma, beta, mean, var):
        s = gamma / jnp.sqrt(var + eps)
        return s, (lin_bias - mean) * s + beta

    p = {}

    # conv0: PyTorch (64,1,1,1) + bias; BN scale pre-multiplied into the weight.
    w = w_init((64, 1, 1, 1)); cb = w_init((64,), 0.01)
    s0, b0 = fold(cb, *bn_init(64))
    p['w0'] = (w.reshape(1, 64) * s0.reshape(1, 64)).astype(jnp.float32)
    p['b0'] = b0.reshape(1, 64).astype(jnp.float32)

    # conv1..conv3: PyTorch (Cout,Cin,5,5) -> tap-major (kh, kw, cin) rows x Cout, bf16.
    # Row index = kh*(5*cin) + kw*cin + ci, matching the K-folded lane layout in-kernel.
    def conv_block(cout, cin):
        w = w_init((cout, cin, 5, 5)); cb = w_init((cout,), 0.01)
        wmat = jnp.transpose(w, (2, 3, 1, 0)).reshape(5 * 5 * cin, cout)
        s, b = fold(cb, *bn_init(cout))
        return wmat.astype(jnp.bfloat16), s.reshape(1, cout), b.reshape(1, cout)

    p['w1'], p['s1'], p['b1'] = conv_block(128, 64)
    p['w2'], p['s2'], p['b2'] = conv_block(128, 128)
    p['w3'], p['s3'], p['b3'] = conv_block(128, 128)

    num_features = 128 * h_pool * w_pool

    def fc(in_f, out_f, bn=True):
        w = w_init((in_f, out_f))
        b = w_init((out_f,), 0.01)
        if bn:
            s, bb = fold(b, *bn_init(out_f))
        else:
            s, bb = jnp.ones((out_f,), jnp.float32), b
        return w, s.reshape(1, out_f), bb.reshape(1, out_f)

    # fc1 generated in PyTorch NCHW-flatten row order, then rows are permuted ONCE
    # so the kernel consumes the NHWC-flat pooled activations directly.
    w_nchw, p['sfc1'], p['bfc1'] = fc(num_features, 512)
    perm = np.asarray([c * h_pool * w_pool + hh * w_pool + ww
                       for hh in range(h_pool)
                       for ww in range(w_pool)
                       for c in range(128)], dtype=np.int32)
    p['wfc1'] = jnp.take(w_nchw, jnp.asarray(perm), axis=0).astype(jnp.bfloat16)

    w, p['sfc1r'], p['bfc1r'] = fc(512, 512); p['wfc1r'] = w.astype(jnp.bfloat16)
    w, p['sfc15'], p['bfc15'] = fc(512, 256); p['wfc15'] = w.astype(jnp.bfloat16)
    w, p['sfc16'], p['bfc16'] = fc(256, 128); p['wfc16'] = w.astype(jnp.bfloat16)

    # fc2 (no BN/ReLU in the reference forward); pad 15 -> 128 output lanes.
    n_out = n_chars * 3
    n_out_pad = _round_up(n_out, 128)
    w, _s, b = fc(128, n_out, bn=False)
    p['wfc2'] = jnp.zeros((128, n_out_pad), jnp.bfloat16).at[:, :n_out].set(
        w.astype(jnp.bfloat16))
    p['bfc2'] = jnp.zeros((1, n_out_pad), jnp.float32).at[:, :n_out].set(b)
    return p


# ---------------------------------------------------------------------------
# Forward pass
# ---------------------------------------------------------------------------
def basic_cnn_forward(params, batch_nchw, region_tag, *, n_chars):
    del region_tag                     # unused by the reference forward
    x = batch_nchw.astype(jnp.float32)
    B, _, H, W = x.shape
    pooled, g = run_conv_stack(x, params)                       # (B, h_pool*W, 128) bf16
    h_pool, w_pool = g['h_pool'], g['w_pool']
    # slice the valid (h_pool, w_pool) pooled window and NHWC-flatten (wfc1 pre-permuted)
    valid = pooled.reshape(B, h_pool, W, 128)[:, :, :w_pool, :]
    flat = valid.reshape(B, h_pool * w_pool * 128)
    # pad the batch to a multiple of 8 so the FC matmuls never run with M < 8 sublanes
    B_pad = _round_up(B, 8)
    if B_pad != B:
        flat = jnp.pad(flat, ((0, B_pad - B), (0, 0)))
    logits_pad = run_fc_stack(flat, params)                     # (B_pad, 128) f32
    logits = logits_pad[:B, :n_chars * 3].reshape(B, n_chars, 3)
    # TODO(synk): log-softmax over the size-3 class dim is left to XLA (lane width 3;
    # not worth a Pallas kernel / layout shuffle).
    return jax.nn.log_softmax(logits, axis=-1)


if __name__ == "__main__":
    # TODO(synk): BatchNorm is folded in eval mode with deterministic synthetic
    # running stats (training-mode batch statistics are not reproduced).
    n_chars = 5
    B, H, W = 2, 8, 16
    g = _geometry(H, W)                # h_pool=2, w_pool=2 -> num_features=512

    key = jax.random.PRNGKey(0)
    kp, kx, kr = jax.random.split(key, 3)
    params = init_params(kp, n_chars, g['h_pool'], g['w_pool'])
    batch = jax.random.normal(kx, (B, 1, H, W), dtype=jnp.float32)
    region_tag = jax.random.normal(kr, (B, 4), dtype=jnp.float32)

    fwd = jax.jit(functools.partial(basic_cnn_forward, n_chars=n_chars))
    out = jax.block_until_ready(fwd(params, batch, region_tag))
    assert out.shape == (B, n_chars, 3)
    assert bool(jnp.all(jnp.isfinite(out)))
    print("KERNEL_OK")
</pallas_src>

<mosaic_0001>
module attributes {stable_mosaic.version = 11 : i64} {
  func.func @_conv_stack_kernel(%arg0: i32, %arg1: memref<1x128x1xf32, #tpu.memory_space<vmem>>, %arg2: memref<1x64xf32, #tpu.memory_space<vmem>>, %arg3: memref<1x64xf32, #tpu.memory_space<vmem>>, %arg4: memref<1600x128xbf16, #tpu.memory_space<vmem>>, %arg5: memref<1x128xf32, #tpu.memory_space<vmem>>, %arg6: memref<1x128xf32, #tpu.memory_space<vmem>>, %arg7: memref<3200x128xbf16, #tpu.memory_space<vmem>>, %arg8: memref<1x128xf32, #tpu.memory_space<vmem>>, %arg9: memref<1x128xf32, #tpu.memory_space<vmem>>, %arg10: memref<3200x128xbf16, #tpu.memory_space<vmem>>, %arg11: memref<1x128xf32, #tpu.memory_space<vmem>>, %arg12: memref<1x128xf32, #tpu.memory_space<vmem>>, %arg13: memref<1x32x128xbf16, #tpu.memory_space<vmem>>, %arg14: memref<256x320xbf16, #tpu.memory_space<vmem>>, %arg15: memref<192x640xbf16, #tpu.memory_space<vmem>>, %arg16: memref<128x640xbf16, #tpu.memory_space<vmem>>, %arg17: memref<104x128xf32, #tpu.memory_space<vmem>>) attributes {dimension_semantics = [#tpu.dimension_semantics<parallel>], iteration_bounds = array<i64: 2>, scalar_prefetch = 0 : i64, scratch_operands = 4 : i64, tpu.core_type = #tpu.core_type<tc>, window_params = [{transform_indices = @transform_0, window_bounds = array<i64: 1, 128, 1>}, {pipeline_mode = #tpu.pipeline_mode<synchronous>, transform_indices = @transform_1, window_bounds = array<i64: 1, 64>}, {pipeline_mode = #tpu.pipeline_mode<synchronous>, transform_indices = @transform_2, window_bounds = array<i64: 1, 64>}, {pipeline_mode = #tpu.pipeline_mode<synchronous>, transform_indices = @transform_3, window_bounds = array<i64: 1600, 128>}, {pipeline_mode = #tpu.pipeline_mode<synchronous>, transform_indices = @transform_4, window_bounds = array<i64: 1, 128>}, {pipeline_mode = #tpu.pipeline_mode<synchronous>, transform_indices = @transform_5, window_bounds = array<i64: 1, 128>}, {pipeline_mode = #tpu.pipeline_mode<synchronous>, transform_indices = @transform_6, window_bounds = array<i64: 3200, 128>}, {pipeline_mode = #tpu.pipeline_mode<synchronous>, transform_indices = @transform_7, window_bounds = array<i64: 1, 128>}, {pipeline_mode = #tpu.pipeline_mode<synchronous>, transform_indices = @transform_8, window_bounds = array<i64: 1, 128>}, {pipeline_mode = #tpu.pipeline_mode<synchronous>, transform_indices = @transform_9, window_bounds = array<i64: 3200, 128>}, {pipeline_mode = #tpu.pipeline_mode<synchronous>, transform_indices = @transform_10, window_bounds = array<i64: 1, 128>}, {pipeline_mode = #tpu.pipeline_mode<synchronous>, transform_indices = @transform_11, window_bounds = array<i64: 1, 128>}, {transform_indices = @transform_12, window_bounds = array<i64: 1, 32, 128>}]} {
    %cst = arith.constant 0.000000e+00 : bf16
    %0 = vector.broadcast %cst : bf16 to vector<64x320xbf16>
    %c0 = arith.constant 0 : index
    %c0_0 = arith.constant 0 : index
    %1 = vector.load %arg14[%c0, %c0_0] : memref<256x320xbf16, #tpu.memory_space<vmem>>, vector<64x320xbf16>
    tpu.vector_store %arg14[%c0, %c0_0], %0 {strides = array<i32>} : memref<256x320xbf16, #tpu.memory_space<vmem>>, vector<64x320xbf16>,
    %c192 = arith.constant 192 : index
    %c0_1 = arith.constant 0 : index
    %2 = vector.load %arg14[%c192, %c0_1] : memref<256x320xbf16, #tpu.memory_space<vmem>>, vector<64x320xbf16>
    tpu.vector_store %arg14[%c192, %c0_1], %0 {strides = array<i32>} : memref<256x320xbf16, #tpu.memory_space<vmem>>, vector<64x320xbf16>,
    %c0_2 = arith.constant 0 : index
    %c0_3 = arith.constant 0 : index
    %c0_4 = arith.constant 0 : index
    %3 = vector.load %arg1[%c0_2, %c0_3, %c0_4] : memref<1x128x1xf32, #tpu.memory_space<vmem>>, vector<1x128x1xf32>
    %4 = vector.shape_cast %3 : vector<1x128x1xf32> to vector<128x1xf32>
    %c0_5 = arith.constant 0 : index
    %c0_6 = arith.constant 0 : index
    %5 = vector.load %arg2[%c0_5, %c0_6] : memref<1x64xf32, #tpu.memory_space<vmem>>, vector<1x64xf32>
    %6 = vector.broadcast %4 : vector<128x1xf32> to vector<128x64xf32>
    %7 = vector.broadcast %5 : vector<1x64xf32> to vector<128x64xf32>
    %8 = arith.mulf %6, %7 : vector<128x64xf32>
    %c0_7 = arith.constant 0 : index
    %c0_8 = arith.constant 0 : index
    %9 = vector.load %arg3[%c0_7, %c0_8] : memref<1x64xf32, #tpu.memory_space<vmem>>, vector<1x64xf32>
    %10 = vector.broadcast %9 : vector<1x64xf32> to vector<128x64xf32>
    %11 = arith.addf %8, %10 : vector<128x64xf32>
    %cst_9 = arith.constant 0.00999999977 : f32
    %12 = vector.broadcast %cst_9 : f32 to vector<128x64xf32>
    %13 = arith.mulf %12, %11 : vector<128x64xf32>
    %14 = arith.maximumf %11, %13 : vector<128x64xf32>
    %15 = arith.truncf %14 : vector<128x64xf32> to vector<128x64xbf16>
    %c64 = arith.constant 64 : index
    %c0_10 = arith.constant 0 : index
    %16 = vector.load %arg14[%c64, %c0_10] : memref<256x320xbf16, #tpu.memory_space<vmem>>, vector<128x64xbf16>
    tpu.vector_store %arg14[%c64, %c0_10], %15 {strides = array<i32>} : memref<256x320xbf16, #tpu.memory_space<vmem>>, vector<128x64xbf16>,
    %17 = vector.extract_strided_slice %14 {offsets = [1, 0], sizes = [127, 64], strides = [1, 1]} : vector<128x64xf32> to vector<127x64xf32>
    %18 = arith.truncf %17 : vector<127x64xf32> to vector<127x64xbf16>
    %c64_11 = arith.constant 64 : index
    %c64_12 = arith.constant 64 : index
    %19 = vector.load %arg14[%c64_11, %c64_12] : memref<256x320xbf16, #tpu.memory_space<vmem>>, vector<127x64xbf16>
    tpu.vector_store %arg14[%c64_11, %c64_12], %18 {strides = array<i32>} : memref<256x320xbf16, #tpu.memory_space<vmem>>, vector<127x64xbf16>,
    %20 = vector.extract_strided_slice %14 {offsets = [2, 0], sizes = [126, 64], strides = [1, 1]} : vector<128x64xf32> to vector<126x64xf32>
    %21 = arith.truncf %20 : vector<126x64xf32> to vector<126x64xbf16>
    %c64_13 = arith.constant 64 : index
    %c128 = arith.constant 128 : index
    %22 = vector.load %arg14[%c64_13, %c128] : memref<256x320xbf16, #tpu.memory_space<vmem>>, vector<126x64xbf16>
    tpu.vector_store %arg14[%c64_13, %c128], %21 {strides = array<i32>} : memref<256x320xbf16, #tpu.memory_space<vmem>>, vector<126x64xbf16>,
    %23 = vector.extract_strided_slice %14 {offsets = [3, 0], sizes = [125, 64], strides = [1, 1]} : vector<128x64xf32> to vector<125x64xf32>
    %24 = arith.truncf %23 : vector<125x64xf32> to vector<125x64xbf16>
    %c64_14 = arith.constant 64 : index
    %c192_15 = arith.constant 192 : index
    %25 = vector.load %arg14[%c64_14, %c192_15] : memref<256x320xbf16, #tpu.memory_space<vmem>>, vector<125x64xbf16>
    tpu.vector_store %arg14[%c64_14, %c192_15], %24 {strides = array<i32>} : memref<256x320xbf16, #tpu.memory_space<vmem>>, vector<125x64xbf16>,
    %26 = vector.extract_strided_slice %14 {offsets = [4, 0], sizes = [124, 64], strides = [1, 1]} : vector<128x64xf32> to vector<124x64xf32>
    %27 = arith.truncf %26 : vector<124x64xf32> to vector<124x64xbf16>
    %c64_16 = arith.constant 64 : index
    %c256 = arith.constant 256 : index
    %28 = vector.load %arg14[%c64_16, %c256] : memref<256x320xbf16, #tpu.memory_space<vmem>>, vector<124x64xbf16>
    tpu.vector_store %arg14[%c64_16, %c256], %27 {strides = array<i32>} : memref<256x320xbf16, #tpu.memory_space<vmem>>, vector<124x64xbf16>,
    %c0_17 = arith.constant 0 : index
    %c0_18 = arith.constant 0 : index
    %29 = vector.load %arg14[%c0_17, %c0_18] : memref<256x320xbf16, #tpu.memory_space<vmem>>, vector<192x320xbf16>
    %c0_19 = arith.constant 0 : index
    %c0_20 = arith.constant 0 : index
    %30 = vector.load %arg4[%c0_19, %c0_20] : memref<1600x128xbf16, #tpu.memory_space<vmem>>, vector<320x128xbf16>
    %cst_21 = arith.constant dense<0.000000e+00> : vector<192x128xf32>
    %31 = tpu.matmul %29, %30, %cst_21 {dimension_numbers = #tpu.dot_dimension_numbers<[1], [0], [0], [1], [0, 0, 1, 1], [], []>} : vector<192x320xbf16>, vector<320x128xbf16>, vector<192x128xf32> -> vector<192x128xf32>
    %c16 = arith.constant 16 : index
    %c0_22 = arith.constant 0 : index
    %32 = vector.load %arg14[%c16, %c0_22] : memref<256x320xbf16, #tpu.memory_space<vmem>>, vector<192x320xbf16>
    %c320 = arith.constant 320 : index
    %c0_23 = arith.constant 0 : index
    %33 = vector.load %arg4[%c320, %c0_23] : memref<1600x128xbf16, #tpu.memory_space<vmem>>, vector<320x128xbf16>
    %cst_24 = arith.constant dense<0.000000e+00> : vector<192x128xf32>
    %34 = tpu.matmul %32, %33, %cst_24 {dimension_numbers = #tpu.dot_dimension_numbers<[1], [0], [0], [1], [0, 0, 1, 1], [], []>} : vector<192x320xbf16>, vector<320x128xbf16>, vector<192x128xf32> -> vector<192x128xf32>
    %35 = arith.addf %31, %34 : vector<192x128xf32>
    %c32 = arith.constant 32 : index
    %c0_25 = arith.constant 0 : index
    %36 = vector.load %arg14[%c32, %c0_25] : memref<256x320xbf16, #tpu.memory_space<vmem>>, vector<192x320xbf16>
    %c640 = arith.constant 640 : index
    %c0_26 = arith.constant 0 : index
    %37 = vector.load %arg4[%c640, %c0_26] : memref<1600x128xbf16, #tpu.memory_space<vmem>>, vector<320x128xbf16>
    %cst_27 = arith.constant dense<0.000000e+00> : vector<192x128xf32>
    %38 = tpu.matmul %36, %37, %cst_27 {dimension_numbers = #tpu.dot_dimension_numbers<[1], [0], [0], [1], [0, 0, 1, 1], [], []>} : vector<192x320xbf16>, vector<320x128xbf16>, vector<192x128xf32> -> vector<192x128xf32>
    %39 = arith.addf %35, %38 : vector<192x128xf32>
    %c48 = arith.constant 48 : index
    %c0_28 = arith.constant 0 : index
    %40 = vector.load %arg14[%c48, %c0_28] : memref<256x320xbf16, #tpu.memory_space<vmem>>, vector<192x320xbf16>
    %c960 = arith.constant 960 : index
    %c0_29 = arith.constant 0 : index
    %41 = vector.load %arg4[%c960, %c0_29] : memref<1600x128xbf16, #tpu.memory_space<vmem>>, vector<320x128xbf16>
    %cst_30 = arith.constant dense<0.000000e+00> : vector<192x128xf32>
    %42 = tpu.matmul %40, %41, %cst_30 {dimension_numbers = #tpu.dot_dimension_numbers<[1], [0], [0], [1], [0, 0, 1, 1], [], []>} : vector<192x320xbf16>, vector<320x128xbf16>, vector<192x128xf32> -> vector<192x128xf32>
    %43 = arith.addf %39, %42 : vector<192x128xf32>
    %c64_31 = arith.constant 64 : index
    %c0_32 = arith.constant 0 : index
    %44 = vector.load %arg14[%c64_31, %c0_32] : memref<256x320xbf16, #tpu.memory_space<vmem>>, vector<192x320xbf16>
    %c1280 = arith.constant 1280 : index
    %c0_33 = arith.constant 0 : index
    %45 = vector.load %arg4[%c1280, %c0_33] : memref<1600x128xbf16, #tpu.memory_space<vmem>>, vector<320x128xbf16>
    %cst_34 = arith.constant dense<0.000000e+00> : vector<192x128xf32>
    %46 = tpu.matmul %44, %45, %cst_34 {dimension_numbers = #tpu.dot_dimension_numbers<[1], [0], [0], [1], [0, 0, 1, 1], [], []>} : vector<192x320xbf16>, vector<320x128xbf16>, vector<192x128xf32> -> vector<192x128xf32>
    %47 = arith.addf %43, %46 : vector<192x128xf32>
    %c0_35 = arith.constant 0 : index
    %c0_36 = arith.constant 0 : index
    %48 = vector.load %arg5[%c0_35, %c0_36] : memref<1x128xf32, #tpu.memory_space<vmem>>, vector<1x128xf32>
    %49 = vector.broadcast %48 : vector<1x128xf32> to vector<192x128xf32>
    %50 = arith.mulf %47, %49 : vector<192x128xf32>
    %c0_37 = arith.constant 0 : index
    %c0_38 = arith.constant 0 : index
    %51 = vector.load %arg6[%c0_37, %c0_38] : memref<1x128xf32, #tpu.memory_space<vmem>>, vector<1x128xf32>
    %52 = vector.broadcast %51 : vector<1x128xf32> to vector<192x128xf32>
    %53 = arith.addf %50, %52 : vector<192x128xf32>
    %cst_39 = arith.constant 0.00999999977 : f32
    %54 = vector.broadcast %cst_39 : f32 to vector<192x128xf32>
    %55 = arith.mulf %54, %53 : vector<192x128xf32>
    %56 = arith.maximumf %53, %55 : vector<192x128xf32>
    %57 = arith.truncf %56 : vector<192x128xf32> to vector<192x128xbf16>
    %c0_40 = arith.constant 0 : index
    %c0_41 = arith.constant 0 : index
    %58 = vector.load %arg15[%c0_40, %c0_41] : memref<192x640xbf16, #tpu.memory_space<vmem>>, vector<192x128xbf16>
    tpu.vector_store %arg15[%c0_40, %c0_41], %57 {strides = array<i32>} : memref<192x640xbf16, #tpu.memory_space<vmem>>, vector<192x128xbf16>,
    %59 = vector.extract_strided_slice %56 {offsets = [1, 0], sizes = [191, 128], strides = [1, 1]} : vector<192x128xf32> to vector<191x128xf32>
    %60 = arith.truncf %59 : vector<191x128xf32> to vector<191x128xbf16>
    %c0_42 = arith.constant 0 : index
    %c128_43 = arith.constant 128 : index
    %61 = vector.load %arg15[%c0_42, %c128_43] : memref<192x640xbf16, #tpu.memory_space<vmem>>, vector<191x128xbf16>
    tpu.vector_store %arg15[%c0_42, %c128_43], %60 {strides = array<i32>} : memref<192x640xbf16, #tpu.memory_space<vmem>>, vector<191x128xbf16>,
    %62 = vector.extract_strided_slice %56 {offsets = [2, 0], sizes = [190, 128], strides = [1, 1]} : vector<192x128xf32> to vector<190x128xf32>
    %63 = arith.truncf %62 : vector<190x128xf32> to vector<190x128xbf16>
    %c0_44 = arith.constant 0 : index
    %c256_45 = arith.constant 256 : index
    %64 = vector.load %arg15[%c0_44, %c256_45] : memref<192x640xbf16, #tpu.memory_space<vmem>>, vector<190x128xbf16>
    tpu.vector_store %arg15[%c0_44, %c256_45], %63 {strides = array<i32>} : memref<192x640xbf16, #tpu.memory_space<vmem>>, vector<190x128xbf16>,
    %65 = vector.extract_strided_slice %56 {offsets = [3, 0], sizes = [189, 128], strides = [1, 1]} : vector<192x128xf32> to vector<189x128xf32>
    %66 = arith.truncf %65 : vector<189x128xf32> to vector<189x128xbf16>
    %c0_46 = arith.constant 0 : index
    %c384 = arith.constant 384 : index
    %67 = vector.load %arg15[%c0_46, %c384] : memref<192x640xbf16, #tpu.memory_space<vmem>>, vector<189x128xbf16>
    tpu.vector_store %arg15[%c0_46, %c384], %66 {strides = array<i32>} : memref<192x640xbf16, #tpu.memory_space<vmem>>, vector<189x128xbf16>,
    %68 = vector.extract_strided_slice %56 {offsets = [4, 0], sizes = [188, 128], strides = [1, 1]} : vector<192x128xf32> to vector<188x128xf32>
    %69 = arith.truncf %68 : vector<188x128xf32> to vector<188x128xbf16>
    %c0_47 = arith.constant 0 : index
    %c512 = arith.constant 512 : index
    %70 = vector.load %arg15[%c0_47, %c512] : memref<192x640xbf16, #tpu.memory_space<vmem>>, vector<188x128xbf16>
    tpu.vector_store %arg15[%c0_47, %c512], %69 {strides = array<i32>} : memref<192x640xbf16, #tpu.memory_space<vmem>>, vector<188x128xbf16>,
    %c0_48 = arith.constant 0 : index
    %c0_49 = arith.constant 0 : index
    %71 = vector.load %arg15[%c0_48, %c0_49] : memref<192x640xbf16, #tpu.memory_space<vmem>>, vector<128x640xbf16>
    %c0_50 = arith.constant 0 : index
    %c0_51 = arith.constant 0 : index
    %72 = vector.load %arg7[%c0_50, %c0_51] : memref<3200x128xbf16, #tpu.memory_space<vmem>>, vector<640x128xbf16>
    %cst_52 = arith.constant dense<0.000000e+00> : vector<128x128xf32>
    %73 = tpu.matmul %71, %72, %cst_52 {dimension_numbers = #tpu.dot_dimension_numbers<[1], [0], [0], [1], [0, 0, 1, 1], [], []>} : vector<128x640xbf16>, vector<640x128xbf16>, vector<128x128xf32> -> vector<128x128xf32>
    %c16_53 = arith.constant 16 : index
    %c0_54 = arith.constant 0 : index
    %74 = vector.load %arg15[%c16_53, %c0_54] : memref<192x640xbf16, #tpu.memory_space<vmem>>, vector<128x640xbf16>
    %c640_55 = arith.constant 640 : index
    %c0_56 = arith.constant 0 : index
    %75 = vector.load %arg7[%c640_55, %c0_56] : memref<3200x128xbf16, #tpu.memory_space<vmem>>, vector<640x128xbf16>
    %cst_57 = arith.constant dense<0.000000e+00> : vector<128x128xf32>
    %76 = tpu.matmul %74, %75, %cst_57 {dimension_numbers = #tpu.dot_dimension_numbers<[1], [0], [0], [1], [0, 0, 1, 1], [], []>} : vector<128x640xbf16>, vector<640x128xbf16>, vector<128x128xf32> -> vector<128x128xf32>
    %77 = arith.addf %73, %76 : vector<128x128xf32>
    %c32_58 = arith.constant 32 : index
    %c0_59 = arith.constant 0 : index
    %78 = vector.load %arg15[%c32_58, %c0_59] : memref<192x640xbf16, #tpu.memory_space<vmem>>, vector<128x640xbf16>
    %c1280_60 = arith.constant 1280 : index
    %c0_61 = arith.constant 0 : index
    %79 = vector.load %arg7[%c1280_60, %c0_61] : memref<3200x128xbf16, #tpu.memory_space<vmem>>, vector<640x128xbf16>
    %cst_62 = arith.constant dense<0.000000e+00> : vector<128x128xf32>
    %80 = tpu.matmul %78, %79, %cst_62 {dimension_numbers = #tpu.dot_dimension_numbers<[1], [0], [0], [1], [0, 0, 1, 1], [], []>} : vector<128x640xbf16>, vector<640x128xbf16>, vector<128x128xf32> -> vector<128x128xf32>
    %81 = arith.addf %77, %80 : vector<128x128xf32>
    %c48_63 = arith.constant 48 : index
    %c0_64 = arith.constant 0 : index
    %82 = vector.load %arg15[%c48_63, %c0_64] : memref<192x640xbf16, #tpu.memory_space<vmem>>, vector<128x640xbf16>
    %c1920 = arith.constant 1920 : index
    %c0_65 = arith.constant 0 : index
    %83 = vector.load %arg7[%c1920, %c0_65] : memref<3200x128xbf16, #tpu.memory_space<vmem>>, vector<640x128xbf16>
    %cst_66 = arith.constant dense<0.000000e+00> : vector<128x128xf32>
    %84 = tpu.matmul %82, %83, %cst_66 {dimension_numbers = #tpu.dot_dimension_numbers<[1], [0], [0], [1], [0, 0, 1, 1], [], []>} : vector<128x640xbf16>, vector<640x128xbf16>, vector<128x128xf32> -> vector<128x128xf32>
    %85 = arith.addf %81, %84 : vector<128x128xf32>
    %c64_67 = arith.constant 64 : index
    %c0_68 = arith.constant 0 : index
    %86 = vector.load %arg15[%c64_67, %c0_68] : memref<192x640xbf16, #tpu.memory_space<vmem>>, vector<128x640xbf16>
    %c2560 = arith.constant 2560 : index
    %c0_69 = arith.constant 0 : index
    %87 = vector.load %arg7[%c2560, %c0_69] : memref<3200x128xbf16, #tpu.memory_space<vmem>>, vector<640x128xbf16>
    %cst_70 = arith.constant dense<0.000000e+00> : vector<128x128xf32>
    %88 = tpu.matmul %86, %87, %cst_70 {dimension_numbers = #tpu.dot_dimension_numbers<[1], [0], [0], [1], [0, 0, 1, 1], [], []>} : vector<128x640xbf16>, vector<640x128xbf16>, vector<128x128xf32> -> vector<128x128xf32>
    %89 = arith.addf %85, %88 : vector<128x128xf32>
    %c0_71 = arith.constant 0 : index
    %c0_72 = arith.constant 0 : index
    %90 = vector.load %arg8[%c0_71, %c0_72] : memref<1x128xf32, #tpu.memory_space<vmem>>, vector<1x128xf32>
    %91 = vector.broadcast %90 : vector<1x128xf32> to vector<128x128xf32>
    %92 = arith.mulf %89, %91 : vector<128x128xf32>
    %c0_73 = arith.constant 0 : index
    %c0_74 = arith.constant 0 : index
    %93 = vector.load %arg9[%c0_73, %c0_74] : memref<1x128xf32, #tpu.memory_space<vmem>>, vector<1x128xf32>
    %94 = vector.broadcast %93 : vector<1x128xf32> to vector<128x128xf32>
    %95 = arith.addf %92, %94 : vector<128x128xf32>
    %cst_75 = arith.constant 0.00999999977 : f32
    %96 = vector.broadcast %cst_75 : f32 to vector<128x128xf32>
    %97 = arith.mulf %96, %95 : vector<128x128xf32>
    %98 = arith.maximumf %95, %97 : vector<128x128xf32>
    %99 = arith.truncf %98 : vector<128x128xf32> to vector<128x128xbf16>
    %c0_76 = arith.constant 0 : index
    %c0_77 = arith.constant 0 : index
    %100 = vector.load %arg16[%c0_76, %c0_77] : memref<128x640xbf16, #tpu.memory_space<vmem>>, vector<128x128xbf16>
    tpu.vector_store %arg16[%c0_76, %c0_77], %99 {strides = array<i32>} : memref<128x640xbf16, #tpu.memory_space<vmem>>, vector<128x128xbf16>,
    %101 = vector.extract_strided_slice %98 {offsets = [1, 0], sizes = [127, 128], strides = [1, 1]} : vector<128x128xf32> to vector<127x128xf32>
    %102 = arith.truncf %101 : vector<127x128xf32> to vector<127x128xbf16>
    %c0_78 = arith.constant 0 : index
    %c128_79 = arith.constant 128 : index
    %103 = vector.load %arg16[%c0_78, %c128_79] : memref<128x640xbf16, #tpu.memory_space<vmem>>, vector<127x128xbf16>
    tpu.vector_store %arg16[%c0_78, %c128_79], %102 {strides = array<i32>} : memref<128x640xbf16, #tpu.memory_space<vmem>>, vector<127x128xbf16>,
    %104 = vector.extract_strided_slice %98 {offsets = [2, 0], sizes = [126, 128], strides = [1, 1]} : vector<128x128xf32> to vector<126x128xf32>
    %105 = arith.truncf %104 : vector<126x128xf32> to vector<126x128xbf16>
    %c0_80 = arith.constant 0 : index
    %c256_81 = arith.constant 256 : index
    %106 = vector.load %arg16[%c0_80, %c256_81] : memref<128x640xbf16, #tpu.memory_space<vmem>>, vector<126x128xbf16>
    tpu.vector_store %arg16[%c0_80, %c256_81], %105 {strides = array<i32>} : memref<128x640xbf16, #tpu.memory_space<vmem>>, vector<126x128xbf16>,
    %107 = vector.extract_strided_slice %98 {offsets = [3, 0], sizes = [125, 128], strides = [1, 1]} : vector<128x128xf32> to vector<125x128xf32>
    %108 = arith.truncf %107 : vector<125x128xf32> to vector<125x128xbf16>
    %c0_82 = arith.constant 0 : index
    %c384_83 = arith.constant 384 : index
    %109 = vector.load %arg16[%c0_82, %c384_83] : memref<128x640xbf16, #tpu.memory_space<vmem>>, vector<125x128xbf16>
    tpu.vector_store %arg16[%c0_82, %c384_83], %108 {strides = array<i32>} : memref<128x640xbf16, #tpu.memory_space<vmem>>, vector<125x128xbf16>,
    %110 = vector.extract_strided_slice %98 {offsets = [4, 0], sizes = [124, 128], strides = [1, 1]} : vector<128x128xf32> to vector<124x128xf32>
    %111 = arith.truncf %110 : vector<124x128xf32> to vector<124x128xbf16>
    %c0_84 = arith.constant 0 : index
    %c512_85 = arith.constant 512 : index
    %112 = vector.load %arg16[%c0_84, %c512_85] : memref<128x640xbf16, #tpu.memory_space<vmem>>, vector<124x128xbf16>
    tpu.vector_store %arg16[%c0_84, %c512_85], %111 {strides = array<i32>} : memref<128x640xbf16, #tpu.memory_space<vmem>>, vector<124x128xbf16>,
    %c0_86 = arith.constant 0 : index
    %c0_87 = arith.constant 0 : index
    %113 = vector.load %arg16[%c0_86, %c0_87] : memref<128x640xbf16, #tpu.memory_space<vmem>>, vector<64x640xbf16>
    %c0_88 = arith.constant 0 : index
    %c0_89 = arith.constant 0 : index
    %114 = vector.load %arg10[%c0_88, %c0_89] : memref<3200x128xbf16, #tpu.memory_space<vmem>>, vector<640x128xbf16>
    %cst_90 = arith.constant dense<0.000000e+00> : vector<64x128xf32>
    %115 = tpu.matmul %113, %114, %cst_90 {dimension_numbers = #tpu.dot_dimension_numbers<[1], [0], [0], [1], [0, 0, 1, 1], [], []>} : vector<64x640xbf16>, vector<640x128xbf16>, vector<64x128xf32> -> vector<64x128xf32>
    %c16_91 = arith.constant 16 : index
    %c0_92 = arith.constant 0 : index
    %116 = vector.load %arg16[%c16_91, %c0_92] : memref<128x640xbf16, #tpu.memory_space<vmem>>, vector<64x640xbf16>
    %c640_93 = arith.constant 640 : index
    %c0_94 = arith.constant 0 : index
    %117 = vector.load %arg10[%c640_93, %c0_94] : memref<3200x128xbf16, #tpu.memory_space<vmem>>, vector<640x128xbf16>
    %cst_95 = arith.constant dense<0.000000e+00> : vector<64x128xf32>
    %118 = tpu.matmul %116, %117, %cst_95 {dimension_numbers = #tpu.dot_dimension_numbers<[1], [0], [0], [1], [0, 0, 1, 1], [], []>} : vector<64x640xbf16>, vector<640x128xbf16>, vector<64x128xf32> -> vector<64x128xf32>
    %119 = arith.addf %115, %118 : vector<64x128xf32>
    %c32_96 = arith.constant 32 : index
    %c0_97 = arith.constant 0 : index
    %120 = vector.load %arg16[%c32_96, %c0_97] : memref<128x640xbf16, #tpu.memory_space<vmem>>, vector<64x640xbf16>
    %c1280_98 = arith.constant 1280 : index
    %c0_99 = arith.constant 0 : index
    %121 = vector.load %arg10[%c1280_98, %c0_99] : memref<3200x128xbf16, #tpu.memory_space<vmem>>, vector<640x128xbf16>
    %cst_100 = arith.constant dense<0.000000e+00> : vector<64x128xf32>
    %122 = tpu.matmul %120, %121, %cst_100 {dimension_numbers = #tpu.dot_dimension_numbers<[1], [0], [0], [1], [0, 0, 1, 1], [], []>} : vector<64x640xbf16>, vector<640x128xbf16>, vector<64x128xf32> -> vector<64x128xf32>
    %123 = arith.addf %119, %122 : vector<64x128xf32>
    %c48_101 = arith.constant 48 : index
    %c0_102 = arith.constant 0 : index
    %124 = vector.load %arg16[%c48_101, %c0_102] : memref<128x640xbf16, #tpu.memory_space<vmem>>, vector<64x640xbf16>
    %c1920_103 = arith.constant 1920 : index
    %c0_104 = arith.constant 0 : index
    %125 = vector.load %arg10[%c1920_103, %c0_104] : memref<3200x128xbf16, #tpu.memory_space<vmem>>, vector<640x128xbf16>
    %cst_105 = arith.constant dense<0.000000e+00> : vector<64x128xf32>
    %126 = tpu.matmul %124, %125, %cst_105 {dimension_numbers = #tpu.dot_dimension_numbers<[1], [0], [0], [1], [0, 0, 1, 1], [], []>} : vector<64x640xbf16>, vector<640x128xbf16>, vector<64x128xf32> -> vector<64x128xf32>
    %127 = arith.addf %123, %126 : vector<64x128xf32>
    %c64_106 = arith.constant 64 : index
    %c0_107 = arith.constant 0 : index
    %128 = vector.load %arg16[%c64_106, %c0_107] : memref<128x640xbf16, #tpu.memory_space<vmem>>, vector<64x640xbf16>
    %c2560_108 = arith.constant 2560 : index
    %c0_109 = arith.constant 0 : index
    %129 = vector.load %arg10[%c2560_108, %c0_109] : memref<3200x128xbf16, #tpu.memory_space<vmem>>, vector<640x128xbf16>
    %cst_110 = arith.constant dense<0.000000e+00> : vector<64x128xf32>
    %130 = tpu.matmul %128, %129, %cst_110 {dimension_numbers = #tpu.dot_dimension_numbers<[1], [0], [0], [1], [0, 0, 1, 1], [], []>} : vector<64x640xbf16>, vector<640x128xbf16>, vector<64x128xf32> -> vector<64x128xf32>
    %131 = arith.addf %127, %130 : vector<64x128xf32>
    %c0_111 = arith.constant 0 : index
    %c0_112 = arith.constant 0 : index
    %132 = vector.load %arg11[%c0_111, %c0_112] : memref<1x128xf32, #tpu.memory_space<vmem>>, vector<1x128xf32>
    %133 = vector.broadcast %132 : vector<1x128xf32> to vector<64x128xf32>
    %134 = arith.mulf %131, %133 : vector<64x128xf32>
    %c0_113 = arith.constant 0 : index
    %c0_114 = arith.constant 0 : index
    %135 = vector.load %arg12[%c0_113, %c0_114] : memref<1x128xf32, #tpu.memory_space<vmem>>, vector<1x128xf32>
    %136 = vector.broadcast %135 : vector<1x128xf32> to vector<64x128xf32>
    %137 = arith.addf %134, %136 : vector<64x128xf32>
    %cst_115 = arith.constant 0.00999999977 : f32
    %138 = vector.broadcast %cst_115 : f32 to vector<64x128xf32>
    %139 = arith.mulf %138, %137 : vector<64x128xf32>
    %140 = arith.maximumf %137, %139 : vector<64x128xf32>
    %c0_116 = arith.constant 0 : index
    %c0_117 = arith.constant 0 : index
    %141 = vector.load %arg17[%c0_116, %c0_117] : memref<104x128xf32, #tpu.memory_space<vmem>>, vector<64x128xf32>
    tpu.vector_store %arg17[%c0_116, %c0_117], %140 {strides = array<i32>} : memref<104x128xf32, #tpu.memory_space<vmem>>, vector<64x128xf32>,
    %c0_118 = arith.constant 0 : index
    %c0_119 = arith.constant 0 : index
    %142 = vector.load %arg17[%c0_118, %c0_119] : memref<104x128xf32, #tpu.memory_space<vmem>>, vector<32x128xf32>
    %c1 = arith.constant 1 : index
    %c0_120 = arith.constant 0 : index
    %143 = vector.load %arg17[%c1, %c0_120] : memref<104x128xf32, #tpu.memory_space<vmem>>, vector<32x128xf32>
    %144 = arith.maximumf %142, %143 : vector<32x128xf32>
    %c2 = arith.constant 2 : index
    %c0_121 = arith.constant 0 : index
    %145 = vector.load %arg17[%c2, %c0_121] : memref<104x128xf32, #tpu.memory_space<vmem>>, vector<32x128xf32>
    %146 = arith.maximumf %144, %145 : vector<32x128xf32>
    %c16_122 = arith.constant 16 : index
    %c0_123 = arith.constant 0 : index
    %147 = vector.load %arg17[%c16_122, %c0_123] : memref<104x128xf32, #tpu.memory_space<vmem>>, vector<32x128xf32>
    %148 = arith.maximumf %146, %147 : vector<32x128xf32>
    %c17 = arith.constant 17 : index
    %c0_124 = arith.constant 0 : index
    %149 = vector.load %arg17[%c17, %c0_124] : memref<104x128xf32, #tpu.memory_space<vmem>>, vector<32x128xf32>
    %150 = arith.maximumf %148, %149 : vector<32x128xf32>
    %c18 = arith.constant 18 : index
    %c0_125 = arith.constant 0 : index
    %151 = vector.load %arg17[%c18, %c0_125] : memref<104x128xf32, #tpu.memory_space<vmem>>, vector<32x128xf32>
    %152 = arith.maximumf %150, %151 : vector<32x128xf32>
    %c32_126 = arith.constant 32 : index
    %c0_127 = arith.constant 0 : index
    %153 = vector.load %arg17[%c32_126, %c0_127] : memref<104x128xf32, #tpu.memory_space<vmem>>, vector<32x128xf32>
    %154 = arith.maximumf %152, %153 : vector<32x128xf32>
    %c33 = arith.constant 33 : index
    %c0_128 = arith.constant 0 : index
    %155 = vector.load %arg17[%c33, %c0_128] : memref<104x128xf32, #tpu.memory_space<vmem>>, vector<32x128xf32>
    %156 = arith.maximumf %154, %155 : vector<32x128xf32>
    %c34 = arith.constant 34 : index
    %c0_129 = arith.constant 0 : index
    %157 = vector.load %arg17[%c34, %c0_129] : memref<104x128xf32, #tpu.memory_space<vmem>>, vector<32x128xf32>
    %158 = arith.maximumf %156, %157 : vector<32x128xf32>
    %159 = arith.truncf %158 : vector<32x128xf32> to vector<32x128xbf16>
    %c0_130 = arith.constant 0 : index
    %c0_131 = arith.constant 0 : index
    %c0_132 = arith.constant 0 : index
    %160 = vector.load %arg13[%c0_130, %c0_131, %c0_132] : memref<1x32x128xbf16, #tpu.memory_space<vmem>>, vector<1x32x128xbf16>
    %161 = vector.shape_cast %160 : vector<1x32x128xbf16> to vector<32x128xbf16>
    %162 = vector.shape_cast %159 : vector<32x128xbf16> to vector<1x32x128xbf16>
    tpu.vector_store %arg13[%c0_130, %c0_131, %c0_132], %162 {strides = array<i32>} : memref<1x32x128xbf16, #tpu.memory_space<vmem>>, vector<1x32x128xbf16>,
    return
  }
  func.func @transform_0(%arg0: i32) -> (i32, i32, i32) {
    %c0_i32 = arith.constant 0 : i32
    %c0_i32_0 = arith.constant 0 : i32
    %c0_i32_1 = arith.constant 0 : i32
    return %arg0, %c0_i32, %c0_i32_0 : i32, i32, i32
  }
  func.func @transform_1(%arg0: i32) -> (i32, i32) {
    %c0_i32 = arith.constant 0 : i32
    %c0_i32_0 = arith.constant 0 : i32
    %c0_i32_1 = arith.constant 0 : i32
    return %c0_i32, %c0_i32_0 : i32, i32
  }
  func.func @transform_2(%arg0: i32) -> (i32, i32) {
    %c0_i32 = arith.constant 0 : i32
    %c0_i32_0 = arith.constant 0 : i32
    %c0_i32_1 = arith.constant 0 : i32
    return %c0_i32, %c0_i32_0 : i32, i32
  }
  func.func @transform_3(%arg0: i32) -> (i32, i32) {
    %c0_i32 = arith.constant 0 : i32
    %c0_i32_0 = arith.constant 0 : i32
    %c0_i32_1 = arith.constant 0 : i32
    return %c0_i32, %c0_i32_0 : i32, i32
  }
  func.func @transform_4(%arg0: i32) -> (i32, i32) {
    %c0_i32 = arith.constant 0 : i32
    %c0_i32_0 = arith.constant 0 : i32
    %c0_i32_1 = arith.constant 0 : i32
    return %c0_i32, %c0_i32_0 : i32, i32
  }
  func.func @transform_5(%arg0: i32) -> (i32, i32) {
    %c0_i32 = arith.constant 0 : i32
    %c0_i32_0 = arith.constant 0 : i32
    %c0_i32_1 = arith.constant 0 : i32
    return %c0_i32, %c0_i32_0 : i32, i32
  }
  func.func @transform_6(%arg0: i32) -> (i32, i32) {
    %c0_i32 = arith.constant 0 : i32
    %c0_i32_0 = arith.constant 0 : i32
    %c0_i32_1 = arith.constant 0 : i32
    return %c0_i32, %c0_i32_0 : i32, i32
  }
  func.func @transform_7(%arg0: i32) -> (i32, i32) {
    %c0_i32 = arith.constant 0 : i32
    %c0_i32_0 = arith.constant 0 : i32
    %c0_i32_1 = arith.constant 0 : i32
    return %c0_i32, %c0_i32_0 : i32, i32
  }
  func.func @transform_8(%arg0: i32) -> (i32, i32) {
    %c0_i32 = arith.constant 0 : i32
    %c0_i32_0 = arith.constant 0 : i32
    %c0_i32_1 = arith.constant 0 : i32
    return %c0_i32, %c0_i32_0 : i32, i32
  }
  func.func @transform_9(%arg0: i32) -> (i32, i32) {
    %c0_i32 = arith.constant 0 : i32
    %c0_i32_0 = arith.constant 0 : i32
    %c0_i32_1 = arith.constant 0 : i32
    return %c0_i32, %c0_i32_0 : i32, i32
  }
  func.func @transform_10(%arg0: i32) -> (i32, i32) {
    %c0_i32 = arith.constant 0 : i32
    %c0_i32_0 = arith.constant 0 : i32
    %c0_i32_1 = arith.constant 0 : i32
    return %c0_i32, %c0_i32_0 : i32, i32
  }
  func.func @transform_11(%arg0: i32) -> (i32, i32) {
    %c0_i32 = arith.constant 0 : i32
    %c0_i32_0 = arith.constant 0 : i32
    %c0_i32_1 = arith.constant 0 : i32
    return %c0_i32, %c0_i32_0 : i32, i32
  }
  func.func @transform_12(%arg0: i32) -> (i32, i32, i32) {
    %c0_i32 = arith.constant 0 : i32
    %c0_i32_0 = arith.constant 0 : i32
    %c0_i32_1 = arith.constant 0 : i32
    return %arg0, %c0_i32, %c0_i32_0 : i32, i32, i32
  }
}

module attributes {stable_mosaic.version = 11 : i64} {
  func.func @_fc_stack_kernel(%arg0: i32, %arg1: memref<8x512xbf16, #tpu.memory_space<vmem>>, %arg2: memref<512x512xbf16, #tpu.memory_space<vmem>>, %arg3: memref<1x512xf32, #tpu.memory_space<vmem>>, %arg4: memref<1x512xf32, #tpu.memory_space<vmem>>, %arg5: memref<512x512xbf16, #tpu.memory_space<vmem>>, %arg6: memref<1x512xf32, #tpu.memory_space<vmem>>, %arg7: memref<1x512xf32, #tpu.memory_space<vmem>>, %arg8: memref<512x256xbf16, #tpu.memory_space<vmem>>, %arg9: memref<1x256xf32, #tpu.memory_space<vmem>>, %arg10: memref<1x256xf32, #tpu.memory_space<vmem>>, %arg11: memref<256x128xbf16, #tpu.memory_space<vmem>>, %arg12: memref<1x128xf32, #tpu.memory_space<vmem>>, %arg13: memref<1x128xf32, #tpu.memory_space<vmem>>, %arg14: memref<128x128xbf16, #tpu.memory_space<vmem>>, %arg15: memref<1x128xf32, #tpu.memory_space<vmem>>, %arg16: memref<8x128xf32, #tpu.memory_space<vmem>>) attributes {dimension_semantics = [#tpu.dimension_semantics<parallel>], iteration_bounds = array<i64: 1>, scalar_prefetch = 0 : i64, scratch_operands = 0 : i64, tpu.core_type = #tpu.core_type<tc>, window_params = [{transform_indices = @transform_0, window_bounds = array<i64: 8, 512>}, {pipeline_mode = #tpu.pipeline_mode<synchronous>, transform_indices = @transform_1, window_bounds = array<i64: 512, 512>}, {pipeline_mode = #tpu.pipeline_mode<synchronous>, transform_indices = @transform_2, window_bounds = array<i64: 1, 512>}, {pipeline_mode = #tpu.pipeline_mode<synchronous>, transform_indices = @transform_3, window_bounds = array<i64: 1, 512>}, {pipeline_mode = #tpu.pipeline_mode<synchronous>, transform_indices = @transform_4, window_bounds = array<i64: 512, 512>}, {pipeline_mode = #tpu.pipeline_mode<synchronous>, transform_indices = @transform_5, window_bounds = array<i64: 1, 512>}, {pipeline_mode = #tpu.pipeline_mode<synchronous>, transform_indices = @transform_6, window_bounds = array<i64: 1, 512>}, {pipeline_mode = #tpu.pipeline_mode<synchronous>, transform_indices = @transform_7, window_bounds = array<i64: 512, 256>}, {pipeline_mode = #tpu.pipeline_mode<synchronous>, transform_indices = @transform_8, window_bounds = array<i64: 1, 256>}, {pipeline_mode = #tpu.pipeline_mode<synchronous>, transform_indices = @transform_9, window_bounds = array<i64: 1, 256>}, {pipeline_mode = #tpu.pipeline_mode<synchronous>, transform_indices = @transform_10, window_bounds = array<i64: 256, 128>}, {pipeline_mode = #tpu.pipeline_mode<synchronous>, transform_indices = @transform_11, window_bounds = array<i64: 1, 128>}, {pipeline_mode = #tpu.pipeline_mode<synchronous>, transform_indices = @transform_12, window_bounds = array<i64: 1, 128>}, {pipeline_mode = #tpu.pipeline_mode<synchronous>, transform_indices = @transform_13, window_bounds = array<i64: 128, 128>}, {pipeline_mode = #tpu.pipeline_mode<synchronous>, transform_indices = @transform_14, window_bounds = array<i64: 1, 128>}, {transform_indices = @transform_15, window_bounds = array<i64: 8, 128>}]} {
    %c0 = arith.constant 0 : index
    %c0_0 = arith.constant 0 : index
    %0 = vector.load %arg1[%c0, %c0_0] : memref<8x512xbf16, #tpu.memory_space<vmem>>, vector<8x512xbf16>
    %c0_1 = arith.constant 0 : index
    %c0_2 = arith.constant 0 : index
    %1 = vector.load %arg2[%c0_1, %c0_2] : memref<512x512xbf16, #tpu.memory_space<vmem>>, vector<512x512xbf16>
    %cst = arith.constant dense<0.000000e+00> : vector<8x512xf32>
    %2 = tpu.matmul %0, %1, %cst {dimension_numbers = #tpu.dot_dimension_numbers<[1], [0], [0], [1], [0, 0, 1, 1], [], []>} : vector<8x512xbf16>, vector<512x512xbf16>, vector<8x512xf32> -> vector<8x512xf32>
    %c0_3 = arith.constant 0 : index
    %c0_4 = arith.constant 0 : index
    %3 = vector.load %arg3[%c0_3, %c0_4] : memref<1x512xf32, #tpu.memory_space<vmem>>, vector<1x512xf32>
    %4 = vector.broadcast %3 : vector<1x512xf32> to vector<8x512xf32>
    %5 = arith.mulf %2, %4 : vector<8x512xf32>
    %c0_5 = arith.constant 0 : index
    %c0_6 = arith.constant 0 : index
    %6 = vector.load %arg4[%c0_5, %c0_6] : memref<1x512xf32, #tpu.memory_space<vmem>>, vector<1x512xf32>
    %7 = vector.broadcast %6 : vector<1x512xf32> to vector<8x512xf32>
    %8 = arith.addf %5, %7 : vector<8x512xf32>
    %cst_7 = arith.constant 0.00999999977 : f32
    %9 = vector.broadcast %cst_7 : f32 to vector<8x512xf32>
    %10 = arith.mulf %9, %8 : vector<8x512xf32>
    %11 = arith.maximumf %8, %10 : vector<8x512xf32>
    %12 = arith.truncf %11 : vector<8x512xf32> to vector<8x512xbf16>
    %c0_8 = arith.constant 0 : index
    %c0_9 = arith.constant 0 : index
    %13 = vector.load %arg5[%c0_8, %c0_9] : memref<512x512xbf16, #tpu.memory_space<vmem>>, vector<512x512xbf16>
    %cst_10 = arith.constant dense<0.000000e+00> : vector<8x512xf32>
    %14 = tpu.matmul %12, %13, %cst_10 {dimension_numbers = #tpu.dot_dimension_numbers<[1], [0], [0], [1], [0, 0, 1, 1], [], []>} : vector<8x512xbf16>, vector<512x512xbf16>, vector<8x512xf32> -> vector<8x512xf32>
    %c0_11 = arith.constant 0 : index
    %c0_12 = arith.constant 0 : index
    %15 = vector.load %arg6[%c0_11, %c0_12] : memref<1x512xf32, #tpu.memory_space<vmem>>, vector<1x512xf32>
    %16 = vector.broadcast %15 : vector<1x512xf32> to vector<8x512xf32>
    %17 = arith.mulf %14, %16 : vector<8x512xf32>
    %c0_13 = arith.constant 0 : index
    %c0_14 = arith.constant 0 : index
    %18 = vector.load %arg7[%c0_13, %c0_14] : memref<1x512xf32, #tpu.memory_space<vmem>>, vector<1x512xf32>
    %19 = vector.broadcast %18 : vector<1x512xf32> to vector<8x512xf32>
    %20 = arith.addf %17, %19 : vector<8x512xf32>
    %cst_15 = arith.constant 0.00999999977 : f32
    %21 = vector.broadcast %cst_15 : f32 to vector<8x512xf32>
    %22 = arith.mulf %21, %20 : vector<8x512xf32>
    %23 = arith.maximumf %20, %22 : vector<8x512xf32>
    %24 = arith.truncf %23 : vector<8x512xf32> to vector<8x512xbf16>
    %c0_16 = arith.constant 0 : index
    %c0_17 = arith.constant 0 : index
    %25 = vector.load %arg8[%c0_16, %c0_17] : memref<512x256xbf16, #tpu.memory_space<vmem>>, vector<512x256xbf16>
    %cst_18 = arith.constant dense<0.000000e+00> : vector<8x256xf32>
    %26 = tpu.matmul %24, %25, %cst_18 {dimension_numbers = #tpu.dot_dimension_numbers<[1], [0], [0], [1], [0, 0, 1, 1], [], []>} : vector<8x512xbf16>, vector<512x256xbf16>, vector<8x256xf32> -> vector<8x256xf32>
    %c0_19 = arith.constant 0 : index
    %c0_20 = arith.constant 0 : index
    %27 = vector.load %arg9[%c0_19, %c0_20] : memref<1x256xf32, #tpu.memory_space<vmem>>, vector<1x256xf32>
    %28 = vector.broadcast %27 : vector<1x256xf32> to vector<8x256xf32>
    %29 = arith.mulf %26, %28 : vector<8x256xf32>
    %c0_21 = arith.constant 0 : index
    %c0_22 = arith.constant 0 : index
    %30 = vector.load %arg10[%c0_21, %c0_22] : memref<1x256xf32, #tpu.memory_space<vmem>>, vector<1x256xf32>
    %31 = vector.broadcast %30 : vector<1x256xf32> to vector<8x256xf32>
    %32 = arith.addf %29, %31 : vector<8x256xf32>
    %cst_23 = arith.constant 0.00999999977 : f32
    %33 = vector.broadcast %cst_23 : f32 to vector<8x256xf32>
    %34 = arith.mulf %33, %32 : vector<8x256xf32>
    %35 = arith.maximumf %32, %34 : vector<8x256xf32>
    %36 = arith.truncf %35 : vector<8x256xf32> to vector<8x256xbf16>
    %c0_24 = arith.constant 0 : index
    %c0_25 = arith.constant 0 : index
    %37 = vector.load %arg11[%c0_24, %c0_25] : memref<256x128xbf16, #tpu.memory_space<vmem>>, vector<256x128xbf16>
    %cst_26 = arith.constant dense<0.000000e+00> : vector<8x128xf32>
    %38 = tpu.matmul %36, %37, %cst_26 {dimension_numbers = #tpu.dot_dimension_numbers<[1], [0], [0], [1], [0, 0, 1, 1], [], []>} : vector<8x256xbf16>, vector<256x128xbf16>, vector<8x128xf32> -> vector<8x128xf32>
    %c0_27 = arith.constant 0 : index
    %c0_28 = arith.constant 0 : index
    %39 = vector.load %arg12[%c0_27, %c0_28] : memref<1x128xf32, #tpu.memory_space<vmem>>, vector<1x128xf32>
    %40 = vector.broadcast %39 : vector<1x128xf32> to vector<8x128xf32>
    %41 = arith.mulf %38, %40 : vector<8x128xf32>
    %c0_29 = arith.constant 0 : index
    %c0_30 = arith.constant 0 : index
    %42 = vector.load %arg13[%c0_29, %c0_30] : memref<1x128xf32, #tpu.memory_space<vmem>>, vector<1x128xf32>
    %43 = vector.broadcast %42 : vector<1x128xf32> to vector<8x128xf32>
    %44 = arith.addf %41, %43 : vector<8x128xf32>
    %cst_31 = arith.constant 0.00999999977 : f32
    %45 = vector.broadcast %cst_31 : f32 to vector<8x128xf32>
    %46 = arith.mulf %45, %44 : vector<8x128xf32>
    %47 = arith.maximumf %44, %46 : vector<8x128xf32>
    %48 = arith.truncf %47 : vector<8x128xf32> to vector<8x128xbf16>
    %c0_32 = arith.constant 0 : index
    %c0_33 = arith.constant 0 : index
    %49 = vector.load %arg14[%c0_32, %c0_33] : memref<128x128xbf16, #tpu.memory_space<vmem>>, vector<128x128xbf16>
    %cst_34 = arith.constant dense<0.000000e+00> : vector<8x128xf32>
    %50 = tpu.matmul %48, %49, %cst_34 {dimension_numbers = #tpu.dot_dimension_numbers<[1], [0], [0], [1], [0, 0, 1, 1], [], []>} : vector<8x128xbf16>, vector<128x128xbf16>, vector<8x128xf32> -> vector<8x128xf32>
    %c0_35 = arith.constant 0 : index
    %c0_36 = arith.constant 0 : index
    %51 = vector.load %arg15[%c0_35, %c0_36] : memref<1x128xf32, #tpu.memory_space<vmem>>, vector<1x128xf32>
    %52 = vector.broadcast %51 : vector<1x128xf32> to vector<8x128xf32>
    %53 = arith.addf %50, %52 : vector<8x128xf32>
    %c0_37 = arith.constant 0 : index
    %c0_38 = arith.constant 0 : index
    %54 = vector.load %arg16[%c0_37, %c0_38] : memref<8x128xf32, #tpu.memory_space<vmem>>, vector<8x128xf32>
    tpu.vector_store %arg16[%c0_37, %c0_38], %53 {strides = array<i32>} : memref<8x128xf32, #tpu.memory_space<vmem>>, vector<8x128xf32>,
    return
  }
  func.func @transform_0(%arg0: i32) -> (i32, i32) {
    %c0_i32 = arith.constant 0 : i32
    %c0_i32_0 = arith.constant 0 : i32
    return %arg0, %c0_i32 : i32, i32
  }
  func.func @transform_1(%arg0: i32) -> (i32, i32) {
    %c0_i32 = arith.constant 0 : i32
    %c0_i32_0 = arith.constant 0 : i32
    %c0_i32_1 = arith.constant 0 : i32
    return %c0_i32, %c0_i32_0 : i32, i32
  }
  func.func @transform_2(%arg0: i32) -> (i32, i32) {
    %c0_i32 = arith.constant 0 : i32
    %c0_i32_0 = arith.constant 0 : i32
    %c0_i32_1 = arith.constant 0 : i32
    return %c0_i32, %c0_i32_0 : i32, i32
  }
  func.func @transform_3(%arg0: i32) -> (i32, i32) {
    %c0_i32 = arith.constant 0 : i32
    %c0_i32_0 = arith.constant 0 : i32
    %c0_i32_1 = arith.constant 0 : i32
    return %c0_i32, %c0_i32_0 : i32, i32
  }
  func.func @transform_4(%arg0: i32) -> (i32, i32) {
    %c0_i32 = arith.constant 0 : i32
    %c0_i32_0 = arith.constant 0 : i32
    %c0_i32_1 = arith.constant 0 : i32
    return %c0_i32, %c0_i32_0 : i32, i32
  }
  func.func @transform_5(%arg0: i32) -> (i32, i32) {
    %c0_i32 = arith.constant 0 : i32
    %c0_i32_0 = arith.constant 0 : i32
    %c0_i32_1 = arith.constant 0 : i32
    return %c0_i32, %c0_i32_0 : i32, i32
  }
  func.func @transform_6(%arg0: i32) -> (i32, i32) {
    %c0_i32 = arith.constant 0 : i32
    %c0_i32_0 = arith.constant 0 : i32
    %c0_i32_1 = arith.constant 0 : i32
    return %c0_i32, %c0_i32_0 : i32, i32
  }
  func.func @transform_7(%arg0: i32) -> (i32, i32) {
    %c0_i32 = arith.constant 0 : i32
    %c0_i32_0 = arith.constant 0 : i32
    %c0_i32_1 = arith.constant 0 : i32
    return %c0_i32, %c0_i32_0 : i32, i32
  }
  func.func @transform_8(%arg0: i32) -> (i32, i32) {
    %c0_i32 = arith.constant 0 : i32
    %c0_i32_0 = arith.constant 0 : i32
    %c0_i32_1 = arith.constant 0 : i32
    return %c0_i32, %c0_i32_0 : i32, i32
  }
  func.func @transform_9(%arg0: i32) -> (i32, i32) {
    %c0_i32 = arith.constant 0 : i32
    %c0_i32_0 = arith.constant 0 : i32
    %c0_i32_1 = arith.constant 0 : i32
    return %c0_i32, %c0_i32_0 : i32, i32
  }
  func.func @transform_10(%arg0: i32) -> (i32, i32) {
    %c0_i32 = arith.constant 0 : i32
    %c0_i32_0 = arith.constant 0 : i32
    %c0_i32_1 = arith.constant 0 : i32
    return %c0_i32, %c0_i32_0 : i32, i32
  }
  func.func @transform_11(%arg0: i32) -> (i32, i32) {
    %c0_i32 = arith.constant 0 : i32
    %c0_i32_0 = arith.constant 0 : i32
    %c0_i32_1 = arith.constant 0 : i32
    return %c0_i32, %c0_i32_0 : i32, i32
  }
  func.func @transform_12(%arg0: i32) -> (i32, i32) {
    %c0_i32 = arith.constant 0 : i32
    %c0_i32_0 = arith.constant 0 : i32
    %c0_i32_1 = arith.constant 0 : i32
    return %c0_i32, %c0_i32_0 : i32, i32
  }
  func.func @transform_13(%arg0: i32) -> (i32, i32) {
    %c0_i32 = arith.constant 0 : i32
    %c0_i32_0 = arith.constant 0 : i32
    %c0_i32_1 = arith.constant 0 : i32
    return %c0_i32, %c0_i32_0 : i32, i32
  }
  func.func @transform_14(%arg0: i32) -> (i32, i32) {
    %c0_i32 = arith.constant 0 : i32
    %c0_i32_0 = arith.constant 0 : i32
    %c0_i32_1 = arith.constant 0 : i32
    return %c0_i32, %c0_i32_0 : i32, i32
  }
  func.func @transform_15(%arg0: i32) -> (i32, i32) {
    %c0_i32 = arith.constant 0 : i32
    %c0_i32_0 = arith.constant 0 : i32
    return %arg0, %c0_i32 : i32, i32
  }
}

</mosaic_0001>

<bundles_post_ra>
// kernel: basic_cnn_forward.3
= control target key start
LH: loop header
LB: loop body
LE: loop exit
PB: predicated region body
PF: predicated region fallthrough
CT: control target
= control target key end

     0   :  { %vm3795_vm0 = vmmov 0   ;;  %s4986_s1 = inlined_call_operand.vmem [shape: bf16[512,512], index: 1, kind: input, shape index: {}]   ;;  %s4987_s0 = inlined_call_operand.vmem [shape: bf16[8,512], index: 0, kind: input, shape index: {}]   ;;  %s4988_s4 = inlined_call_operand.vmem [shape: bf16[512,512], index: 4, kind: input, shape index: {}]   ;;  %s4989_s7 = inlined_call_operand.vmem [shape: bf16[512,256], index: 7, kind: input, shape index: {}]   ;;  %s4990_s2 = inlined_call_operand.vmem [shape: f32[1,512], index: 2, kind: input, shape index: {}]   ;;  %s4991_s3 = inlined_call_operand.vmem [shape: f32[1,512], index: 3, kind: input, shape index: {}]   ;;  %s4992_s10 = inlined_call_operand.vmem [shape: bf16[256,128], index: 10, kind: input, shape index: {}]   ;;  %s4993_s5 = inlined_call_operand.vmem [shape: f32[1,512], index: 5, kind: input, shape index: {}]   ;;  %s4994_s6 = inlined_call_operand.vmem [shape: f32[1,512], index: 6, kind: input, shape index: {}]   ;;  %s4995_s13 = inlined_call_operand.vmem [shape: bf16[128,128], index: 13, kind: input, shape index: {}]   ;;  %s4996_s8 = inlined_call_operand.vmem [shape: f32[1,256], index: 8, kind: input, shape index: {}]   ;;  %s4997_s9 = inlined_call_operand.vmem [shape: f32[1,256], index: 9, kind: input, shape index: {}]   ;;  %s4998_s11 = inlined_call_operand.vmem [shape: f32[1,128], index: 11, kind: input, shape index: {}]   ;;  %s4999_s12 = inlined_call_operand.vmem [shape: f32[1,128], index: 12, kind: input, shape index: {}]   ;;  %s5000_s14 = inlined_call_operand.vmem [shape: f32[1,128], index: 14, kind: input, shape index: {}]   ;;  %s5001_s15 = inlined_call_operand.vmem [shape: f32[8,128], index: 15, kind: output, shape index: {}]  }
   0x1   :  { %v3286_v0 = vld [vmem:[%s4986_s1 + $0x4] ss:$16 sps:$4 sm:$0xff]   ;;  %v3288_v1 = vld [vmem:[%s4986_s1 + $0xc] ss:$16 sps:$4 sm:$0xff]   ;;  %v3290_v2 = vld [vmem:[%s4986_s1] ss:$16 sps:$4 sm:$0xff]  }
   0x2   :  { %835 = vmatprep.subr.bf16.mxu0 %v3286_v0  ;;  %v3291_v3 = vld [vmem:[%s4986_s1 + $0x8] ss:$16 sps:$4 sm:$0xff]   ;;  %917 = vmatprep.subr.bf16.mxu1 %v3288_v1  ;;  %v3292_v4 = vld [vmem:[%s4986_s1 + $0x24] ss:$16 sps:$4 sm:$0xff]   ;;  %v3294_v5 = vld [vmem:[%s4986_s1 + $0x2c] ss:$16 sps:$4 sm:$0xff]  }
   0x3   :  { %836 = vmatpush1.bf16.msra.mxu0 %v3290_v2  ;;  %918 = vmatpush1.bf16.msra.mxu1 %v3291_v3  ;;  %v3296_v6 = vld [vmem:[%s4986_s1 + $0x20] ss:$16 sps:$4 sm:$0xff]   ;;  %v3297_v7 = vld [vmem:[%s4986_s1 + $0x28] ss:$16 sps:$4 sm:$0xff]   ;;  %v3298_v8 = vld [vmem:[%s4986_s1 + $0x44] ss:$16 sps:$4 sm:$0xff]  }
   0x4   :  { %837 = vmatprep.subr.bf16.mxu0 %v3292_v4  ;;  %919 = vmatprep.subr.bf16.mxu1 %v3294_v5  ;;  %v3300_v9 = vld [vmem:[%s4986_s1 + $0x4c] ss:$16 sps:$4 sm:$0xff]   ;;  %v3302_v10 = vld [vmem:[%s4986_s1 + $0x40] ss:$16 sps:$4 sm:$0xff]   ;;  %v3303_v11 = vld [vmem:[%s4986_s1 + $0x48] ss:$16 sps:$4 sm:$0xff]  }
   0x5   :  { %v3304_v12 = vld [vmem:[%s4986_s1 + $0x64] ss:$16 sps:$4 sm:$0xff]   ;;  %v3306_v13 = vld [vmem:[%s4986_s1 + $0x6c] ss:$16 sps:$4 sm:$0xff]   ;;  %v3308_v14 = vld [vmem:[%s4986_s1 + $0x60] ss:$16 sps:$4 sm:$0xff]  }
   0x6   :  { %v3309_v15 = vld [vmem:[%s4986_s1 + $0x68] ss:$16 sps:$4 sm:$0xff]   ;;  %v3310_v16 = vld [vmem:[%s4986_s1 + $0x84] ss:$16 sps:$4 sm:$0xff]   ;;  %v3312_v17 = vld [vmem:[%s4986_s1 + $0x8c] ss:$16 sps:$4 sm:$0xff]  }
   0x7   :  { %838 = vmatpush1.bf16.msra.mxu0 %v3296_v6  ;;  %920 = vmatpush1.bf16.msra.mxu1 %v3297_v7  ;;  %v3314_v18 = vld [vmem:[%s4986_s1 + $0x80] ss:$16 sps:$4 sm:$0xff]   ;;  %v3315_v19 = vld [vmem:[%s4986_s1 + $0x88] ss:$16 sps:$4 sm:$0xff]   ;;  %v3316_v20 = vld [vmem:[%s4986_s1 + $0xa4] ss:$16 sps:$4 sm:$0xff]  }
   0x8   :  { %839 = vmatprep.subr.bf16.mxu0 %v3298_v8  ;;  %921 = vmatprep.subr.bf16.mxu1 %v3300_v9  ;;  %v3318_v21 = vld [vmem:[%s4986_s1 + $0xac] ss:$16 sps:$4 sm:$0xff]   ;;  %v3320_v22 = vld [vmem:[%s4986_s1 + $0xa0] ss:$16 sps:$4 sm:$0xff]   ;;  %v3321_v23 = vld [vmem:[%s4986_s1 + $0xa8] ss:$16 sps:$4 sm:$0xff]  }
   0x9   :  { %v3322_v24 = vld [vmem:[%s4986_s1 + $0xc4] ss:$16 sps:$4 sm:$0xff]   ;;  %v3324_v25 = vld [vmem:[%s4986_s1 + $0xcc] ss:$16 sps:$4 sm:$0xff]   ;;  %v3326_v26 = vld [vmem:[%s4986_s1 + $0xc0] ss:$16 sps:$4 sm:$0xff]  }
   0xa   :  { %v3327_v27 = vld [vmem:[%s4986_s1 + $0xc8] ss:$16 sps:$4 sm:$0xff]   ;;  %v3328_v28 = vld [vmem:[%s4986_s1 + $0xe4] ss:$16 sps:$4 sm:$0xff]   ;;  %v3330_v29 = vld [vmem:[%s4986_s1 + $0xec] ss:$16 sps:$4 sm:$0xff]  }
   0xb   :  { %840 = vmatpush1.bf16.msra.mxu0 %v3302_v10  ;;  %922 = vmatpush1.bf16.msra.mxu1 %v3303_v11  ;;  %v3332_v30 = vld [vmem:[%s4986_s1 + $0xe0] ss:$16 sps:$4 sm:$0xff]   ;;  %v3333_v31 = vld [vmem:[%s4986_s1 + $0xe8] ss:$16 sps:$4 sm:$0xff]   ;;  %v3334_v32 = vld [vmem:[%s4986_s1 + $0x104] ss:$16 sps:$4 sm:$0xff]  }
   0xc   :  { %841 = vmatprep.subr.bf16.mxu0 %v3304_v12  ;;  %923 = vmatprep.subr.bf16.mxu1 %v3306_v13  ;;  %v3336_v33 = vld [vmem:[%s4986_s1 + $0x10c] ss:$16 sps:$4 sm:$0xff]   ;;  %v3338_v34 = vld [vmem:[%s4986_s1 + $0x100] ss:$16 sps:$4 sm:$0xff]   ;;  %v3339_v35 = vld [vmem:[%s4986_s1 + $0x108] ss:$16 sps:$4 sm:$0xff]  }
   0xd   :  { %v3340_v36 = vld [vmem:[%s4986_s1 + $0x124] ss:$16 sps:$4 sm:$0xff]   ;;  %v3342_v37 = vld [vmem:[%s4986_s1 + $0x12c] ss:$16 sps:$4 sm:$0xff]   ;;  %v3344_v38 = vld [vmem:[%s4986_s1 + $0x120] ss:$16 sps:$4 sm:$0xff]  }
   0xe   :  { %v3345_v39 = vld [vmem:[%s4986_s1 + $0x128] ss:$16 sps:$4 sm:$0xff]   ;;  %v3346_v40 = vld [vmem:[%s4986_s1 + $0x144] ss:$16 sps:$4 sm:$0xff]   ;;  %v3348_v41 = vld [vmem:[%s4986_s1 + $0x14c] ss:$16 sps:$4 sm:$0xff]  }
   0xf   :  { %842 = vmatpush1.bf16.msra.mxu0 %v3308_v14  ;;  %924 = vmatpush1.bf16.msra.mxu1 %v3309_v15  ;;  %v3350_v42 = vld [vmem:[%s4986_s1 + $0x140] ss:$16 sps:$4 sm:$0xff]   ;;  %v3351_v43 = vld [vmem:[%s4986_s1 + $0x148] ss:$16 sps:$4 sm:$0xff]   ;;  %v3352_v44 = vld [vmem:[%s4986_s1 + $0x164] ss:$16 sps:$4 sm:$0xff]  }
  0x10   :  { %843 = vmatprep.subr.bf16.mxu0 %v3310_v16  ;;  %925 = vmatprep.subr.bf16.mxu1 %v3312_v17  ;;  %v3354_v45 = vld [vmem:[%s4986_s1 + $0x16c] ss:$16 sps:$4 sm:$0xff]   ;;  %v51_v46 = vld [vmem:[%s4987_s0] sm:$0xff]  ;;  %v3357_v49 = vld [vmem:[%s4986_s1 + $0x168] ss:$16 sps:$4 sm:$0xff]  }
  0x11   :  { %v2863_v47 = vcombine.high %v51_v46, %v51_v46  ;;  %v3356_v48 = vld [vmem:[%s4986_s1 + $0x160] ss:$16 sps:$4 sm:$0xff]   ;;  %v3358_v50 = vld [vmem:[%s4986_s1 + $0x184] ss:$16 sps:$4 sm:$0xff]   ;;  %v3360_v51 = vld [vmem:[%s4986_s1 + $0x18c] ss:$16 sps:$4 sm:$0xff]   ;;  %v2862_v5 = vcombine.low %v51_v46, %v51_v46 }
  0x12   :  { %v3362_v52 = vld [vmem:[%s4986_s1 + $0x180] ss:$16 sps:$4 sm:$0xff]   ;;  %v3363_v53 = vld [vmem:[%s4986_s1 + $0x188] ss:$16 sps:$4 sm:$0xff]   ;;  %v3364_v54 = vld [vmem:[%s4986_s1 + $0x1a4] ss:$16 sps:$4 sm:$0xff]  }
  0x13   :  { %844 = vmatpush1.bf16.msra.mxu0 %v3314_v18  ;;  %926 = vmatpush1.bf16.msra.mxu1 %v3315_v19  ;;  %v3366_v55 = vld [vmem:[%s4986_s1 + $0x1ac] ss:$16 sps:$4 sm:$0xff]   ;;  %v3368_v56 = vld [vmem:[%s4986_s1 + $0x1a0] ss:$16 sps:$4 sm:$0xff]   ;;  %v3369_v57 = vld [vmem:[%s4986_s1 + $0x1a8] ss:$16 sps:$4 sm:$0xff]  }
  0x14   :  { %845 = vmatprep.subr.bf16.mxu0 %v3316_v20  ;;  %927 = vmatprep.subr.bf16.mxu1 %v3318_v21  ;;  %v3370_v58 = vld [vmem:[%s4986_s1 + $0x1c4] ss:$16 sps:$4 sm:$0xff]   ;;  %v3372_v59 = vld [vmem:[%s4986_s1 + $0x1cc] ss:$16 sps:$4 sm:$0xff]   ;;  %v3374_v60 = vld [vmem:[%s4986_s1 + $0x1c0] ss:$16 sps:$4 sm:$0xff]  }
  0x15   :  { %867 = vmatprep.mubr.bf16.mxu0 %v2863_v47  ;;  %949 = vmatprep.mubr.bf16.mxu1 %v2863_v47  ;;  %v3375_v61 = vld [vmem:[%s4986_s1 + $0x1c8] ss:$16 sps:$4 sm:$0xff]   ;;  %v3376_v62 = vld [vmem:[%s4986_s1 + $0x1e4] ss:$16 sps:$4 sm:$0xff]   ;;  %v3378_v63 = vld [vmem:[%s4986_s1 + $0x1ec] ss:$16 sps:$4 sm:$0xff]  }
  0x16   :  { %v3380_v0 = vld [vmem:[%s4986_s1 + $0x1e0] ss:$16 sps:$4 sm:$0xff]   ;;  %v3381_v1 = vld [vmem:[%s4986_s1 + $0x1e8] ss:$16 sps:$4 sm:$0xff]   ;;  %v3387_v2 = vld [vmem:[%s4986_s1 + $0x204] ss:$16 sps:$4 sm:$0xff]  }
  0x17   :  { %846 = vmatpush1.bf16.msra.mxu0 %v3320_v22  ;;  %928 = vmatpush1.bf16.msra.mxu1 %v3321_v23  ;;  %v3390_v3 = vld [vmem:[%s4986_s1 + $0x20c] ss:$16 sps:$4 sm:$0xff]   ;;  %v3385_v6 = vld [vmem:[%s4986_s1 + $0x200] ss:$16 sps:$4 sm:$0xff]   ;;  %v3388_v7 = vld [vmem:[%s4986_s1 + $0x208] ss:$16 sps:$4 sm:$0xff]  }
  0x18   :  { %847 = vmatprep.subr.bf16.mxu0 %v3322_v24  ;;  %929 = vmatprep.subr.bf16.mxu1 %v3324_v25  ;;  %v4080_v4 = vld [vmem:[%s4987_s0 + $0x8] sm:$0xff]  ;;  %v3393_v8 = vld [vmem:[%s4986_s1 + $0x224] ss:$16 sps:$4 sm:$0xff]   ;;  %v3391_v11 = vld [vmem:[%s4986_s1 + $0x220] ss:$16 sps:$4 sm:$0xff]  }
  0x19   :  { %v3396_v9 = vld [vmem:[%s4986_s1 + $0x22c] ss:$16 sps:$4 sm:$0xff]   ;;  %v2865_v10 = vcombine.high %v4080_v4, %v4080_v4  ;;  %v3394_v12 = vld [vmem:[%s4986_s1 + $0x228] ss:$16 sps:$4 sm:$0xff]   ;;  %v3399_v13 = vld [vmem:[%s4986_s1 + $0x244] ss:$16 sps:$4 sm:$0xff]  }
  0x1a   :  { %v3402_v14 = vld [vmem:[%s4986_s1 + $0x24c] ss:$16 sps:$4 sm:$0xff]   ;;  %v3397_v15 = vld [vmem:[%s4986_s1 + $0x240] ss:$16 sps:$4 sm:$0xff]   ;;  %v3400_v16 = vld [vmem:[%s4986_s1 + $0x248] ss:$16 sps:$4 sm:$0xff]  }
  0x1b   :  { %848 = vmatpush1.bf16.msra.mxu0 %v3326_v26  ;;  %930 = vmatpush1.bf16.msra.mxu1 %v3327_v27  ;;  %v3405_v17 = vld [vmem:[%s4986_s1 + $0x264] ss:$16 sps:$4 sm:$0xff]   ;;  %v3408_v18 = vld [vmem:[%s4986_s1 + $0x26c] ss:$16 sps:$4 sm:$0xff]   ;;  %v3403_v19 = vld [vmem:[%s4986_s1 + $0x260] ss:$16 sps:$4 sm:$0xff]  }
  0x1c   :  { %849 = vmatprep.subr.bf16.mxu0 %v3328_v28  ;;  %931 = vmatprep.subr.bf16.mxu1 %v3330_v29  ;;  %v3406_v20 = vld [vmem:[%s4986_s1 + $0x268] ss:$16 sps:$4 sm:$0xff]   ;;  %v3411_v21 = vld [vmem:[%s4986_s1 + $0x284] ss:$16 sps:$4 sm:$0xff]   ;;  %v3414_v22 = vld [vmem:[%s4986_s1 + $0x28c] ss:$16 sps:$4 sm:$0xff]  }
  0x1d   :  { %v3409_v23 = vld [vmem:[%s4986_s1 + $0x280] ss:$16 sps:$4 sm:$0xff]   ;;  %v3412_v24 = vld [vmem:[%s4986_s1 + $0x288] ss:$16 sps:$4 sm:$0xff]   ;;  %v3417_v25 = vld [vmem:[%s4986_s1 + $0x2a4] ss:$16 sps:$4 sm:$0xff]  }
  0x1e   :  { %v3420_v26 = vld [vmem:[%s4986_s1 + $0x2ac] ss:$16 sps:$4 sm:$0xff]   ;;  %v3415_v27 = vld [vmem:[%s4986_s1 + $0x2a0] ss:$16 sps:$4 sm:$0xff]   ;;  %v3418_v28 = vld [vmem:[%s4986_s1 + $0x2a8] ss:$16 sps:$4 sm:$0xff]  }
  0x1f   :  { %850 = vmatpush1.bf16.msra.mxu0 %v3332_v30  ;;  %932 = vmatpush1.bf16.msra.mxu1 %v3333_v31  ;;  %v3423_v29 = vld [vmem:[%s4986_s1 + $0x2c4] ss:$16 sps:$4 sm:$0xff]   ;;  %v3426_v30 = vld [vmem:[%s4986_s1 + $0x2cc] ss:$16 sps:$4 sm:$0xff]   ;;  %v3421_v31 = vld [vmem:[%s4986_s1 + $0x2c0] ss:$16 sps:$4 sm:$0xff]  }
  0x20   :  { %851 = vmatprep.subr.bf16.mxu0 %v3334_v32  ;;  %933 = vmatprep.subr.bf16.mxu1 %v3336_v33  ;;  %v3424_v32 = vld [vmem:[%s4986_s1 + $0x2c8] ss:$16 sps:$4 sm:$0xff]   ;;  %v3429_v33 = vld [vmem:[%s4986_s1 + $0x2e4] ss:$16 sps:$4 sm:$0xff]   ;;  %v3450_v46 = vld [vmem:[%s4986_s1 + $0x34c] ss:$16 sps:$4 sm:$0xff]  }
  0x21   :  { %v3445_v47 = vld [vmem:[%s4986_s1 + $0x340] ss:$16 sps:$4 sm:$0xff]  }
  0x23   :  { %852 = vmatpush1.bf16.msra.mxu0 %v3338_v34  ;;  %934 = vmatpush1.bf16.msra.mxu1 %v3339_v35  ;;  %v3432_v34 = vld [vmem:[%s4986_s1 + $0x2ec] ss:$16 sps:$4 sm:$0xff]   ;;  %v3427_v35 = vld [vmem:[%s4986_s1 + $0x2e0] ss:$16 sps:$4 sm:$0xff]  }
  0x24   :  { %853 = vmatprep.subr.bf16.mxu0 %v3340_v36  ;;  %935 = vmatprep.subr.bf16.mxu1 %v3342_v37  ;;  %v3430_v36 = vld [vmem:[%s4986_s1 + $0x2e8] ss:$16 sps:$4 sm:$0xff]   ;;  %v3435_v37 = vld [vmem:[%s4986_s1 + $0x304] ss:$16 sps:$4 sm:$0xff]  }
  0x27   :  { %854 = vmatpush1.bf16.msra.mxu0 %v3344_v38  ;;  %936 = vmatpush1.bf16.msra.mxu1 %v3345_v39  ;;  %v3438_v38 = vld [vmem:[%s4986_s1 + $0x30c] ss:$16 sps:$4 sm:$0xff]   ;;  %v3433_v39 = vld [vmem:[%s4986_s1 + $0x300] ss:$16 sps:$4 sm:$0xff]  }
  0x28   :  { %855 = vmatprep.subr.bf16.mxu0 %v3346_v40  ;;  %937 = vmatprep.subr.bf16.mxu1 %v3348_v41  ;;  %v3436_v40 = vld [vmem:[%s4986_s1 + $0x308] ss:$16 sps:$4 sm:$0xff]   ;;  %v3441_v41 = vld [vmem:[%s4986_s1 + $0x324] ss:$16 sps:$4 sm:$0xff]  }
  0x2b   :  { %856 = vmatpush1.bf16.msra.mxu0 %v3350_v42  ;;  %938 = vmatpush1.bf16.msra.mxu1 %v3351_v43  ;;  %v3444_v42 = vld [vmem:[%s4986_s1 + $0x32c] ss:$16 sps:$4 sm:$0xff]   ;;  %v3439_v43 = vld [vmem:[%s4986_s1 + $0x320] ss:$16 sps:$4 sm:$0xff]  }
  0x2c   :  { %857 = vmatprep.subr.bf16.mxu0 %v3352_v44  ;;  %939 = vmatprep.subr.bf16.mxu1 %v3354_v45  ;;  %v3442_v44 = vld [vmem:[%s4986_s1 + $0x328] ss:$16 sps:$4 sm:$0xff]   ;;  %v3447_v45 = vld [vmem:[%s4986_s1 + $0x344] ss:$16 sps:$4 sm:$0xff]  }
  0x2f   :  { %858 = vmatpush1.bf16.msra.mxu0 %v3356_v48  ;;  %940 = vmatpush1.bf16.msra.mxu1 %v3357_v49  ;;  %v3448_v48 = vld [vmem:[%s4986_s1 + $0x348] ss:$16 sps:$4 sm:$0xff]   ;;  %v3453_v49 = vld [vmem:[%s4986_s1 + $0x364] ss:$16 sps:$4 sm:$0xff]  }
  0x30   :  { %859 = vmatprep.subr.bf16.mxu0 %v3358_v50  ;;  %941 = vmatprep.subr.bf16.mxu1 %v3360_v51  ;;  %v3456_v50 = vld [vmem:[%s4986_s1 + $0x36c] ss:$16 sps:$4 sm:$0xff]   ;;  %v3451_v51 = vld [vmem:[%s4986_s1 + $0x360] ss:$16 sps:$4 sm:$0xff]  }
  0x33   :  { %860 = vmatpush1.bf16.msra.mxu0 %v3362_v52  ;;  %942 = vmatpush1.bf16.msra.mxu1 %v3363_v53  ;;  %v3454_v52 = vld [vmem:[%s4986_s1 + $0x368] ss:$16 sps:$4 sm:$0xff]   ;;  %v3459_v53 = vld [vmem:[%s4986_s1 + $0x384] ss:$16 sps:$4 sm:$0xff]  }
  0x34   :  { %861 = vmatprep.subr.bf16.mxu0 %v3364_v54  ;;  %943 = vmatprep.subr.bf16.mxu1 %v3366_v55  ;;  %v3462_v54 = vld [vmem:[%s4986_s1 + $0x38c] ss:$16 sps:$4 sm:$0xff]   ;;  %v3457_v55 = vld [vmem:[%s4986_s1 + $0x380] ss:$16 sps:$4 sm:$0xff]  }
  0x37   :  { %862 = vmatpush1.bf16.msra.mxu0 %v3368_v56  ;;  %944 = vmatpush1.bf16.msra.mxu1 %v3369_v57  ;;  %v3460_v56 = vld [vmem:[%s4986_s1 + $0x388] ss:$16 sps:$4 sm:$0xff]   ;;  %v3465_v57 = vld [vmem:[%s4986_s1 + $0x3a4] ss:$16 sps:$4 sm:$0xff]  }
  0x38   :  { %863 = vmatprep.subr.bf16.mxu0 %v3370_v58  ;;  %945 = vmatprep.subr.bf16.mxu1 %v3372_v59  ;;  %v3468_v58 = vld [vmem:[%s4986_s1 + $0x3ac] ss:$16 sps:$4 sm:$0xff]   ;;  %v3463_v59 = vld [vmem:[%s4986_s1 + $0x3a0] ss:$16 sps:$4 sm:$0xff]  }
  0x3b   :  { %864 = vmatpush1.bf16.msra.mxu0 %v3374_v60  ;;  %946 = vmatpush1.bf16.msra.mxu1 %v3375_v61  ;;  %v3466_v60 = vld [vmem:[%s4986_s1 + $0x3a8] ss:$16 sps:$4 sm:$0xff]   ;;  %v3471_v61 = vld [vmem:[%s4986_s1 + $0x3c4] ss:$16 sps:$4 sm:$0xff]  }
  0x3c   :  { %865 = vmatprep.subr.bf16.mxu0 %v3376_v62  ;;  %947 = vmatprep.subr.bf16.mxu1 %v3378_v63  ;;  %v3474_v62 = vld [vmem:[%s4986_s1 + $0x3cc] ss:$16 sps:$4 sm:$0xff]   ;;  %v3469_v63 = vld [vmem:[%s4986_s1 + $0x3c0] ss:$16 sps:$4 sm:$0xff]  }
  0x3f   :  { %866 = vmatpush1.bf16.msra.mxu0 %v3380_v0  ;;  %948 = vmatpush1.bf16.msra.mxu1 %v3381_v1  ;;  %v3472_v0 = vld [vmem:[%s4986_s1 + $0x3c8] ss:$16 sps:$4 sm:$0xff]   ;;  %v3477_v1 = vld [vmem:[%s4986_s1 + $0x3e4] ss:$16 sps:$4 sm:$0xff]  }
  0x40   :  { %876 = vmatprep.subr.bf16.mxu0 %v3387_v2  ;;  %958 = vmatprep.subr.bf16.mxu1 %v3390_v3  ;;  %v3480_v2 = vld [vmem:[%s4986_s1 + $0x3ec] ss:$16 sps:$4 sm:$0xff]   ;;  %v3475_v3 = vld [vmem:[%s4986_s1 + $0x3e0] ss:$16 sps:$4 sm:$0xff]  }
  0x42   :  { %868 = vmatmul.mubr.bf16.vlgmr.msra.gmra.mrb[0].mxu0 %v2862_v5  ;;  %950 = vmatmul.mubr.bf16.vlgmr.msra.gmra.mrb[0].mxu1 %v2862_v5  ;;  %v3478_v5 = vld [vmem:[%s4986_s1 + $0x3e8] ss:$16 sps:$4 sm:$0xff]  }
  0x43   :  { %877 = vmatpush1.bf16.msra.mxu0 %v3385_v6  ;;  %959 = vmatpush1.bf16.msra.mxu1 %v3388_v7  ;;  %v3484_v6 = vld [vmem:[%s4988_s4 + $0x4] ss:$16 sps:$4 sm:$0xff]   ;;  %v3487_v7 = vld [vmem:[%s4988_s4 + $0xc] ss:$16 sps:$4 sm:$0xff]  }
  0x44   :  { %878 = vmatprep.subr.bf16.mxu0 %v3393_v8  ;;  %960 = vmatprep.subr.bf16.mxu1 %v3396_v9  ;;  %v3482_v8 = vld [vmem:[%s4988_s4] ss:$16 sps:$4 sm:$0xff]   ;;  %v3485_v9 = vld [vmem:[%s4988_s4 + $0x8] ss:$16 sps:$4 sm:$0xff]  }
  0x45   :  { %908 = vmatprep.mubr.bf16.mxu0 %v2865_v10  ;;  %990 = vmatprep.mubr.bf16.mxu1 %v2865_v10  ;;  %v2864_v10 = vcombine.low %v4080_v4, %v4080_v4  ;;  %v3491_v4 = vld [vmem:[%s4988_s4 + $0x28] ss:$16 sps:$4 sm:$0xff]  }
  0x47   :  { %879 = vmatpush1.bf16.msra.mxu0 %v3391_v11  ;;  %961 = vmatpush1.bf16.msra.mxu1 %v3394_v12  ;;  %v3490_v11 = vld [vmem:[%s4988_s4 + $0x24] ss:$16 sps:$4 sm:$0xff]   ;;  %v3493_v12 = vld [vmem:[%s4988_s4 + $0x2c] ss:$16 sps:$4 sm:$0xff]  }
  0x48   :  { %880 = vmatprep.subr.bf16.mxu0 %v3399_v13  ;;  %962 = vmatprep.subr.bf16.mxu1 %v3402_v14  ;;  %v3488_v13 = vld [vmem:[%s4988_s4 + $0x20] ss:$16 sps:$4 sm:$0xff]   ;;  %v3496_v14 = vld [vmem:[%s4988_s4 + $0x44] ss:$16 sps:$4 sm:$0xff]  }
  0x4b   :  { %881 = vmatpush1.bf16.msra.mxu0 %v3397_v15  ;;  %963 = vmatpush1.bf16.msra.mxu1 %v3400_v16  ;;  %v3499_v15 = vld [vmem:[%s4988_s4 + $0x4c] ss:$16 sps:$4 sm:$0xff]   ;;  %v3494_v16 = vld [vmem:[%s4988_s4 + $0x40] ss:$16 sps:$4 sm:$0xff]  }
  0x4c   :  { %882 = vmatprep.subr.bf16.mxu0 %v3405_v17  ;;  %964 = vmatprep.subr.bf16.mxu1 %v3408_v18  ;;  %v3497_v17 = vld [vmem:[%s4988_s4 + $0x48] ss:$16 sps:$4 sm:$0xff]   ;;  %v3502_v18 = vld [vmem:[%s4988_s4 + $0x64] ss:$16 sps:$4 sm:$0xff]  }
  0x4f   :  { %883 = vmatpush1.bf16.msra.mxu0 %v3403_v19  ;;  %965 = vmatpush1.bf16.msra.mxu1 %v3406_v20  ;;  %v3505_v19 = vld [vmem:[%s4988_s4 + $0x6c] ss:$16 sps:$4 sm:$0xff]   ;;  %v3500_v20 = vld [vmem:[%s4988_s4 + $0x60] ss:$16 sps:$4 sm:$0xff]  }
  0x50   :  { %884 = vmatprep.subr.bf16.mxu0 %v3411_v21  ;;  %966 = vmatprep.subr.bf16.mxu1 %v3414_v22  ;;  %v3503_v21 = vld [vmem:[%s4988_s4 + $0x68] ss:$16 sps:$4 sm:$0xff]   ;;  %v3508_v22 = vld [vmem:[%s4988_s4 + $0x84] ss:$16 sps:$4 sm:$0xff]  }
  0x53   :  { %885 = vmatpush1.bf16.msra.mxu0 %v3409_v23  ;;  %967 = vmatpush1.bf16.msra.mxu1 %v3412_v24  ;;  %v3511_v23 = vld [vmem:[%s4988_s4 + $0x8c] ss:$16 sps:$4 sm:$0xff]   ;;  %v3506_v24 = vld [vmem:[%s4988_s4 + $0x80] ss:$16 sps:$4 sm:$0xff]  }
  0x54   :  { %886 = vmatprep.subr.bf16.mxu0 %v3417_v25  ;;  %968 = vmatprep.subr.bf16.mxu1 %v3420_v26  ;;  %v3509_v25 = vld [vmem:[%s4988_s4 + $0x88] ss:$16 sps:$4 sm:$0xff]   ;;  %v3514_v26 = vld [vmem:[%s4988_s4 + $0xa4] ss:$16 sps:$4 sm:$0xff]  }
  0x57   :  { %887 = vmatpush1.bf16.msra.mxu0 %v3415_v27  ;;  %969 = vmatpush1.bf16.msra.mxu1 %v3418_v28  ;;  %v3517_v27 = vld [vmem:[%s4988_s4 + $0xac] ss:$16 sps:$4 sm:$0xff]   ;;  %v3512_v28 = vld [vmem:[%s4988_s4 + $0xa0] ss:$16 sps:$4 sm:$0xff]  }
  0x58   :  { %888 = vmatprep.subr.bf16.mxu0 %v3423_v29  ;;  %970 = vmatprep.subr.bf16.mxu1 %v3426_v30  ;;  %v3515_v29 = vld [vmem:[%s4988_s4 + $0xa8] ss:$16 sps:$4 sm:$0xff]   ;;  %v3520_v30 = vld [vmem:[%s4988_s4 + $0xc4] ss:$16 sps:$4 sm:$0xff]  }
  0x5b   :  { %889 = vmatpush1.bf16.msra.mxu0 %v3421_v31  ;;  %971 = vmatpush1.bf16.msra.mxu1 %v3424_v32  ;;  %v3523_v31 = vld [vmem:[%s4988_s4 + $0xcc] ss:$16 sps:$4 sm:$0xff]   ;;  %v3518_v32 = vld [vmem:[%s4988_s4 + $0xc0] ss:$16 sps:$4 sm:$0xff]  }
  0x5c   :  { %890 = vmatprep.subr.bf16.mxu0 %v3429_v33  ;;  %972 = vmatprep.subr.bf16.mxu1 %v3432_v34  ;;  %v3521_v33 = vld [vmem:[%s4988_s4 + $0xc8] ss:$16 sps:$4 sm:$0xff]   ;;  %v3526_v34 = vld [vmem:[%s4988_s4 + $0xe4] ss:$16 sps:$4 sm:$0xff]  }
  0x5f   :  { %891 = vmatpush1.bf16.msra.mxu0 %v3427_v35  ;;  %973 = vmatpush1.bf16.msra.mxu1 %v3430_v36  ;;  %v3529_v35 = vld [vmem:[%s4988_s4 + $0xec] ss:$16 sps:$4 sm:$0xff]   ;;  %v3524_v36 = vld [vmem:[%s4988_s4 + $0xe0] ss:$16 sps:$4 sm:$0xff]  }
  0x60   :  { %892 = vmatprep.subr.bf16.mxu0 %v3435_v37  ;;  %974 = vmatprep.subr.bf16.mxu1 %v3438_v38  ;;  %v3527_v37 = vld [vmem:[%s4988_s4 + $0xe8] ss:$16 sps:$4 sm:$0xff]   ;;  %v3532_v38 = vld [vmem:[%s4988_s4 + $0x104] ss:$16 sps:$4 sm:$0xff]  }
  0x63   :  { %893 = vmatpush1.bf16.msra.mxu0 %v3433_v39  ;;  %975 = vmatpush1.bf16.msra.mxu1 %v3436_v40  ;;  %v3535_v39 = vld [vmem:[%s4988_s4 + $0x10c] ss:$16 sps:$4 sm:$0xff]   ;;  %v3530_v40 = vld [vmem:[%s4988_s4 + $0x100] ss:$16 sps:$4 sm:$0xff]  }
  0x64   :  { %894 = vmatprep.subr.bf16.mxu0 %v3441_v41  ;;  %976 = vmatprep.subr.bf16.mxu1 %v3444_v42  ;;  %v3533_v41 = vld [vmem:[%s4988_s4 + $0x108] ss:$16 sps:$4 sm:$0xff]   ;;  %v3538_v42 = vld [vmem:[%s4988_s4 + $0x124] ss:$16 sps:$4 sm:$0xff]  }
  0x67   :  { %895 = vmatpush1.bf16.msra.mxu0 %v3439_v43  ;;  %977 = vmatpush1.bf16.msra.mxu1 %v3442_v44  ;;  %v3541_v43 = vld [vmem:[%s4988_s4 + $0x12c] ss:$16 sps:$4 sm:$0xff]   ;;  %v3536_v44 = vld [vmem:[%s4988_s4 + $0x120] ss:$16 sps:$4 sm:$0xff]  }
  0x68   :  { %896 = vmatprep.subr.bf16.mxu0 %v3447_v45  ;;  %978 = vmatprep.subr.bf16.mxu1 %v3450_v46  ;;  %v3539_v45 = vld [vmem:[%s4988_s4 + $0x128] ss:$16 sps:$4 sm:$0xff]   ;;  %v3544_v46 = vld [vmem:[%s4988_s4 + $0x144] ss:$16 sps:$4 sm:$0xff]  }
  0x6b   :  { %897 = vmatpush1.bf16.msra.mxu0 %v3445_v47  ;;  %979 = vmatpush1.bf16.msra.mxu1 %v3448_v48  ;;  %v3547_v47 = vld [vmem:[%s4988_s4 + $0x14c] ss:$16 sps:$4 sm:$0xff]   ;;  %v3542_v48 = vld [vmem:[%s4988_s4 + $0x140] ss:$16 sps:$4 sm:$0xff]  }
  0x6c   :  { %898 = vmatprep.subr.bf16.mxu0 %v3453_v49  ;;  %980 = vmatprep.subr.bf16.mxu1 %v3456_v50  ;;  %v3545_v49 = vld [vmem:[%s4988_s4 + $0x148] ss:$16 sps:$4 sm:$0xff]   ;;  %v3550_v50 = vld [vmem:[%s4988_s4 + $0x164] ss:$16 sps:$4 sm:$0xff]  }
  0x6f   :  { %899 = vmatpush1.bf16.msra.mxu0 %v3451_v51  ;;  %981 = vmatpush1.bf16.msra.mxu1 %v3454_v52  ;;  %v3553_v51 = vld [vmem:[%s4988_s4 + $0x16c] ss:$16 sps:$4 sm:$0xff]   ;;  %v3548_v52 = vld [vmem:[%s4988_s4 + $0x160] ss:$16 sps:$4 sm:$0xff]  }
  0x70   :  { %900 = vmatprep.subr.bf16.mxu0 %v3459_v53  ;;  %982 = vmatprep.subr.bf16.mxu1 %v3462_v54  ;;  %v3551_v53 = vld [vmem:[%s4988_s4 + $0x168] ss:$16 sps:$4 sm:$0xff]   ;;  %v3556_v54 = vld [vmem:[%s4988_s4 + $0x184] ss:$16 sps:$4 sm:$0xff]  }
  0x73   :  { %901 = vmatpush1.bf16.msra.mxu0 %v3457_v55  ;;  %983 = vmatpush1.bf16.msra.mxu1 %v3460_v56  ;;  %v3559_v55 = vld [vmem:[%s4988_s4 + $0x18c] ss:$16 sps:$4 sm:$0xff]   ;;  %v3554_v56 = vld [vmem:[%s4988_s4 + $0x180] ss:$16 sps:$4 sm:$0xff]  }
  0x74   :  { %902 = vmatprep.subr.bf16.mxu0 %v3465_v57  ;;  %984 = vmatprep.subr.bf16.mxu1 %v3468_v58  ;;  %v3557_v57 = vld [vmem:[%s4988_s4 + $0x188] ss:$16 sps:$4 sm:$0xff]   ;;  %v3562_v58 = vld [vmem:[%s4988_s4 + $0x1a4] ss:$16 sps:$4 sm:$0xff]  }
  0x77   :  { %903 = vmatpush1.bf16.msra.mxu0 %v3463_v59  ;;  %985 = vmatpush1.bf16.msra.mxu1 %v3466_v60  ;;  %v3565_v59 = vld [vmem:[%s4988_s4 + $0x1ac] ss:$16 sps:$4 sm:$0xff]   ;;  %v3560_v60 = vld [vmem:[%s4988_s4 + $0x1a0] ss:$16 sps:$4 sm:$0xff]  }
  0x78   :  { %904 = vmatprep.subr.bf16.mxu0 %v3471_v61  ;;  %986 = vmatprep.subr.bf16.mxu1 %v3474_v62  ;;  %v3563_v61 = vld [vmem:[%s4988_s4 + $0x1a8] ss:$16 sps:$4 sm:$0xff]   ;;  %v3568_v62 = vld [vmem:[%s4988_s4 + $0x1c4] ss:$16 sps:$4 sm:$0xff]  }
  0x7b   :  { %905 = vmatpush1.bf16.msra.mxu0 %v3469_v63  ;;  %987 = vmatpush1.bf16.msra.mxu1 %v3472_v0  ;;  %v3571_v63 = vld [vmem:[%s4988_s4 + $0x1cc] ss:$16 sps:$4 sm:$0xff]   ;;  %v3566_v0 = vld [vmem:[%s4988_s4 + $0x1c0] ss:$16 sps:$4 sm:$0xff]  }
  0x7c   :  { %906 = vmatprep.subr.bf16.mxu0 %v3477_v1  ;;  %988 = vmatprep.subr.bf16.mxu1 %v3480_v2  ;;  %v3569_v1 = vld [vmem:[%s4988_s4 + $0x1c8] ss:$16 sps:$4 sm:$0xff]   ;;  %v3574_v2 = vld [vmem:[%s4988_s4 + $0x1e4] ss:$16 sps:$4 sm:$0xff]  }
  0x7f   :  { %907 = vmatpush1.bf16.msra.mxu0 %v3475_v3  ;;  %989 = vmatpush1.bf16.msra.mxu1 %v3478_v5  ;;  %v3577_v3 = vld [vmem:[%s4988_s4 + $0x1ec] ss:$16 sps:$4 sm:$0xff]   ;;  %v3572_v5 = vld [vmem:[%s4988_s4 + $0x1e0] ss:$16 sps:$4 sm:$0xff]  }
  0x80   :  { %1831 = vmatprep.subr.bf16.mxu0 %v3484_v6  ;;  %1913 = vmatprep.subr.bf16.mxu1 %v3487_v7  ;;  %v3575_v6 = vld [vmem:[%s4988_s4 + $0x1e8] ss:$16 sps:$4 sm:$0xff]   ;;  %v3580_v7 = vld [vmem:[%s4988_s4 + $0x204] ss:$16 sps:$4 sm:$0xff]  }
  0x82   :  { %909 = vmatmul.mubr.bf16.vlgmr.msra.gmra.mrb[0].mxu0 %v2864_v10  ;;  %991 = vmatmul.mubr.bf16.vlgmr.msra.gmra.mrb[0].mxu1 %v2864_v10 }
  0x83   :  { %1832 = vmatpush1.bf16.msra.mxu0 %v3482_v8  ;;  %1914 = vmatpush1.bf16.msra.mxu1 %v3485_v9  ;;  %v3583_v8 = vld [vmem:[%s4988_s4 + $0x20c] ss:$16 sps:$4 sm:$0xff]   ;;  %v1001_v9 = vlaneseq }
  0x84   :  { %1833 = vmatprep.subr.bf16.mxu0 %v3490_v11  ;;  %1915 = vmatprep.subr.bf16.mxu1 %v3493_v12 }
  0x85   :  { %v1002_v10 = vshrl.u32 %v1001_v9, 7  ;;  %v3619_v9 = vld [vmem:[%s4988_s4 + $0x2cc] ss:$16 sps:$4 sm:$0xff]  }
  0x87   :  { %1834 = vmatpush1.bf16.msra.mxu0 %v3488_v13  ;;  %1916 = vmatpush1.bf16.msra.mxu1 %v3491_v4  ;;  %v4470_v11 = vsub.s32 0, %v1002_v10  ;;  %v4472_v12 = vsub.s32 2, %v1002_v10  ;;  %v999_v13 = vld [vmem:[%s4990_s2] sm:$0xf]  ;;  %v4477_v4 = vsub.s32 1, %v1002_v10 }
  0x88   :  { %1835 = vmatprep.subr.bf16.mxu0 %v3496_v14  ;;  %1917 = vmatprep.subr.bf16.mxu1 %v3499_v15  ;;  %v4479_v14 = vsub.s32 3, %v1002_v10  ;;  %v1025_v15 = vld [vmem:[%s4991_s3] sm:$0xf] }
  0x89   :  { %v3614_v10 = vld [vmem:[%s4988_s4 + $0x2c0] ss:$16 sps:$4 sm:$0xff]  }
  0x8b   :  { %1836 = vmatpush1.bf16.msra.mxu0 %v3494_v16  ;;  %1918 = vmatpush1.bf16.msra.mxu1 %v3497_v17  ;;  %v1004_v16 = vrot.slane %v999_v13, %v4470_v11  ;;  %v1012_v17 = vrot.slane %v999_v13, %v4472_v12 }
  0x8c   :  { %1837 = vmatprep.subr.bf16.mxu0 %v3502_v18  ;;  %1919 = vmatprep.subr.bf16.mxu1 %v3505_v19  ;;  %v1008_v18 = vrot.slane %v999_v13, %v4477_v4  ;;  %v1016_v19 = vrot.slane %v999_v13, %v4479_v14  ;;  %v3617_v13 = vld [vmem:[%s4988_s4 + $0x2c8] ss:$16 sps:$4 sm:$0xff]  }
  0x8f   :  { %1838 = vmatpush1.bf16.msra.mxu0 %v3500_v20  ;;  %1920 = vmatpush1.bf16.msra.mxu1 %v3503_v21  ;;  %v1030_v20 = vrot.slane %v1025_v15, %v4470_v11  ;;  %v1038_v21 = vrot.slane %v1025_v15, %v4472_v12 }
  0x90   :  { %1839 = vmatprep.subr.bf16.mxu0 %v3508_v22  ;;  %1921 = vmatprep.subr.bf16.mxu1 %v3511_v23 }
  0x93   :  { %1840 = vmatpush1.bf16.msra.mxu0 %v3506_v24  ;;  %1922 = vmatpush1.bf16.msra.mxu1 %v3509_v25  ;;  %v1034_v24 = vrot.slane %v1025_v15, %v4477_v4  ;;  %v1042_v25 = vrot.slane %v1025_v15, %v4479_v14  ;;  %v3622_v15 = vld [vmem:[%s4988_s4 + $0x2e4] ss:$16 sps:$4 sm:$0xff]  }
  0x94   :  { %1841 = vmatprep.subr.bf16.mxu0 %v3514_v26  ;;  %1923 = vmatprep.subr.bf16.mxu1 %v3517_v27 }
  0x97   :  { %1842 = vmatpush1.bf16.msra.mxu0 %v3512_v28  ;;  %1924 = vmatpush1.bf16.msra.mxu1 %v3515_v29 }
  0x98   :  { %1843 = vmatprep.subr.bf16.mxu0 %v3520_v30  ;;  %1925 = vmatprep.subr.bf16.mxu1 %v3523_v31 }
  0x9b   :  { %1844 = vmatpush1.bf16.msra.mxu0 %v3518_v32  ;;  %1926 = vmatpush1.bf16.msra.mxu1 %v3521_v33 }
  0x9c   :  { %1845 = vmatprep.subr.bf16.mxu0 %v3526_v34  ;;  %1927 = vmatprep.subr.bf16.mxu1 %v3529_v35 }
  0x9f   :  { %1846 = vmatpush1.bf16.msra.mxu0 %v3524_v36  ;;  %1928 = vmatpush1.bf16.msra.mxu1 %v3527_v37 }
  0xa0   :  { %1847 = vmatprep.subr.bf16.mxu0 %v3532_v38  ;;  %1929 = vmatprep.subr.bf16.mxu1 %v3535_v39 }
  0xa3   :  { %1848 = vmatpush1.bf16.msra.mxu0 %v3530_v40  ;;  %1930 = vmatpush1.bf16.msra.mxu1 %v3533_v41 }
  0xa4   :  { %1849 = vmatprep.subr.bf16.mxu0 %v3538_v42  ;;  %1931 = vmatprep.subr.bf16.mxu1 %v3541_v43 }
  0xa7   :  { %1850 = vmatpush1.bf16.msra.mxu0 %v3536_v44  ;;  %1932 = vmatpush1.bf16.msra.mxu1 %v3539_v45 }
  0xa8   :  { %1851 = vmatprep.subr.bf16.mxu0 %v3544_v46  ;;  %1933 = vmatprep.subr.bf16.mxu1 %v3547_v47  ;;  %v3578_v47 = vld [vmem:[%s4988_s4 + $0x200] ss:$16 sps:$4 sm:$0xff]  }
  0xab   :  { %1852 = vmatpush1.bf16.msra.mxu0 %v3542_v48  ;;  %1934 = vmatpush1.bf16.msra.mxu1 %v3545_v49  ;;  %v3581_v48 = vld [vmem:[%s4988_s4 + $0x208] ss:$16 sps:$4 sm:$0xff]  }
  0xac   :  { %1853 = vmatprep.subr.bf16.mxu0 %v3550_v50  ;;  %1935 = vmatprep.subr.bf16.mxu1 %v3553_v51  ;;  %v3586_v50 = vld [vmem:[%s4988_s4 + $0x224] ss:$16 sps:$4 sm:$0xff]   ;;  %v3589_v51 = vld [vmem:[%s4988_s4 + $0x22c] ss:$16 sps:$4 sm:$0xff]  }
  0xaf   :  { %1854 = vmatpush1.bf16.msra.mxu0 %v3548_v52  ;;  %1936 = vmatpush1.bf16.msra.mxu1 %v3551_v53  ;;  %v3584_v53 = vld [vmem:[%s4988_s4 + $0x220] ss:$16 sps:$4 sm:$0xff]  }
  0xb0   :  { %1855 = vmatprep.subr.bf16.mxu0 %v3556_v54  ;;  %1937 = vmatprep.subr.bf16.mxu1 %v3559_v55  ;;  %v3587_v54 = vld [vmem:[%s4988_s4 + $0x228] ss:$16 sps:$4 sm:$0xff]   ;;  %v3592_v55 = vld [vmem:[%s4988_s4 + $0x244] ss:$16 sps:$4 sm:$0xff]  }
  0xb3   :  { %1856 = vmatpush1.bf16.msra.mxu0 %v3554_v56  ;;  %1938 = vmatpush1.bf16.msra.mxu1 %v3557_v57  ;;  %v3595_v56 = vld [vmem:[%s4988_s4 + $0x24c] ss:$16 sps:$4 sm:$0xff]   ;;  %v3590_v57 = vld [vmem:[%s4988_s4 + $0x240] ss:$16 sps:$4 sm:$0xff]  }
  0xb4   :  { %1857 = vmatprep.subr.bf16.mxu0 %v3562_v58  ;;  %1939 = vmatprep.subr.bf16.mxu1 %v3565_v59  ;;  %v3593_v58 = vld [vmem:[%s4988_s4 + $0x248] ss:$16 sps:$4 sm:$0xff]   ;;  %v3598_v59 = vld [vmem:[%s4988_s4 + $0x264] ss:$16 sps:$4 sm:$0xff]  }
  0xb7   :  { %1858 = vmatpush1.bf16.msra.mxu0 %v3560_v60  ;;  %1940 = vmatpush1.bf16.msra.mxu1 %v3563_v61  ;;  %v3601_v60 = vld [vmem:[%s4988_s4 + $0x26c] ss:$16 sps:$4 sm:$0xff]   ;;  %v3596_v61 = vld [vmem:[%s4988_s4 + $0x260] ss:$16 sps:$4 sm:$0xff]  }
  0xb8   :  { %1859 = vmatprep.subr.bf16.mxu0 %v3568_v62  ;;  %1941 = vmatprep.subr.bf16.mxu1 %v3571_v63  ;;  %v3599_v62 = vld [vmem:[%s4988_s4 + $0x268] ss:$16 sps:$4 sm:$0xff]   ;;  %v3604_v63 = vld [vmem:[%s4988_s4 + $0x284] ss:$16 sps:$4 sm:$0xff]  }
  0xbb   :  { %1860 = vmatpush1.bf16.msra.mxu0 %v3566_v0  ;;  %1942 = vmatpush1.bf16.msra.mxu1 %v3569_v1  ;;  %v3607_v0 = vld [vmem:[%s4988_s4 + $0x28c] ss:$16 sps:$4 sm:$0xff]   ;;  %v3602_v1 = vld [vmem:[%s4988_s4 + $0x280] ss:$16 sps:$4 sm:$0xff]  }
  0xbc   :  { %1861 = vmatprep.subr.bf16.mxu0 %v3574_v2  ;;  %1943 = vmatprep.subr.bf16.mxu1 %v3577_v3  ;;  %v3605_v2 = vld [vmem:[%s4988_s4 + $0x288] ss:$16 sps:$4 sm:$0xff]   ;;  %v3610_v3 = vld [vmem:[%s4988_s4 + $0x2a4] ss:$16 sps:$4 sm:$0xff]  }
  0xbf   :  { %1862 = vmatpush1.bf16.msra.mxu0 %v3572_v5  ;;  %1944 = vmatpush1.bf16.msra.mxu1 %v3575_v6  ;;  %v3613_v5 = vld [vmem:[%s4988_s4 + $0x2ac] ss:$16 sps:$4 sm:$0xff]   ;;  %v3608_v6 = vld [vmem:[%s4988_s4 + $0x2a0] ss:$16 sps:$4 sm:$0xff]  }
  0xc0   :  { %1872 = vmatprep.subr.bf16.mxu0 %v3580_v7  ;;  %1954 = vmatprep.subr.bf16.mxu1 %v3583_v8  ;;  %v3611_v7 = vld [vmem:[%s4988_s4 + $0x2a8] ss:$16 sps:$4 sm:$0xff]   ;;  %v3616_v8 = vld [vmem:[%s4988_s4 + $0x2c4] ss:$16 sps:$4 sm:$0xff]  }
 0x155   :  { %v910_v22 = vpop.f32.mrb[0].mxu0  ;;  %v992_v23 = vpop.f32.mrb[0].mxu1 }
 0x156   :  { %v1021_v26 = vmul.f32 %v1004_v16, %v910_v22  ;;  %v1023_v27 = vmul.f32 %v1012_v17, %v992_v23  ;;  %v912_v28 = vpop.f32.mrb[1].mxu0  ;;  %v994_v29 = vpop.f32.mrb[1].mxu1  ;;  %v3625_v16 = vld [vmem:[%s4988_s4 + $0x2ec] ss:$16 sps:$4 sm:$0xff]   ;;  %v3620_v17 = vld [vmem:[%s4988_s4 + $0x2e0] ss:$16 sps:$4 sm:$0xff]  }
 0x157   :  { %v1022_v30 = vmul.f32 %v1008_v18, %v912_v28  ;;  %v1024_v31 = vmul.f32 %v1016_v19, %v994_v29  ;;  %v914_v32 = vpop.f32.mrb[2].mxu0  ;;  %v996_v33 = vpop.f32.mrb[2].mxu1  ;;  %v3623_v18 = vld [vmem:[%s4988_s4 + $0x2e8] ss:$16 sps:$4 sm:$0xff]   ;;  %v3628_v19 = vld [vmem:[%s4988_s4 + $0x304] ss:$16 sps:$4 sm:$0xff]  }
 0x158   :  { %v1047_v34 = vadd.f32 %v1030_v20, %v1021_v26  ;;  %v4492_v35 = vadd.f32 %v1038_v21, %v1023_v27  ;;  %v915_v36 = vpop.f32.mrb[3].mxu0  ;;  %v997_v37 = vpop.f32.mrb[3].mxu1  ;;  %v3631_v20 = vld [vmem:[%s4988_s4 + $0x30c] ss:$16 sps:$4 sm:$0xff]   ;;  %v3626_v21 = vld [vmem:[%s4988_s4 + $0x300] ss:$16 sps:$4 sm:$0xff]  }
 0x159   :  { %v1048_v38 = vadd.f32 %v1034_v24, %v1022_v30  ;;  %v1050_v39 = vadd.f32 %v1042_v25, %v1024_v31  ;;  %v3629_v22 = vld [vmem:[%s4988_s4 + $0x308] ss:$16 sps:$4 sm:$0xff]   ;;  %v3634_v23 = vld [vmem:[%s4988_s4 + $0x324] ss:$16 sps:$4 sm:$0xff]   ;;  %v3637_v24 = vld [vmem:[%s4988_s4 + $0x32c] ss:$16 sps:$4 sm:$0xff]  }
 0x15a   :  { %v1051_v40 = vmul.f32 0.01, %v1047_v34  ;;  %v3632_v25 = vld [vmem:[%s4988_s4 + $0x320] ss:$16 sps:$4 sm:$0xff]   ;;  %v3635_v26 = vld [vmem:[%s4988_s4 + $0x328] ss:$16 sps:$4 sm:$0xff]  }
 0x15b   :  { %v1052_v41 = vmul.f32 0.01, %v1048_v38  ;;  %v1054_v42 = vmul.f32 0.01, %v1050_v39  ;;  %v3640_v27 = vld [vmem:[%s4988_s4 + $0x344] ss:$16 sps:$4 sm:$0xff]  }
 0x15c   :  { %v1055_v43 = vmax.f32 %v1047_v34, %v1051_v40  ;;  %v3643_v28 = vld [vmem:[%s4988_s4 + $0x34c] ss:$16 sps:$4 sm:$0xff]   ;;  %v3638_v29 = vld [vmem:[%s4988_s4 + $0x340] ss:$16 sps:$4 sm:$0xff]   ;;  %v3641_v30 = vld [vmem:[%s4988_s4 + $0x348] ss:$16 sps:$4 sm:$0xff]  }
 0x15d   :  { %v1056_v44 = vmax.f32 %v1048_v38, %v1052_v41  ;;  %v1058_v45 = vmax.f32 %v1050_v39, %v1054_v42  ;;  %v3646_v31 = vld [vmem:[%s4988_s4 + $0x364] ss:$16 sps:$4 sm:$0xff]   ;;  %v3649_v32 = vld [vmem:[%s4988_s4 + $0x36c] ss:$16 sps:$4 sm:$0xff]   ;;  %v3644_v33 = vld [vmem:[%s4988_s4 + $0x360] ss:$16 sps:$4 sm:$0xff]  }
 0x15e   :  { %v1059_v49 = vpack.c.bf16 %v1055_v43, %v1055_v43  ;;  %v3647_v34 = vld [vmem:[%s4988_s4 + $0x368] ss:$16 sps:$4 sm:$0xff]   ;;  %v3652_v36 = vld [vmem:[%s4988_s4 + $0x384] ss:$16 sps:$4 sm:$0xff]   ;;  %v3655_v37 = vld [vmem:[%s4988_s4 + $0x38c] ss:$16 sps:$4 sm:$0xff]  }
 0x15f   :  { %v1060_v46 = vpack.c.bf16 %v1056_v44, %v1056_v44  ;;  %v1062_v52 = vpack.c.bf16 %v1058_v45, %v1058_v45  ;;  %v3650_v38 = vld [vmem:[%s4988_s4 + $0x380] ss:$16 sps:$4 sm:$0xff]   ;;  %v3653_v39 = vld [vmem:[%s4988_s4 + $0x388] ss:$16 sps:$4 sm:$0xff]   ;;  %v3658_v40 = vld [vmem:[%s4988_s4 + $0x3a4] ss:$16 sps:$4 sm:$0xff]  }
 0x160   :  { %v3661_v41 = vld [vmem:[%s4988_s4 + $0x3ac] ss:$16 sps:$4 sm:$0xff]   ;;  %v3656_v42 = vld [vmem:[%s4988_s4 + $0x3a0] ss:$16 sps:$4 sm:$0xff]   ;;  %v3659_v43 = vld [vmem:[%s4988_s4 + $0x3a8] ss:$16 sps:$4 sm:$0xff]  }
 0x161   :  { %1863 = vmatprep.mubr.bf16.mxu0 %v1060_v46  ;;  %1945 = vmatprep.mubr.bf16.mxu1 %v1060_v46  ;;  %v3664_v44 = vld [vmem:[%s4988_s4 + $0x3c4] ss:$16 sps:$4 sm:$0xff]   ;;  %v3667_v45 = vld [vmem:[%s4988_s4 + $0x3cc] ss:$16 sps:$4 sm:$0xff]   ;;  %v3662_v46 = vld [vmem:[%s4988_s4 + $0x3c0] ss:$16 sps:$4 sm:$0xff]  }
 0x162   :  { %1864 = vmatmul.mubr.bf16.vlgmr.msra.gmra.mrb[4].mxu0 %v1059_v49  ;;  %1946 = vmatmul.mubr.bf16.vlgmr.msra.gmra.mrb[4].mxu1 %v1059_v49  ;;  %v3670_v49 = vld [vmem:[%s4988_s4 + $0x3e4] ss:$16 sps:$4 sm:$0xff]  }
 0x163   :  { %1873 = vmatpush1.bf16.msra.mxu0 %v3578_v47  ;;  %1955 = vmatpush1.bf16.msra.mxu1 %v3581_v48  ;;  %v3665_v47 = vld [vmem:[%s4988_s4 + $0x3c8] ss:$16 sps:$4 sm:$0xff]   ;;  %v1053_v48 = vmul.f32 0.01, %v4492_v35 }
 0x164   :  { %1904 = vmatprep.mubr.bf16.mxu0 %v1062_v52  ;;  %1986 = vmatprep.mubr.bf16.mxu1 %v1062_v52  ;;  %v3671_v52 = vld [vmem:[%s4988_s4 + $0x3e8] ss:$16 sps:$4 sm:$0xff]  }
 0x165   :  { %1874 = vmatprep.subr.bf16.mxu0 %v3586_v50  ;;  %1956 = vmatprep.subr.bf16.mxu1 %v3589_v51  ;;  %v3673_v50 = vld [vmem:[%s4988_s4 + $0x3ec] ss:$16 sps:$4 sm:$0xff]   ;;  %v3668_v51 = vld [vmem:[%s4988_s4 + $0x3e0] ss:$16 sps:$4 sm:$0xff]  }
 0x167   :  { %1875 = vmatpush1.bf16.msra.mxu0 %v3584_v53  ;;  %1957 = vmatpush1.bf16.msra.mxu1 %v3587_v54  ;;  %v1057_v53 = vmax.f32 %v4492_v35, %v1053_v48  ;;  %v3676_v54 = vld [vmem:[%s4989_s7 + $0x4] ss:$8 sps:$4 sm:$0xff]   ;;  %v3677_v35 = vld [vmem:[%s4989_s7 + $0x10] ss:$8 sps:$4 sm:$0xff]  }
 0x168   :  { %1876 = vmatprep.subr.bf16.mxu0 %v3592_v55  ;;  %1958 = vmatprep.subr.bf16.mxu1 %v3595_v56  ;;  %v3674_v55 = vld [vmem:[%s4989_s7] ss:$8 sps:$4 sm:$0xff]  }
 0x169   :  { %v1061_v56 = vpack.c.bf16 %v1057_v53, %v1057_v53 }
 0x16b   :  { %1877 = vmatpush1.bf16.msra.mxu0 %v3590_v57  ;;  %1959 = vmatpush1.bf16.msra.mxu1 %v3593_v58  ;;  %v3679_v57 = vld [vmem:[%s4989_s7 + $0x14] ss:$8 sps:$4 sm:$0xff]   ;;  %v3682_v58 = vld [vmem:[%s4989_s7 + $0x24] ss:$8 sps:$4 sm:$0xff]  }
 0x16c   :  { %1878 = vmatprep.subr.bf16.mxu0 %v3598_v59  ;;  %1960 = vmatprep.subr.bf16.mxu1 %v3601_v60  ;;  %v3680_v59 = vld [vmem:[%s4989_s7 + $0x20] ss:$8 sps:$4 sm:$0xff]   ;;  %v3685_v60 = vld [vmem:[%s4989_s7 + $0x34] ss:$8 sps:$4 sm:$0xff]  }
 0x16f   :  { %1879 = vmatpush1.bf16.msra.mxu0 %v3596_v61  ;;  %1961 = vmatpush1.bf16.msra.mxu1 %v3599_v62  ;;  %v3683_v61 = vld [vmem:[%s4989_s7 + $0x30] ss:$8 sps:$4 sm:$0xff]   ;;  %v3688_v62 = vld [vmem:[%s4989_s7 + $0x44] ss:$8 sps:$4 sm:$0xff]  }
 0x170   :  { %1880 = vmatprep.subr.bf16.mxu0 %v3604_v63  ;;  %1962 = vmatprep.subr.bf16.mxu1 %v3607_v0  ;;  %v3686_v63 = vld [vmem:[%s4989_s7 + $0x40] ss:$8 sps:$4 sm:$0xff]   ;;  %v3691_v0 = vld [vmem:[%s4989_s7 + $0x54] ss:$8 sps:$4 sm:$0xff]  }
 0x173   :  { %1881 = vmatpush1.bf16.msra.mxu0 %v3602_v1  ;;  %1963 = vmatpush1.bf16.msra.mxu1 %v3605_v2  ;;  %v3689_v1 = vld [vmem:[%s4989_s7 + $0x50] ss:$8 sps:$4 sm:$0xff]   ;;  %v3694_v2 = vld [vmem:[%s4989_s7 + $0x64] ss:$8 sps:$4 sm:$0xff]  }
 0x174   :  { %1882 = vmatprep.subr.bf16.mxu0 %v3610_v3  ;;  %1964 = vmatprep.subr.bf16.mxu1 %v3613_v5  ;;  %v3692_v3 = vld [vmem:[%s4989_s7 + $0x60] ss:$8 sps:$4 sm:$0xff]   ;;  %v3697_v5 = vld [vmem:[%s4989_s7 + $0x74] ss:$8 sps:$4 sm:$0xff]  }
 0x177   :  { %1883 = vmatpush1.bf16.msra.mxu0 %v3608_v6  ;;  %1965 = vmatpush1.bf16.msra.mxu1 %v3611_v7  ;;  %v3695_v6 = vld [vmem:[%s4989_s7 + $0x70] ss:$8 sps:$4 sm:$0xff]   ;;  %v3700_v7 = vld [vmem:[%s4989_s7 + $0x84] ss:$8 sps:$4 sm:$0xff]  }
 0x178   :  { %1884 = vmatprep.subr.bf16.mxu0 %v3616_v8  ;;  %1966 = vmatprep.subr.bf16.mxu1 %v3619_v9  ;;  %v3698_v8 = vld [vmem:[%s4989_s7 + $0x80] ss:$8 sps:$4 sm:$0xff]   ;;  %v3703_v9 = vld [vmem:[%s4989_s7 + $0x94] ss:$8 sps:$4 sm:$0xff]  }
 0x17b   :  { %1885 = vmatpush1.bf16.msra.mxu0 %v3614_v10  ;;  %1967 = vmatpush1.bf16.msra.mxu1 %v3617_v13  ;;  %v3701_v10 = vld [vmem:[%s4989_s7 + $0x90] ss:$8 sps:$4 sm:$0xff]   ;;  %v3706_v13 = vld [vmem:[%s4989_s7 + $0xa4] ss:$8 sps:$4 sm:$0xff]  }
 0x17c   :  { %1886 = vmatprep.subr.bf16.mxu0 %v3622_v15  ;;  %1968 = vmatprep.subr.bf16.mxu1 %v3625_v16  ;;  %v3704_v15 = vld [vmem:[%s4989_s7 + $0xa0] ss:$8 sps:$4 sm:$0xff]   ;;  %v3709_v16 = vld [vmem:[%s4989_s7 + $0xb4] ss:$8 sps:$4 sm:$0xff]  }
 0x17f   :  { %1887 = vmatpush1.bf16.msra.mxu0 %v3620_v17  ;;  %1969 = vmatpush1.bf16.msra.mxu1 %v3623_v18  ;;  %v3707_v17 = vld [vmem:[%s4989_s7 + $0xb0] ss:$8 sps:$4 sm:$0xff]   ;;  %v3712_v18 = vld [vmem:[%s4989_s7 + $0xc4] ss:$8 sps:$4 sm:$0xff]  }
 0x180   :  { %1888 = vmatprep.subr.bf16.mxu0 %v3628_v19  ;;  %1970 = vmatprep.subr.bf16.mxu1 %v3631_v20  ;;  %v3710_v19 = vld [vmem:[%s4989_s7 + $0xc0] ss:$8 sps:$4 sm:$0xff]   ;;  %v3715_v20 = vld [vmem:[%s4989_s7 + $0xd4] ss:$8 sps:$4 sm:$0xff]  }
 0x183   :  { %1889 = vmatpush1.bf16.msra.mxu0 %v3626_v21  ;;  %1971 = vmatpush1.bf16.msra.mxu1 %v3629_v22  ;;  %v3713_v21 = vld [vmem:[%s4989_s7 + $0xd0] ss:$8 sps:$4 sm:$0xff]   ;;  %v3718_v22 = vld [vmem:[%s4989_s7 + $0xe4] ss:$8 sps:$4 sm:$0xff]  }
 0x184   :  { %1890 = vmatprep.subr.bf16.mxu0 %v3634_v23  ;;  %1972 = vmatprep.subr.bf16.mxu1 %v3637_v24  ;;  %v3716_v23 = vld [vmem:[%s4989_s7 + $0xe0] ss:$8 sps:$4 sm:$0xff]   ;;  %v3721_v24 = vld [vmem:[%s4989_s7 + $0xf4] ss:$8 sps:$4 sm:$0xff]  }
 0x187   :  { %1891 = vmatpush1.bf16.msra.mxu0 %v3632_v25  ;;  %1973 = vmatpush1.bf16.msra.mxu1 %v3635_v26  ;;  %v3719_v25 = vld [vmem:[%s4989_s7 + $0xf0] ss:$8 sps:$4 sm:$0xff]   ;;  %v3724_v26 = vld [vmem:[%s4989_s7 + $0x104] ss:$8 sps:$4 sm:$0xff]  }
 0x188   :  { %1892 = vmatprep.subr.bf16.mxu0 %v3640_v27  ;;  %1974 = vmatprep.subr.bf16.mxu1 %v3643_v28  ;;  %v3770_v27 = vld [vmem:[%s4992_s10 + $0x40] sm:$0xff]  }
 0x189   :  { %v3771_v28 = vld [vmem:[%s4992_s10] sm:$0xff]  }
 0x18b   :  { %1893 = vmatpush1.bf16.msra.mxu0 %v3638_v29  ;;  %1975 = vmatpush1.bf16.msra.mxu1 %v3641_v30  ;;  %v3772_v29 = vld [vmem:[%s4992_s10 + $0x48] sm:$0xff]  }
 0x18c   :  { %1894 = vmatprep.subr.bf16.mxu0 %v3646_v31  ;;  %1976 = vmatprep.subr.bf16.mxu1 %v3649_v32  ;;  %v3773_v30 = vld [vmem:[%s4992_s10 + $0x8] sm:$0xff]   ;;  %v3774_v31 = vld [vmem:[%s4992_s10 + $0x50] sm:$0xff]  }
 0x18d   :  { %v3775_v32 = vld [vmem:[%s4992_s10 + $0x10] sm:$0xff]  }
 0x18f   :  { %1895 = vmatpush1.bf16.msra.mxu0 %v3644_v33  ;;  %1977 = vmatpush1.bf16.msra.mxu1 %v3647_v34  ;;  %v3776_v33 = vld [vmem:[%s4992_s10 + $0x58] sm:$0xff]  }
 0x190   :  { %1896 = vmatprep.subr.bf16.mxu0 %v3652_v36  ;;  %1978 = vmatprep.subr.bf16.mxu1 %v3655_v37  ;;  %v3777_v34 = vld [vmem:[%s4992_s10 + $0x18] sm:$0xff]   ;;  %v3778_v36 = vld [vmem:[%s4992_s10 + $0x60] sm:$0xff]  }
 0x191   :  { %v3779_v37 = vld [vmem:[%s4992_s10 + $0x20] sm:$0xff]  }
 0x193   :  { %1897 = vmatpush1.bf16.msra.mxu0 %v3650_v38  ;;  %1979 = vmatpush1.bf16.msra.mxu1 %v3653_v39  ;;  %v1995_v38 = vld [vmem:[%s4993_s5] sm:$0xf] }
 0x194   :  { %1898 = vmatprep.subr.bf16.mxu0 %v3658_v40  ;;  %1980 = vmatprep.subr.bf16.mxu1 %v3661_v41  ;;  %v2021_v39 = vld [vmem:[%s4994_s6] sm:$0xf]  ;;  %v2000_v40 = vrot.slane %v1995_v38, %v4470_v11  ;;  %v2008_v41 = vrot.slane %v1995_v38, %v4472_v12 }
 0x195   :  { %v2030_v48 = vrot.slane %v2021_v39, %v4477_v4 }
 0x197   :  { %1899 = vmatpush1.bf16.msra.mxu0 %v3656_v42  ;;  %1981 = vmatpush1.bf16.msra.mxu1 %v3659_v43  ;;  %v2004_v42 = vrot.slane %v1995_v38, %v4477_v4  ;;  %v2012_v43 = vrot.slane %v1995_v38, %v4479_v14  ;;  %v3766_v38 = vld [vmem:[%s4989_s7 + $0x1e4] ss:$8 sps:$4 sm:$0xff]  }
 0x198   :  { %1900 = vmatprep.subr.bf16.mxu0 %v3664_v44  ;;  %1982 = vmatprep.subr.bf16.mxu1 %v3667_v45  ;;  %v2026_v44 = vrot.slane %v2021_v39, %v4470_v11  ;;  %v2034_v45 = vrot.slane %v2021_v39, %v4472_v12 }
 0x19b   :  { %1901 = vmatpush1.bf16.msra.mxu0 %v3662_v46  ;;  %1983 = vmatpush1.bf16.msra.mxu1 %v3665_v47 }
 0x19c   :  { %1902 = vmatprep.subr.bf16.mxu0 %v3670_v49  ;;  %1984 = vmatprep.subr.bf16.mxu1 %v3673_v50  ;;  %v2038_v49 = vrot.slane %v2021_v39, %v4479_v14  ;;  %v3764_v39 = vld [vmem:[%s4989_s7 + $0x1e0] ss:$8 sps:$4 sm:$0xff]  }
 0x19f   :  { %1903 = vmatpush1.bf16.msra.mxu0 %v3668_v51  ;;  %1985 = vmatpush1.bf16.msra.mxu1 %v3671_v52 }
 0x1a0   :  { %2443 = vmatprep.subr.bf16.mxu0 %v3676_v54  ;;  %3213 = vmatprep.subr.bf16.mxu1 %v3770_v27  ;;  %v3751_v27 = vld [vmem:[%s4989_s7 + $0x194] ss:$8 sps:$4 sm:$0xff]  }
 0x1a2   :  { %1905 = vmatmul.mubr.bf16.vlgmr.msra.gmra.mrb[4].mxu0 %v1061_v56  ;;  %1987 = vmatmul.mubr.bf16.vlgmr.msra.gmra.mrb[4].mxu1 %v1061_v56 }
 0x1a3   :  { %2444 = vmatpush1.bf16.msra.mxu0 %v3674_v55  ;;  %3214 = vmatpush3.bf16.msra.mxu1 %v3771_v28  ;;  %v3749_v28 = vld [vmem:[%s4989_s7 + $0x190] ss:$8 sps:$4 sm:$0xff]  }
 0x1a4   :  { %2445 = vmatprep.subr.bf16.mxu0 %v3679_v57  ;;  %3215 = vmatprep.subr.bf16.mxu1 %v3772_v29  ;;  %v3754_v29 = vld [vmem:[%s4989_s7 + $0x1a4] ss:$8 sps:$4 sm:$0xff]  }
 0x1a7   :  { %2446 = vmatpush1.bf16.msra.mxu0 %v3677_v35  ;;  %3216 = vmatpush3.bf16.msra.mxu1 %v3773_v30  ;;  %v3752_v30 = vld [vmem:[%s4989_s7 + $0x1a0] ss:$8 sps:$4 sm:$0xff]  }
 0x1a8   :  { %2447 = vmatprep.subr.bf16.mxu0 %v3682_v58  ;;  %3217 = vmatprep.subr.bf16.mxu1 %v3774_v31  ;;  %v3757_v31 = vld [vmem:[%s4989_s7 + $0x1b4] ss:$8 sps:$4 sm:$0xff]  }
 0x1ab   :  { %2448 = vmatpush1.bf16.msra.mxu0 %v3680_v59  ;;  %3218 = vmatpush3.bf16.msra.mxu1 %v3775_v32  ;;  %v3755_v32 = vld [vmem:[%s4989_s7 + $0x1b0] ss:$8 sps:$4 sm:$0xff]  }
 0x1ac   :  { %2449 = vmatprep.subr.bf16.mxu0 %v3685_v60  ;;  %3219 = vmatprep.subr.bf16.mxu1 %v3776_v33  ;;  %v3760_v33 = vld [vmem:[%s4989_s7 + $0x1c4] ss:$8 sps:$4 sm:$0xff]  }
 0x1af   :  { %2450 = vmatpush1.bf16.msra.mxu0 %v3683_v61  ;;  %3220 = vmatpush3.bf16.msra.mxu1 %v3777_v34  ;;  %v3758_v34 = vld [vmem:[%s4989_s7 + $0x1c0] ss:$8 sps:$4 sm:$0xff]  }
 0x1b0   :  { %2451 = vmatprep.subr.bf16.mxu0 %v3688_v62  ;;  %3221 = vmatprep.subr.bf16.mxu1 %v3778_v36  ;;  %v3763_v36 = vld [vmem:[%s4989_s7 + $0x1d4] ss:$8 sps:$4 sm:$0xff]  }
 0x1b3   :  { %2452 = vmatpush1.bf16.msra.mxu0 %v3686_v63  ;;  %3222 = vmatpush3.bf16.msra.mxu1 %v3779_v37  ;;  %v3761_v37 = vld [vmem:[%s4989_s7 + $0x1d0] ss:$8 sps:$4 sm:$0xff]  }
 0x1b4   :  { %2453 = vmatprep.subr.bf16.mxu0 %v3691_v0 }
 0x1b7   :  { %2454 = vmatpush1.bf16.msra.mxu0 %v3689_v1 }
 0x1b8   :  { %2455 = vmatprep.subr.bf16.mxu0 %v3694_v2 }
 0x1bb   :  { %2456 = vmatpush1.bf16.msra.mxu0 %v3692_v3 }
 0x1bc   :  { %2457 = vmatprep.subr.bf16.mxu0 %v3697_v5  ;;  %v3722_v5 = vld [vmem:[%s4989_s7 + $0x100] ss:$8 sps:$4 sm:$0xff]  }
 0x1bf   :  { %2458 = vmatpush1.bf16.msra.mxu0 %v3695_v6 }
 0x1c0   :  { %2459 = vmatprep.subr.bf16.mxu0 %v3700_v7  ;;  %v3727_v7 = vld [vmem:[%s4989_s7 + $0x114] ss:$8 sps:$4 sm:$0xff]  }
 0x1c3   :  { %2460 = vmatpush1.bf16.msra.mxu0 %v3698_v8 }
 0x1c4   :  { %2461 = vmatprep.subr.bf16.mxu0 %v3703_v9  ;;  %v3725_v9 = vld [vmem:[%s4989_s7 + $0x110] ss:$8 sps:$4 sm:$0xff]  }
 0x1c7   :  { %2462 = vmatpush1.bf16.msra.mxu0 %v3701_v10  ;;  %v3730_v10 = vld [vmem:[%s4989_s7 + $0x124] ss:$8 sps:$4 sm:$0xff]  }
 0x1c8   :  { %2463 = vmatprep.subr.bf16.mxu0 %v3706_v13  ;;  %v3728_v13 = vld [vmem:[%s4989_s7 + $0x120] ss:$8 sps:$4 sm:$0xff]  }
 0x1cb   :  { %2464 = vmatpush1.bf16.msra.mxu0 %v3704_v15  ;;  %v3733_v15 = vld [vmem:[%s4989_s7 + $0x134] ss:$8 sps:$4 sm:$0xff]  }
 0x1cc   :  { %2465 = vmatprep.subr.bf16.mxu0 %v3709_v16  ;;  %v3731_v16 = vld [vmem:[%s4989_s7 + $0x130] ss:$8 sps:$4 sm:$0xff]  }
 0x1cf   :  { %2466 = vmatpush1.bf16.msra.mxu0 %v3707_v17  ;;  %v3736_v17 = vld [vmem:[%s4989_s7 + $0x144] ss:$8 sps:$4 sm:$0xff]  }
 0x1d0   :  { %2467 = vmatprep.subr.bf16.mxu0 %v3712_v18  ;;  %v3734_v18 = vld [vmem:[%s4989_s7 + $0x140] ss:$8 sps:$4 sm:$0xff]  }
 0x1d3   :  { %2468 = vmatpush1.bf16.msra.mxu0 %v3710_v19  ;;  %v3739_v19 = vld [vmem:[%s4989_s7 + $0x154] ss:$8 sps:$4 sm:$0xff]  }
 0x1d4   :  { %2469 = vmatprep.subr.bf16.mxu0 %v3715_v20  ;;  %v3737_v20 = vld [vmem:[%s4989_s7 + $0x150] ss:$8 sps:$4 sm:$0xff]  }
 0x1d7   :  { %2470 = vmatpush1.bf16.msra.mxu0 %v3713_v21  ;;  %v3742_v21 = vld [vmem:[%s4989_s7 + $0x164] ss:$8 sps:$4 sm:$0xff]  }
 0x1d8   :  { %2471 = vmatprep.subr.bf16.mxu0 %v3718_v22  ;;  %v3740_v22 = vld [vmem:[%s4989_s7 + $0x160] ss:$8 sps:$4 sm:$0xff]  }
 0x1db   :  { %2472 = vmatpush1.bf16.msra.mxu0 %v3716_v23  ;;  %v3745_v23 = vld [vmem:[%s4989_s7 + $0x174] ss:$8 sps:$4 sm:$0xff]  }
 0x1dc   :  { %2473 = vmatprep.subr.bf16.mxu0 %v3721_v24  ;;  %v3743_v24 = vld [vmem:[%s4989_s7 + $0x170] ss:$8 sps:$4 sm:$0xff]  }
 0x1df   :  { %2474 = vmatpush1.bf16.msra.mxu0 %v3719_v25  ;;  %v3748_v25 = vld [vmem:[%s4989_s7 + $0x184] ss:$8 sps:$4 sm:$0xff]  }
 0x1e0   :  { %2484 = vmatprep.subr.bf16.mxu0 %v3724_v26  ;;  %v3746_v26 = vld [vmem:[%s4989_s7 + $0x180] ss:$8 sps:$4 sm:$0xff]  }
 0x275   :  { %v1906_v46 = vpop.f32.mrb[4].mxu0  ;;  %v1988_v47 = vpop.f32.mrb[4].mxu1 }
 0x276   :  { %v2017_v50 = vmul.f32 %v2000_v40, %v1906_v46  ;;  %v2019_v51 = vmul.f32 %v2008_v41, %v1988_v47  ;;  %v1908_v52 = vpop.f32.mrb[5].mxu0  ;;  %v1990_v53 = vpop.f32.mrb[5].mxu1  ;;  %v3769_v41 = vld [vmem:[%s4989_s7 + $0x1f4] ss:$8 sps:$4 sm:$0xff]   ;;  %v3781_v46 = vld [vmem:[%s4992_s10 + $0x28] sm:$0xff]  }
 0x277   :  { %v2018_v54 = vmul.f32 %v2004_v42, %v1908_v52  ;;  %v2020_v55 = vmul.f32 %v2012_v43, %v1990_v53  ;;  %v1910_v56 = vpop.f32.mrb[6].mxu0  ;;  %v1992_v57 = vpop.f32.mrb[6].mxu1  ;;  %v3767_v42 = vld [vmem:[%s4989_s7 + $0x1f0] ss:$8 sps:$4 sm:$0xff]   ;;  %v2525_v52 = vld [vmem:[%s4996_s8] sm:$0x3] }
 0x278   :  { %v2043_v35 = vadd.f32 %v2026_v44, %v2017_v50  ;;  %v4825_v58 = vadd.f32 %v2034_v45, %v2019_v51  ;;  %v1911_v59 = vpop.f32.mrb[7].mxu0  ;;  %v1993_v60 = vpop.f32.mrb[7].mxu1  ;;  %v3780_v45 = vld [vmem:[%s4992_s10 + $0x68] sm:$0xff]   ;;  %v3782_v47 = vld [vmem:[%s4992_s10 + $0x70] sm:$0xff]   ;;  %v3785_v50 = vld [vmem:[%s4992_s10 + $0x38] sm:$0xff]   ;;  %v3794_v51 = vmov 0.0  }
 0x279   :  { %v2044_v12 = vadd.f32 %v2030_v48, %v2018_v54  ;;  %v2046_v61 = vadd.f32 %v2038_v49, %v2020_v55  ;;  %3223 = vmatprep.subr.bf16.mxu1 %v3780_v45  ;;  %v3783_v48 = vld [vmem:[%s4992_s10 + $0x30] sm:$0xff]   ;;  %v3784_v49 = vld [vmem:[%s4992_s10 + $0x78] sm:$0xff]   ;;  %v2539_v53 = vld [vmem:[%s4997_s9] sm:$0x3]  ;;  %v2530_v54 = vrot.slane %v2525_v52, %v4470_v11  ;;  %v2534_v55 = vrot.slane %v2525_v52, %v4477_v4 }
 0x27a   :  { %v2047_v62 = vmul.f32 0.01, %v2043_v35  ;;  %v2049_v40 = vmul.f32 0.01, %v4825_v58  ;;  %3224 = vmatpush3.bf16.msra.mxu1 %v3781_v46  ;;  %v2544_v56 = vrot.slane %v2539_v53, %v4470_v11 }
 0x27b   :  { %v2048_v63 = vmul.f32 0.01, %v2044_v12  ;;  %v2050_v0 = vmul.f32 0.01, %v2046_v61  ;;  %3225 = vmatprep.subr.bf16.mxu1 %v3782_v47 }
 0x27c   :  { %v2051_v1 = vmax.f32 %v2043_v35, %v2047_v62  ;;  %v2053_v43 = vmax.f32 %v4825_v58, %v2049_v40  ;;  %v2548_v35 = vrot.slane %v2539_v53, %v4477_v4  ;;  %v3787_v4 = vld [vmem:[%s4995_s13 + $0x8] sm:$0xff]  }
 0x27d   :  { %v2052_v14 = vmax.f32 %v2044_v12, %v2048_v63  ;;  %v2054_v2 = vmax.f32 %v2046_v61, %v2050_v0 }
 0x27e   :  { %v2055_v6 = vpack.c.bf16 %v2051_v1, %v2051_v1  ;;  %v2057_v44 = vpack.c.bf16 %v2053_v43, %v2053_v43  ;;  %3226 = vmatpush3.bf16.msra.mxu1 %v3783_v48 }
 0x27f   :  { %v2056_v3 = vpack.c.bf16 %v2052_v14, %v2052_v14  ;;  %v2058_v8 = vpack.c.bf16 %v2054_v2, %v2054_v2  ;;  %3227 = vmatprep.subr.bf16.mxu1 %v3784_v49 }
 0x281   :  { %2475 = vmatprep.mubr.bf16.mxu0 %v2056_v3 }
 0x282   :  { %2476 = vmatmul.mubr.bf16.vlgmr.msra.gmra.mrb[8].mxu0 %v2055_v6  ;;  %3228 = vmatpush3.bf16.msra.mxu1 %v3785_v50  ;;  %v3788_v6 = vld [vmem:[%s4995_s13 + $0x10] sm:$0xff]  }
 0x283   :  { %2485 = vmatpush1.bf16.msra.mxu0 %v3722_v5  ;;  %2516 = vmatprep.mubr.bf16.mxu0 %v2058_v8  ;;  %v3786_v5 = vld [vmem:[%s4995_s13] sm:$0xff]  }
 0x284   :  { %2486 = vmatprep.subr.bf16.mxu0 %v3727_v7  ;;  %3244 = vmatprep.subr.bf16.mxu1 %v3794_v51  ;;  %v3789_v7 = vld [vmem:[%s4995_s13 + $0x18] sm:$0xff]   ;;  %v3790_v8 = vld [vmem:[%s4995_s13 + $0x20] sm:$0xff]  }
 0x287   :  { %2487 = vmatpush1.bf16.msra.mxu0 %v3725_v9  ;;  %v3791_v9 = vld [vmem:[%s4995_s13 + $0x28] sm:$0xff]  }
 0x288   :  { %2488 = vmatprep.subr.bf16.mxu0 %v3730_v10  ;;  %v3792_v10 = vld [vmem:[%s4995_s13 + $0x30] sm:$0xff]  }
 0x28b   :  { %2489 = vmatpush1.bf16.msra.mxu0 %v3728_v13  ;;  %v3793_v13 = vld [vmem:[%s4995_s13 + $0x38] sm:$0xff]  }
 0x28c   :  { %2490 = vmatprep.subr.bf16.mxu0 %v3733_v15 }
 0x28f   :  { %2491 = vmatpush1.bf16.msra.mxu0 %v3731_v16 }
 0x290   :  { %2492 = vmatprep.subr.bf16.mxu0 %v3736_v17  ;;  %v3202_v17 = vld [vmem:[%s4998_s11] ss:$0 sm:$0xff] }
 0x293   :  { %2493 = vmatpush1.bf16.msra.mxu0 %v3734_v18 }
 0x294   :  { %2494 = vmatprep.subr.bf16.mxu0 %v3739_v19 }
 0x297   :  { %2495 = vmatpush1.bf16.msra.mxu0 %v3737_v20  ;;  %v3203_v20 = vld [vmem:[%s4999_s12] ss:$0 sm:$0xff] }
 0x298   :  { %2496 = vmatprep.subr.bf16.mxu0 %v3742_v21 }
 0x29b   :  { %2497 = vmatpush1.bf16.msra.mxu0 %v3740_v22 }
 0x29c   :  { %2498 = vmatprep.subr.bf16.mxu0 %v3745_v23 }
 0x29f   :  { %2499 = vmatpush1.bf16.msra.mxu0 %v3743_v24 }
 0x2a0   :  { %2500 = vmatprep.subr.bf16.mxu0 %v3748_v25 }
 0x2a3   :  { %2501 = vmatpush1.bf16.msra.mxu0 %v3746_v26 }
 0x2a4   :  { %2502 = vmatprep.subr.bf16.mxu0 %v3751_v27  ;;  %v3204_v27 = vld [vmem:[%s5000_s14] ss:$0 sm:$0xff] }
 0x2a7   :  { %2503 = vmatpush1.bf16.msra.mxu0 %v3749_v28 }
 0x2a8   :  { %2504 = vmatprep.subr.bf16.mxu0 %v3754_v29 }
 0x2ab   :  { %2505 = vmatpush1.bf16.msra.mxu0 %v3752_v30 }
 0x2ac   :  { %2506 = vmatprep.subr.bf16.mxu0 %v3757_v31 }
 0x2af   :  { %2507 = vmatpush1.bf16.msra.mxu0 %v3755_v32 }
 0x2b0   :  { %2508 = vmatprep.subr.bf16.mxu0 %v3760_v33 }
 0x2b3   :  { %2509 = vmatpush1.bf16.msra.mxu0 %v3758_v34 }
 0x2b4   :  { %2510 = vmatprep.subr.bf16.mxu0 %v3763_v36 }
 0x2b7   :  { %2511 = vmatpush1.bf16.msra.mxu0 %v3761_v37 }
 0x2b8   :  { %2512 = vmatprep.subr.bf16.mxu0 %v3766_v38 }
 0x2bb   :  { %2513 = vmatpush1.bf16.msra.mxu0 %v3764_v39 }
 0x2bc   :  { %2514 = vmatprep.subr.bf16.mxu0 %v3769_v41 }
 0x2bf   :  { %2515 = vmatpush1.bf16.msra.mxu0 %v3767_v42 }
 0x2c2   :  { %2517 = vmatmul.mubr.bf16.vlgmr.msra.gmra.mrb[8].mxu0 %v2057_v44 }
 0x395   :  { %v2518_v57 = vpop.f32.mrb[8].mxu0 }
 0x396   :  { %v2537_v58 = vmul.f32 %v2530_v54, %v2518_v57  ;;  %v2520_v59 = vpop.f32.mrb[9].mxu0 }
 0x397   :  { %v2538_v60 = vmul.f32 %v2534_v55, %v2520_v59  ;;  %v2522_v12 = vpop.f32.mrb[10].mxu0 }
 0x398   :  { %v2551_v61 = vadd.f32 %v2544_v56, %v2537_v58  ;;  %v2523_v62 = vpop.f32.mrb[11].mxu0 }
 0x399   :  { %v2552_v63 = vadd.f32 %v2548_v35, %v2538_v60 }
 0x39a   :  { %v2553_v0 = vmul.f32 0.01, %v2551_v61 }
 0x39b   :  { %v2554_v1 = vmul.f32 0.01, %v2552_v63 }
 0x39c   :  { %v2555_v14 = vmax.f32 %v2551_v61, %v2553_v0 }
 0x39d   :  { %v2556_v2 = vmax.f32 %v2552_v63, %v2554_v1 }
 0x39e   :  { %v2557_v11 = vpack.c.bf16 %v2555_v14, %v2555_v14 }
 0x39f   :  { %v2558_v3 = vpack.c.bf16 %v2556_v2, %v2556_v2 }
 0x3a1   :  { %2719 = vmatprep.mubr.bf16.mxu1 %v2558_v3 }
 0x3a2   :  { %2720 = vmatmul.mubr.bf16.vlgmr.msra.gmra.mrb[8].mxu1 %v2557_v11 }
 0x3a3   :  { %3245 = vmatpush3.bf16.msra.mxu1 %v3786_v5  ;;  %3260 = vmatprep.mubr.msk.bf16.mxu1 %vm3795_vm0, %v3794_v51 }
 0x3a4   :  { %3246 = vmatprep.subr.bf16.mxu1 %v3794_v51 }
 0x3a7   :  { %3247 = vmatpush3.bf16.msra.mxu1 %v3787_v4 }
 0x3a8   :  { %3248 = vmatprep.subr.bf16.mxu1 %v3794_v51 }
 0x3ab   :  { %3249 = vmatpush3.bf16.msra.mxu1 %v3788_v6 }
 0x3ac   :  { %3250 = vmatprep.subr.bf16.mxu1 %v3794_v51 }
 0x3af   :  { %3251 = vmatpush3.bf16.msra.mxu1 %v3789_v7 }
 0x3b0   :  { %3252 = vmatprep.subr.bf16.mxu1 %v3794_v51 }
 0x3b3   :  { %3253 = vmatpush3.bf16.msra.mxu1 %v3790_v8 }
 0x3b4   :  { %3254 = vmatprep.subr.bf16.mxu1 %v3794_v51 }
 0x3b7   :  { %3255 = vmatpush3.bf16.msra.mxu1 %v3791_v9 }
 0x3b8   :  { %3256 = vmatprep.subr.bf16.mxu1 %v3794_v51 }
 0x3bb   :  { %3257 = vmatpush3.bf16.msra.mxu1 %v3792_v10 }
 0x3bc   :  { %3258 = vmatprep.subr.bf16.mxu1 %v3794_v51 }
 0x3bf   :  { %3259 = vmatpush3.bf16.msra.mxu1 %v3793_v13 }
 0x475   :  { %v3229_v15 = vpop.f32.mrb[8].mxu1 }
 0x476   :  { %v3230_v16 = vpop.f32.mrb[9].mxu1 }
 0x477   :  { %v3231_v18 = vadd.f32 %v3230_v16, %v3229_v15  ;;  %v3232_v19 = vpop.f32.mrb[10].mxu1 }
 0x478   :  { %v3233_v21 = vpop.f32.mrb[11].mxu1 }
 0x479   :  { %v2734_v22 = vmul.f32 %v3231_v18, %v3202_v17 }
 0x47b   :  { %v2742_v23 = vadd.f32 %v3203_v20, %v2734_v22 }
 0x47d   :  { %v2743_v24 = vmul.f32 0.01, %v2742_v23 }
 0x47f   :  { %v2744_v25 = vmax.f32 %v2742_v23, %v2743_v24 }
 0x481   :  { %v2745_v26 = vpack.c.bf16 %v2744_v25, %v2744_v25 }
 0x483   :  { %3261 = vmatmul.mubr.bf16.vlgmr.msra.gmra.mrb[12].mxu1 %v2745_v26 }
 0x556   :  { %v2851_v28 = vpop.f32.mrb[12].mxu1 }
 0x557   :  { %v2852_v29 = vadd.f32 %v3204_v27, %v2851_v28  ;;  %v3262_v30 = vpop.f32.mrb[13].mxu1 }
 0x558   :  { %v2854_v31 = vpop.f32.mrb[14].mxu1 }
 0x559   :  { %2857 = vst [vmem:[%s5001_s15] sm:$0xff] %v2852_v29  ;;  %v3263_v32 = vpop.f32.mrb[15].mxu1 }

// kernel: basic_cnn_forward.2
= control target key start
LH: loop header
LB: loop body
LE: loop exit
PB: predicated region body
PF: predicated region fallthrough
CT: control target
= control target key end

     0   :  { %17 = vsyncpa [#allocation7], 0  ;;  %s16580_s0 = inlined_call_operand.vmem [shape: f32[2,128,1], index: 0, kind: input, shape index: {}]   ;;  %s16581_s1 = inlined_call_operand.vmem [shape: f32[1,64], index: 1, kind: input, shape index: {}]   ;;  %s16582_s2 = inlined_call_operand.vmem [shape: f32[1,64], index: 2, kind: input, shape index: {}]   ;;  %s16583_s3 = inlined_call_operand.hbm [shape: bf16[1600,128], index: 3, kind: input, shape index: {}]   ;;  %s16584_s4 = inlined_call_operand.vmem [shape: f32[1,128], index: 4, kind: input, shape index: {}]   ;;  %s16585_s5 = inlined_call_operand.vmem [shape: f32[1,128], index: 5, kind: input, shape index: {}]   ;;  %s16586_s6 = inlined_call_operand.hbm [shape: bf16[3200,128], index: 6, kind: input, shape index: {}]   ;;  %s16587_s7 = inlined_call_operand.vmem [shape: f32[1,128], index: 7, kind: input, shape index: {}]   ;;  %s16588_s8 = inlined_call_operand.vmem [shape: f32[1,128], index: 8, kind: input, shape index: {}]   ;;  %s16589_s9 = inlined_call_operand.hbm [shape: bf16[3200,128], index: 9, kind: input, shape index: {}]   ;;  %s16590_s10 = inlined_call_operand.vmem [shape: f32[1,128], index: 10, kind: input, shape index: {}]   ;;  %s16591_s11 = inlined_call_operand.vmem [shape: f32[1,128], index: 11, kind: input, shape index: {}]   ;;  %s16592_s12 = inlined_call_operand.vmem [shape: bf16[2,32,128], index: 12, kind: output, shape index: {}]  }
   0x1   :  { %18 = vsyncpa [#allocation9], 0  ;;  %s14222_s21 = smov 0  }
   0x2 LB: > { %16598 = sst [smem:[#allocation13_spill]] %s14148_s21  ;;  %s14228_s22 = sadd.s32 4294967295, %s14148_s21   ;;  %s14148_s21 = sphi %s14222_s21, %s24_s21  }
   0x3   : > { %p10274_p0 = scmp.ge.s32.totalorder %s14148_s21, 1  ;;  %p312_p1 = scmp.lt.s32.totalorder %s14148_s21, 3 }
   0x4   : > { %p16593_p2 = scmp.eq.s32.totalorder %s14228_s22, 0  ;;  %s14150_s24 = smov [#allocation8]  }
   0x5   : > { %p14233_p3 = pnand %p10274_p0, %p312_p1  ;;  %s349_s25 = sshll.u32 %s14150_s24, 4  ;;  %s350_s25 = int_to_ptr.vmem [resolvable:$true] %s349_s25 }
   0x6   : > { %s14151_s26 = smov [#allocation6]   ;;  %s14152_s29 = smov [#allocation10]  }
   0x7   : > { %s16599_s23 = scalar_select %p14233_p3, 1, 0 }
   0x8   : > { %p13486_p4 = pneg %p14233_p3  ;;  %s330_s27 = sshll.u32 %s14151_s26, 4  ;;  %s14245_s27 = int_to_ptr.vmem [resolvable:$true] %s330_s27 }
   0x9   : > { %s368_s30 = sshll.u32 %s14152_s29, 4  ;;  %s14050_s15 = scalar_lea.hbm %s16586_s6, 25600  ;;  %s14247_s30 = int_to_ptr.vmem [resolvable:$true] %s368_s30 }
   0xa   : > { %p14241_p5 = pnand %p16593_p2, %p13486_p4  ;;  %p14051_p6 = scmp.ne.s32.totalorder %s16586_s6, %s14050_s15 }
   0xb   : > { %p14057_p10 = scmp.lt.u32.totalorder %s14050_s15, %s16586_s6 }
   0xc   : > { %p14257_p7 = pneg %p14241_p5 }
   0xe   : > { %p14053_p8 = pnand %p14257_p7, %p14051_p6 }
  0x10   : > { %p14054_p9 = pneg %p14053_p8 }
  0x12   : > { %p14059_p11 = pnand %p14057_p10, %p14054_p9 }
  0x14   : > { %14062 = shalt.err (!%p14059_p11)
}
  0x15   : > { %s14063_s24 = scalar_lea.vmem %s350_s25, 25600  ;;  %p14071_p1 = scmp.lt.s32.totalorder %s350_s25, %s350_s25 }
  0x16   : > { %p14064_p12 = scmp.ne.s32.totalorder %s350_s25, %s14063_s24  ;;  %p14072_p4 = scmp.lt.s32.totalorder %s14063_s24, %s14063_s24 }
  0x18   : > { %p14066_p13 = pnand %p14064_p12, %p14257_p7  ;;  %p14073_p2 = por %p14072_p4, %p14071_p1 }
  0x1a   : > { %p14067_p0 = pneg %p14066_p13 }
  0x1c   : > { %p14074_p3 = pnand %p14073_p2, %p14067_p0 }
  0x1e   : > { %14077 = shalt.err (!%p14074_p3)
}
  0x1f   : > { %s14153_s26 = smov 64   ;;  %s14154_s29 = smov 4  }
  0x20   : > { %13492 = dma.hbm_to_vmem [thread:$0]  (!%p14241_p5), %s16586_s6, 25600, %s350_s25, [#allocation9], %s14153_s26, %s14153_s26, %s14154_s29  }
  0x21   : > { %s14078_s17 = scalar_lea.hbm %s16583_s3, 12800 }
  0x22   : > { %p14079_p2 = scmp.ne.s32.totalorder %s16583_s3, %s14078_s17  ;;  %p14085_p8 = scmp.lt.u32.totalorder %s14078_s17, %s16583_s3 }
  0x24   : > { %p14081_p3 = pnand %p14079_p2, %p14257_p7 }
  0x26   : > { %p14082_p6 = pneg %p14081_p3 }
  0x28   : > { %p14087_p9 = pnand %p14085_p8, %p14082_p6 }
  0x2a   : > { %14090 = shalt.err (!%p14087_p9)
}
  0x2b   : > { %s14091_s25 = scalar_lea.vmem %s14245_s27, 12800  ;;  %p14099_p13 = scmp.lt.s32.totalorder %s14245_s27, %s14245_s27 }
  0x2c   : > { %p14092_p10 = scmp.ne.s32.totalorder %s14245_s27, %s14091_s25  ;;  %p14100_p0 = scmp.lt.s32.totalorder %s14091_s25, %s14091_s25 }
  0x2e   : > { %p14094_p11 = pnand %p14092_p10, %p14257_p7  ;;  %p14101_p1 = por %p14100_p0, %p14099_p13 }
  0x30   : > { %p14095_p12 = pneg %p14094_p11 }
  0x32   : > { %p14102_p4 = pnand %p14101_p1, %p14095_p12 }
  0x34   : > { %14105 = shalt.err (!%p14102_p4)
}
  0x35   : > { %13489 = dma.hbm_to_vmem [thread:$0]  (!%p14241_p5), %s16583_s3, 12800, %s14245_s27, [#allocation7], %s14153_s26, %s14153_s26, %s14154_s29  }
  0x36   : > { %s14106_s16 = scalar_lea.hbm %s16589_s9, 25600 }
  0x37   : > { %p14107_p2 = scmp.ne.s32.totalorder %s16589_s9, %s14106_s16  ;;  %p14113_p8 = scmp.lt.u32.totalorder %s14106_s16, %s16589_s9 }
  0x39   : > { %p14109_p3 = pnand %p14107_p2, %p14257_p7 }
  0x3b   : > { %p14110_p6 = pneg %p14109_p3 }
  0x3d   : > { %p14115_p9 = pnand %p14113_p8, %p14110_p6 }
  0x3f   : > { %14118 = shalt.err (!%p14115_p9)
}
  0x40   : > { %s14119_s27 = scalar_lea.vmem %s14247_s30, 25600  ;;  %p14127_p13 = scmp.lt.s32.totalorder %s14247_s30, %s14247_s30 }
  0x41   : > { %p14120_p10 = scmp.ne.s32.totalorder %s14247_s30, %s14119_s27  ;;  %p14128_p0 = scmp.lt.s32.totalorder %s14119_s27, %s14119_s27 }
  0x43   : > { %p14122_p11 = pnand %p14120_p10, %p14257_p7  ;;  %p14129_p1 = por %p14128_p0, %p14127_p13 }
  0x45   : > { %p14123_p12 = pneg %p14122_p11 }
  0x47   : > { %p14130_p4 = pnand %p14129_p1, %p14123_p12 }
  0x49   : > { %14133 = shalt.err (!%p14130_p4)
}
  0x4a   : > { %13495 = dma.hbm_to_vmem [thread:$0]  (!%p14241_p5), %s16589_s9, 25600, %s14247_s30, [#allocation9], %s14153_s26, %s14153_s26, %s14154_s29  }
  0x4b   : > { %p16602_p2 = scmp.ne.s32.totalorder %s16599_s23, 0 }
  0x4d   : > { %398 = sbr.rel (%p16602_p2) target bundleno = 2104 (0x838), region = 68 }
  0x54   : > { %p16603_p7 = scmp.eq.s32.totalorder %s14228_s22, 0 }
  0x56   : > { %14139 = dma.done.wait (%p16603_p7), [#allocation7], 12800   ;;  %p16604_p3 = pmov %p16603_p7 }
  0x58   : > { %14141 = vsyncadd (%p16604_p3), [#allocation7], 4294954496  ;;  %p16605_p6 = pmov %p16604_p3 }
  0x59   : > { %p16606_p8 = pmov %p16604_p3 }
  0x5a   : > { %14143 = dma.done.wait (%p16605_p6), [#allocation9], 51200  }
  0x5b   : > { %14145 = vsyncadd (%p16606_p8), [#allocation9], 4294916096  ;;  %p448_p9 = scmp.lt.s32.totalorder %s14228_s22, 1  ;;  %v14155_v0 = vmov 0   ;;  %v13519_v7 = vld [vmem:[#allocation6 + $0x120] sm:$0xff]   ;;  %v13520_v8 = vld [vmem:[#allocation6 + $0x128] sm:$0xff]  }
  0x5c   : > { %13518 = vset.pattern.permute.xlu1 %v14155_v0  ;;  %459 = vst [vmem:[#allocation2] sm:$0xff] %v14155_v0  ;;  %13517 = vset.pattern.permute.xlu0 %v14155_v0  ;;  %vm461_vm0 = vcmask 523264   ;;  %v13521_v11 = vld [vmem:[#allocation6 + $0x130] sm:$0xff]   ;;  %v13522_v14 = vld [vmem:[#allocation6 + $0x138] sm:$0xff]   ;;  %v13523_v24 = vld [vmem:[#allocation6 + $0x40] sm:$0xff]   ;;  %vm884_vm1 = vcmask 1045504  }
  0x5d   : > { %s16635_s22 = smov (!%p448_p9, %s14228_s22), 1  ;;  %1224 = vmatprep.mubr.bf16.mxu0 %v14155_v0  ;;  %12578 = vmatprep.subr.bf16.mxu1 %v13519_v7  ;;  %462 = vst.msk [vmem:[#allocation2 + $0x10] sm:$0xff] %vm461_vm0, %v14155_v0  ;;  %465 = vst.msk [vmem:[#allocation2 + $0x28] sm:$0xff] %vm461_vm0, %v14155_v0  ;;  %v13524_v25 = vld [vmem:[#allocation6] sm:$0xff]   ;;  %v13525_v26 = vld [vmem:[#allocation6 + $0x48] sm:$0xff]   ;;  %s14156_s15 = smov 64  }
  0x5e   : > { %s10861_s23 = sshll.u32 %s16635_s22, 7  ;;  %468 = vst.msk [vmem:[#allocation2 + $0x40] sm:$0xff] %vm461_vm0, %v14155_v0  ;;  %471 = vst.msk [vmem:[#allocation2 + $0x58] sm:$0xff] %vm461_vm0, %v14155_v0  ;;  %12579 = vmatpush3.bf16.msra.mxu1 %v13519_v7  ;;  %v13529_v27 = vld [vmem:[#allocation6 + $0xe0] sm:$0xff]   ;;  %v13531_v29 = vld [vmem:[#allocation6 + $0xe8] sm:$0xff]   ;;  %vm915_vm4 = vcmask 521216  }
  0x5f   : > { %s14350_s18 = scalar_lea.vmem %s16580_s0, %s10861_s23  ;;  %474 = vst.msk [vmem:[#allocation2 + $0x130] sm:$0xff] %vm461_vm0, %v14155_v0  ;;  %477 = vst.msk [vmem:[#allocation2 + $0x148] sm:$0xff] %vm461_vm0, %v14155_v0  ;;  %12580 = vmatprep.subr.bf16.mxu1 %v13520_v8  ;;  %v13530_v28 = vld [vmem:[#allocation6 + $0xa0] sm:$0xff]   ;;  %v13526_v30 = vld [vmem:[#allocation6 + $0x8] sm:$0xff]   ;;  %10878 = vmatprep.subr.bf16.mxu0 %v13529_v27  ;;  %vm816_vm2 = vsmask.f32 6400 }
  0x60   : > { %v486_v1 = vld [vmem:[%s14350_s18 + $0x10] sm:$0xff]  ;;  %v484_v2 = vld [vmem:[%s14350_s18] sm:$0xff]  ;;  %v487_v3 = vld [vmem:[%s14350_s18 + $0x18] sm:$0xff]  ;;  %480 = vst.msk [vmem:[#allocation2 + $0x160] sm:$0xff] %vm461_vm0, %v14155_v0  ;;  %10879 = vmatpush3.bf16.msra.mxu0 %v13530_v28  ;;  %vm674_vm3 = vsmask.f32 7424 }
  0x61   : > { %513 = vperm.xlu1 %13518, %v486_v1   ;;  %503 = vperm.xlu0 %13517, %v484_v2   ;;  %v485_v4 = vld [vmem:[%s14350_s18 + $0x8] sm:$0xff]  ;;  %v488_v6 = vld [vmem:[%s14350_s18 + $0x20] sm:$0xff]  ;;  %v491_v9 = vld [vmem:[%s14350_s18 + $0x38] sm:$0xff]  ;;  %483 = vst.msk [vmem:[#allocation2 + $0x178] sm:$0xff] %vm461_vm0, %v14155_v0  ;;  %vm783_vm5 = vcmask 1046528   ;;  %vm814_vm6 = vcmask 522240  }
  0x62   : > { %v489_v5 = vld [vmem:[%s14350_s18 + $0x28] sm:$0xff]  ;;  %v490_v10 = vld [vmem:[%s14350_s18 + $0x30] sm:$0xff]  ;;  %v492_v13 = vld [vmem:[%s14350_s18 + $0x40] sm:$0xff]  ;;  %12581 = vmatpush3.bf16.msra.mxu1 %v13520_v8  ;;  %10880 = vmatprep.subr.bf16.mxu0 %v13531_v29  ;;  %vm762_vm7 = vcmask 1048064   ;;  %vm879_vm8 = vcmask 1047040   ;;  %vm3625_vm11 = vcmask 1047552  }
  0x63   : > { %v493_v12 = vld [vmem:[%s14350_s18 + $0x48] sm:$0xff]  ;;  %12582 = vmatprep.subr.bf16.mxu1 %v13521_v11  ;;  %v495_v15 = vld [vmem:[%s14350_s18 + $0x58] sm:$0xff]  ;;  %v494_v17 = vld [vmem:[%s14350_s18 + $0x50] sm:$0xff]  ;;  %s10862_s26 = sshll.u32 %s16635_s22, 4 }
  0x64   : > { %v922_v16 = vld [vmem:[#allocation2 + $0x28] sm:$0xff]  ;;  %v496_v19 = vld [vmem:[%s14350_s18 + $0x60] sm:$0xff]  ;;  %v499_v21 = vld [vmem:[%s14350_s18 + $0x78] sm:$0xff]  ;;  %s457_s14 = scalar_lea.vmem %s16592_s12, %s10862_s26 }
  0x65   : > { %518 = vperm.xlu1 %13518, %v487_v3   ;;  %508 = vperm.xlu0 %13517, %v485_v4   ;;  %v497_v18 = vld [vmem:[%s14350_s18 + $0x68] sm:$0xff]  ;;  %v925_v20 = vld [vmem:[#allocation2 + $0x40] sm:$0xff]  ;;  %v498_v22 = vld [vmem:[%s14350_s18 + $0x70] sm:$0xff] }
  0x66   : > { %12583 = vmatpush3.bf16.msra.mxu1 %v13521_v11  ;;  %12586 = vmatprep.mubr.msk.bf16.mxu1 %vm461_vm0, %v922_v16  ;;  %v928_v23 = vld [vmem:[#allocation2 + $0x58] sm:$0xff]  ;;  %v13533_v32 = vld [vmem:[#allocation6 + $0xa8] sm:$0xff]   ;;  %v13532_v35 = vld [vmem:[#allocation6 + $0x58] sm:$0xff]  }
  0x67   : > { %12584 = vmatprep.subr.bf16.mxu1 %v13522_v14  ;;  %v13527_v31 = vld [vmem:[#allocation6 + $0x50] sm:$0xff]   ;;  %10881 = vmatpush3.bf16.msra.mxu0 %v13533_v32  ;;  %v13534_v37 = vld [vmem:[#allocation6 + $0x18] sm:$0xff]   ;;  %v13537_v38 = vld [vmem:[#allocation6 + $0x60] sm:$0xff]  }
  0x68   : > { %v13535_v33 = vld [vmem:[#allocation6 + $0xf0] sm:$0xff]   ;;  %v13539_v39 = vld [vmem:[#allocation6 + $0xf8] sm:$0xff]   ;;  %v13541_v41 = vld [vmem:[#allocation6 + $0x100] sm:$0xff]  }
  0x69   : > { %528 = vperm.xlu1 %13518, %v489_v5   ;;  %523 = vperm.xlu0 %13517, %v488_v6   ;;  %v13528_v34 = vld [vmem:[#allocation6 + $0x10] sm:$0xff]   ;;  %v13540_v40 = vld [vmem:[#allocation6 + $0xb8] sm:$0xff]   ;;  %v13538_v42 = vld [vmem:[#allocation6 + $0x20] sm:$0xff]  }
  0x6a   : > { %12585 = vmatpush3.bf16.msra.mxu1 %v13522_v14  ;;  %v13536_v36 = vld [vmem:[#allocation6 + $0xb0] sm:$0xff]   ;;  %10882 = vmatprep.subr.bf16.mxu0 %v13535_v33  ;;  %v13542_v43 = vld [vmem:[#allocation6 + $0x68] sm:$0xff]   ;;  %v13543_v44 = vld [vmem:[#allocation6 + $0xc0] sm:$0xff]  }
  0x6b   : > { %10982 = vmatprep.subr.bf16.mxu1 %v13523_v24  ;;  %10883 = vmatpush3.bf16.msra.mxu0 %v13536_v36  ;;  %v13545_v45 = vld [vmem:[#allocation6 + $0x108] sm:$0xff]   ;;  %v13547_v47 = vld [vmem:[#allocation6 + $0x70] sm:$0xff]   ;;  %v13552_v51 = vld [vmem:[#allocation6 + $0x78] sm:$0xff]  }
  0x6c   : > { %10884 = vmatprep.subr.bf16.mxu0 %v13539_v39  ;;  %v13544_v46 = vld [vmem:[#allocation6 + $0x28] sm:$0xff]   ;;  %v13549_v49 = vld [vmem:[#allocation6 + $0x110] sm:$0xff]   ;;  %v13551_v53 = vld [vmem:[#allocation6 + $0x118] sm:$0xff]  }
  0x6d   : > { %538 = vperm.xlu1 %13518, %v491_v9   ;;  %533 = vperm.xlu0 %13517, %v490_v10   ;;  %v13546_v48 = vld [vmem:[#allocation6 + $0xc8] sm:$0xff]   ;;  %v13548_v50 = vld [vmem:[#allocation6 + $0x30] sm:$0xff]   ;;  %v13554_v54 = vld [vmem:[#allocation6 + $0x38] sm:$0xff]  }
  0x6e   : > { %12587 = vmatmul.mubr.msk.bf16.vlgmr.msra.gmra.mrb[0].mxu1 %vm461_vm0, %v925_v20  ;;  %v13550_v52 = vld [vmem:[#allocation6 + $0xd0] sm:$0xff]   ;;  %v13555_v55 = vld [vmem:[#allocation6 + $0x80] sm:$0xff]   ;;  %v13553_v56 = vld [vmem:[#allocation6 + $0xd8] sm:$0xff]  }
  0x6f   : > { %12590 = vmatprep.mubr.msk.bf16.mxu1 %vm461_vm0, %v928_v23  ;;  %10983 = vmatpush3.bf16.msra.mxu1 %v13524_v25  ;;  %v14395_v57 = vld [vmem:[%s16581_s1] ss:$0 sm:$0xff]  ;;  %vm771_vm9 = vmand %vm762_vm7, %vm674_vm3 }
  0x70   : > { %10984 = vmatprep.subr.bf16.mxu1 %v13525_v26  ;;  %10885 = vmatpush3.bf16.msra.mxu0 %v13540_v40  ;;  %v14400_v58 = vld [vmem:[%s16582_s2] ss:$0 sm:$0xff]  ;;  %vm880_vm10 = vmand %vm879_vm8, %vm816_vm2 }
  0x71   : > { %548 = vperm.xlu1 %13518, %v493_v12   ;;  %543 = vperm.xlu0 %13517, %v492_v13   ;;  %vm15487_vm12 = vmand %vm3625_vm11, %vm674_vm3 }
  0x72   : > { %10886 = vmatprep.subr.bf16.mxu0 %v13541_v41  ;;  %vm15495_vm13 = vmand %vm783_vm5, %vm816_vm2 }
  0x73   : > { %10985 = vmatpush3.bf16.msra.mxu1 %v13526_v30 }
  0x74   : > { %10986 = vmatprep.subr.bf16.mxu1 %v13527_v31  ;;  %10887 = vmatpush3.bf16.msra.mxu0 %v13543_v44 }
  0x75   : > { %558 = vperm.xlu1 %13518, %v495_v15   ;;  %553 = vperm.xlu0 %13517, %v494_v17  }
  0x76   : > { %10888 = vmatprep.subr.bf16.mxu0 %v13545_v45 }
  0x77   : > { %10987 = vmatpush3.bf16.msra.mxu1 %v13528_v34 }
  0x78   : > { %10988 = vmatprep.subr.bf16.mxu1 %v13532_v35  ;;  %10889 = vmatpush3.bf16.msra.mxu0 %v13546_v48 }
  0x79   : > { %568 = vperm.xlu1 %13518, %v497_v18   ;;  %563 = vperm.xlu0 %13517, %v496_v19  }
  0x7a   : > { %10890 = vmatprep.subr.bf16.mxu0 %v13549_v49 }
  0x7b   : > { %10989 = vmatpush3.bf16.msra.mxu1 %v13534_v37 }
  0x7c   : > { %10990 = vmatprep.subr.bf16.mxu1 %v13537_v38  ;;  %10891 = vmatpush3.bf16.msra.mxu0 %v13550_v52 }
  0x7d   : > { %578 = vperm.xlu1 %13518, %v499_v21   ;;  %573 = vperm.xlu0 %13517, %v498_v22  }
  0x7e   : > { %10892 = vmatprep.subr.bf16.mxu0 %v13551_v53 }
  0x7f   : > { %10991 = vmatpush3.bf16.msra.mxu1 %v13538_v42 }
  0x80   : > { %10992 = vmatprep.subr.bf16.mxu1 %v13542_v43  ;;  %10893 = vmatpush3.bf16.msra.mxu0 %v13553_v56 }
  0x83   : > { %10993 = vmatpush3.bf16.msra.mxu1 %v13544_v46  ;;  %1225 = vmatmul.mubr.bf16.vlgmr.msra.gmra.mrb[0].mxu0 %v14155_v0 }
  0x84   : > { %10994 = vmatprep.subr.bf16.mxu1 %v13547_v47  ;;  %1232 = vmatprep.mubr.bf16.mxu0 %v14155_v0 }
  0x87   : > { %10995 = vmatpush3.bf16.msra.mxu1 %v13548_v50 }
  0x88   : > { %10996 = vmatprep.subr.bf16.mxu1 %v13552_v51 }
  0x8b   : > { %10997 = vmatpush3.bf16.msra.mxu1 %v13554_v54  ;;  %1233 = vmatmul.mubr.bf16.gmra.mrb[4].mxu0 %v14155_v0 }
  0x8c   : > { %12610 = vmatprep.subr.bf16.mxu1 %v13555_v55  ;;  %1240 = vmatprep.mubr.bf16.mxu0 %v14155_v0 }
  0x93   : > { %1241 = vmatmul.mubr.bf16.gmra.mrb[8].mxu0 %v14155_v0 }
  0xe0   : > { %v514_v59 = vpop.permute.xlu1 %513  ;;  %v504_v60 = vpop.permute.xlu0 %503 }
  0xe1   : > { %v589_v61 = vmul.f32 %v14395_v57, %v514_v59  ;;  %v587_v62 = vmul.f32 %v14395_v57, %v504_v60 }
  0xe3   : > { %v612_v63 = vadd.f32 %v14400_v58, %v589_v61  ;;  %v610_v0 = vadd.f32 %v14400_v58, %v587_v62 }
  0xe4   : > { %v519_v1 = vpop.permute.xlu1 %518  ;;  %v509_v2 = vpop.permute.xlu0 %508 }
  0xe5   : > { %v628_v3 = vmul.f32 0.01, %v612_v63  ;;  %v626_v4 = vmul.f32 0.01, %v610_v0  ;;  %v590_v5 = vmul.f32 %v14395_v57, %v519_v1  ;;  %v588_v6 = vmul.f32 %v14395_v57, %v509_v2 }
  0xe7   : > { %v613_v7 = vadd.f32 %v14400_v58, %v590_v5  ;;  %v611_v8 = vadd.f32 %v14400_v58, %v588_v6  ;;  %v644_v15 = vmax.f32 %v612_v63, %v628_v3  ;;  %v642_v16 = vmax.f32 %v610_v0, %v626_v4 }
  0xe8   : > { %v529_v9 = vpop.permute.xlu1 %528  ;;  %v524_v10 = vpop.permute.xlu0 %523 }
  0xe9   : > { %v629_v11 = vmul.f32 0.01, %v613_v7  ;;  %v627_v12 = vmul.f32 0.01, %v611_v8  ;;  %v592_v13 = vmul.f32 %v14395_v57, %v529_v9  ;;  %v591_v14 = vmul.f32 %v14395_v57, %v524_v10 }
  0xeb   : > { %v645_v17 = vmax.f32 %v613_v7, %v629_v11  ;;  %v643_v18 = vmax.f32 %v611_v8, %v627_v12  ;;  %v615_v19 = vadd.f32 %v14400_v58, %v592_v13  ;;  %v614_v20 = vadd.f32 %v14400_v58, %v591_v14 }
  0xec   : > { %v539_v21 = vpop.permute.xlu1 %538  ;;  %v534_v22 = vpop.permute.xlu0 %533 }
  0xed   : > { %v14414_v23 = vpack.c.bf16 %v645_v17, %v644_v15  ;;  %v14416_v24 = vpack.c.bf16 %v643_v18, %v642_v16  ;;  %v631_v25 = vmul.f32 0.01, %v615_v19  ;;  %v630_v26 = vmul.f32 0.01, %v614_v20 }
  0xee   : > { %v594_v27 = vmul.f32 %v14395_v57, %v539_v21  ;;  %v593_v28 = vmul.f32 %v14395_v57, %v534_v22 }
  0xef   : > { %v886_v29 = vrot.slane %v14414_v23, 2  ;;  %v885_v30 = vrot.slane %v14416_v24, 2  ;;  %666 = vst.msk [vmem:[#allocation2 + $0x60] sm:$0xff] %vm461_vm0, %v14416_v24  ;;  %667 = vst.msk [vmem:[#allocation2 + $0x78] sm:$0xff] %vm461_vm0, %v14414_v23  ;;  %v647_v31 = vmax.f32 %v615_v19, %v631_v25  ;;  %v646_v32 = vmax.f32 %v614_v20, %v630_v26 }
  0xf0   : > { %v617_v33 = vadd.f32 %v14400_v58, %v594_v27  ;;  %v616_v34 = vadd.f32 %v14400_v58, %v593_v28  ;;  %v549_v35 = vpop.permute.xlu1 %548  ;;  %v544_v36 = vpop.permute.xlu0 %543  ;;  %v676_v37 = vshrl.u32 %v14416_v24, 16  ;;  %v678_v38 = vshll.u32 %v14416_v24, 16 }
  0xf1   : > { %v887_v39 = vsel %vm884_vm1, %v885_v30, %v886_v29  ;;  %v14431_v40 = vpack.c.bf16 %v647_v31, %v646_v32  ;;  %v596_v41 = vmul.f32 %v14395_v57, %v549_v35  ;;  %v595_v42 = vmul.f32 %v14395_v57, %v544_v36 }
  0xf2   : > { %908 = vst.msk [vmem:[#allocation2 + $0x70] sm:$0xff] %vm461_vm0, %v887_v39  ;;  %v633_v43 = vmul.f32 0.01, %v617_v33  ;;  %v632_v44 = vmul.f32 0.01, %v616_v34  ;;  %v683_v45 = vshll.u32 %v14414_v23, 16 }
  0xf3   : > { %v687_v46 = vshrl.u32 %v14414_v23, 16  ;;  %v888_v47 = vrot.slane %v14431_v40, 2  ;;  %668 = vst.msk [vmem:[#allocation2 + $0x90] sm:$0xff] %vm461_vm0, %v14431_v40  ;;  %v619_v48 = vadd.f32 %v14400_v58, %v596_v41  ;;  %v618_v49 = vadd.f32 %v14400_v58, %v595_v42 }
  0xf4   : > { %v817_v50 = vrot.slane %v676_v37, 1  ;;  %v649_v51 = vmax.f32 %v617_v33, %v633_v43  ;;  %v648_v52 = vmax.f32 %v616_v34, %v632_v44  ;;  %v559_v53 = vpop.permute.xlu1 %558  ;;  %v554_v54 = vpop.permute.xlu0 %553  ;;  %v818_v55 = vrot.slane %v678_v38, 2 }
  0xf5   : > { %v820_v56 = vrot.slane %v687_v46, 1  ;;  %v889_v59 = vsel %vm884_vm1, %v886_v29, %v888_v47  ;;  %v635_v60 = vmul.f32 0.01, %v619_v48  ;;  %v634_v61 = vmul.f32 0.01, %v618_v49 }
  0xf6   : > { %v598_v62 = vmul.f32 %v14395_v57, %v559_v53  ;;  %909 = vst.msk [vmem:[#allocation2 + $0x88] sm:$0xff] %vm461_vm0, %v889_v59  ;;  %v14446_v63 = vpack.c.bf16 %v649_v51, %v648_v52  ;;  %v597_v0 = vmul.f32 %v14395_v57, %v554_v54  ;;  %v819_v1 = vor.u32 %v818_v55, %v817_v50 }
  0xf7   : > { %v821_v2 = vrot.slane %v683_v45, 2  ;;  %v651_v3 = vmax.f32 %v619_v48, %v635_v60  ;;  %v650_v4 = vmax.f32 %v618_v49, %v634_v61  ;;  %v680_v6 = vrot.slane %v678_v38, 1 }
  0xf8   : > { %v621_v5 = vadd.f32 %v14400_v58, %v598_v62  ;;  %v890_v7 = vrot.slane %v14446_v63, 2  ;;  %669 = vst.msk [vmem:[#allocation2 + $0xa8] sm:$0xff] %vm461_vm0, %v14446_v63  ;;  %v620_v8 = vadd.f32 %v14400_v58, %v597_v0  ;;  %v685_v10 = vrot.slane %v683_v45, 1  ;;  %v569_v11 = vpop.permute.xlu1 %568  ;;  %v564_v12 = vpop.permute.xlu0 %563 }
  0xf9   : > { %v822_v9 = vor.u32 %v821_v2, %v820_v56  ;;  %v14454_v13 = vpack.c.bf16 %v651_v3, %v650_v4  ;;  %v681_v15 = vor.u32 %v680_v6, %v676_v37  ;;  %v600_v16 = vmul.f32 %v14395_v57, %v569_v11  ;;  %v931_v17 = vld [vmem:[#allocation2 + $0x70] sm:$0xff] }
  0xfa   : > { %v637_v14 = vmul.f32 0.01, %v621_v5  ;;  %v891_v18 = vsel %vm884_vm1, %v888_v47, %v890_v7  ;;  %v636_v19 = vmul.f32 0.01, %v620_v8  ;;  %v599_v21 = vmul.f32 %v14395_v57, %v564_v12  ;;  %12591 = vmatmul.mubr.msk.bf16.gmra.mrb[4].mxu1 %vm461_vm0, %v931_v17 }
  0xfb   : > { %v823_v20 = vsel %vm816_vm2, %v819_v1, %v822_v9  ;;  %910 = vst.msk [vmem:[#allocation2 + $0xa0] sm:$0xff] %vm461_vm0, %v891_v18  ;;  %v892_v22 = vrot.slane %v14454_v13, 2  ;;  %670 = vst.msk [vmem:[#allocation2 + $0xc0] sm:$0xff] %vm461_vm0, %v14454_v13  ;;  %v686_v26 = vsel %vm674_vm3, %v681_v15, %v685_v10  ;;  %v623_v27 = vadd.f32 %v14400_v58, %v600_v16 }
  0xfc   : > { %v653_v25 = vmax.f32 %v621_v5, %v637_v14  ;;  %848 = vrot.lane.b32.xlu0 %v823_v20, %s14156_s15  ;;  %v652_v28 = vmax.f32 %v620_v8, %v636_v19  ;;  %738 = vrot.lane.b32.xlu1 %v686_v26, %s14156_s15  ;;  %v622_v29 = vadd.f32 %v14400_v58, %v599_v21  ;;  %v691_v30 = vshll.u32 %v14431_v40, 16  ;;  %v579_v32 = vpop.permute.xlu1 %578  ;;  %v574_v33 = vpop.permute.xlu0 %573 }
  0xfd   : > { %v695_v31 = vshrl.u32 %v14431_v40, 16  ;;  %v893_v34 = vsel %vm884_vm1, %v890_v7, %v892_v22  ;;  %v639_v35 = vmul.f32 0.01, %v623_v27  ;;  %v689_v36 = vor.u32 %v687_v46, %v685_v10  ;;  %v934_v38 = vld [vmem:[#allocation2 + $0x88] sm:$0xff] }
  0xfe   : > { %v602_v37 = vmul.f32 %v14395_v57, %v579_v32  ;;  %911 = vst.msk [vmem:[#allocation2 + $0xb8] sm:$0xff] %vm461_vm0, %v893_v34  ;;  %v14475_v39 = vpack.c.bf16 %v653_v25, %v652_v28  ;;  %v638_v41 = vmul.f32 0.01, %v622_v29  ;;  %v825_v43 = vrot.slane %v691_v30, 2  ;;  %12594 = vmatprep.mubr.msk.bf16.mxu1 %vm461_vm0, %v934_v38 }
  0xff   : > { %v824_v42 = vrot.slane %v695_v31, 1  ;;  %v655_v44 = vmax.f32 %v623_v27, %v639_v35  ;;  %v693_v45 = vrot.slane %v691_v30, 1  ;;  %v601_v48 = vmul.f32 %v14395_v57, %v574_v33 }
 0x100   : > { %v625_v47 = vadd.f32 %v14400_v58, %v602_v37  ;;  %v894_v46 = vrot.slane %v14475_v39, 2  ;;  %671 = vst.msk [vmem:[#allocation2 + $0xd8] sm:$0xff] %vm461_vm0, %v14475_v39  ;;  %v654_v49 = vmax.f32 %v622_v29, %v638_v41  ;;  %v699_v51 = vshll.u32 %v14446_v63, 16 }
 0x101   : > { %v826_v50 = vor.u32 %v825_v43, %v824_v42  ;;  %v694_v52 = vsel %vm674_vm3, %v689_v36, %v693_v45  ;;  %v624_v54 = vadd.f32 %v14400_v58, %v601_v48  ;;  %v703_v55 = vshrl.u32 %v14446_v63, 16 }
 0x102   : > { %v641_v53 = vmul.f32 0.01, %v625_v47  ;;  %v895_v56 = vsel %vm884_vm1, %v892_v22, %v894_v46  ;;  %v14488_v57 = vpack.c.bf16 %v655_v44, %v654_v49  ;;  %740 = vrot.lane.b32.xlu1 %v694_v52, %s14156_s15  ;;  %v829_v60 = vrot.slane %v699_v51, 2  ;;  %v937_v61 = vld [vmem:[#allocation2 + $0xa0] sm:$0xff] }
 0x103   : > { %v827_v59 = vsel %vm816_vm2, %v822_v9, %v826_v50  ;;  %912 = vst.msk [vmem:[#allocation2 + $0xd0] sm:$0xff] %vm461_vm0, %v895_v56  ;;  %v640_v0 = vmul.f32 0.01, %v624_v54  ;;  %v828_v1 = vrot.slane %v703_v55, 1  ;;  %v697_v58 = vor.u32 %v695_v31, %v693_v45  ;;  %12595 = vmatmul.mubr.msk.bf16.gmra.mrb[8].mxu1 %vm461_vm0, %v937_v61 }
 0x104   : > { %850 = vrot.lane.b32.xlu0 %v827_v59, %s14156_s15  ;;  %v657_v62 = vmax.f32 %v625_v47, %v641_v53  ;;  %v896_v2 = vrot.slane %v14488_v57, 2  ;;  %672 = vst.msk [vmem:[#allocation2 + $0xf0] sm:$0xff] %vm461_vm0, %v14488_v57  ;;  %v701_v3 = vrot.slane %v699_v51, 1  ;;  %v707_v4 = vshll.u32 %v14454_v13, 16 }
 0x105   : > { %v711_v5 = vshrl.u32 %v14454_v13, 16  ;;  %v656_v6 = vmax.f32 %v624_v54, %v640_v0  ;;  %v830_v7 = vor.u32 %v829_v60, %v828_v1  ;;  %v715_v8 = vshll.u32 %v14475_v39, 16  ;;  %v940_v10 = vld [vmem:[#allocation2 + $0xb8] sm:$0xff] }
 0x106   : > { %v719_v9 = vshrl.u32 %v14475_v39, 16  ;;  %v897_v11 = vsel %vm884_vm1, %v894_v46, %v896_v2  ;;  %v702_v12 = vsel %vm674_vm3, %v697_v58, %v701_v3  ;;  %v833_v15 = vrot.slane %v707_v4, 2  ;;  %12598 = vmatprep.mubr.msk.bf16.mxu1 %vm461_vm0, %v940_v10  ;;  %v13561_v10 = vld [vmem:[#allocation6 + $0x188] sm:$0xff]  }
 0x107   : > { %v832_v14 = vrot.slane %v711_v5, 1  ;;  %913 = vst.msk [vmem:[#allocation2 + $0xe8] sm:$0xff] %vm461_vm0, %v897_v11  ;;  %v14506_v16 = vpack.c.bf16 %v657_v62, %v656_v6  ;;  %v831_v17 = vsel %vm816_vm2, %v826_v50, %v830_v7  ;;  %742 = vrot.lane.b32.xlu1 %v702_v12, %s14156_s15  ;;  %v705_v18 = vor.u32 %v703_v55, %v701_v3  ;;  %v14567_v6 = vld [vmem:[#allocation2] sm:$0xff]  ;;  %v13562_v11 = vld [vmem:[#allocation6 + $0x148] sm:$0xff]   ;;  %v13557_v12 = vld [vmem:[#allocation6 + $0x90] sm:$0xff]  }
 0x108   : > { %v709_v19 = vrot.slane %v707_v4, 1  ;;  %852 = vrot.lane.b32.xlu0 %v831_v17, %s14156_s15  ;;  %v836_v21 = vrot.slane %v719_v9, 1  ;;  %v837_v22 = vrot.slane %v715_v8, 2  ;;  %v717_v25 = vrot.slane %v715_v8, 1  ;;  %v995_v4 = vld [vmem:[#allocation2 + $0x130] sm:$0xff]  ;;  %v13564_v17 = vld [vmem:[#allocation6 + $0x150] sm:$0xff]  }
 0x109   : > { %v834_v20 = vor.u32 %v833_v15, %v832_v14  ;;  %v898_v26 = vrot.slane %v14506_v16, 2  ;;  %673 = vst.msk [vmem:[#allocation2 + $0x108] sm:$0xff] %vm461_vm0, %v14506_v16  ;;  %v723_v27 = vshll.u32 %v14488_v57, 16  ;;  %v727_v31 = vshrl.u32 %v14488_v57, 16  ;;  %v13556_v8 = vld [vmem:[#allocation6 + $0x88] sm:$0xff]   ;;  %v14020_v14 = vld [vmem:[#allocation6 + $0x80] sm:$0xff]  }
 0x10a   : > { %v710_v29 = vsel %vm674_vm3, %v705_v18, %v709_v19  ;;  %v838_v30 = vor.u32 %v837_v22, %v836_v21  ;;  %v943_v32 = vld [vmem:[#allocation2 + $0xd0] sm:$0xff]  ;;  %v713_v34 = vor.u32 %v711_v5, %v709_v19  ;;  %v731_v37 = vshll.u32 %v14506_v16, 16  ;;  %v13563_v15 = vld [vmem:[#allocation6 + $0x190] sm:$0xff]   ;;  %v13565_v18 = vld [vmem:[#allocation6 + $0x198] sm:$0xff]  }
 0x10b   : > { %v835_v28 = vsel %vm816_vm2, %v830_v7, %v834_v20  ;;  %v899_v33 = vsel %vm884_vm1, %v896_v2, %v898_v26  ;;  %916 = vst.msk [vmem:[#allocation2 + $0x118] sm:$0x3f] %vm915_vm4, %v898_v26  ;;  %744 = vrot.lane.b32.xlu1 %v710_v29, %s14156_s15  ;;  %v841_v35 = vrot.slane %v723_v27, 2  ;;  %12599 = vmatmul.mubr.msk.bf16.gmra.mrb[12].mxu1 %vm461_vm0, %v943_v32  ;;  %v840_v36 = vrot.slane %v727_v31, 1  ;;  %v13559_v7 = vld [vmem:[#allocation6 + $0x180] sm:$0xff]   ;;  %v13566_v19 = vld [vmem:[#allocation6 + $0x158] sm:$0xff]  }
 0x10c   : > { %914 = vst.msk [vmem:[#allocation2 + $0x100] sm:$0xff] %vm461_vm0, %v899_v33  ;;  %854 = vrot.lane.b32.xlu0 %v835_v28, %s14156_s15  ;;  %v735_v38 = vshrl.u32 %v14506_v16, 16  ;;  %v839_v41 = vsel %vm816_vm2, %v834_v20, %v838_v30  ;;  %v718_v42 = vsel %vm674_vm3, %v713_v34, %v717_v25  ;;  %v784_v43 = vrot.slane %v14416_v24, 1  ;;  %11086 = vmatprep.subr.bf16.mxu0 %v13559_v7  ;;  %v13567_v20 = vld [vmem:[#allocation6 + $0x1a0] sm:$0xff]   ;;  %v13569_v22 = vld [vmem:[#allocation6 + $0x1a8] sm:$0xff]   ;;  %v13573_v28 = vld [vmem:[#allocation6 + $0x170] sm:$0xff]  }
 0x10d   : > { %v785_v44 = vrot.slane %v14414_v23, 1  ;;  %v842_v45 = vor.u32 %v841_v35, %v840_v36  ;;  %v725_v47 = vrot.slane %v723_v27, 1  ;;  %v845_v46 = vrot.slane %v731_v37, 2  ;;  %v13568_v21 = vld [vmem:[#allocation6 + $0x160] sm:$0xff]   ;;  %v13572_v27 = vld [vmem:[#allocation6 + $0x1b0] sm:$0xff]   ;;  %v13574_v29 = vld [vmem:[#allocation6 + $0x1b8] sm:$0xff]  }
 0x10e   : > { %v844_v48 = vrot.slane %v735_v38, 1  ;;  %v946_v49 = vld [vmem:[#allocation2 + $0xe8] sm:$0xff]  ;;  %v787_v51 = vrot.slane %v14431_v40, 1  ;;  %v789_v52 = vrot.slane %v14446_v63, 1  ;;  %v791_v53 = vrot.slane %v14454_v13, 1 }
 0x10f   : > { %746 = vrot.lane.b32.xlu1 %v718_v42, %s14156_s15  ;;  %12602 = vmatprep.mubr.msk.bf16.mxu1 %vm461_vm0, %v946_v49  ;;  %v786_v50 = vsel %vm783_vm5, %v784_v43, %v785_v44  ;;  %v843_v23 = vsel %vm816_vm2, %v838_v30, %v842_v45  ;;  %v721_v24 = vor.u32 %v719_v9, %v717_v25  ;;  %v793_v40 = vrot.slane %v14475_v39, 1  ;;  %v13560_v9 = vld [vmem:[#allocation6 + $0x140] sm:$0xff]   ;;  %v13570_v25 = vld [vmem:[#allocation6 + $0x168] sm:$0xff]   ;;  %v13575_v30 = vld [vmem:[#allocation6 + $0x178] sm:$0xff]  }
 0x110   : > { %856 = vrot.lane.b32.xlu0 %v839_v41, %s14156_s15  ;;  %v846_v54 = vor.u32 %v845_v46, %v844_v48  ;;  %807 = vst.msk [vmem:[#allocation2 + $0x68] sm:$0xff] %vm461_vm0, %v786_v50  ;;  %v788_v55 = vsel %vm783_vm5, %v785_v44, %v787_v51  ;;  %v790_v56 = vsel %vm783_vm5, %v787_v51, %v789_v52  ;;  %v733_v13 = vrot.slane %v731_v37, 1  ;;  %v14574_v26 = vld [vmem:[#allocation6 + $0x1c0] sm:$0xff]  }
 0x111   : > { %v792_v59 = vsel %vm783_vm5, %v789_v52, %v791_v53  ;;  %v726_v63 = vsel %vm674_vm3, %v721_v24, %v725_v47  ;;  %808 = vst.msk [vmem:[#allocation2 + $0x80] sm:$0xff] %vm461_vm0, %v788_v55  ;;  %809 = vst.msk [vmem:[#allocation2 + $0x98] sm:$0xff] %vm461_vm0, %v790_v56  ;;  %v795_v60 = vrot.slane %v14488_v57, 1  ;;  %v797_v61 = vrot.slane %v14506_v16, 1  ;;  %11087 = vmatpush3.bf16.msra.mxu0 %v13560_v9  ;;  %v13558_v16 = vld [vmem:[#allocation6 + $0x98] sm:$0xff]  }
 0x112   : > { %810 = vst.msk [vmem:[#allocation2 + $0xb0] sm:$0xff] %vm461_vm0, %v792_v59  ;;  %v952_v0 = vld [vmem:[#allocation2 + $0x118] sm:$0xff]  ;;  %v794_v1 = vsel %vm783_vm5, %v791_v53, %v793_v40  ;;  %v729_v39 = vor.u32 %v727_v31, %v725_v47  ;;  %v847_v57 = vsel %vm816_vm2, %v842_v45, %v846_v54  ;;  %v737_v5 = vor.u32 %v735_v38, %v733_v13  ;;  %v13582_v45 = vld [vmem:[#allocation6 + $0x220] sm:$0xff]  }
 0x113   : > { %748 = vrot.lane.b32.xlu1 %v726_v63, %s14156_s15  ;;  %v949_v62 = vld [vmem:[#allocation2 + $0x100] sm:$0xff]  ;;  %811 = vst.msk [vmem:[#allocation2 + $0xc8] sm:$0xff] %vm461_vm0, %v794_v1  ;;  %v796_v58 = vsel %vm783_vm5, %v793_v40, %v795_v60  ;;  %v798_v2 = vsel %vm783_vm5, %v795_v60, %v797_v61  ;;  %11088 = vmatprep.subr.bf16.mxu0 %v13561_v10 }
 0x114   : > { %858 = vrot.lane.b32.xlu0 %v843_v23, %s14156_s15  ;;  %12603 = vmatmul.mubr.msk.bf16.gmra.mrb[16].mxu1 %vm461_vm0, %v949_v62  ;;  %815 = vst.msk [vmem:[#allocation2 + $0x110] sm:$0x7f] %vm814_vm6, %v797_v61  ;;  %v734_v3 = vsel %vm674_vm3, %v729_v39, %v733_v13 }
 0x115   : > { %12606 = vmatprep.mubr.msk.bf16.mxu1 %vm461_vm0, %v952_v0  ;;  %812 = vst.msk [vmem:[#allocation2 + $0xe0] sm:$0xff] %vm461_vm0, %v796_v58  ;;  %813 = vst.msk [vmem:[#allocation2 + $0xf8] sm:$0xff] %vm461_vm0, %v798_v2  ;;  %11089 = vmatpush3.bf16.msra.mxu0 %v13562_v11 }
 0x116   : > { %11090 = vmatprep.subr.bf16.mxu0 %v13563_v15 }
 0x117   : > { %750 = vrot.lane.b32.xlu1 %v734_v3, %s14156_s15 }
 0x118   : > { %860 = vrot.lane.b32.xlu0 %v847_v57, %s14156_s15 }
 0x119   : > { %11091 = vmatpush3.bf16.msra.mxu0 %v13564_v17  ;;  %v14672_v17 = vld [vmem:[#allocation2] sm:$0xff] }
 0x11a   : > { %11092 = vmatprep.subr.bf16.mxu0 %v13565_v18  ;;  %v14022_v18 = vld [vmem:[#allocation2 + $0x28] sm:$0xff] }
 0x11b   : > { %752 = vrot.lane.b32.xlu1 %v737_v5, %s14156_s15  ;;  %v881_v56 = vld [vmem:[#allocation2 + $0x110] sm:$0x7f] }
 0x11c   : > { %862 = vrot.lane.b32.xlu0 %v846_v54, %s14156_s15  ;;  %12607 = vmatmul.mubr.msk.bf16.gmra.mrb[20].mxu1 %vm461_vm0, %v995_v4  ;;  %v772_v54 = vld [vmem:[#allocation2 + $0x108] sm:$0xff] }
 0x11d   : > { %1605 = vmatprep.mubr.bf16.mxu1 %v14567_v6  ;;  %11093 = vmatpush3.bf16.msra.mxu0 %v13566_v19 }
 0x11e   : > { %11094 = vmatprep.subr.bf16.mxu0 %v13567_v20 }
 0x121   : > { %11095 = vmatpush3.bf16.msra.mxu0 %v13568_v21 }
 0x122   : > { %11096 = vmatprep.subr.bf16.mxu0 %v13569_v22  ;;  %v13577_v22 = vld [vmem:[#allocation6 + $0x1d0] sm:$0xff]  }
 0x124   : > { %1606 = vmatmul.mubr.bf16.vlgmr.msra.gmra.mrb[24].mxu1 %v14567_v6 }
 0x125   : > { %12611 = vmatpush3.bf16.msra.mxu1 %v14020_v14  ;;  %1613 = vmatprep.mubr.bf16.mxu1 %v14567_v6 }
 0x126   : > { %12612 = vmatprep.subr.bf16.mxu1 %v13556_v8  ;;  %11097 = vmatpush3.bf16.msra.mxu0 %v13570_v25 }
 0x127   : > { %11098 = vmatprep.subr.bf16.mxu0 %v13572_v27 }
 0x129   : > { %12613 = vmatpush3.bf16.msra.mxu1 %v13556_v8  ;;  %v919_v8 = vld [vmem:[#allocation2 + $0x10] sm:$0xff] }
 0x12a   : > { %12614 = vmatprep.subr.bf16.mxu1 %v13557_v12  ;;  %11099 = vmatpush3.bf16.msra.mxu0 %v13573_v28  ;;  %v13583_v28 = vld [vmem:[#allocation6 + $0x1e0] sm:$0xff]  }
 0x12b   : > { %11100 = vmatprep.subr.bf16.mxu0 %v13574_v29  ;;  %v13578_v29 = vld [vmem:[#allocation6 + $0x1d8] sm:$0xff]  }
 0x12c   : > { %1614 = vmatmul.mubr.bf16.gmra.mrb[28].mxu1 %v14567_v6 }
 0x12d   : > { %1621 = vmatprep.mubr.bf16.mxu1 %v14567_v6  ;;  %12615 = vmatpush3.bf16.msra.mxu1 %v13557_v12 }
 0x12e   : > { %12616 = vmatprep.subr.bf16.mxu1 %v13558_v16  ;;  %11101 = vmatpush3.bf16.msra.mxu0 %v13575_v30  ;;  %v13584_v30 = vld [vmem:[#allocation6 + $0x228] sm:$0xff]  }
 0x12f   : > { %11190 = vmatprep.subr.bf16.mxu0 %v13582_v45  ;;  %v14027_v45 = vld [vmem:[#allocation2 + $0xa0] sm:$0xff] }
 0x131   : > { %12617 = vmatpush3.bf16.msra.mxu1 %v13558_v16  ;;  %v13576_v16 = vld [vmem:[#allocation6 + $0x1c8] sm:$0xff]  }
 0x132   : > { %12642 = vmatprep.subr.bf16.mxu1 %v14574_v26 }
 0x134   : > { %1622 = vmatmul.mubr.bf16.gmra.mrb[32].mxu1 %v14567_v6 }
 0x135   : > { %1629 = vmatprep.mubr.bf16.mxu1 %v14567_v6 }
 0x13c   : > { %1630 = vmatmul.mubr.bf16.gmra.mrb[36].mxu1 %v14567_v6 }
 0x156   : > { %v10894_v1 = vpop.f32.mrb[0].mxu0 }
 0x157   : > { %v10895_v2 = vpop.f32.mrb[1].mxu0 }
 0x158   : > { %v14660_v57 = vadd.f32 %v10895_v2, %v10894_v1  ;;  %v10897_v3 = vpop.f32.mrb[2].mxu0  ;;  %v13580_v1 = vld [vmem:[#allocation6 + $0x268] sm:$0xff]  }
 0x159   : > { %v10898_v4 = vpop.f32.mrb[3].mxu0 }
 0x15a   : > { %v14662_v5 = vadd.f32 %v10898_v4, %v10897_v3 }
 0x15e   : > { %v10900_v7 = vpop.f32.mrb[4].mxu0 }
 0x15f   : > { %v10901_v9 = vpop.f32.mrb[5].mxu0 }
 0x160   : > { %v14668_v10 = vadd.f32 %v10901_v9, %v10900_v7  ;;  %v10903_v11 = vpop.f32.mrb[6].mxu0 }
 0x161   : > { %v10904_v12 = vpop.f32.mrb[7].mxu0 }
 0x162   : > { %v14670_v14 = vadd.f32 %v10904_v12, %v10903_v11 }
 0x166   : > { %v10906_v15 = vpop.f32.mrb[8].mxu0 }
 0x167   : > { %v10907_v19 = vpop.f32.mrb[9].mxu0 }
 0x168   : > { %v14678_v20 = vadd.f32 %v10907_v19, %v10906_v15  ;;  %v10909_v21 = vpop.f32.mrb[10].mxu0 }
 0x169   : > { %v10910_v25 = vpop.f32.mrb[11].mxu0 }
 0x16a   : > { %v14681_v27 = vadd.f32 %v10910_v25, %v10909_v21 }
 0x16e   : > { %v849_v31 = vpop.permute.xlu0 %848  ;;  %v739_v32 = vpop.permute.xlu1 %738 }
 0x16f   : > { %872 = vst.msk [vmem:[#allocation2 + $0x68] sm:$0xff] %vm762_vm7, %v849_v31  ;;  %763 = vst.msk [vmem:[#allocation2 + $0x60] sm:$0xff] %vm762_vm7, %v739_v32  ;;  %v14024_v31 = vld [vmem:[#allocation2 + $0x58] sm:$0xff]  ;;  %v13579_v32 = vld [vmem:[#allocation6 + $0x260] sm:$0xff]  }
 0x174   : > { %v741_v33 = vpop.permute.xlu1 %740 }
 0x175   : > { %764 = vst.msk [vmem:[#allocation2 + $0x78] sm:$0xff] %vm762_vm7, %v741_v33  ;;  %v13585_v33 = vld [vmem:[#allocation6 + $0x1e8] sm:$0xff]  }
 0x176   : > { %v851_v34 = vpop.permute.xlu0 %850  ;;  %v14583_v35 = vld [vmem:[#allocation2 + $0x68] sm:$0xff]  ;;  %v14588_v36 = vld [vmem:[#allocation2 + $0x60] sm:$0xff] }
 0x177   : > { %873 = vst.msk [vmem:[#allocation2 + $0x80] sm:$0xff] %vm762_vm7, %v851_v34  ;;  %1248 = vmatprep.mubr.bf16.mxu0 %v14583_v35  ;;  %1637 = vmatprep.mubr.bf16.mxu1 %v14583_v35  ;;  %v13586_v34 = vld [vmem:[#allocation6 + $0x230] sm:$0xff]  }
 0x178   : > { %1249 = vmatmul.mubr.bf16.gmra.mrb[12].mxu0 %v14588_v36  ;;  %1638 = vmatmul.mubr.bf16.gmra.mrb[40].mxu1 %v14588_v36 }
 0x179   : > { %v743_v37 = vpop.permute.xlu1 %742 }
 0x17a   : > { %765 = vst.msk [vmem:[#allocation2 + $0x90] sm:$0xff] %vm762_vm7, %v743_v37  ;;  %v853_v38 = vpop.permute.xlu0 %852  ;;  %v13587_v37 = vld [vmem:[#allocation6 + $0x1f0] sm:$0xff]  }
 0x17b   : > { %874 = vst.msk [vmem:[#allocation2 + $0x98] sm:$0xff] %vm762_vm7, %v853_v38  ;;  %v13589_v38 = vld [vmem:[#allocation6 + $0x238] sm:$0xff]  }
 0x17c   : > { %v14596_v43 = vld [vmem:[#allocation2 + $0x78] sm:$0xff] }
 0x17d   : > { %v745_v41 = vpop.permute.xlu1 %744 }
 0x17e   : > { %v14594_v42 = vld [vmem:[#allocation2 + $0x80] sm:$0xff]  ;;  %766 = vst.msk [vmem:[#allocation2 + $0xa8] sm:$0xff] %vm762_vm7, %v745_v41  ;;  %v855_v44 = vpop.permute.xlu0 %854  ;;  %v14026_v41 = vld [vmem:[#allocation2 + $0x88] sm:$0xff] }
 0x17f   : > { %1256 = vmatprep.mubr.bf16.mxu0 %v14594_v42  ;;  %1645 = vmatprep.mubr.bf16.mxu1 %v14594_v42  ;;  %875 = vst.msk [vmem:[#allocation2 + $0xb0] sm:$0xff] %vm762_vm7, %v855_v44  ;;  %v13590_v44 = vld [vmem:[#allocation6 + $0x1f8] sm:$0xff]  }
 0x180   : > { %1257 = vmatmul.mubr.bf16.gmra.mrb[16].mxu0 %v14596_v43  ;;  %1646 = vmatmul.mubr.bf16.gmra.mrb[44].mxu1 %v14596_v43 }
 0x181   : > { %v747_v47 = vpop.permute.xlu1 %746  ;;  %v14611_v51 = vld [vmem:[#allocation2 + $0x90] sm:$0xff] }
 0x182   : > { %767 = vst.msk [vmem:[#allocation2 + $0xc0] sm:$0xff] %vm762_vm7, %v747_v47  ;;  %v857_v48 = vpop.permute.xlu0 %856  ;;  %v14605_v46 = vld [vmem:[#allocation2 + $0x98] sm:$0xff]  ;;  %v13591_v47 = vld [vmem:[#allocation6 + $0x240] sm:$0xff]  }
 0x183   : > { %876 = vst.msk [vmem:[#allocation2 + $0xc8] sm:$0xff] %vm762_vm7, %v857_v48  ;;  %1264 = vmatprep.mubr.bf16.mxu0 %v14605_v46  ;;  %1653 = vmatprep.mubr.bf16.mxu1 %v14605_v46  ;;  %v13592_v48 = vld [vmem:[#allocation6 + $0x200] sm:$0xff]  }
 0x185   : > { %v749_v49 = vpop.permute.xlu1 %748  ;;  %v14627_v40 = vld [vmem:[#allocation2 + $0xa8] sm:$0xff] }
 0x186   : > { %768 = vst.msk [vmem:[#allocation2 + $0xd8] sm:$0xff] %vm762_vm7, %v749_v49  ;;  %v859_v50 = vpop.permute.xlu0 %858  ;;  %v14616_v52 = vld [vmem:[#allocation2 + $0xb0] sm:$0xff] }
 0x187   : > { %877 = vst.msk [vmem:[#allocation2 + $0xe0] sm:$0xff] %vm762_vm7, %v859_v50  ;;  %v13593_v49 = vld [vmem:[#allocation6 + $0x248] sm:$0xff]   ;;  %v14028_v50 = vld [vmem:[#allocation2 + $0xb8] sm:$0xff] }
 0x188   : > { %1265 = vmatmul.mubr.bf16.gmra.mrb[20].mxu0 %v14611_v51  ;;  %1654 = vmatmul.mubr.bf16.gmra.mrb[48].mxu1 %v14611_v51 }
 0x189   : > { %1272 = vmatprep.mubr.bf16.mxu0 %v14616_v52  ;;  %1661 = vmatprep.mubr.bf16.mxu1 %v14616_v52  ;;  %v751_v53 = vpop.permute.xlu1 %750  ;;  %v14636_v60 = vld [vmem:[#allocation2 + $0xc0] sm:$0xff] }
 0x18a   : > { %769 = vst.msk [vmem:[#allocation2 + $0xf0] sm:$0xff] %vm762_vm7, %v751_v53  ;;  %v861_v23 = vpop.permute.xlu0 %860  ;;  %v14632_v13 = vld [vmem:[#allocation2 + $0xc8] sm:$0xff]  ;;  %v13594_v53 = vld [vmem:[#allocation6 + $0x208] sm:$0xff]  }
 0x18b   : > { %878 = vst.msk [vmem:[#allocation2 + $0xf8] sm:$0xff] %vm762_vm7, %v861_v23  ;;  %v14029_v23 = vld [vmem:[#allocation2 + $0xd0] sm:$0xff] }
 0x18d   : > { %v753_v24 = vpop.permute.xlu1 %752  ;;  %v14644_v62 = vld [vmem:[#allocation2 + $0xd8] sm:$0xff] }
 0x18e   : > { %v14625_v55 = vsel %vm771_vm9, %v753_v24, %v772_v54  ;;  %v863_v59 = vpop.permute.xlu0 %862  ;;  %v14640_v61 = vld [vmem:[#allocation2 + $0xe0] sm:$0xff]  ;;  %v13596_v24 = vld [vmem:[#allocation6 + $0x250] sm:$0xff]  }
 0x18f   : > { %774 = vst [vmem:[#allocation2 + $0x108] sm:$0xff] %v14625_v55  ;;  %v882_v63 = vsel %vm880_vm10, %v863_v59, %v881_v56  ;;  %v13599_v54 = vld [vmem:[#allocation6 + $0x258] sm:$0xff]   ;;  %v14030_v56 = vld [vmem:[#allocation2 + $0xe8] sm:$0xff] }
 0x190   : > { %1273 = vmatmul.mubr.bf16.gmra.mrb[24].mxu0 %v14627_v40  ;;  %1662 = vmatmul.mubr.bf16.gmra.mrb[52].mxu1 %v14627_v40  ;;  %883 = vst [vmem:[#allocation2 + $0x110] sm:$0x7f] %v882_v63  ;;  %v13600_v59 = vld [vmem:[#allocation6 + $0x218] sm:$0xff]   ;;  %v14032_v63 = vld [vmem:[#allocation2 + $0x118] sm:$0xff] }
 0x191   : > { %1280 = vmatprep.mubr.bf16.mxu0 %v14632_v13  ;;  %1669 = vmatprep.mubr.bf16.mxu1 %v14632_v13  ;;  %v14652_v39 = vld [vmem:[#allocation2 + $0xf0] sm:$0xff] }
 0x192   : > { %v14646_v0 = vld [vmem:[#allocation2 + $0xf8] sm:$0xff] }
 0x197   : > { %v14656_v58 = vld [vmem:[#allocation2 + $0x110] sm:$0xff] }
 0x198   : > { %1281 = vmatmul.mubr.bf16.gmra.mrb[28].mxu0 %v14636_v60  ;;  %1670 = vmatmul.mubr.bf16.gmra.mrb[56].mxu1 %v14636_v60 }
 0x199   : > { %1288 = vmatprep.mubr.bf16.mxu0 %v14640_v61  ;;  %1677 = vmatprep.mubr.bf16.mxu1 %v14640_v61 }
 0x1a0   : > { %1289 = vmatmul.mubr.bf16.gmra.mrb[32].mxu0 %v14644_v62  ;;  %1678 = vmatmul.mubr.bf16.gmra.mrb[60].mxu1 %v14644_v62 }
 0x1a1   : > { %1296 = vmatprep.mubr.bf16.mxu0 %v14646_v0  ;;  %1685 = vmatprep.mubr.bf16.mxu1 %v14646_v0 }
 0x1a8   : > { %1297 = vmatmul.mubr.bf16.gmra.mrb[36].mxu0 %v14652_v39  ;;  %1686 = vmatmul.mubr.bf16.gmra.mrb[64].mxu1 %v14652_v39 }
 0x1a9   : > { %1304 = vmatprep.mubr.bf16.mxu0 %v14656_v58  ;;  %1693 = vmatprep.mubr.bf16.mxu1 %v14656_v58 }
 0x1b0   : > { %1305 = vmatmul.mubr.bf16.gmra.mrb[40].mxu0 %v14625_v55  ;;  %1694 = vmatmul.mubr.bf16.gmra.mrb[68].mxu1 %v14625_v55 }
 0x1b1   : > { %1312 = vmatprep.mubr.bf16.mxu0 %v14567_v6  ;;  %12618 = vmatprep.mubr.msk.bf16.mxu1 %vm461_vm0, %v919_v8  ;;  %v14023_v6 = vld [vmem:[#allocation2 + $0x40] sm:$0xff] }
 0x1b8   : > { %1313 = vmatmul.mubr.bf16.gmra.mrb[44].mxu0 %v14672_v17  ;;  %12619 = vmatmul.mubr.msk.bf16.vlgmr.msra.gmra.mrb[0].mxu1 %vm461_vm0, %v14022_v18 }
 0x1b9   : > { %12643 = vmatpush3.bf16.msra.mxu1 %v14574_v26  ;;  %12622 = vmatprep.mubr.msk.bf16.mxu1 %vm461_vm0, %v14023_v6  ;;  %v14685_v26 = vld [vmem:[#allocation2 + $0x70] sm:$0xff] }
 0x1ba   : > { %2095 = vmatprep.mubr.bf16.mxu0 %v14672_v17  ;;  %12644 = vmatprep.subr.bf16.mxu1 %v13576_v16 }
 0x1bd   : > { %12645 = vmatpush3.bf16.msra.mxu1 %v13576_v16 }
 0x1be   : > { %12646 = vmatprep.subr.bf16.mxu1 %v13577_v22 }
 0x1c0   : > { %12623 = vmatmul.mubr.msk.bf16.gmra.mrb[4].mxu1 %vm461_vm0, %v14024_v31  ;;  %2096 = vmatmul.mubr.bf16.vlgmr.msra.gmra.mrb[48].mxu0 %v14672_v17  ;;  %v14760_v31 = vld [vmem:[#allocation2 + $0x70] sm:$0xff] }
 0x1c1   : > { %12626 = vmatprep.mubr.msk.bf16.mxu1 %vm461_vm0, %v14685_v26  ;;  %2103 = vmatprep.mubr.bf16.mxu0 %v14672_v17 }
 0x1c2   : > { %12647 = vmatpush3.bf16.msra.mxu1 %v13577_v22  ;;  %11191 = vmatpush3.bf16.msra.mxu0 %v13583_v28 }
 0x1c3   : > { %12648 = vmatprep.subr.bf16.mxu1 %v13578_v29  ;;  %11192 = vmatprep.subr.bf16.mxu0 %v13584_v30  ;;  %v13601_v30 = vld [vmem:[#allocation6 + $0x2c8] sm:$0xff]  }
 0x1c6   : > { %12649 = vmatpush3.bf16.msra.mxu1 %v13578_v29  ;;  %11193 = vmatpush3.bf16.msra.mxu0 %v13585_v33  ;;  %v13603_v33 = vld [vmem:[#allocation6 + $0x2d0] sm:$0xff]  }
 0x1c7   : > { %12674 = vmatprep.subr.bf16.mxu1 %v13579_v32  ;;  %11194 = vmatprep.subr.bf16.mxu0 %v13586_v34  ;;  %v13604_v34 = vld [vmem:[#allocation6 + $0x290] sm:$0xff]  }
 0x1c8   : > { %12627 = vmatmul.mubr.msk.bf16.gmra.mrb[8].mxu1 %vm461_vm0, %v14026_v41  ;;  %2104 = vmatmul.mubr.bf16.gmra.mrb[52].mxu0 %v14672_v17 }
 0x1c9   : > { %12630 = vmatprep.mubr.msk.bf16.mxu1 %vm461_vm0, %v14027_v45  ;;  %2111 = vmatprep.mubr.bf16.mxu0 %v14583_v35  ;;  %v13598_v35 = vld [vmem:[#allocation6 + $0x210] sm:$0xff]  }
 0x1ca   : > { %11195 = vmatpush3.bf16.msra.mxu0 %v13587_v37  ;;  %v14770_v37 = vld [vmem:[#allocation2 + $0xa0] sm:$0xff] }
 0x1cb   : > { %11196 = vmatprep.subr.bf16.mxu0 %v13589_v38  ;;  %v13605_v38 = vld [vmem:[#allocation6 + $0x2d8] sm:$0xff]  }
 0x1ce   : > { %11197 = vmatpush3.bf16.msra.mxu0 %v13590_v44  ;;  %v14034_v44 = vld [vmem:[#allocation2 + $0x68] sm:$0xff] }
 0x1cf   : > { %11198 = vmatprep.subr.bf16.mxu0 %v13591_v47  ;;  %v13607_v47 = vld [vmem:[#allocation6 + $0x2e0] sm:$0xff]  }
 0x1d0   : > { %12631 = vmatmul.mubr.msk.bf16.gmra.mrb[12].mxu1 %vm461_vm0, %v14028_v50  ;;  %2112 = vmatmul.mubr.bf16.gmra.mrb[56].mxu0 %v14588_v36  ;;  %v14031_v36 = vld [vmem:[#allocation2 + $0x100] sm:$0xff] }
 0x1d1   : > { %12634 = vmatprep.mubr.msk.bf16.mxu1 %vm461_vm0, %v14029_v23  ;;  %2119 = vmatprep.mubr.bf16.mxu0 %v14594_v42  ;;  %v1833_v42 = vld [vmem:[#allocation2 + $0x40] sm:$0xff] }
 0x1d2   : > { %11199 = vmatpush3.bf16.msra.mxu0 %v13592_v48  ;;  %v13608_v48 = vld [vmem:[#allocation6 + $0x2a0] sm:$0xff]  }
 0x1d3   : > { %11200 = vmatprep.subr.bf16.mxu0 %v13593_v49  ;;  %v14779_v49 = vld [vmem:[#allocation2 + $0xd0] sm:$0xff] }
 0x1d6   : > { %11201 = vmatpush3.bf16.msra.mxu0 %v13594_v53  ;;  %v14035_v53 = vld [vmem:[#allocation2 + $0x60] sm:$0xff] }
 0x1d7   : > { %11202 = vmatprep.subr.bf16.mxu0 %v13596_v24  ;;  %v14036_v24 = vld [vmem:[#allocation2 + $0x80] sm:$0xff] }
 0x1d8   : > { %12635 = vmatmul.mubr.msk.bf16.gmra.mrb[16].mxu1 %vm461_vm0, %v14030_v56  ;;  %2120 = vmatmul.mubr.bf16.gmra.mrb[60].mxu0 %v14596_v43  ;;  %v14706_v43 = vld [vmem:[#allocation2 + $0x58] sm:$0xff] }
 0x1d9   : > { %12638 = vmatprep.mubr.msk.bf16.mxu1 %vm461_vm0, %v14031_v36  ;;  %2127 = vmatprep.mubr.bf16.mxu0 %v14605_v46  ;;  %v13581_v46 = vld [vmem:[#allocation6 + $0x270] sm:$0xff]  }
 0x1da   : > { %11203 = vmatpush3.bf16.msra.mxu0 %v13598_v35  ;;  %v13610_v35 = vld [vmem:[#allocation6 + $0x2a8] sm:$0xff]  }
 0x1db   : > { %11204 = vmatprep.subr.bf16.mxu0 %v13599_v54  ;;  %v13611_v54 = vld [vmem:[#allocation6 + $0x2f0] sm:$0xff]  }
 0x1de   : > { %11205 = vmatpush3.bf16.msra.mxu0 %v13600_v59  ;;  %v14787_v59 = vld [vmem:[#allocation2 + $0x100] sm:$0xff] }
 0x1e0   : > { %12639 = vmatmul.mubr.msk.bf16.gmra.mrb[20].mxu1 %vm461_vm0, %v14032_v63  ;;  %2128 = vmatmul.mubr.bf16.gmra.mrb[64].mxu0 %v14611_v51  ;;  %v13588_v51 = vld [vmem:[#allocation6 + $0x278] sm:$0xff]  }
 0x1e1   : > { %2135 = vmatprep.mubr.bf16.mxu0 %v14616_v52  ;;  %12650 = vmatprep.mubr.msk.bf16.mxu1 %vm461_vm0, %v1833_v42  ;;  %v13595_v52 = vld [vmem:[#allocation6 + $0x2c0] sm:$0xff]   ;;  %v14037_v42 = vld [vmem:[#allocation2 + $0x78] sm:$0xff] }
 0x1e8   : > { %2136 = vmatmul.mubr.bf16.gmra.mrb[68].mxu0 %v14627_v40  ;;  %12651 = vmatmul.mubr.msk.bf16.vlgmr.msra.gmra.mrb[0].mxu1 %vm461_vm0, %v14706_v43 }
 0x1e9   : > { %12675 = vmatpush3.bf16.msra.mxu1 %v13579_v32  ;;  %2143 = vmatprep.mubr.bf16.mxu0 %v14632_v13  ;;  %v13602_v32 = vld [vmem:[#allocation6 + $0x288] sm:$0xff]  }
 0x1ea   : > { %12654 = vmatprep.mubr.msk.bf16.mxu1 %vm461_vm0, %v14685_v26  ;;  %12676 = vmatprep.subr.bf16.mxu1 %v13580_v1  ;;  %v14765_v26 = vld [vmem:[#allocation2 + $0x88] sm:$0xff] }
 0x1ed   : > { %12677 = vmatpush3.bf16.msra.mxu1 %v13580_v1  ;;  %v13614_v1 = vld [vmem:[#allocation6 + $0x2b8] sm:$0xff]  }
 0x1ee   : > { %12678 = vmatprep.subr.bf16.mxu1 %v13581_v46 }
 0x1f0   : > { %2144 = vmatmul.mubr.bf16.gmra.mrb[72].mxu0 %v14636_v60  ;;  %12655 = vmatmul.mubr.msk.bf16.gmra.mrb[4].mxu1 %vm461_vm0, %v14026_v41  ;;  %v14775_v41 = vld [vmem:[#allocation2 + $0xb8] sm:$0xff] }
 0x1f1   : > { %2151 = vmatprep.mubr.bf16.mxu0 %v14640_v61  ;;  %12658 = vmatprep.mubr.msk.bf16.mxu1 %vm461_vm0, %v14027_v45  ;;  %v13606_v45 = vld [vmem:[#allocation6 + $0x298] sm:$0xff]  }
 0x1f2   : > { %12679 = vmatpush3.bf16.msra.mxu1 %v13581_v46  ;;  %v13615_v46 = vld [vmem:[#allocation6 + $0x300] sm:$0xff]  }
 0x1f3   : > { %12680 = vmatprep.subr.bf16.mxu1 %v13588_v51 }
 0x1f6   : > { %12681 = vmatpush3.bf16.msra.mxu1 %v13588_v51  ;;  %v14795_v51 = vld [vmem:[#allocation2 + $0x130] sm:$0xff] }
 0x1f7   : > { %11294 = vmatprep.subr.bf16.mxu1 %v13595_v52  ;;  %v10998_v40 = vpop.f32.mrb[24].mxu1  ;;  %v14039_v52 = vld [vmem:[#allocation2 + $0x90] sm:$0xff] }
 0x1f8   : > { %2152 = vmatmul.mubr.bf16.gmra.mrb[76].mxu0 %v14644_v62  ;;  %12659 = vmatmul.mubr.msk.bf16.gmra.mrb[8].mxu1 %vm461_vm0, %v14028_v50  ;;  %v10999_v13 = vpop.f32.mrb[25].mxu1  ;;  %v13609_v50 = vld [vmem:[#allocation6 + $0x2e8] sm:$0xff]  }
 0x1f9   : > { %2159 = vmatprep.mubr.bf16.mxu0 %v14646_v0  ;;  %12662 = vmatprep.mubr.msk.bf16.mxu1 %vm461_vm0, %v14029_v23  ;;  %v11000_v60 = vadd.f32 %v10999_v13, %v10998_v40  ;;  %v11001_v2 = vpop.f32.mrb[26].mxu1  ;;  %v14783_v23 = vld [vmem:[#allocation2 + $0xe8] sm:$0xff]  ;;  %v14040_v40 = vld [vmem:[#allocation2 + $0xb0] sm:$0xff]  ;;  %v14801_v13 = vld [vmem:[#allocation2 + $0x160] sm:$0xff] }
 0x1fa   : > { %v11002_v61 = vpop.f32.mrb[27].mxu1 }
 0x1fb   : > { %v14723_v3 = vadd.f32 %v11000_v60, %v14660_v57  ;;  %v11003_v4 = vadd.f32 %v11002_v61, %v11001_v2  ;;  %v14041_v60 = vld [vmem:[#allocation2 + $0xa8] sm:$0xff]  ;;  %v13616_v61 = vld [vmem:[#allocation6 + $0x308] sm:$0xff]  }
 0x1fc   : > { %v14042_v2 = vld [vmem:[#allocation2 + $0xc8] sm:$0xff] }
 0x1fd   : > { %v14726_v7 = vadd.f32 %v11003_v4, %v14662_v5  ;;  %v2859_v4 = vld [vmem:[#allocation2 + $0x60] sm:$0xff] }
 0x1ff   : > { %v11004_v62 = vpop.f32.mrb[28].mxu1 }
 0x200   : > { %2160 = vmatmul.mubr.bf16.gmra.mrb[80].mxu0 %v14652_v39  ;;  %12663 = vmatmul.mubr.msk.bf16.gmra.mrb[12].mxu1 %vm461_vm0, %v14030_v56  ;;  %v11005_v0 = vpop.f32.mrb[29].mxu1  ;;  %v13612_v56 = vld [vmem:[#allocation6 + $0x2b0] sm:$0xff]  }
 0x201   : > { %2167 = vmatprep.mubr.bf16.mxu0 %v14656_v58  ;;  %12666 = vmatprep.mubr.msk.bf16.mxu1 %vm461_vm0, %v14031_v36  ;;  %v11006_v8 = vadd.f32 %v11005_v0, %v11004_v62  ;;  %v11007_v9 = vpop.f32.mrb[30].mxu1  ;;  %v14033_v58 = vld [vmem:[#allocation2 + $0x130] sm:$0xff]  ;;  %v13613_v36 = vld [vmem:[#allocation6 + $0x2f8] sm:$0xff]  }
 0x202   : > { %v11008_v11 = vpop.f32.mrb[31].mxu1  ;;  %v14043_v62 = vld [vmem:[#allocation2 + $0xc0] sm:$0xff] }
 0x203   : > { %v14733_v57 = vadd.f32 %v11006_v8, %v14668_v10  ;;  %v11009_v12 = vadd.f32 %v11008_v11, %v11007_v9  ;;  %v14044_v0 = vld [vmem:[#allocation2 + $0xe0] sm:$0xff]  ;;  %v13617_v9 = vld [vmem:[#allocation6 + $0x310] sm:$0xff]  }
 0x204   : > { %v2863_v8 = vld [vmem:[#allocation2 + $0x80] sm:$0xff] }
 0x205   : > { %v14736_v5 = vadd.f32 %v11009_v12, %v14670_v14  ;;  %v14745_v14 = vld [vmem:[#allocation2 + $0x148] sm:$0xff] }
 0x207   : > { %v11010_v39 = vpop.f32.mrb[32].mxu1 }
 0x208   : > { %2168 = vmatmul.mubr.bf16.gmra.mrb[84].mxu0 %v14625_v55  ;;  %12667 = vmatmul.mubr.msk.bf16.gmra.mrb[16].mxu1 %vm461_vm0, %v14032_v63  ;;  %v11011_v15 = vpop.f32.mrb[33].mxu1  ;;  %v14791_v63 = vld [vmem:[#allocation2 + $0x118] sm:$0xff] }
 0x209   : > { %2175 = vmatprep.mubr.bf16.mxu0 %v14672_v17  ;;  %12670 = vmatprep.mubr.msk.bf16.mxu1 %vm461_vm0, %v14033_v58  ;;  %v11012_v16 = vadd.f32 %v11011_v15, %v11010_v39  ;;  %v11013_v18 = vpop.f32.mrb[34].mxu1 }
 0x20a   : > { %v11014_v19 = vpop.f32.mrb[35].mxu1 }
 0x20b   : > { %v14743_v10 = vadd.f32 %v11012_v16, %v14678_v20  ;;  %v11015_v6 = vadd.f32 %v11014_v19, %v11013_v18 }
 0x20d   : > { %v14748_v55 = vadd.f32 %v11015_v6, %v14681_v27  ;;  %v13597_v27 = vld [vmem:[#allocation6 + $0x280] sm:$0xff]  }
 0x20f   : > { %v11016_v21 = vpop.f32.mrb[36].mxu1 }
 0x210   : > { %2176 = vmatmul.mubr.bf16.gmra.mrb[88].mxu0 %v14672_v17  ;;  %12671 = vmatmul.mubr.msk.bf16.gmra.mrb[20].mxu1 %vm461_vm0, %v14745_v14  ;;  %v11017_v22 = vpop.f32.mrb[37].mxu1 }
 0x211   : > { %2183 = vmatprep.mubr.bf16.mxu0 %v14672_v17  ;;  %12682 = vmatprep.mubr.msk.bf16.mxu1 %vm461_vm0, %v14706_v43  ;;  %v14756_v20 = vadd.f32 %v11017_v22, %v11016_v21  ;;  %v11019_v25 = vpop.f32.mrb[38].mxu1  ;;  %v14038_v43 = vld [vmem:[#allocation2 + $0x98] sm:$0xff] }
 0x212   : > { %v11020_v28 = vpop.f32.mrb[39].mxu1 }
 0x213   : > { %v14758_v29 = vadd.f32 %v11020_v28, %v11019_v25 }
 0x218   : > { %2184 = vmatmul.mubr.bf16.gmra.mrb[92].mxu0 %v14672_v17  ;;  %12683 = vmatmul.mubr.msk.bf16.vlgmr.msra.gmra.mrb[0].mxu1 %vm461_vm0, %v14760_v31 }
 0x219   : > { %11295 = vmatpush3.bf16.msra.mxu1 %v13597_v27  ;;  %12686 = vmatprep.mubr.msk.bf16.mxu1 %vm461_vm0, %v14765_v26  ;;  %v2862_v27 = vld [vmem:[#allocation2 + $0x78] sm:$0xff] }
 0x21a   : > { %11296 = vmatprep.subr.bf16.mxu1 %v13601_v30  ;;  %2609 = vmatprep.mubr.bf16.mxu0 %v14672_v17  ;;  %v13618_v30 = vld [vmem:[#allocation6 + $0x318] sm:$0xff]  }
 0x21d   : > { %11297 = vmatpush3.bf16.msra.mxu1 %v13602_v32  ;;  %v14045_v32 = vld [vmem:[#allocation2 + $0xd8] sm:$0xff] }
 0x21e   : > { %11298 = vmatprep.subr.bf16.mxu1 %v13603_v33  ;;  %v2866_v33 = vld [vmem:[#allocation2 + $0x98] sm:$0xff] }
 0x220   : > { %2610 = vmatmul.mubr.bf16.vlgmr.msra.gmra.mrb[96].mxu0 %v14672_v17  ;;  %12687 = vmatmul.mubr.msk.bf16.gmra.mrb[4].mxu1 %vm461_vm0, %v14770_v37 }
 0x221   : > { %2617 = vmatprep.mubr.bf16.mxu0 %v14034_v44  ;;  %12690 = vmatprep.mubr.msk.bf16.mxu1 %vm461_vm0, %v14775_v41 }
 0x222   : > { %11299 = vmatpush3.bf16.msra.mxu1 %v13604_v34 }
 0x223   : > { %11300 = vmatprep.subr.bf16.mxu1 %v13605_v38  ;;  %v14046_v38 = vld [vmem:[#allocation2 + $0xf8] sm:$0xff] }
 0x226   : > { %11301 = vmatpush3.bf16.msra.mxu1 %v13606_v45 }
 0x227   : > { %11302 = vmatprep.subr.bf16.mxu1 %v13607_v47 }
 0x228   : > { %2618 = vmatmul.mubr.bf16.gmra.mrb[100].mxu0 %v14035_v53  ;;  %12691 = vmatmul.mubr.msk.bf16.gmra.mrb[8].mxu1 %vm461_vm0, %v14779_v49 }
 0x229   : > { %2625 = vmatprep.mubr.bf16.mxu0 %v14036_v24  ;;  %12694 = vmatprep.mubr.msk.bf16.mxu1 %vm461_vm0, %v14783_v23 }
 0x22a   : > { %11303 = vmatpush3.bf16.msra.mxu1 %v13608_v48 }
 0x22b   : > { %11304 = vmatprep.subr.bf16.mxu1 %v13609_v50 }
 0x22e   : > { %11305 = vmatpush3.bf16.msra.mxu1 %v13610_v35 }
 0x22f   : > { %11306 = vmatprep.subr.bf16.mxu1 %v13611_v54 }
 0x230   : > { %2626 = vmatmul.mubr.bf16.gmra.mrb[104].mxu0 %v14037_v42  ;;  %12695 = vmatmul.mubr.msk.bf16.gmra.mrb[12].mxu1 %vm461_vm0, %v14787_v59  ;;  %v2865_v42 = vld [vmem:[#allocation2 + $0x90] sm:$0xff] }
 0x231   : > { %2633 = vmatprep.mubr.bf16.mxu0 %v14038_v43  ;;  %12698 = vmatprep.mubr.msk.bf16.mxu1 %vm461_vm0, %v14791_v63  ;;  %v14047_v43 = vld [vmem:[#allocation2 + $0xf0] sm:$0xff] }
 0x232   : > { %11307 = vmatpush3.bf16.msra.mxu1 %v13612_v56 }
 0x233   : > { %11308 = vmatprep.subr.bf16.mxu1 %v13613_v36 }
 0x236   : > { %11309 = vmatpush3.bf16.msra.mxu1 %v13614_v1  ;;  %v2869_v1 = vld [vmem:[#allocation2 + $0xb0] sm:$0xff] }
 0x237   : > { %12706 = vmatprep.subr.bf16.mxu1 %v13615_v46 }
 0x238   : > { %2634 = vmatmul.mubr.bf16.gmra.mrb[108].mxu0 %v14039_v52  ;;  %12699 = vmatmul.mubr.msk.bf16.gmra.mrb[16].mxu1 %vm461_vm0, %v14795_v51  ;;  %v14048_v52 = vld [vmem:[#allocation2 + $0x110] sm:$0xff] }
 0x239   : > { %2641 = vmatprep.mubr.bf16.mxu0 %v14040_v40  ;;  %12702 = vmatprep.mubr.msk.bf16.mxu1 %vm461_vm0, %v14745_v14 }
 0x240   : > { %2642 = vmatmul.mubr.bf16.gmra.mrb[112].mxu0 %v14041_v60  ;;  %12703 = vmatmul.mubr.msk.bf16.gmra.mrb[20].mxu1 %vm461_vm0, %v14801_v13 }
 0x241   : > { %2649 = vmatprep.mubr.bf16.mxu0 %v14042_v2  ;;  %3123 = vmatprep.mubr.bf16.mxu1 %v14034_v44 }
 0x248   : > { %2650 = vmatmul.mubr.bf16.gmra.mrb[116].mxu0 %v14043_v62  ;;  %3124 = vmatmul.mubr.bf16.vlgmr.msra.gmra.mrb[72].mxu1 %v2859_v4 }
 0x249   : > { %12707 = vmatpush3.bf16.msra.mxu1 %v13615_v46  ;;  %2657 = vmatprep.mubr.bf16.mxu0 %v14044_v0 }
 0x24a   : > { %3131 = vmatprep.mubr.bf16.mxu1 %v2863_v8  ;;  %12708 = vmatprep.subr.bf16.mxu1 %v13616_v61 }
 0x24b   : > { %v10912_v11 = vpop.f32.mrb[12].mxu0  ;;  %v11022_v12 = vpop.f32.mrb[40].mxu1 }
 0x24c   : > { %v10913_v39 = vpop.f32.mrb[13].mxu0  ;;  %v11023_v58 = vpop.f32.mrb[41].mxu1 }
 0x24d   : > { %v10914_v15 = vadd.f32 %v10913_v39, %v10912_v11  ;;  %v11024_v16 = vadd.f32 %v11023_v58, %v11022_v12  ;;  %v10915_v18 = vpop.f32.mrb[14].mxu0  ;;  %v11025_v19 = vpop.f32.mrb[42].mxu1  ;;  %12709 = vmatpush3.bf16.msra.mxu1 %v13616_v61 }
 0x24e   : > { %v10916_v6 = vpop.f32.mrb[15].mxu0  ;;  %v11026_v21 = vpop.f32.mrb[43].mxu1  ;;  %12710 = vmatprep.subr.bf16.mxu1 %v13617_v9 }
 0x24f   : > { %v14806_v22 = vadd.f32 %v14756_v20, %v10914_v15  ;;  %v10917_v25 = vadd.f32 %v10916_v6, %v10915_v18  ;;  %v11027_v28 = vadd.f32 %v11026_v21, %v11025_v19  ;;  %v14817_v15 = vld [vmem:[#allocation2 + $0x108] sm:$0xff] }
 0x250   : > { %2658 = vmatmul.mubr.bf16.gmra.mrb[120].mxu0 %v14045_v32  ;;  %3132 = vmatmul.mubr.bf16.gmra.mrb[76].mxu1 %v2862_v27  ;;  %v2872_v18 = vld [vmem:[#allocation2 + $0xc8] sm:$0xff] }
 0x251   : > { %v14809_v34 = vadd.f32 %v14758_v29, %v10917_v25  ;;  %2665 = vmatprep.mubr.bf16.mxu0 %v14046_v38  ;;  %3139 = vmatprep.mubr.bf16.mxu1 %v2866_v33 }
 0x252   : > { %12711 = vmatpush3.bf16.msra.mxu1 %v13617_v9 }
 0x253   : > { %v10918_v44 = vpop.f32.mrb[16].mxu0  ;;  %v11028_v45 = vpop.f32.mrb[44].mxu1  ;;  %12712 = vmatprep.subr.bf16.mxu1 %v13618_v30 }
 0x254   : > { %v10919_v20 = vpop.f32.mrb[17].mxu0  ;;  %v11029_v47 = vpop.f32.mrb[45].mxu1 }
 0x255   : > { %v10920_v48 = vadd.f32 %v10919_v20, %v10918_v44  ;;  %v11030_v50 = vadd.f32 %v11029_v47, %v11028_v45  ;;  %v10921_v53 = vpop.f32.mrb[18].mxu0  ;;  %v11031_v24 = vpop.f32.mrb[46].mxu1 }
 0x256   : > { %v10922_v35 = vpop.f32.mrb[19].mxu0  ;;  %v11032_v54 = vpop.f32.mrb[47].mxu1  ;;  %12713 = vmatpush3.bf16.msra.mxu1 %v13618_v30 }
 0x257   : > { %v14811_v56 = vadd.f32 %v11024_v16, %v10920_v48  ;;  %v10923_v29 = vadd.f32 %v10922_v35, %v10921_v53  ;;  %v11033_v36 = vadd.f32 %v11032_v54, %v11031_v24  ;;  %v2868_v16 = vld [vmem:[#allocation2 + $0xa8] sm:$0xff]  ;;  %v2871_v48 = vld [vmem:[#allocation2 + $0xc0] sm:$0xff] }
 0x258   : > { %2666 = vmatmul.mubr.bf16.gmra.mrb[124].mxu0 %v14047_v43  ;;  %3140 = vmatmul.mubr.bf16.gmra.mrb[80].mxu1 %v2865_v42 }
 0x259   : > { %v14813_v46 = vadd.f32 %v11027_v28, %v10923_v29  ;;  %2673 = vmatprep.mubr.bf16.mxu0 %v14048_v52  ;;  %3147 = vmatprep.mubr.bf16.mxu1 %v2869_v1 }
 0x25b   : > { %v10924_v40 = vpop.f32.mrb[20].mxu0  ;;  %v11034_v60 = vpop.f32.mrb[48].mxu1 }
 0x25c   : > { %v10925_v2 = vpop.f32.mrb[21].mxu0  ;;  %v11035_v61 = vpop.f32.mrb[49].mxu1 }
 0x25d   : > { %v10926_v4 = vadd.f32 %v10925_v2, %v10924_v40  ;;  %v11036_v62 = vadd.f32 %v11035_v61, %v11034_v60  ;;  %v10927_v0 = vpop.f32.mrb[22].mxu0  ;;  %v11037_v8 = vpop.f32.mrb[50].mxu1 }
 0x25e   : > { %v10928_v9 = vpop.f32.mrb[23].mxu0  ;;  %v11038_v11 = vpop.f32.mrb[51].mxu1 }
 0x25f   : > { %v14815_v12 = vadd.f32 %v11030_v50, %v10926_v4  ;;  %v10929_v39 = vadd.f32 %v10928_v9, %v10927_v0  ;;  %v11039_v58 = vadd.f32 %v11038_v11, %v11037_v8  ;;  %v2875_v50 = vld [vmem:[#allocation2 + $0xe0] sm:$0xff]  ;;  %v2874_v4 = vld [vmem:[#allocation2 + $0xd8] sm:$0xff] }
 0x260   : > { %2674 = vmatmul.mubr.bf16.gmra.mrb[128].mxu0 %v14817_v15  ;;  %3148 = vmatmul.mubr.bf16.gmra.mrb[84].mxu1 %v2868_v16  ;;  %v14834_v8 = vld [vmem:[#allocation2] sm:$0xff] }
 0x261   : > { %v14820_v19 = vadd.f32 %v11033_v36, %v10929_v39  ;;  %3155 = vmatprep.mubr.bf16.mxu1 %v2872_v18  ;;  %2681 = vmatprep.mubr.bf16.mxu0 %v14672_v17 }
 0x263   : > { %v10930_v6 = vpop.f32.mrb[24].mxu0  ;;  %v11040_v21 = vpop.f32.mrb[52].mxu1 }
 0x264   : > { %v10931_v25 = vpop.f32.mrb[25].mxu0  ;;  %v11041_v28 = vpop.f32.mrb[53].mxu1 }
 0x265   : > { %v10932_v27 = vadd.f32 %v10931_v25, %v10930_v6  ;;  %v11042_v30 = vadd.f32 %v11041_v28, %v11040_v21  ;;  %v10933_v32 = vpop.f32.mrb[26].mxu0  ;;  %v11043_v33 = vpop.f32.mrb[54].mxu1 }
 0x266   : > { %v10934_v38 = vpop.f32.mrb[27].mxu0  ;;  %v11044_v44 = vpop.f32.mrb[55].mxu1 }
 0x267   : > { %v14823_v45 = vadd.f32 %v11036_v62, %v10932_v27  ;;  %v10935_v20 = vadd.f32 %v10934_v38, %v10933_v32  ;;  %v11045_v47 = vadd.f32 %v11044_v44, %v11043_v33  ;;  %v2878_v62 = vld [vmem:[#allocation2 + $0xf8] sm:$0xff]  ;;  %v2877_v32 = vld [vmem:[#allocation2 + $0xf0] sm:$0xff] }
 0x268   : > { %2682 = vmatmul.mubr.bf16.gmra.mrb[132].mxu0 %v14672_v17  ;;  %3156 = vmatmul.mubr.bf16.gmra.mrb[88].mxu1 %v2871_v48  ;;  %v2881_v33 = vld [vmem:[#allocation2 + $0x110] sm:$0xff] }
 0x269   : > { %v14826_v53 = vadd.f32 %v11039_v58, %v10935_v20  ;;  %3163 = vmatprep.mubr.bf16.mxu1 %v2875_v50  ;;  %2689 = vmatprep.mubr.bf16.mxu0 %v14672_v17 }
 0x26b   : > { %v10936_v24 = vpop.f32.mrb[28].mxu0  ;;  %v11046_v35 = vpop.f32.mrb[56].mxu1 }
 0x26c   : > { %v10937_v54 = vpop.f32.mrb[29].mxu0  ;;  %v11047_v29 = vpop.f32.mrb[57].mxu1 }
 0x26d   : > { %v10938_v36 = vadd.f32 %v10937_v54, %v10936_v24  ;;  %v11048_v42 = vadd.f32 %v11047_v29, %v11046_v35  ;;  %v10939_v43 = vpop.f32.mrb[30].mxu0  ;;  %v11049_v1 = vpop.f32.mrb[58].mxu1 }
 0x26e   : > { %v10940_v52 = vpop.f32.mrb[31].mxu0  ;;  %v11050_v40 = vpop.f32.mrb[59].mxu1 }
 0x26f   : > { %v14829_v60 = vadd.f32 %v11042_v30, %v10938_v36  ;;  %v10941_v2 = vadd.f32 %v10940_v52, %v10939_v43  ;;  %v11051_v61 = vadd.f32 %v11050_v40, %v11049_v1 }
 0x270   : > { %2690 = vmatmul.mubr.bf16.gmra.mrb[136].mxu0 %v14672_v17  ;;  %3164 = vmatmul.mubr.bf16.gmra.mrb[92].mxu1 %v2874_v4 }
 0x271   : > { %v14832_v0 = vadd.f32 %v11045_v47, %v10941_v2  ;;  %3171 = vmatprep.mubr.bf16.mxu1 %v2878_v62  ;;  %2697 = vmatprep.mubr.bf16.mxu0 %v14834_v8 }
 0x273   : > { %v10942_v9 = vpop.f32.mrb[32].mxu0  ;;  %v11052_v11 = vpop.f32.mrb[60].mxu1 }
 0x274   : > { %v10943_v39 = vpop.f32.mrb[33].mxu0  ;;  %v11053_v58 = vpop.f32.mrb[61].mxu1 }
 0x275   : > { %v10944_v16 = vadd.f32 %v10943_v39, %v10942_v9  ;;  %v11054_v18 = vadd.f32 %v11053_v58, %v11052_v11  ;;  %v10945_v6 = vpop.f32.mrb[34].mxu0  ;;  %v11055_v21 = vpop.f32.mrb[62].mxu1 }
 0x276   : > { %v10946_v25 = vpop.f32.mrb[35].mxu0  ;;  %v11056_v28 = vpop.f32.mrb[63].mxu1 }
 0x277   : > { %v14837_v17 = vadd.f32 %v11048_v42, %v10944_v16  ;;  %v10947_v27 = vadd.f32 %v10946_v25, %v10945_v6  ;;  %v11057_v30 = vadd.f32 %v11056_v28, %v11055_v21 }
 0x278   : > { %2698 = vmatmul.mubr.bf16.gmra.mrb[140].mxu0 %v14834_v8  ;;  %3172 = vmatmul.mubr.bf16.gmra.mrb[96].mxu1 %v2877_v32 }
 0x279   : > { %v14840_v38 = vadd.f32 %v11051_v61, %v10947_v27  ;;  %3179 = vmatprep.mubr.bf16.mxu1 %v2881_v33 }
 0x27b   : > { %v10948_v44 = vpop.f32.mrb[36].mxu0  ;;  %v11058_v20 = vpop.f32.mrb[64].mxu1 }
 0x27c   : > { %v10949_v47 = vpop.f32.mrb[37].mxu0  ;;  %v11059_v48 = vpop.f32.mrb[65].mxu1 }
 0x27d   : > { %v10950_v50 = vadd.f32 %v10949_v47, %v10948_v44  ;;  %v10951_v24 = vpop.f32.mrb[38].mxu0  ;;  %v11061_v35 = vpop.f32.mrb[66].mxu1  ;;  %v11060_v54 = vadd.f32 %v11059_v48, %v11058_v20 }
 0x27e   : > { %v10952_v29 = vpop.f32.mrb[39].mxu0  ;;  %v11062_v36 = vpop.f32.mrb[67].mxu1 }
 0x27f   : > { %v14842_v42 = vadd.f32 %v11054_v18, %v10950_v50  ;;  %v10953_v43 = vadd.f32 %v10952_v29, %v10951_v24  ;;  %v11063_v1 = vadd.f32 %v11062_v36, %v11061_v35 }
 0x280   : > { %3180 = vmatmul.mubr.bf16.gmra.mrb[100].mxu1 %v14817_v15 }
 0x281   : > { %v14845_v52 = vadd.f32 %v11057_v30, %v10953_v43  ;;  %3187 = vmatprep.mubr.bf16.mxu1 %v14834_v8 }
 0x283   : > { %v10954_v40 = vpop.f32.mrb[40].mxu0  ;;  %v11064_v2 = vpop.f32.mrb[68].mxu1 }
 0x284   : > { %v10955_v61 = vpop.f32.mrb[41].mxu0  ;;  %v11065_v4 = vpop.f32.mrb[69].mxu1 }
 0x285   : > { %v10956_v62 = vadd.f32 %v10955_v61, %v10954_v40  ;;  %v10957_v9 = vpop.f32.mrb[42].mxu0  ;;  %v11067_v11 = vpop.f32.mrb[70].mxu1  ;;  %v11066_v39 = vadd.f32 %v11065_v4, %v11064_v2 }
 0x286   : > { %v10958_v58 = vpop.f32.mrb[43].mxu0  ;;  %v11068_v16 = vpop.f32.mrb[71].mxu1 }
 0x287   : > { %v14848_v18 = vadd.f32 %v11060_v54, %v10956_v62  ;;  %v10959_v6 = vadd.f32 %v10958_v58, %v10957_v9  ;;  %v11069_v21 = vadd.f32 %v11068_v16, %v11067_v11 }
 0x288   : > { %3188 = vmatmul.mubr.bf16.gmra.mrb[104].mxu1 %v14834_v8 }
 0x289   : > { %v14851_v15 = vadd.f32 %v11063_v1, %v10959_v6  ;;  %3195 = vmatprep.mubr.bf16.mxu1 %v14834_v8 }
 0x28b   : > { %v10960_v25 = vpop.f32.mrb[44].mxu0 }
 0x28c   : > { %v10961_v28 = vpop.f32.mrb[45].mxu0 }
 0x28d   : > { %v10962_v27 = vadd.f32 %v10961_v28, %v10960_v25  ;;  %v10963_v30 = vpop.f32.mrb[46].mxu0 }
 0x28e   : > { %v10964_v32 = vpop.f32.mrb[47].mxu0 }
 0x28f   : > { %v14854_v33 = vadd.f32 %v11066_v39, %v10962_v27  ;;  %v10965_v44 = vadd.f32 %v10964_v32, %v10963_v30 }
 0x290   : > { %3196 = vmatmul.mubr.bf16.gmra.mrb[108].mxu1 %v14834_v8 }
 0x291   : > { %v14857_v20 = vadd.f32 %v11069_v21, %v10965_v44  ;;  %3203 = vmatprep.mubr.bf16.mxu1 %v14834_v8 }
 0x293   : > { %v11102_v47 = vpop.f32.mrb[48].mxu0 }
 0x294   : > { %v11103_v48 = vpop.f32.mrb[49].mxu0 }
 0x295   : > { %v11104_v50 = vadd.f32 %v11103_v48, %v11102_v47  ;;  %v11105_v24 = vpop.f32.mrb[50].mxu0 }
 0x296   : > { %v11106_v35 = vpop.f32.mrb[51].mxu0 }
 0x297   : > { %v14861_v54 = vadd.f32 %v14723_v3, %v11104_v50  ;;  %v11107_v29 = vadd.f32 %v11106_v35, %v11105_v24  ;;  %v13619_v35 = vld [vmem:[#allocation8 + $0x180] sm:$0xff]  }
 0x298   : > { %3204 = vmatmul.mubr.bf16.gmra.mrb[112].mxu1 %v14834_v8  ;;  %11398 = vmatprep.subr.bf16.mxu0 %v13619_v35 }
 0x299   : > { %v14865_v36 = vadd.f32 %v14726_v7, %v11107_v29  ;;  %3211 = vmatprep.mubr.bf16.mxu1 %v14834_v8  ;;  %v13620_v29 = vld [vmem:[#allocation8 + $0x140] sm:$0xff]  }
 0x29a   : > { %11399 = vmatpush3.bf16.msra.mxu0 %v13620_v29 }
 0x29b   : > { %v11108_v43 = vpop.f32.mrb[52].mxu0 }
 0x29c   : > { %v11109_v1 = vpop.f32.mrb[53].mxu0 }
 0x29d   : > { %v11110_v40 = vadd.f32 %v11109_v1, %v11108_v43  ;;  %v11111_v2 = vpop.f32.mrb[54].mxu0 }
 0x29e   : > { %v11112_v61 = vpop.f32.mrb[55].mxu0 }
 0x29f   : > { %v14869_v4 = vadd.f32 %v14733_v57, %v11110_v40  ;;  %v11113_v62 = vadd.f32 %v11112_v61, %v11111_v2 }
 0x2a0   : > { %3212 = vmatmul.mubr.bf16.gmra.mrb[116].mxu1 %v14834_v8 }
 0x2a1   : > { %v14873_v3 = vadd.f32 %v14736_v5, %v11113_v62  ;;  %12714 = vmatprep.mubr.msk.bf16.mxu1 %vm461_vm0, %v14760_v31 }
 0x2a3   : > { %v11114_v7 = vpop.f32.mrb[56].mxu0 }
 0x2a4   : > { %v11115_v9 = vpop.f32.mrb[57].mxu0 }
 0x2a5   : > { %v11116_v11 = vadd.f32 %v11115_v9, %v11114_v7  ;;  %v11117_v39 = vpop.f32.mrb[58].mxu0  ;;  %v2894_v7 = vld [vmem:[#allocation2 + $0x178] sm:$0xff]  ;;  %v13621_v9 = vld [vmem:[#allocation8 + $0x188] sm:$0xff]  }
 0x2a6   : > { %v11118_v58 = vpop.f32.mrb[59].mxu0  ;;  %11400 = vmatprep.subr.bf16.mxu0 %v13621_v9 }
 0x2a7   : > { %v14878_v16 = vadd.f32 %v14743_v10, %v11116_v11  ;;  %v11119_v6 = vadd.f32 %v11118_v58, %v11117_v39  ;;  %v13622_v11 = vld [vmem:[#allocation8 + $0x148] sm:$0xff]  }
 0x2a8   : > { %12715 = vmatmul.mubr.msk.bf16.vlgmr.msra.gmra.mrb[0].mxu1 %vm461_vm0, %v14765_v26  ;;  %11401 = vmatpush3.bf16.msra.mxu0 %v13622_v11 }
 0x2a9   : > { %v14883_v57 = vadd.f32 %v14748_v55, %v11119_v6  ;;  %12718 = vmatprep.mubr.msk.bf16.mxu1 %vm461_vm0, %v14770_v37 }
 0x2ab   : > { %v11120_v5 = vpop.f32.mrb[60].mxu0 }
 0x2ac   : > { %v11121_v31 = vpop.f32.mrb[61].mxu0 }
 0x2ad   : > { %v11122_v8 = vadd.f32 %v11121_v31, %v11120_v5  ;;  %v11123_v21 = vpop.f32.mrb[62].mxu0 }
 0x2ae   : > { %v11124_v25 = vpop.f32.mrb[63].mxu0 }
 0x2af   : > { %v14888_v28 = vadd.f32 %v14806_v22, %v11122_v8  ;;  %v11125_v10 = vadd.f32 %v11124_v25, %v11123_v21  ;;  %v13623_v25 = vld [vmem:[#allocation8 + $0x190] sm:$0xff]  }
 0x2b0   : > { %12719 = vmatmul.mubr.msk.bf16.gmra.mrb[4].mxu1 %vm461_vm0, %v14775_v41  ;;  %11402 = vmatprep.subr.bf16.mxu0 %v13623_v25 }
 0x2b1   : > { %v14893_v26 = vadd.f32 %v14809_v34, %v11125_v10  ;;  %12722 = vmatprep.mubr.msk.bf16.mxu1 %vm461_vm0, %v14779_v49 }
 0x2b3   : > { %v11126_v55 = vpop.f32.mrb[64].mxu0 }
 0x2b4   : > { %v11127_v37 = vpop.f32.mrb[65].mxu0 }
 0x2b5   : > { %v11128_v27 = vadd.f32 %v11127_v37, %v11126_v55  ;;  %v11129_v30 = vpop.f32.mrb[66].mxu0 }
 0x2b6   : > { %v11130_v32 = vpop.f32.mrb[67].mxu0 }
 0x2b7   : > { %v14898_v44 = vadd.f32 %v14811_v56, %v11128_v27  ;;  %v11131_v22 = vadd.f32 %v11130_v32, %v11129_v30 }
 0x2b8   : > { %12723 = vmatmul.mubr.msk.bf16.gmra.mrb[8].mxu1 %vm461_vm0, %v14783_v23 }
 0x2b9   : > { %v14903_v41 = vadd.f32 %v14813_v46, %v11131_v22  ;;  %12726 = vmatprep.mubr.msk.bf16.mxu1 %vm461_vm0, %v14787_v59 }
 0x2bb   : > { %v11132_v34 = vpop.f32.mrb[68].mxu0 }
 0x2bc   : > { %v11133_v49 = vpop.f32.mrb[69].mxu0 }
 0x2bd   : > { %v11134_v47 = vadd.f32 %v11133_v49, %v11132_v34  ;;  %v11135_v48 = vpop.f32.mrb[70].mxu0 }
 0x2be   : > { %v11136_v50 = vpop.f32.mrb[71].mxu0 }
 0x2bf   : > { %v14908_v24 = vadd.f32 %v14815_v12, %v11134_v47  ;;  %v11137_v56 = vadd.f32 %v11136_v50, %v11135_v48  ;;  %v13626_v50 = vld [vmem:[#allocation8 + $0x158] sm:$0xff]  }
 0x2c0   : > { %12727 = vmatmul.mubr.msk.bf16.gmra.mrb[12].mxu1 %vm461_vm0, %v14791_v63 }
 0x2c1   : > { %v14913_v23 = vadd.f32 %v14820_v19, %v11137_v56  ;;  %12730 = vmatprep.mubr.msk.bf16.mxu1 %vm461_vm0, %v14795_v51 }
 0x2c3   : > { %v11138_v59 = vpop.f32.mrb[72].mxu0 }
 0x2c4   : > { %v11139_v46 = vpop.f32.mrb[73].mxu0 }
 0x2c5   : > { %v11140_v43 = vadd.f32 %v11139_v46, %v11138_v59  ;;  %v11141_v1 = vpop.f32.mrb[74].mxu0 }
 0x2c6   : > { %v11142_v12 = vpop.f32.mrb[75].mxu0 }
 0x2c7   : > { %v14918_v40 = vadd.f32 %v14823_v45, %v11140_v43  ;;  %v11143_v2 = vadd.f32 %v11142_v12, %v11141_v1 }
 0x2c8   : > { %12731 = vmatmul.mubr.msk.bf16.gmra.mrb[16].mxu1 %vm461_vm0, %v14745_v14 }
 0x2c9   : > { %v14923_v63 = vadd.f32 %v14826_v53, %v11143_v2  ;;  %12734 = vmatprep.mubr.msk.bf16.mxu1 %vm461_vm0, %v14801_v13 }
 0x2cb   : > { %v11144_v51 = vpop.f32.mrb[76].mxu0 }
 0x2cc   : > { %v11145_v19 = vpop.f32.mrb[77].mxu0 }
 0x2cd   : > { %v11146_v61 = vadd.f32 %v11145_v19, %v11144_v51  ;;  %v11147_v62 = vpop.f32.mrb[78].mxu0  ;;  %v13627_v51 = vld [vmem:[#allocation8 + $0x1a0] sm:$0xff]  }
 0x2ce   : > { %v11148_v39 = vpop.f32.mrb[79].mxu0  ;;  %v13628_v19 = vld [vmem:[#allocation8 + $0x160] sm:$0xff]  }
 0x2cf   : > { %v14928_v45 = vadd.f32 %v14829_v60, %v11146_v61  ;;  %v11149_v58 = vadd.f32 %v11148_v39, %v11147_v62  ;;  %v13624_v60 = vld [vmem:[#allocation8 + $0x150] sm:$0xff]  }
 0x2d0   : > { %12735 = vmatmul.mubr.msk.bf16.gmra.mrb[20].mxu1 %vm461_vm0, %v2894_v7  ;;  %11403 = vmatpush3.bf16.msra.mxu0 %v13624_v60 }
 0x2d1   : > { %v14932_v14 = vadd.f32 %v14832_v0, %v11149_v58 }
 0x2d3   : > { %v11150_v13 = vpop.f32.mrb[80].mxu0 }
 0x2d4   : > { %v11151_v53 = vpop.f32.mrb[81].mxu0 }
 0x2d5   : > { %v11152_v6 = vadd.f32 %v11151_v53, %v11150_v13  ;;  %v11153_v5 = vpop.f32.mrb[82].mxu0 }
 0x2d6   : > { %v11154_v31 = vpop.f32.mrb[83].mxu0 }
 0x2d7   : > { %v14935_v8 = vadd.f32 %v14837_v17, %v11152_v6  ;;  %v11155_v21 = vadd.f32 %v11154_v31, %v11153_v5 }
 0x2d9   : > { %v14938_v10 = vadd.f32 %v14840_v38, %v11155_v21  ;;  %v13625_v38 = vld [vmem:[#allocation8 + $0x198] sm:$0xff]  }
 0x2da   : > { %11404 = vmatprep.subr.bf16.mxu0 %v13625_v38  ;;  %v13632_v38 = vld [vmem:[#allocation8 + $0x168] sm:$0xff]  }
 0x2db   : > { %v11156_v55 = vpop.f32.mrb[84].mxu0  ;;  %11405 = vmatpush3.bf16.msra.mxu0 %v13626_v50  ;;  %v13633_v50 = vld [vmem:[#allocation8 + $0x48] sm:$0xff]  }
 0x2dc   : > { %v11157_v37 = vpop.f32.mrb[85].mxu0  ;;  %11406 = vmatprep.subr.bf16.mxu0 %v13627_v51 }
 0x2dd   : > { %v11158_v0 = vadd.f32 %v11157_v37, %v11156_v55  ;;  %v11159_v27 = vpop.f32.mrb[86].mxu0  ;;  %v13629_v55 = vld [vmem:[#allocation8 + $0x40] sm:$0xff]  }
 0x2de   : > { %v11160_v30 = vpop.f32.mrb[87].mxu0  ;;  %11542 = vmatprep.subr.bf16.mxu1 %v13629_v55 }
 0x2df   : > { %v14941_v32 = vadd.f32 %v14842_v42, %v11158_v0  ;;  %v11161_v22 = vadd.f32 %v11160_v30, %v11159_v27  ;;  %11407 = vmatpush3.bf16.msra.mxu0 %v13628_v19  ;;  %v13630_v0 = vld [vmem:[#allocation8 + $0x1a8] sm:$0xff]   ;;  %v13637_v19 = vld [vmem:[#allocation8 + $0x58] sm:$0xff]  }
 0x2e0   : > { %11408 = vmatprep.subr.bf16.mxu0 %v13630_v0  ;;  %v13644_v0 = vld [vmem:[#allocation8 + $0x28] sm:$0xff]  }
 0x2e1   : > { %v14944_v17 = vadd.f32 %v14845_v52, %v11161_v22 }
 0x2e3   : > { %v11162_v34 = vpop.f32.mrb[88].mxu0  ;;  %11409 = vmatpush3.bf16.msra.mxu0 %v13632_v38 }
 0x2e4   : > { %v11163_v49 = vpop.f32.mrb[89].mxu0 }
 0x2e5   : > { %v11164_v47 = vadd.f32 %v11163_v49, %v11162_v34  ;;  %v11165_v48 = vpop.f32.mrb[90].mxu0 }
 0x2e6   : > { %v11166_v56 = vpop.f32.mrb[91].mxu0 }
 0x2e7   : > { %v14947_v35 = vadd.f32 %v14848_v18, %v11164_v47  ;;  %v11167_v29 = vadd.f32 %v11166_v56, %v11165_v48 }
 0x2e9   : > { %v14950_v42 = vadd.f32 %v14851_v15, %v11167_v29  ;;  %v13634_v29 = vld [vmem:[#allocation8 + $0x8] sm:$0xff]  }
 0x2eb   : > { %v11168_v59 = vpop.f32.mrb[92].mxu0 }
 0x2ec   : > { %v11169_v46 = vpop.f32.mrb[93].mxu0 }
 0x2ed   : > { %v11170_v52 = vadd.f32 %v11169_v46, %v11168_v59  ;;  %v11171_v43 = vpop.f32.mrb[94].mxu0  ;;  %v13636_v46 = vld [vmem:[#allocation8 + $0x10] sm:$0xff]  }
 0x2ee   : > { %v11172_v1 = vpop.f32.mrb[95].mxu0 }
 0x2ef   : > { %v14953_v12 = vadd.f32 %v14854_v33, %v11170_v52  ;;  %v11173_v2 = vadd.f32 %v11172_v1, %v11171_v43 }
 0x2f1   : > { %v14956_v18 = vadd.f32 %v14857_v20, %v11173_v2 }
 0x2f3   : > { %v11206_v61 = vpop.f32.mrb[96].mxu0 }
 0x2f4   : > { %v11207_v62 = vpop.f32.mrb[97].mxu0 }
 0x2f5   : > { %v11208_v15 = vadd.f32 %v11207_v62, %v11206_v61  ;;  %v11209_v7 = vpop.f32.mrb[98].mxu0  ;;  %v13639_v62 = vld [vmem:[#allocation8 + $0x18] sm:$0xff]  }
 0x2f6   : > { %v11210_v9 = vpop.f32.mrb[99].mxu0 }
 0x2f7   : > { %v11211_v11 = vadd.f32 %v11210_v9, %v11209_v7  ;;  %v14959_v39 = vadd.f32 %v14861_v54, %v11208_v15  ;;  %v13641_v15 = vld [vmem:[#allocation8 + $0x60] sm:$0xff]  }
 0x2f9   : > { %v14962_v33 = vadd.f32 %v14865_v36, %v11211_v11  ;;  %v13631_v36 = vld [vmem:[#allocation8] sm:$0xff]  }
 0x2fa   : > { %11543 = vmatpush3.bf16.msra.mxu1 %v13631_v36  ;;  %v13642_v11 = vld [vmem:[#allocation8 + $0x20] sm:$0xff]   ;;  %v13638_v36 = vld [vmem:[#allocation8 + $0x1b0] sm:$0xff]  }
 0x2fb   : > { %v11212_v58 = vpop.f32.mrb[100].mxu0  ;;  %11544 = vmatprep.subr.bf16.mxu1 %v13633_v50  ;;  %11410 = vmatprep.subr.bf16.mxu0 %v13638_v36 }
 0x2fc   : > { %v11213_v13 = vpop.f32.mrb[101].mxu0 }
 0x2fd   : > { %v11214_v53 = vadd.f32 %v11213_v13, %v11212_v58  ;;  %v11215_v6 = vpop.f32.mrb[102].mxu0 }
 0x2fe   : > { %v11216_v20 = vpop.f32.mrb[103].mxu0  ;;  %11545 = vmatpush3.bf16.msra.mxu1 %v13634_v29 }
 0x2ff   : > { %v11217_v5 = vadd.f32 %v11216_v20, %v11215_v6  ;;  %v14965_v31 = vadd.f32 %v14869_v4, %v11214_v53 }
 0x301   : > { %v14968_v21 = vadd.f32 %v14873_v3, %v11217_v5 }
 0x303   : > { %v11218_v25 = vpop.f32.mrb[104].mxu0 }
 0x304   : > { %v11219_v60 = vpop.f32.mrb[105].mxu0 }
 0x305   : > { %v11220_v54 = vadd.f32 %v11219_v60, %v11218_v25  ;;  %v11221_v37 = vpop.f32.mrb[106].mxu0  ;;  %v13643_v60 = vld [vmem:[#allocation8 + $0x68] sm:$0xff]  }
 0x306   : > { %v11222_v27 = vpop.f32.mrb[107].mxu0 }
 0x307   : > { %v11223_v30 = vadd.f32 %v11222_v27, %v11221_v37  ;;  %v14971_v22 = vadd.f32 %v14878_v16, %v11220_v54  ;;  %v13640_v27 = vld [vmem:[#allocation8 + $0x170] sm:$0xff]  }
 0x308   : > { %11411 = vmatpush3.bf16.msra.mxu0 %v13640_v27 }
 0x309   : > { %v14974_v4 = vadd.f32 %v14883_v57, %v11223_v30  ;;  %v13635_v57 = vld [vmem:[#allocation8 + $0x50] sm:$0xff]  }
 0x30a   : > { %11546 = vmatprep.subr.bf16.mxu1 %v13635_v57 }
 0x30b   : > { %v11224_v3 = vpop.f32.mrb[108].mxu0  ;;  %11547 = vmatpush3.bf16.msra.mxu1 %v13636_v46  ;;  %v13649_v46 = vld [vmem:[#allocation8 + $0x78] sm:$0xff]  }
 0x30c   : > { %v11225_v34 = vpop.f32.mrb[109].mxu0  ;;  %11548 = vmatprep.subr.bf16.mxu1 %v13637_v19 }
 0x30d   : > { %v11226_v49 = vadd.f32 %v11225_v34, %v11224_v3  ;;  %v11227_v47 = vpop.f32.mrb[110].mxu0  ;;  %v13645_v34 = vld [vmem:[#allocation8 + $0x70] sm:$0xff]  }
 0x30e   : > { %v11228_v48 = vpop.f32.mrb[111].mxu0 }
 0x30f   : > { %v11229_v56 = vadd.f32 %v11228_v48, %v11227_v47  ;;  %v14977_v59 = vadd.f32 %v14888_v28, %v11226_v49  ;;  %11549 = vmatpush3.bf16.msra.mxu1 %v13639_v62 }
 0x310   : > { %11550 = vmatprep.subr.bf16.mxu1 %v13641_v15 }
 0x311   : > { %v14980_v16 = vadd.f32 %v14893_v26, %v11229_v56 }
 0x313   : > { %v11230_v52 = vpop.f32.mrb[112].mxu0  ;;  %11551 = vmatpush3.bf16.msra.mxu1 %v13642_v11 }
 0x314   : > { %v11231_v43 = vpop.f32.mrb[113].mxu0  ;;  %11552 = vmatprep.subr.bf16.mxu1 %v13643_v60 }
 0x315   : > { %v11232_v1 = vadd.f32 %v11231_v43, %v11230_v52  ;;  %v11233_v2 = vpop.f32.mrb[114].mxu0 }
 0x316   : > { %v11234_v51 = vpop.f32.mrb[115].mxu0 }
 0x317   : > { %v11235_v61 = vadd.f32 %v11234_v51, %v11233_v2  ;;  %v14983_v28 = vadd.f32 %v14898_v44, %v11232_v1  ;;  %11553 = vmatpush3.bf16.msra.mxu1 %v13644_v0  ;;  %v13650_v2 = vld [vmem:[#allocation8 + $0x38] sm:$0xff]  }
 0x318   : > { %11554 = vmatprep.subr.bf16.mxu1 %v13645_v34 }
 0x319   : > { %v14986_v26 = vadd.f32 %v14903_v41, %v11235_v61 }
 0x31b   : > { %v11236_v7 = vpop.f32.mrb[116].mxu0  ;;  %v11310_v9 = vpop.f32.mrb[72].mxu1 }
 0x31c   : > { %v11237_v58 = vpop.f32.mrb[117].mxu0  ;;  %v11311_v13 = vpop.f32.mrb[73].mxu1 }
 0x31d   : > { %v11238_v53 = vadd.f32 %v11237_v58, %v11236_v7  ;;  %v11312_v6 = vadd.f32 %v11311_v13, %v11310_v9  ;;  %v11239_v20 = vpop.f32.mrb[118].mxu0  ;;  %v11313_v5 = vpop.f32.mrb[74].mxu1  ;;  %v13646_v9 = vld [vmem:[#allocation8 + $0x1b8] sm:$0xff]  }
 0x31e   : > { %v11240_v25 = vpop.f32.mrb[119].mxu0  ;;  %v11314_v44 = vpop.f32.mrb[75].mxu1  ;;  %11412 = vmatprep.subr.bf16.mxu0 %v13646_v9 }
 0x31f   : > { %v11241_v55 = vadd.f32 %v11240_v25, %v11239_v20  ;;  %v11315_v54 = vadd.f32 %v11314_v44, %v11313_v5  ;;  %v14989_v41 = vadd.f32 %v14959_v39, %v11312_v6  ;;  %v14992_v37 = vadd.f32 %v14908_v24, %v11238_v53  ;;  %v13647_v39 = vld [vmem:[#allocation8 + $0x30] sm:$0xff]  }
 0x320   : > { %11555 = vmatpush3.bf16.msra.mxu1 %v13647_v39 }
 0x321   : > { %v14995_v30 = vadd.f32 %v14962_v33, %v11315_v54  ;;  %v14998_v3 = vadd.f32 %v14913_v23, %v11241_v55  ;;  %11556 = vmatprep.subr.bf16.mxu1 %v13649_v46 }
 0x323   : > { %v11242_v49 = vpop.f32.mrb[120].mxu0  ;;  %v11316_v47 = vpop.f32.mrb[76].mxu1 }
 0x324   : > { %v11243_v48 = vpop.f32.mrb[121].mxu0  ;;  %v11317_v24 = vpop.f32.mrb[77].mxu1  ;;  %11557 = vmatpush3.bf16.msra.mxu1 %v13650_v2 }
 0x325   : > { %v11244_v38 = vadd.f32 %v11243_v48, %v11242_v49  ;;  %v11318_v50 = vadd.f32 %v11317_v24, %v11316_v47  ;;  %v11245_v56 = vpop.f32.mrb[122].mxu0  ;;  %v11319_v29 = vpop.f32.mrb[78].mxu1 }
 0x326   : > { %v11246_v33 = vpop.f32.mrb[123].mxu0  ;;  %v11320_v57 = vpop.f32.mrb[79].mxu1 }
 0x327   : > { %v11247_v23 = vadd.f32 %v11246_v33, %v11245_v56  ;;  %v11321_v52 = vadd.f32 %v11320_v57, %v11319_v29  ;;  %v15001_v43 = vadd.f32 %v14965_v31, %v11318_v50  ;;  %v15004_v1 = vadd.f32 %v14918_v40, %v11244_v38  ;;  %v13648_v40 = vld [vmem:[#allocation8 + $0x178] sm:$0xff]  }
 0x328   : > { %11413 = vmatpush3.bf16.msra.mxu0 %v13648_v40 }
 0x329   : > { %v15007_v51 = vadd.f32 %v14968_v21, %v11321_v52  ;;  %v15010_v19 = vadd.f32 %v14923_v63, %v11247_v23 }
 0x32b   : > { %v11248_v61 = vpop.f32.mrb[124].mxu0  ;;  %v11322_v62 = vpop.f32.mrb[80].mxu1 }
 0x32c   : > { %v11249_v15 = vpop.f32.mrb[125].mxu0  ;;  %v11323_v7 = vpop.f32.mrb[81].mxu1 }
 0x32d   : > { %v11250_v11 = vadd.f32 %v11249_v15, %v11248_v61  ;;  %v11324_v31 = vadd.f32 %v11323_v7, %v11322_v62  ;;  %v11251_v58 = vpop.f32.mrb[126].mxu0  ;;  %v11325_v13 = vpop.f32.mrb[82].mxu1 }
 0x32e   : > { %v11252_v53 = vpop.f32.mrb[127].mxu0  ;;  %v11326_v6 = vpop.f32.mrb[83].mxu1 }
 0x32f   : > { %v11253_v20 = vadd.f32 %v11252_v53, %v11251_v58  ;;  %v11327_v21 = vadd.f32 %v11326_v6, %v11325_v13  ;;  %v15013_v5 = vadd.f32 %v14971_v22, %v11324_v31  ;;  %v15016_v63 = vadd.f32 %v14928_v45, %v11250_v11 }
 0x331   : > { %v15019_v25 = vadd.f32 %v14974_v4, %v11327_v21  ;;  %v15022_v44 = vadd.f32 %v14932_v14, %v11253_v20 }
 0x333   : > { %v11254_v60 = vpop.f32.mrb[128].mxu0  ;;  %v11328_v55 = vpop.f32.mrb[84].mxu1 }
 0x334   : > { %v11255_v54 = vpop.f32.mrb[129].mxu0  ;;  %v11329_v0 = vpop.f32.mrb[85].mxu1 }
 0x335   : > { %v11256_v36 = vadd.f32 %v11255_v54, %v11254_v60  ;;  %v11330_v27 = vadd.f32 %v11329_v0, %v11328_v55  ;;  %v11257_v34 = vpop.f32.mrb[130].mxu0  ;;  %v11331_v49 = vpop.f32.mrb[86].mxu1  ;;  %v13659_v55 = vld [vmem:[#allocation8 + $0x2c0] sm:$0xff]  }
 0x336   : > { %v11258_v22 = vpop.f32.mrb[131].mxu0  ;;  %v11332_v47 = vpop.f32.mrb[87].mxu1  ;;  %11686 = vmatprep.subr.bf16.mxu1 %v13659_v55 }
 0x337   : > { %v11259_v39 = vadd.f32 %v11258_v22, %v11257_v34  ;;  %v11333_v45 = vadd.f32 %v11332_v47, %v11331_v49  ;;  %v15025_v48 = vadd.f32 %v14977_v59, %v11330_v27  ;;  %v15028_v4 = vadd.f32 %v14935_v8, %v11256_v36 }
 0x339   : > { %v15031_v14 = vadd.f32 %v14980_v16, %v11333_v45  ;;  %v15034_v24 = vadd.f32 %v14938_v10, %v11259_v39 }
 0x33b   : > { %v11260_v38 = vpop.f32.mrb[132].mxu0  ;;  %v11334_v50 = vpop.f32.mrb[88].mxu1 }
 0x33c   : > { %v11261_v56 = vpop.f32.mrb[133].mxu0  ;;  %v11335_v29 = vpop.f32.mrb[89].mxu1 }
 0x33d   : > { %v11262_v33 = vadd.f32 %v11261_v56, %v11260_v38  ;;  %v11336_v57 = vadd.f32 %v11335_v29, %v11334_v50  ;;  %v11263_v46 = vpop.f32.mrb[134].mxu0  ;;  %v11337_v23 = vpop.f32.mrb[90].mxu1 }
 0x33e   : > { %v11264_v52 = vpop.f32.mrb[135].mxu0  ;;  %v11338_v59 = vpop.f32.mrb[91].mxu1 }
 0x33f   : > { %v11265_v2 = vadd.f32 %v11264_v52, %v11263_v46  ;;  %v11339_v61 = vadd.f32 %v11338_v59, %v11337_v23  ;;  %v15037_v8 = vadd.f32 %v14983_v28, %v11336_v57  ;;  %v13100_v16 = vadd.f32 %v14941_v32, %v11262_v33  ;;  %v13651_v32 = vld [vmem:[#allocation8 + $0x200] sm:$0xff]  }
 0x340   : > { %11462 = vmatprep.subr.bf16.mxu0 %v13651_v32 }
 0x341   : > { %v15041_v10 = vadd.f32 %v14986_v26, %v11339_v61  ;;  %v13110_v62 = vadd.f32 %v14944_v17, %v11265_v2 }
 0x343   : > { %v11266_v15 = vpop.f32.mrb[136].mxu0  ;;  %v11340_v7 = vpop.f32.mrb[92].mxu1 }
 0x344   : > { %v11267_v9 = vpop.f32.mrb[137].mxu0  ;;  %v11341_v11 = vpop.f32.mrb[93].mxu1 }
 0x345   : > { %v11268_v31 = vadd.f32 %v11267_v9, %v11266_v15  ;;  %v11342_v58 = vadd.f32 %v11341_v11, %v11340_v7  ;;  %v11269_v13 = vpop.f32.mrb[138].mxu0  ;;  %v11343_v40 = vpop.f32.mrb[94].mxu1 }
 0x346   : > { %v11270_v53 = vpop.f32.mrb[139].mxu0  ;;  %v11344_v6 = vpop.f32.mrb[95].mxu1 }
 0x347   : > { %v11271_v20 = vadd.f32 %v11270_v53, %v11269_v13  ;;  %v11345_v28 = vadd.f32 %v11344_v6, %v11343_v40  ;;  %v15045_v21 = vadd.f32 %v14992_v37, %v11342_v58  ;;  %v13125_v26 = vadd.f32 %v14947_v35, %v11268_v31 }
 0x349   : > { %v15049_v17 = vadd.f32 %v14998_v3, %v11345_v28  ;;  %v13135_v60 = vadd.f32 %v14950_v42, %v11271_v20 }
 0x34b   : > { %v11272_v54 = vpop.f32.mrb[140].mxu0  ;;  %v11346_v0 = vpop.f32.mrb[96].mxu1 }
 0x34c   : > { %v11273_v36 = vpop.f32.mrb[141].mxu0  ;;  %v11347_v27 = vpop.f32.mrb[97].mxu1 }
 0x34d   : > { %v11274_v34 = vadd.f32 %v11273_v36, %v11272_v54  ;;  %v11348_v49 = vadd.f32 %v11347_v27, %v11346_v0  ;;  %v11275_v22 = vpop.f32.mrb[142].mxu0  ;;  %v11349_v37 = vpop.f32.mrb[98].mxu1 }
 0x34e   : > { %v11276_v47 = vpop.f32.mrb[143].mxu0  ;;  %v11350_v39 = vpop.f32.mrb[99].mxu1 }
 0x34f   : > { %v11277_v45 = vadd.f32 %v11276_v47, %v11275_v22  ;;  %v11351_v35 = vadd.f32 %v11350_v39, %v11349_v37  ;;  %v15053_v3 = vadd.f32 %v15004_v1, %v11348_v49  ;;  %v13120_v38 = vadd.f32 %v14953_v12, %v11274_v34  ;;  %v15087_v37 = vld [vmem:[%s16584_s4] ss:$0 sm:$0xff] }
 0x350   : > { %v15093_v47 = vld [vmem:[%s16585_s5] ss:$0 sm:$0xff] }
 0x351   : > { %v15057_v42 = vadd.f32 %v15010_v19, %v11351_v35  ;;  %v13130_v50 = vadd.f32 %v14956_v18, %v11277_v45 }
 0x353   : > { %v11352_v56 = vpop.f32.mrb[100].mxu1 }
 0x354   : > { %v11353_v29 = vpop.f32.mrb[101].mxu1 }
 0x355   : > { %v11354_v33 = vadd.f32 %v11353_v29, %v11352_v56  ;;  %v11355_v57 = vpop.f32.mrb[102].mxu1 }
 0x356   : > { %v11356_v46 = vpop.f32.mrb[103].mxu1 }
 0x357   : > { %v11357_v23 = vadd.f32 %v11356_v46, %v11355_v57  ;;  %v15061_v52 = vadd.f32 %v15016_v63, %v11354_v33 }
 0x359   : > { %v15064_v59 = vadd.f32 %v15022_v44, %v11357_v23 }
 0x35b   : > { %v11358_v1 = vpop.f32.mrb[104].mxu1 }
 0x35c   : > { %v11359_v2 = vpop.f32.mrb[105].mxu1 }
 0x35d   : > { %v11360_v12 = vadd.f32 %v11359_v2, %v11358_v1  ;;  %v11361_v61 = vpop.f32.mrb[106].mxu1 }
 0x35e   : > { %v11362_v19 = vpop.f32.mrb[107].mxu1 }
 0x35f   : > { %v11363_v15 = vadd.f32 %v11362_v19, %v11361_v61  ;;  %v15067_v18 = vadd.f32 %v15028_v4, %v11360_v12 }
 0x361   : > { %v15070_v7 = vadd.f32 %v15034_v24, %v11363_v15 }
 0x363   : > { %v11364_v9 = vpop.f32.mrb[108].mxu1 }
 0x364   : > { %v11365_v11 = vpop.f32.mrb[109].mxu1 }
 0x365   : > { %v11366_v31 = vadd.f32 %v11365_v11, %v11364_v9  ;;  %v11367_v63 = vpop.f32.mrb[110].mxu1 }
 0x366   : > { %v11368_v58 = vpop.f32.mrb[111].mxu1 }
 0x367   : > { %v11369_v13 = vadd.f32 %v11368_v58, %v11367_v63  ;;  %v15072_v44 = vadd.f32 %v13100_v16, %v11366_v31 }
 0x369   : > { %v15074_v40 = vadd.f32 %v13110_v62, %v11369_v13 }
 0x36b   : > { %v11370_v53 = vpop.f32.mrb[112].mxu1 }
 0x36c   : > { %v11371_v6 = vpop.f32.mrb[113].mxu1 }
 0x36d   : > { %v11372_v20 = vadd.f32 %v11371_v6, %v11370_v53  ;;  %v11373_v28 = vpop.f32.mrb[114].mxu1 }
 0x36e   : > { %v11374_v32 = vpop.f32.mrb[115].mxu1 }
 0x36f   : > { %v11375_v4 = vadd.f32 %v11374_v32, %v11373_v28  ;;  %v15076_v55 = vadd.f32 %v13125_v26, %v11372_v20 }
 0x371   : > { %v15078_v24 = vadd.f32 %v13135_v60, %v11375_v4 }
 0x373   : > { %v11376_v54 = vpop.f32.mrb[116].mxu1 }
 0x374   : > { %v11377_v0 = vpop.f32.mrb[117].mxu1 }
 0x375   : > { %v11378_v36 = vadd.f32 %v11377_v0, %v11376_v54  ;;  %v11379_v27 = vpop.f32.mrb[118].mxu1 }
 0x376   : > { %v11380_v34 = vpop.f32.mrb[119].mxu1 }
 0x377   : > { %v11381_v49 = vadd.f32 %v11380_v34, %v11379_v27  ;;  %v15080_v16 = vadd.f32 %v13120_v38, %v11378_v36 }
 0x379   : > { %v15082_v62 = vadd.f32 %v13130_v50, %v11381_v49 }
 0x37b   : > { %v12716_v22 = vpop.f32.mrb[0].mxu1 }
 0x37c   : > { %v13022_v26 = vadd.f32 %v15001_v43, %v12716_v22  ;;  %v3254_v60 = vpop.f32.mrb[1].mxu1 }
 0x37d   : > { %v13027_v39 = vadd.f32 %v14989_v41, %v3254_v60  ;;  %v12717_v45 = vpop.f32.mrb[2].mxu1 }
 0x37e   : > { %v3382_v35 = vmul.f32 %v13022_v26, %v15087_v37  ;;  %v13032_v38 = vadd.f32 %v15007_v51, %v12717_v45  ;;  %v3257_v50 = vpop.f32.mrb[3].mxu1 }
 0x37f   : > { %v3380_v56 = vmul.f32 %v13027_v39, %v15087_v37  ;;  %v13037_v29 = vadd.f32 %v14995_v30, %v3257_v50 }
 0x380   : > { %v3413_v43 = vadd.f32 %v15093_v47, %v3382_v35  ;;  %v3383_v33 = vmul.f32 %v13032_v38, %v15087_v37 }
 0x381   : > { %v3411_v57 = vadd.f32 %v15093_v47, %v3380_v56  ;;  %v3381_v46 = vmul.f32 %v13037_v29, %v15087_v37 }
 0x382   : > { %v3437_v23 = vmul.f32 0.01, %v3413_v43  ;;  %v3414_v41 = vadd.f32 %v15093_v47, %v3383_v33 }
 0x383   : > { %v3435_v1 = vmul.f32 0.01, %v3411_v57  ;;  %v3412_v2 = vadd.f32 %v15093_v47, %v3381_v46  ;;  %v12720_v51 = vpop.f32.mrb[4].mxu1 }
 0x384   : > { %v3438_v12 = vmul.f32 0.01, %v3414_v41  ;;  %v13042_v61 = vadd.f32 %v15025_v48, %v12720_v51  ;;  %v3270_v19 = vpop.f32.mrb[5].mxu1  ;;  %v3461_v11 = vmax.f32 %v3413_v43, %v3437_v23 }
 0x385   : > { %v3436_v30 = vmul.f32 0.01, %v3412_v2  ;;  %v13047_v15 = vadd.f32 %v15013_v5, %v3270_v19  ;;  %v12721_v9 = vpop.f32.mrb[6].mxu1  ;;  %v3459_v53 = vmax.f32 %v3411_v57, %v3435_v1 }
 0x386   : > { %v3462_v31 = vmax.f32 %v3414_v41, %v3438_v12  ;;  %v3386_v63 = vmul.f32 %v13042_v61, %v15087_v37  ;;  %v13052_v58 = vadd.f32 %v15031_v14, %v12721_v9  ;;  %v3273_v13 = vpop.f32.mrb[7].mxu1  ;;  %v13660_v9 = vld [vmem:[#allocation8 + $0x280] sm:$0xff]  }
 0x387   : > { %v3460_v6 = vmax.f32 %v3412_v2, %v3436_v30  ;;  %v3384_v20 = vmul.f32 %v13047_v15, %v15087_v37  ;;  %v13057_v28 = vadd.f32 %v15019_v25, %v3273_v13 }
 0x388   : > { %v15112_v32 = vpack.c.bf16 %v3462_v31, %v3461_v11  ;;  %v3417_v4 = vadd.f32 %v15093_v47, %v3386_v63  ;;  %v3387_v54 = vmul.f32 %v13052_v58, %v15087_v37  ;;  %v13661_v58 = vld [vmem:[#allocation8 + $0x2c8] sm:$0xff]  }
 0x389   : > { %v3483_v48 = vpack.c.bf16 %v3460_v6, %v3459_v53  ;;  %v15116_v5 = vadd.f32 %v15093_v47, %v3384_v20  ;;  %v3385_v45 = vmul.f32 %v13057_v28, %v15087_v37 }
 0x38a   : > { %v3515_v0 = vshll.u32 %v15112_v32, 16  ;;  %v3519_v14 = vshrl.u32 %v15112_v32, 16  ;;  %v3643_v36 = vrot.slane %v15112_v32, 1  ;;  %v3764_v27 = vrot.slane %v15112_v32, 2 }
 0x38b   : > { %v3508_v34 = vshrl.u32 %v3483_v48, 16  ;;  %v3510_v25 = vshll.u32 %v3483_v48, 16  ;;  %v3642_v49 = vrot.slane %v3483_v48, 1  ;;  %v3763_v22 = vrot.slane %v3483_v48, 2  ;;  %v12724_v26 = vpop.f32.mrb[8].mxu1 }
 0x38c   : > { %v3692_v60 = vrot.slane %v3519_v14, 1  ;;  %v3693_v39 = vrot.slane %v3515_v0, 2  ;;  %v3286_v35 = vpop.f32.mrb[9].mxu1  ;;  %v3517_v33 = vrot.slane %v3515_v0, 1  ;;  %v3441_v23 = vmul.f32 0.01, %v3417_v4 }
 0x38d   : > { %v3512_v38 = vrot.slane %v3510_v25, 1  ;;  %v3644_v50 = vsel %vm783_vm5, %v3642_v49, %v3643_v36  ;;  %v3689_v56 = vrot.slane %v3508_v34, 1  ;;  %v3690_v29 = vrot.slane %v3510_v25, 2  ;;  %v12725_v43 = vpop.f32.mrb[10].mxu1 }
 0x38e   : > { %v15127_v57 = vor.u32 %v3693_v39, %v3692_v60  ;;  %3677 = vst [vmem:[#allocation3 + $0x10] sm:$0xff] %v3644_v50  ;;  %v3765_v46 = vsel %vm884_vm1, %v3763_v22, %v3764_v27  ;;  %v3289_v41 = vpop.f32.mrb[11].mxu1  ;;  %v3439_v51 = vmul.f32 0.01, %v15116_v5  ;;  %v3418_v12 = vadd.f32 %v15093_v47, %v3387_v54  ;;  %v13663_v22 = vld [vmem:[#allocation8 + $0x288] sm:$0xff]   ;;  %v13665_v60 = vld [vmem:[#allocation8 + $0x2d0] sm:$0xff]  }
 0x38f   : > { %v3513_v1 = vor.u32 %v3512_v38, %v3508_v34  ;;  %v3691_v2 = vor.u32 %v3690_v29, %v3689_v56  ;;  %3798 = vst [vmem:[#allocation3 + $0x20] sm:$0xff] %v3765_v46  ;;  %v3416_v61 = vadd.f32 %v15093_v47, %v3385_v45  ;;  %v13062_v19 = vadd.f32 %v15045_v21, %v12724_v26 }
 0x390   : > { %v13067_v30 = vadd.f32 %v15037_v8, %v3286_v35  ;;  %v13072_v15 = vadd.f32 %v15049_v17, %v12725_v43  ;;  %v3442_v63 = vmul.f32 0.01, %v3418_v12  ;;  %v3465_v8 = vmax.f32 %v3417_v4, %v3441_v23  ;;  %v13666_v23 = vld [vmem:[#allocation8 + $0x290] sm:$0xff]  }
 0x391   : > { %v3518_v11 = vsel %vm674_vm3, %v3513_v1, %v3517_v33  ;;  %v3695_v31 = vsel %vm816_vm2, %v3691_v2, %v15127_v57  ;;  %v3440_v13 = vmul.f32 0.01, %v3416_v61  ;;  %v3390_v53 = vmul.f32 %v13062_v19, %v15087_v37 }
 0x392   : > { %3748 = vst [vmem:[#allocation3 + $0x18] sm:$0xff] %v3695_v31  ;;  %v3388_v6 = vmul.f32 %v13067_v30, %v15087_v37  ;;  %v3391_v21 = vmul.f32 %v13072_v15, %v15087_v37  ;;  %4818 = vmatprep.mubr.bf16.mxu1 %v3518_v11  ;;  %v3466_v20 = vmax.f32 %v3418_v12, %v3442_v63 }
 0x393   : > { %v13077_v17 = vadd.f32 %v15041_v10, %v3289_v41  ;;  %v12728_v28 = vpop.f32.mrb[12].mxu1  ;;  %4819 = vmatmul.mubr.bf16.vlgmr.msra.gmra.mrb[120].mxu1 %v3483_v48  ;;  %v3463_v54 = vmax.f32 %v15116_v5, %v3439_v51  ;;  %v3464_v0 = vmax.f32 %v3416_v61, %v3440_v13  ;;  %v15147_v34 = vadd.f32 %v15093_v47, %v3390_v53 }
 0x394   : > { %v15150_v25 = vadd.f32 %v15093_v47, %v3388_v6  ;;  %v3302_v49 = vpop.f32.mrb[13].mxu1  ;;  %11687 = vmatpush3.bf16.msra.mxu1 %v13660_v9  ;;  %v15152_v26 = vpack.c.bf16 %v3466_v20, %v3465_v8  ;;  %v15155_v4 = vadd.f32 %v15093_v47, %v3391_v21  ;;  %v13082_v10 = vadd.f32 %v15061_v52, %v12728_v28  ;;  %v13652_v21 = vld [vmem:[#allocation8 + $0x1c0] sm:$0xff]  }
 0x395   : > { %v13087_v48 = vadd.f32 %v15053_v3, %v3302_v49  ;;  %v12729_v5 = vpop.f32.mrb[14].mxu1  ;;  %11688 = vmatprep.subr.bf16.mxu1 %v13661_v58  ;;  %v3521_v39 = vor.u32 %v3519_v14, %v3517_v33  ;;  %v15159_v45 = vpack.c.bf16 %v3464_v0, %v3463_v54  ;;  %v3445_v35 = vmul.f32 0.01, %v15147_v34 }
 0x396   : > { %v3389_v38 = vmul.f32 %v13077_v17, %v15087_v37  ;;  %3498 = vst [vmem:[#allocation3 + $0x78] sm:$0xff] %v15152_v26  ;;  %v3531_v50 = vshll.u32 %v15152_v26, 16  ;;  %v3535_v56 = vshrl.u32 %v15152_v26, 16  ;;  %v3647_v52 = vrot.slane %v15152_v26, 1  ;;  %v3305_v29 = vpop.f32.mrb[15].mxu1 }
 0x397   : > { %v3768_v3 = vrot.slane %v15152_v26, 2  ;;  %3497 = vst [vmem:[#allocation3 + $0x50] sm:$0xff] %v15159_v45  ;;  %v3523_v14 = vshll.u32 %v15159_v45, 16  ;;  %v3527_v43 = vshrl.u32 %v15159_v45, 16  ;;  %v3645_v33 = vrot.slane %v15159_v45, 1 }
 0x398   : > { %v3766_v46 = vrot.slane %v15159_v45, 2  ;;  %11689 = vmatpush3.bf16.msra.mxu1 %v13663_v22  ;;  %v3700_v41 = vrot.slane %v3535_v56, 1  ;;  %v3701_v1 = vrot.slane %v3531_v50, 2  ;;  %v15176_v2 = vmul.f32 0.01, %v15150_v25 }
 0x399   : > { %v3446_v51 = vmul.f32 0.01, %v15155_v4  ;;  %11690 = vmatprep.subr.bf16.mxu1 %v13665_v60  ;;  %v3525_v12 = vrot.slane %v3523_v14, 1  ;;  %v3646_v61 = vsel %vm783_vm5, %v3643_v36, %v3645_v33  ;;  %v3648_v19 = vsel %vm783_vm5, %v3645_v33, %v3647_v52  ;;  %v13653_v60 = vld [vmem:[#allocation8 + $0x208] sm:$0xff]  }
 0x39a   : > { %v3696_v30 = vrot.slane %v3527_v43, 1  ;;  %v3533_v15 = vrot.slane %v3531_v50, 1  ;;  %v15185_v9 = vor.u32 %v3701_v1, %v3700_v41  ;;  %3678 = vst [vmem:[#allocation3 + $0x38] sm:$0xff] %v3646_v61  ;;  %3679 = vst [vmem:[#allocation3 + $0x60] sm:$0xff] %v3648_v19  ;;  %v3697_v11 = vrot.slane %v3523_v14, 2  ;;  %v13654_v50 = vld [vmem:[#allocation8 + $0x1c8] sm:$0xff]  }
 0x39b   : > { %v3767_v31 = vsel %vm884_vm1, %v3764_v27, %v3766_v46  ;;  %v15190_v63 = vpop.f32.mrb[16].mxu1  ;;  %v3526_v58 = vsel %vm674_vm3, %v3521_v39, %v3525_v12  ;;  %v3529_v36 = vor.u32 %v3527_v43, %v3525_v12  ;;  %v3769_v13 = vsel %vm884_vm1, %v3766_v46, %v3768_v3  ;;  %v13655_v46 = vld [vmem:[#allocation8 + $0x210] sm:$0xff]  }
 0x39c   : > { %3799 = vst [vmem:[#allocation3 + $0x48] sm:$0xff] %v3767_v31  ;;  %v3469_v53 = vmax.f32 %v15147_v34, %v3445_v35  ;;  %v15197_v6 = vpop.f32.mrb[17].mxu1  ;;  %11691 = vmatpush3.bf16.msra.mxu1 %v13666_v23  ;;  %v3698_v8 = vor.u32 %v3697_v11, %v3696_v30  ;;  %3800 = vst [vmem:[#allocation3 + $0x70] sm:$0xff] %v3769_v13  ;;  %v3470_v27 = vmax.f32 %v15155_v4, %v3446_v51  ;;  %v13667_v4 = vld [vmem:[#allocation8 + $0x2d8] sm:$0xff]  }
 0x39d   : > { %v3420_v20 = vadd.f32 %v15093_v47, %v3389_v38  ;;  %v3394_v17 = vmul.f32 %v13082_v10, %v15087_v37  ;;  %v15202_v28 = vpop.f32.mrb[18].mxu1  ;;  %4287 = vmatprep.mubr.bf16.mxu0 %v3526_v58  ;;  %v3534_v54 = vsel %vm674_vm3, %v3529_v36, %v3533_v15  ;;  %v3392_v0 = vmul.f32 %v13087_v48, %v15087_v37 }
 0x39e   : > { %v13092_v34 = vadd.f32 %v15064_v59, %v12729_v5  ;;  %v13097_v49 = vadd.f32 %v15057_v42, %v3305_v29  ;;  %v15208_v22 = vpop.f32.mrb[19].mxu1  ;;  %4826 = vmatprep.mubr.bf16.mxu1 %v3526_v58  ;;  %3616 = vst [vmem:[#allocation3 + $0x58] sm:$0xff] %v3534_v54  ;;  %v3699_v10 = vsel %vm816_vm2, %v15127_v57, %v3698_v8  ;;  %v13669_v42 = vld [vmem:[#allocation8 + $0x298] sm:$0xff]   ;;  %v13671_v29 = vld [vmem:[#allocation8 + $0x2e0] sm:$0xff]   ;;  %v13656_v58 = vld [vmem:[#allocation8 + $0x1d0] sm:$0xff]  }
 0x39f   : > { %v3703_v39 = vsel %vm816_vm2, %v3698_v8, %v15185_v9  ;;  %v15214_v35 = vpack.c.bf16 %v3470_v27, %v3469_v53  ;;  %v3444_v38 = vmul.f32 0.01, %v3420_v20  ;;  %4288 = vmatmul.mubr.bf16.vlgmr.msra.gmra.mrb[144].mxu0 %v15112_v32  ;;  %4827 = vmatmul.mubr.bf16.gmra.mrb[124].mxu1 %v15112_v32  ;;  %3749 = vst [vmem:[#allocation3 + $0x40] sm:$0xff] %v3699_v10  ;;  %v13657_v27 = vld [vmem:[#allocation8 + $0x218] sm:$0xff]  }
 0x3a0   : > { %3750 = vst [vmem:[#allocation3 + $0x68] sm:$0xff] %v3703_v39  ;;  %v15219_v59 = vadd.f32 %v15093_v47, %v3394_v17  ;;  %v15222_v48 = vadd.f32 %v15093_v47, %v3392_v0  ;;  %v3395_v57 = vmul.f32 %v13092_v34, %v15087_v37  ;;  %v3393_v5 = vmul.f32 %v13097_v49, %v15087_v37 }
 0x3a1   : > { %11463 = vmatpush3.bf16.msra.mxu0 %v13652_v21  ;;  %v15228_v14 = vor.u32 %v3535_v56, %v3533_v15  ;;  %v3467_v32 = vmax.f32 %v15150_v25, %v15176_v2  ;;  %3500 = vst [vmem:[#allocation3 + $0xc8] sm:$0xff] %v15214_v35  ;;  %v3547_v43 = vshll.u32 %v15214_v35, 16  ;;  %v3551_v33 = vshrl.u32 %v15214_v35, 16  ;;  %4295 = vmatprep.mubr.bf16.mxu0 %v3534_v54 }
 0x3a2   : > { %4834 = vmatprep.mubr.bf16.mxu1 %v3534_v54  ;;  %v3468_v23 = vmax.f32 %v3420_v20, %v3444_v38  ;;  %v3449_v41 = vmul.f32 0.01, %v15219_v59  ;;  %v3447_v1 = vmul.f32 0.01, %v15222_v48  ;;  %v3426_v56 = vadd.f32 %v15093_v47, %v3395_v57  ;;  %11464 = vmatprep.subr.bf16.mxu0 %v13653_v60  ;;  %v13672_v20 = vld [vmem:[#allocation8 + $0x2a0] sm:$0xff]   ;;  %v13673_v60 = vld [vmem:[#allocation8 + $0x2e8] sm:$0xff]  }
 0x3a3   : > { %11692 = vmatprep.subr.bf16.mxu1 %v13667_v4  ;;  %v3651_v25 = vrot.slane %v15214_v35, 1  ;;  %v3708_v2 = vrot.slane %v3551_v33, 1  ;;  %v3709_v51 = vrot.slane %v3547_v43, 2  ;;  %v3424_v12 = vadd.f32 %v15093_v47, %v3393_v5  ;;  %v15240_v61 = vpop.f32.mrb[20].mxu1  ;;  %v13662_v5 = vld [vmem:[#allocation8 + $0x220] sm:$0xff]  }
 0x3a4   : > { %11693 = vmatpush3.bf16.msra.mxu1 %v13669_v42  ;;  %v3549_v19 = vrot.slane %v3547_v43, 1  ;;  %v3772_v30 = vrot.slane %v15214_v35, 2  ;;  %v15243_v15 = vpack.c.bf16 %v3468_v23, %v3467_v32  ;;  %v3450_v11 = vmul.f32 0.01, %v3426_v56  ;;  %v15245_v31 = vpop.f32.mrb[21].mxu1 }
 0x3a5   : > { %11465 = vmatpush3.bf16.msra.mxu0 %v13654_v50  ;;  %11694 = vmatprep.subr.bf16.mxu1 %v13671_v29  ;;  %v3473_v36 = vmax.f32 %v15219_v59, %v3449_v41  ;;  %v3471_v13 = vmax.f32 %v15222_v48, %v3447_v1  ;;  %v3448_v53 = vmul.f32 0.01, %v3424_v12  ;;  %v13102_v21 = vadd.f32 %v15072_v44, %v15190_v63  ;;  %v15251_v8 = vpop.f32.mrb[22].mxu1  ;;  %v13658_v48 = vld [vmem:[#allocation8 + $0x1d8] sm:$0xff]  }
 0x3a6   : > { %11466 = vmatprep.subr.bf16.mxu0 %v13655_v46  ;;  %3499 = vst [vmem:[#allocation3 + $0xa0] sm:$0xff] %v15243_v15  ;;  %v3539_v17 = vshll.u32 %v15243_v15, 16  ;;  %v3543_v54 = vshrl.u32 %v15243_v15, 16  ;;  %v3649_v0 = vrot.slane %v15243_v15, 1  ;;  %v3770_v34 = vrot.slane %v15243_v15, 2  ;;  %v15258_v49 = vpop.f32.mrb[23].mxu1 }
 0x3a7   : > { %v15260_v4 = vor.u32 %v3709_v51, %v3708_v2  ;;  %v3474_v44 = vmax.f32 %v3426_v56, %v3450_v11  ;;  %v3472_v63 = vmax.f32 %v3424_v12, %v3448_v53  ;;  %v15264_v10 = vadd.f32 %v15067_v18, %v15197_v6  ;;  %4296 = vmatmul.mubr.bf16.gmra.mrb[148].mxu0 %v15159_v45 }
 0x3a8   : > { %v3541_v39 = vrot.slane %v3539_v17, 1  ;;  %v15270_v38 = vsel %vm783_vm5, %v3647_v52, %v3649_v0  ;;  %v15275_v42 = vsel %vm783_vm5, %v3649_v0, %v3651_v25  ;;  %v3704_v59 = vrot.slane %v3543_v54, 1  ;;  %4835 = vmatmul.mubr.bf16.gmra.mrb[128].mxu1 %v15159_v45  ;;  %v13675_v45 = vld [vmem:[#allocation8 + $0x2a8] sm:$0xff]  }
 0x3a9   : > { %11467 = vmatpush3.bf16.msra.mxu0 %v13656_v58  ;;  %3680 = vst [vmem:[#allocation3 + $0x88] sm:$0xff] %v15270_v38  ;;  %3681 = vst [vmem:[#allocation3 + $0xb0] sm:$0xff] %v15275_v42  ;;  %v3705_v18 = vrot.slane %v3539_v17, 2  ;;  %v3771_v52 = vsel %vm884_vm1, %v3768_v3, %v3770_v34  ;;  %v3773_v6 = vsel %vm884_vm1, %v3770_v34, %v3772_v30  ;;  %11695 = vmatpush3.bf16.msra.mxu1 %v13672_v20  ;;  %v13677_v3 = vld [vmem:[#allocation8 + $0x2f0] sm:$0xff]   ;;  %v13664_v20 = vld [vmem:[#allocation8 + $0x1e0] sm:$0xff]  }
 0x3aa   : > { %v15286_v57 = vpack.c.bf16 %v3474_v44, %v3473_v36  ;;  %11468 = vmatprep.subr.bf16.mxu0 %v13657_v27  ;;  %v3553_v50 = vor.u32 %v3551_v33, %v3549_v19  ;;  %v15290_v29 = vsel %vm674_vm3, %v15228_v14, %v3541_v39  ;;  %v3545_v32 = vor.u32 %v3543_v54, %v3541_v39 }
 0x3ab   : > { %3801 = vst [vmem:[#allocation3 + $0x98] sm:$0xff] %v3771_v52  ;;  %3802 = vst [vmem:[#allocation3 + $0xc0] sm:$0xff] %v3773_v6  ;;  %v15292_v43 = vpack.c.bf16 %v3472_v63, %v3471_v13  ;;  %11696 = vmatprep.subr.bf16.mxu1 %v13673_v60  ;;  %v3706_v46 = vor.u32 %v3705_v18, %v3704_v59  ;;  %v3398_v41 = vmul.f32 %v13102_v21, %v15087_v37  ;;  %v13668_v60 = vld [vmem:[#allocation8 + $0x228] sm:$0xff]   ;;  %v13678_v59 = vld [vmem:[#allocation8 + $0x2b0] sm:$0xff]  }
 0x3ac   : > { %3617 = vst [vmem:[#allocation3 + $0x80] sm:$0xff] %v15290_v29  ;;  %3502 = vst [vmem:[#allocation3 + $0x118] sm:$0xff] %v15286_v57  ;;  %v3563_v23 = vshll.u32 %v15286_v57, 16  ;;  %v3567_v33 = vshrl.u32 %v15286_v57, 16  ;;  %4303 = vmatprep.mubr.bf16.mxu0 %v15290_v29  ;;  %4842 = vmatprep.mubr.bf16.mxu1 %v15290_v29  ;;  %v15302_v14 = vsel %vm674_vm3, %v3545_v32, %v3549_v19  ;;  %v3655_v1 = vrot.slane %v15286_v57, 1  ;;  %v13674_v32 = vld [vmem:[#allocation8 + $0x230] sm:$0xff]  }
 0x3ad   : > { %3501 = vst [vmem:[#allocation3 + $0xf0] sm:$0xff] %v15292_v43  ;;  %v3555_v56 = vshll.u32 %v15292_v43, 16  ;;  %v3559_v2 = vshrl.u32 %v15292_v43, 16  ;;  %11469 = vmatpush3.bf16.msra.mxu0 %v13658_v48  ;;  %3618 = vst [vmem:[#allocation3 + $0xa8] sm:$0xff] %v15302_v14  ;;  %v15311_v51 = vsel %vm816_vm2, %v15185_v9, %v3706_v46  ;;  %v15315_v12 = vsel %vm816_vm2, %v3706_v46, %v15260_v4 }
 0x3ae   : > { %v3716_v19 = vrot.slane %v3567_v33, 1  ;;  %v3776_v11 = vrot.slane %v15286_v57, 2  ;;  %11470 = vmatprep.subr.bf16.mxu0 %v13662_v5  ;;  %11697 = vmatpush3.bf16.msra.mxu1 %v13675_v45  ;;  %3751 = vst [vmem:[#allocation3 + $0x90] sm:$0xff] %v15311_v51  ;;  %3752 = vst [vmem:[#allocation3 + $0xb8] sm:$0xff] %v15315_v12  ;;  %v3717_v58 = vrot.slane %v3563_v23, 2  ;;  %v3653_v9 = vrot.slane %v15292_v43, 1 }
 0x3af   : > { %v3557_v36 = vrot.slane %v3555_v56, 1  ;;  %v3712_v13 = vrot.slane %v3559_v2, 1  ;;  %11698 = vmatprep.subr.bf16.mxu1 %v13677_v3  ;;  %v15323_v53 = vrot.slane %v3563_v23, 1  ;;  %v3713_v21 = vrot.slane %v3555_v56, 2  ;;  %4304 = vmatmul.mubr.bf16.gmra.mrb[152].mxu0 %v15152_v26 }
 0x3b0   : > { %v3774_v27 = vrot.slane %v15292_v43, 2  ;;  %v15327_v17 = vor.u32 %v3717_v58, %v3716_v19  ;;  %v15335_v34 = vsel %vm783_vm5, %v3651_v25, %v3653_v9  ;;  %4311 = vmatprep.mubr.bf16.mxu0 %v15302_v14  ;;  %v15342_v44 = vsel %vm783_vm5, %v3653_v9, %v3655_v1  ;;  %4843 = vmatmul.mubr.bf16.gmra.mrb[132].mxu1 %v15152_v26  ;;  %v13679_v26 = vld [vmem:[#allocation8 + $0x2f8] sm:$0xff]   ;;  %v13676_v58 = vld [vmem:[#allocation8 + $0x1f0] sm:$0xff]  }
 0x3b1   : > { %v15330_v54 = vsel %vm674_vm3, %v3553_v50, %v3557_v36  ;;  %v3561_v0 = vor.u32 %v3559_v2, %v3557_v36  ;;  %3682 = vst [vmem:[#allocation3 + $0xd8] sm:$0xff] %v15335_v34  ;;  %v3714_v63 = vor.u32 %v3713_v21, %v3712_v13  ;;  %3683 = vst [vmem:[#allocation3 + $0x100] sm:$0xff] %v15342_v44  ;;  %4850 = vmatprep.mubr.bf16.mxu1 %v15302_v14 }
 0x3b2   : > { %3619 = vst [vmem:[#allocation3 + $0xd0] sm:$0xff] %v15330_v54  ;;  %v3775_v39 = vsel %vm884_vm1, %v3772_v30, %v3774_v27  ;;  %v3777_v25 = vsel %vm884_vm1, %v3774_v27, %v3776_v11  ;;  %v3429_v18 = vadd.f32 %v15093_v47, %v3398_v41  ;;  %v3396_v30 = vmul.f32 %v15264_v10, %v15087_v37 }
 0x3b3   : > { %v15354_v48 = vsel %vm674_vm3, %v3561_v0, %v15323_v53  ;;  %3803 = vst [vmem:[#allocation3 + $0xe8] sm:$0xff] %v3775_v39  ;;  %3804 = vst [vmem:[#allocation3 + $0x110] sm:$0xff] %v3777_v25  ;;  %v13112_v52 = vadd.f32 %v15074_v40, %v15202_v28  ;;  %v15366_v6 = vsel %vm816_vm2, %v15260_v4, %v3714_v63  ;;  %11471 = vmatpush3.bf16.msra.mxu0 %v13664_v20 }
 0x3b4   : > { %3620 = vst [vmem:[#allocation3 + $0xf8] sm:$0xff] %v15354_v48  ;;  %v15370_v5 = vsel %vm816_vm2, %v3714_v63, %v15327_v17  ;;  %v13117_v45 = vadd.f32 %v15070_v7, %v15208_v22  ;;  %v13122_v10 = vadd.f32 %v15080_v16, %v15240_v61  ;;  %3753 = vst [vmem:[#allocation3 + $0xe0] sm:$0xff] %v15366_v6  ;;  %11472 = vmatprep.subr.bf16.mxu0 %v13668_v60  ;;  %v13670_v7 = vld [vmem:[#allocation8 + $0x1e8] sm:$0xff]  }
 0x3b5   : > { %3754 = vst [vmem:[#allocation3 + $0x108] sm:$0xff] %v15370_v5  ;;  %v3427_v40 = vadd.f32 %v15093_v47, %v3396_v30  ;;  %v3399_v28 = vmul.f32 %v13112_v52, %v15087_v37  ;;  %v13127_v4 = vadd.f32 %v15076_v55, %v15245_v31  ;;  %v13132_v50 = vadd.f32 %v15082_v62, %v15251_v8  ;;  %v13681_v62 = vld [vmem:[#allocation8 + $0x2b8] sm:$0xff]  }
 0x3b6   : > { %v3397_v22 = vmul.f32 %v13117_v45, %v15087_v37  ;;  %v3402_v16 = vmul.f32 %v13122_v10, %v15087_v37  ;;  %v13137_v61 = vadd.f32 %v15078_v24, %v15258_v49  ;;  %11699 = vmatpush3.bf16.msra.mxu1 %v13678_v59  ;;  %v3453_v3 = vmul.f32 0.01, %v3429_v18  ;;  %v13687_v24 = vld [vmem:[#allocation8 + $0x400] sm:$0xff]   ;;  %v13682_v59 = vld [vmem:[#allocation8 + $0x1f8] sm:$0xff]  }
 0x3b7   : > { %v3430_v46 = vadd.f32 %v15093_v47, %v3399_v28  ;;  %v3400_v23 = vmul.f32 %v13127_v4, %v15087_v37  ;;  %v3403_v55 = vmul.f32 %v13132_v50, %v15087_v37  ;;  %11700 = vmatprep.subr.bf16.mxu1 %v13679_v26  ;;  %v3451_v31 = vmul.f32 0.01, %v3427_v40  ;;  %4312 = vmatmul.mubr.bf16.gmra.mrb[156].mxu0 %v15243_v15  ;;  %v15418_v45 = vld [vmem:[#allocation8 + $0x240] sm:$0xff]  }
 0x3b8   : > { %v3428_v8 = vadd.f32 %v15093_v47, %v3397_v22  ;;  %v3433_v41 = vadd.f32 %v15093_v47, %v3402_v16  ;;  %v3401_v56 = vmul.f32 %v13137_v61, %v15087_v37  ;;  %4319 = vmatprep.mubr.bf16.mxu0 %v15330_v54  ;;  %11473 = vmatpush3.bf16.msra.mxu0 %v13670_v7  ;;  %v13680_v37 = vld [vmem:[#allocation8 + $0x238] sm:$0xff]  }
 0x3b9   : > { %v3454_v49 = vmul.f32 0.01, %v3430_v46  ;;  %v15396_v2 = vadd.f32 %v15093_v47, %v3400_v23  ;;  %v3434_v19 = vadd.f32 %v15093_v47, %v3403_v55  ;;  %4851 = vmatmul.mubr.bf16.gmra.mrb[136].mxu1 %v15243_v15  ;;  %11474 = vmatprep.subr.bf16.mxu0 %v13674_v32  ;;  %v3477_v21 = vmax.f32 %v3429_v18, %v3453_v3 }
 0x3ba   : > { %v3452_v36 = vmul.f32 0.01, %v3428_v8  ;;  %v3457_v9 = vmul.f32 0.01, %v3433_v41  ;;  %v15401_v13 = vadd.f32 %v15093_v47, %v3401_v56  ;;  %4858 = vmatprep.mubr.bf16.mxu1 %v15330_v54  ;;  %11701 = vmatpush3.bf16.msra.mxu1 %v13681_v62  ;;  %v3475_v60 = vmax.f32 %v3427_v40, %v3451_v31 }
 0x3bb   : > { %v3478_v27 = vmax.f32 %v3430_v46, %v3454_v49  ;;  %v15405_v20 = vmul.f32 0.01, %v15396_v2  ;;  %v3458_v0 = vmul.f32 0.01, %v3434_v19  ;;  %11830 = vmatprep.subr.bf16.mxu1 %v13687_v24  ;;  %v3569_v18 = vor.u32 %v3567_v33, %v15323_v53 }
 0x3bc   : > { %v3476_v63 = vmax.f32 %v3428_v8, %v3452_v36  ;;  %v3456_v25 = vmul.f32 0.01, %v15401_v13  ;;  %11475 = vmatpush3.bf16.msra.mxu0 %v13676_v58  ;;  %v3481_v52 = vmax.f32 %v3433_v41, %v3457_v9 }
 0x3bd   : > { %v15408_v39 = vpack.c.bf16 %v3478_v27, %v3477_v21  ;;  %v3482_v47 = vmax.f32 %v3434_v19, %v3458_v0  ;;  %v3479_v26 = vmax.f32 %v15396_v2, %v15405_v20  ;;  %11476 = vmatprep.subr.bf16.mxu0 %v13680_v37  ;;  %v16607_v27 = vmov 0  ;;  %v3627_v20 = vld [vmem:[#allocation3 + $0x1c0] sm:$0xff] }
 0x3be   : > { %v15414_v30 = vpack.c.bf16 %v3476_v63, %v3475_v60  ;;  %v3480_v32 = vmax.f32 %v15401_v13, %v3456_v25  ;;  %v16608_v27 = vsel %vm15487_vm12, 4294967295, %v16607_v27  ;;  %v16610_v60 = vmov 0  ;;  %v3760_v63 = vld [vmem:[#allocation3 + $0x1d0] sm:$0x7f] }
 0x3bf   : > { %3504 = vst [vmem:[#allocation3 + $0x168] sm:$0xff] %v15408_v39  ;;  %v3579_v10 = vshll.u32 %v15408_v39, 16  ;;  %v3583_v40 = vshrl.u32 %v15408_v39, 16  ;;  %v3659_v28 = vrot.slane %v15408_v39, 1  ;;  %v3780_v4 = vrot.slane %v15408_v39, 2  ;;  %4320 = vmatmul.mubr.bf16.gmra.mrb[160].mxu0 %v15214_v35  ;;  %16609 = vst [vmem:[#allocation14_spill] sm:$0xff] %v16608_v27 }
 0x3c0   : > { %3503 = vst [vmem:[#allocation3 + $0x140] sm:$0xff] %v15414_v30  ;;  %v3571_v33 = vshll.u32 %v15414_v30, 16  ;;  %v3575_v53 = vshrl.u32 %v15414_v30, 16  ;;  %v3657_v50 = vrot.slane %v15414_v30, 1  ;;  %v3778_v7 = vrot.slane %v15414_v30, 2  ;;  %4327 = vmatprep.mubr.bf16.mxu0 %v15354_v48  ;;  %11477 = vmatpush3.bf16.msra.mxu0 %v13682_v59 }
 0x3c1   : > { %v3724_v22 = vrot.slane %v3583_v40, 1  ;;  %v3725_v16 = vrot.slane %v3579_v10, 2  ;;  %v15431_v61 = vpack.c.bf16 %v3482_v47, %v3481_v52  ;;  %4859 = vmatmul.mubr.bf16.gmra.mrb[140].mxu1 %v15214_v35  ;;  %12738 = vmatprep.subr.bf16.mxu0 %v15418_v45  ;;  %v3581_v62 = vrot.slane %v3579_v10, 1 }
 0x3c2   : > { %v3573_v3 = vrot.slane %v3571_v33, 1  ;;  %v15438_v46 = vsel %vm783_vm5, %v3655_v1, %v3657_v50  ;;  %v15443_v23 = vsel %vm783_vm5, %v3657_v50, %v3659_v28  ;;  %v3720_v55 = vrot.slane %v3575_v53, 1  ;;  %4866 = vmatprep.mubr.bf16.mxu1 %v15354_v48 }
 0x3c3   : > { %v15447_v31 = vor.u32 %v3725_v16, %v3724_v22  ;;  %3684 = vst [vmem:[#allocation3 + $0x128] sm:$0xff] %v15438_v46  ;;  %3685 = vst [vmem:[#allocation3 + $0x150] sm:$0xff] %v15443_v23  ;;  %v3721_v8 = vrot.slane %v3571_v33, 2  ;;  %v15454_v1 = vsel %vm884_vm1, %v3776_v11, %v3778_v7  ;;  %v15464_v56 = vsel %vm884_vm1, %v3778_v7, %v3780_v4 }
 0x3c4   : > { %3506 = vst [vmem:[#allocation3 + $0x1b8] sm:$0xff] %v15431_v61  ;;  %v15459_v35 = vsel %vm674_vm3, %v3569_v18, %v3573_v3  ;;  %v3577_v41 = vor.u32 %v3575_v53, %v3573_v3  ;;  %3805 = vst [vmem:[#allocation3 + $0x138] sm:$0xff] %v15454_v1  ;;  %v3595_v24 = vshll.u32 %v15431_v61, 16  ;;  %v3599_v49 = vshrl.u32 %v15431_v61, 16 }
 0x3c5   : > { %3621 = vst [vmem:[#allocation3 + $0x120] sm:$0xff] %v15459_v35  ;;  %v3722_v11 = vor.u32 %v3721_v8, %v3720_v55  ;;  %3806 = vst [vmem:[#allocation3 + $0x160] sm:$0xff] %v15464_v56  ;;  %v3663_v2 = vrot.slane %v15431_v61, 1  ;;  %v3784_v19 = vrot.slane %v15431_v61, 2  ;;  %v3493_v13 = vpack.c.bf16 %v3480_v32, %v3479_v26  ;;  %v5078_v8 = vld [vmem:[#allocation3 + $0x58] sm:$0xff] }
 0x3c6   : > { %v15474_v58 = vsel %vm674_vm3, %v3577_v41, %v3581_v62  ;;  %v3597_v36 = vrot.slane %v3595_v24, 1  ;;  %v3733_v9 = vrot.slane %v3595_v24, 2  ;;  %v3732_v0 = vrot.slane %v3599_v49, 1  ;;  %v13688_v41 = vld [vmem:[#allocation8 + $0x3c0] sm:$0xff]   ;;  %v15530_v24 = vld [vmem:[#allocation3 + $0x40] sm:$0xff] }
 0x3c7   : > { %3622 = vst [vmem:[#allocation3 + $0x148] sm:$0xff] %v15474_v58  ;;  %v15479_v37 = vsel %vm816_vm2, %v15327_v17, %v3722_v11  ;;  %v15483_v21 = vsel %vm816_vm2, %v3722_v11, %v15447_v31  ;;  %3688 = vst [vmem:[#allocation3 + $0x1c8] sm:$0x7f] %v3663_v2  ;;  %v16611_v60 = vsel %vm15495_vm13, 4294967295, %v16610_v60  ;;  %v3587_v47 = vshll.u32 %v3493_v13, 16  ;;  %4328 = vmatmul.mubr.bf16.gmra.mrb[164].mxu0 %v15292_v43  ;;  %v13689_v11 = vld [vmem:[#allocation8 + $0x408] sm:$0xff]  }
 0x3c8   : > { %3809 = vst [vmem:[#allocation3 + $0x1d8] sm:$0x3f] %v3784_v19  ;;  %3755 = vst [vmem:[#allocation3 + $0x130] sm:$0xff] %v15479_v37  ;;  %v3601_v17 = vor.u32 %v3599_v49, %v3597_v36  ;;  %v3591_v25 = vshrl.u32 %v3493_v13, 16  ;;  %v3661_v59 = vrot.slane %v3493_v13, 1  ;;  %v3585_v18 = vor.u32 %v3583_v40, %v3581_v62  ;;  %4335 = vmatprep.mubr.bf16.mxu0 %v15459_v35  ;;  %v13691_v49 = vld [vmem:[#allocation8 + $0x3c8] sm:$0xff]  }
 0x3c9   : > { %3756 = vst [vmem:[#allocation3 + $0x158] sm:$0xff] %v15483_v21  ;;  %16612 = vst [vmem:[#allocation15_spill] sm:$0xff] %v16611_v60  ;;  %v3734_v52 = vor.u32 %v3733_v9, %v3732_v0  ;;  %v3782_v26 = vrot.slane %v3493_v13, 2  ;;  %v3589_v33 = vrot.slane %v3587_v47, 1  ;;  %4867 = vmatmul.mubr.bf16.gmra.mrb[144].mxu1 %v15292_v43  ;;  %v3729_v22 = vrot.slane %v3587_v47, 2  ;;  %v13693_v9 = vld [vmem:[#allocation8 + $0x3d0] sm:$0xff]  }
 0x3ca   : > { %3505 = vst [vmem:[#allocation3 + $0x190] sm:$0xff] %v3493_v13  ;;  %v3628_v10 = vsel %vm15487_vm12, %v3601_v17, %v3627_v20  ;;  %v3662_v53 = vsel %vm783_vm5, %v3659_v28, %v3661_v59  ;;  %v3664_v50 = vsel %vm783_vm5, %v3661_v59, %v3663_v2  ;;  %v3728_v7 = vrot.slane %v3591_v25, 1  ;;  %4874 = vmatprep.mubr.bf16.mxu1 %v15459_v35  ;;  %v13692_v2 = vld [vmem:[#allocation8 + $0x410] sm:$0xff]   ;;  %v15537_v13 = vld [vmem:[#allocation3 + $0x68] sm:$0xff]  ;;  %v13694_v20 = vld [vmem:[#allocation8 + $0x418] sm:$0xff]  }
 0x3cb   : > { %3629 = vst [vmem:[#allocation3 + $0x1c0] sm:$0xff] %v3628_v10  ;;  %v3761_v40 = vsel %vm15495_vm13, %v3734_v52, %v3760_v63  ;;  %3686 = vst [vmem:[#allocation3 + $0x178] sm:$0xff] %v3662_v53  ;;  %v3783_v16 = vsel %vm884_vm1, %v3780_v4, %v3782_v26  ;;  %v15515_v28 = vsel %vm674_vm3, %v3585_v18, %v3589_v33  ;;  %v13685_v0 = vld [vmem:[#allocation8 + $0x250] sm:$0xff]   ;;  %v13696_v17 = vld [vmem:[#allocation8 + $0x3d8] sm:$0xff]  }
 0x3cc   : > { %3687 = vst [vmem:[#allocation3 + $0x1a0] sm:$0xff] %v3664_v50  ;;  %3762 = vst [vmem:[#allocation3 + $0x1d0] sm:$0x7f] %v3761_v40  ;;  %v3593_v61 = vor.u32 %v3591_v25, %v3589_v33  ;;  %v3785_v32 = vsel %vm884_vm1, %v3782_v26, %v3784_v19  ;;  %v3730_v3 = vor.u32 %v3729_v22, %v3728_v7  ;;  %v13684_v19 = vld [vmem:[#allocation8 + $0x248] sm:$0xff]   ;;  %v13697_v63 = vld [vmem:[#allocation8 + $0x420] sm:$0xff]  }
 0x3cd   : > { %3807 = vst [vmem:[#allocation3 + $0x188] sm:$0xff] %v3783_v16  ;;  %3623 = vst [vmem:[#allocation3 + $0x170] sm:$0xff] %v15515_v28  ;;  %v13686_v47 = vld [vmem:[#allocation8 + $0x258] sm:$0xff]   ;;  %v13699_v59 = vld [vmem:[#allocation8 + $0x428] sm:$0xff]  }
 0x3ce   : > { %3808 = vst [vmem:[#allocation3 + $0x1b0] sm:$0xff] %v3785_v32  ;;  %v15520_v55 = vsel %vm674_vm3, %v3593_v61, %v3597_v36  ;;  %v3731_v4 = vsel %vm816_vm2, %v15447_v31, %v3730_v3  ;;  %v3735_v62 = vsel %vm816_vm2, %v3730_v3, %v3734_v52  ;;  %v5077_v31 = vld [vmem:[#allocation3 + $0x50] sm:$0xff]  ;;  %v15534_v36 = vld [vmem:[#allocation3 + $0x38] sm:$0xff]  ;;  %v15545_v25 = vld [vmem:[#allocation3 + $0x60] sm:$0xff] }
 0x3cf   : > { %3624 = vst [vmem:[#allocation3 + $0x198] sm:$0xff] %v15520_v55  ;;  %3757 = vst [vmem:[#allocation3 + $0x180] sm:$0xff] %v3731_v4  ;;  %4336 = vmatmul.mubr.bf16.gmra.mrb[168].mxu0 %v15286_v57  ;;  %v13701_v18 = vld [vmem:[#allocation8 + $0x3e8] sm:$0xff]   ;;  %v13702_v52 = vld [vmem:[#allocation8 + $0x430] sm:$0xff]  }
 0x3d0   : > { %3758 = vst [vmem:[#allocation3 + $0x1a8] sm:$0xff] %v3735_v62  ;;  %4343 = vmatprep.mubr.bf16.mxu0 %v15474_v58  ;;  %v13695_v26 = vld [vmem:[#allocation8 + $0x268] sm:$0xff]   ;;  %v13703_v10 = vld [vmem:[#allocation8 + $0x3f0] sm:$0xff]   ;;  %v13704_v33 = vld [vmem:[#allocation8 + $0x438] sm:$0xff]  }
 0x3d1   : > { %4875 = vmatmul.mubr.bf16.gmra.mrb[148].mxu1 %v15286_v57  ;;  %v13706_v53 = vld [vmem:[#allocation8 + $0x3f8] sm:$0xff]   ;;  %v13721_v50 = vld [vmem:[#allocation8 + $0x480] sm:$0xff]   ;;  %v15577_v16 = vld [vmem:[#allocation3 + $0x70] sm:$0xff] }
 0x3d2   : > { %5469 = vmatprep.mubr.bf16.mxu1 %v5078_v8  ;;  %v13705_v40 = vld [vmem:[#allocation8 + $0x278] sm:$0xff]   ;;  %v13707_v7 = vld [vmem:[#allocation8 + $0xc0] sm:$0xff]   ;;  %v13729_v61 = vld [vmem:[#allocation8 + $0x450] sm:$0xff]  }
 0x3d3   : > { %v13708_v22 = vld [vmem:[#allocation8 + $0x80] sm:$0xff]   ;;  %v13730_v32 = vld [vmem:[#allocation8 + $0x498] sm:$0xff]   ;;  %v13710_v4 = vld [vmem:[#allocation8 + $0x88] sm:$0xff]  }
 0x3d4   : > { %v5749_v3 = vld [vmem:[#allocation3 + $0xa0] sm:$0xff]  ;;  %v5755_v62 = vld [vmem:[#allocation3 + $0xd0] sm:$0xff]  ;;  %v13711_v8 = vld [vmem:[#allocation8 + $0xd0] sm:$0xff]  }
 0x3d5   : > { %v13809_v60 = vld [vmem:[#allocation8 + $0x578] sm:$0xff]  }
 0x3d7   : > { %4344 = vmatmul.mubr.bf16.gmra.mrb[172].mxu0 %v15414_v30 }
 0x3d8   : > { %4384 = vmatprep.mubr.bf16.mxu0 %v15530_v24 }
 0x3d9   : > { %5470 = vmatmul.mubr.bf16.vlgmr.msra.gmra.mrb[152].mxu1 %v5077_v31  ;;  %v13712_v31 = vld [vmem:[#allocation8 + $0x90] sm:$0xff]  }
 0x3da   : > { %5477 = vmatprep.mubr.bf16.mxu1 %v15290_v29  ;;  %11831 = vmatpush3.bf16.msra.mxu1 %v13688_v41  ;;  %v15541_v29 = vld [vmem:[#allocation3 + $0x78] sm:$0xff]  ;;  %v13732_v41 = vld [vmem:[#allocation8 + $0x458] sm:$0xff]  }
 0x3db   : > { %11832 = vmatprep.subr.bf16.mxu1 %v13689_v11  ;;  %v13733_v11 = vld [vmem:[#allocation8 + $0x4a0] sm:$0xff]  }
 0x3de   : > { %11833 = vmatpush3.bf16.msra.mxu1 %v13691_v49  ;;  %v13713_v49 = vld [vmem:[#allocation8 + $0xd8] sm:$0xff]  }
 0x3df   : > { %4385 = vmatmul.mubr.bf16.vlgmr.msra.gmra.mrb[176].mxu0 %v15534_v36  ;;  %11834 = vmatprep.subr.bf16.mxu1 %v13692_v2  ;;  %v15583_v2 = vld [vmem:[#allocation3 + $0xc0] sm:$0xff] }
 0x3e0   : > { %12739 = vmatpush3.bf16.msra.mxu0 %v15418_v45  ;;  %4392 = vmatprep.mubr.bf16.mxu0 %v15537_v13  ;;  %v13698_v45 = vld [vmem:[#allocation8 + $0x3e0] sm:$0xff]  }
 0x3e1   : > { %5478 = vmatmul.mubr.bf16.gmra.mrb[156].mxu1 %v15541_v29  ;;  %12740 = vmatprep.subr.bf16.mxu0 %v13684_v19 }
 0x3e2   : > { %5485 = vmatprep.mubr.bf16.mxu1 %v15302_v14  ;;  %11835 = vmatpush3.bf16.msra.mxu1 %v13693_v9  ;;  %v13690_v14 = vld [vmem:[#allocation8 + $0x260] sm:$0xff]  }
 0x3e3   : > { %11836 = vmatprep.subr.bf16.mxu1 %v13694_v20  ;;  %v15586_v9 = vld [vmem:[#allocation3 + $0xe8] sm:$0xff]  ;;  %v13735_v20 = vld [vmem:[#allocation8 + $0x4a8] sm:$0xff]  }
 0x3e4   : > { %12741 = vmatpush3.bf16.msra.mxu0 %v13684_v19  ;;  %v13734_v19 = vld [vmem:[#allocation8 + $0x460] sm:$0xff]  }
 0x3e5   : > { %12742 = vmatprep.subr.bf16.mxu0 %v13685_v0 }
 0x3e6   : > { %11837 = vmatpush3.bf16.msra.mxu1 %v13696_v17  ;;  %v13715_v17 = vld [vmem:[#allocation8 + $0xe0] sm:$0xff]  }
 0x3e7   : > { %4393 = vmatmul.mubr.bf16.gmra.mrb[180].mxu0 %v15545_v25  ;;  %11838 = vmatprep.subr.bf16.mxu1 %v13697_v63  ;;  %v13737_v63 = vld [vmem:[#allocation8 + $0x468] sm:$0xff]  }
 0x3e8   : > { %4400 = vmatprep.mubr.bf16.mxu0 %v15311_v51  ;;  %12743 = vmatpush3.bf16.msra.mxu0 %v13685_v0  ;;  %v5760_v0 = vld [vmem:[#allocation3 + $0xf8] sm:$0xff] }
 0x3e9   : > { %5486 = vmatmul.mubr.bf16.gmra.mrb[160].mxu1 %v15243_v15  ;;  %12744 = vmatprep.subr.bf16.mxu0 %v13686_v47  ;;  %v15553_v15 = vld [vmem:[#allocation3 + $0xc8] sm:$0xff] }
 0x3ea   : > { %5493 = vmatprep.mubr.bf16.mxu1 %v15330_v54  ;;  %11839 = vmatpush3.bf16.msra.mxu1 %v13698_v45  ;;  %v13700_v54 = vld [vmem:[#allocation8 + $0x270] sm:$0xff]   ;;  %v13716_v45 = vld [vmem:[#allocation8 + $0xa0] sm:$0xff]  }
 0x3eb   : > { %11840 = vmatprep.subr.bf16.mxu1 %v13699_v59  ;;  %v13717_v59 = vld [vmem:[#allocation8 + $0xe8] sm:$0xff]  }
 0x3ec   : > { %12745 = vmatpush3.bf16.msra.mxu0 %v13686_v47  ;;  %v13738_v47 = vld [vmem:[#allocation8 + $0x4b0] sm:$0xff]  }
 0x3ed   : > { %12746 = vmatprep.subr.bf16.mxu0 %v13690_v14 }
 0x3ee   : > { %11841 = vmatpush3.bf16.msra.mxu1 %v13701_v18  ;;  %v13739_v18 = vld [vmem:[#allocation8 + $0x470] sm:$0xff]  }
 0x3ef   : > { %4401 = vmatmul.mubr.bf16.gmra.mrb[184].mxu0 %v15270_v38  ;;  %11842 = vmatprep.subr.bf16.mxu1 %v13702_v52  ;;  %v13740_v52 = vld [vmem:[#allocation8 + $0x4b8] sm:$0xff]  }
 0x3f0   : > { %4408 = vmatprep.mubr.bf16.mxu0 %v15315_v12  ;;  %12747 = vmatpush3.bf16.msra.mxu0 %v13690_v14  ;;  %v15590_v14 = vld [vmem:[#allocation3 + $0x110] sm:$0xff] }
 0x3f1   : > { %5494 = vmatmul.mubr.bf16.gmra.mrb[164].mxu1 %v15553_v15  ;;  %12748 = vmatprep.subr.bf16.mxu0 %v13695_v26 }
 0x3f2   : > { %5501 = vmatprep.mubr.bf16.mxu1 %v15354_v48  ;;  %11843 = vmatpush3.bf16.msra.mxu1 %v13703_v10  ;;  %v13723_v48 = vld [vmem:[#allocation8 + $0x440] sm:$0xff]   ;;  %v13718_v10 = vld [vmem:[#allocation8 + $0xa8] sm:$0xff]  }
 0x3f3   : > { %11844 = vmatprep.subr.bf16.mxu1 %v13704_v33  ;;  %v5765_v33 = vld [vmem:[#allocation3 + $0x120] sm:$0xff] }
 0x3f4   : > { %12749 = vmatpush3.bf16.msra.mxu0 %v13695_v26  ;;  %v5759_v26 = vld [vmem:[#allocation3 + $0xf0] sm:$0xff] }
 0x3f5   : > { %12750 = vmatprep.subr.bf16.mxu0 %v13700_v54 }
 0x3f6   : > { %11845 = vmatpush3.bf16.msra.mxu1 %v13706_v53  ;;  %v13747_v53 = vld [vmem:[#allocation8 + $0x5c0] sm:$0xff]  }
 0x3f7   : > { %4409 = vmatmul.mubr.bf16.gmra.mrb[188].mxu0 %v15275_v42  ;;  %11894 = vmatprep.subr.bf16.mxu1 %v13721_v50  ;;  %v13720_v50 = vld [vmem:[#allocation8 + $0xb0] sm:$0xff]  }
 0x3f8   : > { %4416 = vmatprep.mubr.bf16.mxu0 %v15366_v6  ;;  %12751 = vmatpush3.bf16.msra.mxu0 %v13700_v54  ;;  %v13742_v54 = vld [vmem:[#allocation8 + $0x478] sm:$0xff]  }
 0x3f9   : > { %5502 = vmatmul.mubr.bf16.gmra.mrb[168].mxu1 %v15292_v43  ;;  %12752 = vmatprep.subr.bf16.mxu0 %v13705_v40  ;;  %v5745_v43 = vld [vmem:[#allocation3 + $0x80] sm:$0xff] }
 0x3fa   : > { %5509 = vmatprep.mubr.bf16.mxu1 %v15459_v35  ;;  %v13725_v35 = vld [vmem:[#allocation8 + $0x488] sm:$0xff]  }
 0x3fc   : > { %12753 = vmatpush3.bf16.msra.mxu0 %v13705_v40  ;;  %v13722_v40 = vld [vmem:[#allocation8 + $0xf8] sm:$0xff]  }
 0x3fd   : > { %11606 = vmatprep.subr.bf16.mxu0 %v13707_v7  ;;  %v3813_v7 = vld [vmem:[#allocation3 + $0x18] sm:$0xff] }
 0x3ff   : > { %4417 = vmatmul.mubr.bf16.gmra.mrb[192].mxu0 %v15335_v34 }
 0x400   : > { %4424 = vmatprep.mubr.bf16.mxu0 %v15370_v5 }
 0x401   : > { %5510 = vmatmul.mubr.bf16.gmra.mrb[172].mxu1 %v15286_v57  ;;  %v15573_v57 = vld [vmem:[#allocation3 + $0x48] sm:$0xff] }
 0x402   : > { %5517 = vmatprep.mubr.bf16.mxu1 %v15474_v58  ;;  %v13727_v58 = vld [vmem:[#allocation8 + $0x448] sm:$0xff]  }
 0x407   : > { %4425 = vmatmul.mubr.bf16.gmra.mrb[196].mxu0 %v15342_v44 }
 0x408   : > { %4432 = vmatprep.mubr.bf16.mxu0 %v15479_v37 }
 0x409   : > { %5518 = vmatmul.mubr.bf16.gmra.mrb[176].mxu1 %v15414_v30  ;;  %v5750_v30 = vld [vmem:[#allocation3 + $0xa8] sm:$0xff] }
 0x40a   : > { %5525 = vmatprep.mubr.bf16.mxu1 %v15515_v28 }
 0x40f   : > { %4433 = vmatmul.mubr.bf16.gmra.mrb[200].mxu0 %v15438_v46 }
 0x410   : > { %4440 = vmatprep.mubr.bf16.mxu0 %v15483_v21  ;;  %v13728_v21 = vld [vmem:[#allocation8 + $0x490] sm:$0xff]  }
 0x411   : > { %5526 = vmatmul.mubr.bf16.gmra.mrb[180].mxu1 %v15408_v39  ;;  %v13709_v39 = vld [vmem:[#allocation8 + $0xc8] sm:$0xff]  }
 0x412   : > { %6136 = vmatprep.mubr.bf16.mxu1 %v5745_v43  ;;  %v5764_v43 = vld [vmem:[#allocation3 + $0x118] sm:$0xff] }
 0x417   : > { %4441 = vmatmul.mubr.bf16.gmra.mrb[204].mxu0 %v15443_v23  ;;  %v15580_v23 = vld [vmem:[#allocation3 + $0x98] sm:$0xff] }
 0x418   : > { %12754 = vmatprep.mubr.bf16.mxu0 %v15573_v57 }
 0x419   : > { %6137 = vmatmul.mubr.bf16.vlgmr.msra.gmra.mrb[184].mxu1 %v15541_v29  ;;  %v13714_v29 = vld [vmem:[#allocation8 + $0x98] sm:$0xff]  }
 0x41a   : > { %6144 = vmatprep.mubr.bf16.mxu1 %v5750_v30  ;;  %11895 = vmatpush3.bf16.msra.mxu1 %v13723_v48  ;;  %v13724_v48 = vld [vmem:[#allocation8 + $0xb8] sm:$0xff]   ;;  %v13726_v30 = vld [vmem:[#allocation8 + $0x100] sm:$0xff]  }
 0x41b   : > { %11896 = vmatprep.subr.bf16.mxu1 %v13725_v35  ;;  %v5770_v35 = vld [vmem:[#allocation3 + $0x148] sm:$0xff] }
 0x41e   : > { %11897 = vmatpush3.bf16.msra.mxu1 %v13727_v58  ;;  %v13731_v58 = vld [vmem:[#allocation8 + $0x108] sm:$0xff]  }
 0x41f   : > { %12755 = vmatmul.mubr.bf16.vlgmr.msra.gmra.mrb[208].mxu0 %v15577_v16  ;;  %11898 = vmatprep.subr.bf16.mxu1 %v13728_v21  ;;  %v3812_v21 = vld [vmem:[#allocation3 + $0x10] sm:$0xff] }
 0x420   : > { %11607 = vmatpush3.bf16.msra.mxu0 %v13708_v22  ;;  %12758 = vmatprep.mubr.bf16.mxu0 %v15580_v23  ;;  %v13736_v22 = vld [vmem:[#allocation8 + $0x110] sm:$0xff]  }
 0x421   : > { %6145 = vmatmul.mubr.bf16.gmra.mrb[188].mxu1 %v5749_v3  ;;  %11608 = vmatprep.subr.bf16.mxu0 %v13709_v39  ;;  %v13741_v39 = vld [vmem:[#allocation8 + $0x118] sm:$0xff]  }
 0x422   : > { %6152 = vmatprep.mubr.bf16.mxu1 %v5755_v62  ;;  %11899 = vmatpush3.bf16.msra.mxu1 %v13729_v61  ;;  %v5774_v61 = vld [vmem:[#allocation3 + $0x168] sm:$0xff]  ;;  %v13746_v3 = vld [vmem:[#allocation8 + $0x138] sm:$0xff]  }
 0x423   : > { %11900 = vmatprep.subr.bf16.mxu1 %v13730_v32  ;;  %v13743_v32 = vld [vmem:[#allocation8 + $0x120] sm:$0xff]  }
 0x424   : > { %11609 = vmatpush3.bf16.msra.mxu0 %v13710_v4  ;;  %v13749_v4 = vld [vmem:[#allocation8 + $0x5c8] sm:$0xff]   ;;  %v13750_v62 = vld [vmem:[#allocation8 + $0x340] sm:$0xff]  }
 0x425   : > { %11610 = vmatprep.subr.bf16.mxu0 %v13711_v8  ;;  %v13751_v8 = vld [vmem:[#allocation8 + $0x588] sm:$0xff]  }
 0x426   : > { %11901 = vmatpush3.bf16.msra.mxu1 %v13732_v41  ;;  %v13753_v41 = vld [vmem:[#allocation8 + $0x5d0] sm:$0xff]  }
 0x427   : > { %12759 = vmatmul.mubr.bf16.gmra.mrb[212].mxu0 %v15583_v2  ;;  %11902 = vmatprep.subr.bf16.mxu1 %v13733_v11  ;;  %v15615_v11 = vld [vmem:[#allocation3 + $0xb0] sm:$0xff] }
 0x428   : > { %11611 = vmatpush3.bf16.msra.mxu0 %v13712_v31  ;;  %12762 = vmatprep.mubr.bf16.mxu0 %v15586_v9  ;;  %v15618_v31 = vld [vmem:[#allocation3 + $0xe0] sm:$0xff] }
 0x429   : > { %6153 = vmatmul.mubr.bf16.gmra.mrb[192].mxu1 %v15553_v15  ;;  %11612 = vmatprep.subr.bf16.mxu0 %v13713_v49  ;;  %v13719_v15 = vld [vmem:[#allocation8 + $0xf0] sm:$0xff]   ;;  %v13759_v49 = vld [vmem:[#allocation8 + $0x598] sm:$0xff]  }
 0x42a   : > { %6160 = vmatprep.mubr.bf16.mxu1 %v5760_v0  ;;  %11903 = vmatpush3.bf16.msra.mxu1 %v13734_v19  ;;  %v13761_v19 = vld [vmem:[#allocation8 + $0x5e0] sm:$0xff]   ;;  %v15623_v0 = vld [vmem:[#allocation3 + $0xd8] sm:$0xff] }
 0x42b   : > { %11904 = vmatprep.subr.bf16.mxu1 %v13735_v20 }
 0x42c   : > { %11613 = vmatpush3.bf16.msra.mxu0 %v13714_v29  ;;  %v13763_v29 = vld [vmem:[#allocation8 + $0x5a0] sm:$0xff]  }
 0x42d   : > { %11614 = vmatprep.subr.bf16.mxu0 %v13715_v17 }
 0x42e   : > { %11905 = vmatpush3.bf16.msra.mxu1 %v13737_v63 }
 0x42f   : > { %12763 = vmatmul.mubr.bf16.gmra.mrb[216].mxu0 %v15590_v14  ;;  %11906 = vmatprep.subr.bf16.mxu1 %v13738_v47  ;;  %v15628_v47 = vld [vmem:[#allocation3 + $0x108] sm:$0xff] }
 0x430   : > { %11615 = vmatpush3.bf16.msra.mxu0 %v13716_v45  ;;  %12766 = vmatprep.mubr.bf16.mxu0 %v15454_v1 }
 0x431   : > { %6161 = vmatmul.mubr.bf16.gmra.mrb[196].mxu1 %v5759_v26  ;;  %11616 = vmatprep.subr.bf16.mxu0 %v13717_v59  ;;  %v15635_v26 = vld [vmem:[#allocation3 + $0x100] sm:$0xff] }
 0x432   : > { %6168 = vmatprep.mubr.bf16.mxu1 %v5765_v33  ;;  %11907 = vmatpush3.bf16.msra.mxu1 %v13739_v18  ;;  %v13769_v18 = vld [vmem:[#allocation8 + $0x5f0] sm:$0xff]  }
 0x433   : > { %11908 = vmatprep.subr.bf16.mxu1 %v13740_v52  ;;  %v13773_v52 = vld [vmem:[#allocation8 + $0x5f8] sm:$0xff]  }
 0x434   : > { %11617 = vmatpush3.bf16.msra.mxu0 %v13718_v10  ;;  %v15638_v10 = vld [vmem:[#allocation3 + $0x130] sm:$0xff] }
 0x435   : > { %11618 = vmatprep.subr.bf16.mxu0 %v13719_v15 }
 0x436   : > { %11909 = vmatpush3.bf16.msra.mxu1 %v13742_v54  ;;  %v13775_v54 = vld [vmem:[#allocation8 + $0x5b8] sm:$0xff]  }
 0x437   : > { %12767 = vmatmul.mubr.bf16.gmra.mrb[220].mxu0 %v15464_v56  ;;  %12038 = vmatprep.subr.bf16.mxu1 %v13747_v53  ;;  %v5769_v56 = vld [vmem:[#allocation3 + $0x140] sm:$0xff] }
 0x438   : > { %11619 = vmatpush3.bf16.msra.mxu0 %v13720_v50  ;;  %4915 = vmatprep.mubr.bf16.mxu0 %v3813_v7 }
 0x439   : > { %6169 = vmatmul.mubr.bf16.gmra.mrb[200].mxu1 %v5764_v43  ;;  %11620 = vmatprep.subr.bf16.mxu0 %v13722_v40 }
 0x43a   : > { %6176 = vmatprep.mubr.bf16.mxu1 %v5770_v35 }
 0x43c   : > { %11621 = vmatpush3.bf16.msra.mxu0 %v13724_v48 }
 0x43d   : > { %12770 = vmatprep.subr.bf16.mxu0 %v13726_v30 }
 0x43f   : > { %4916 = vmatmul.mubr.bf16.vlgmr.msra.gmra.mrb[224].mxu0 %v3812_v21  ;;  %v15650_v21 = vld [vmem:[#allocation3 + $0x128] sm:$0xff] }
 0x440   : > { %12771 = vmatpush3.bf16.msra.mxu0 %v13726_v30  ;;  %4923 = vmatprep.mubr.bf16.mxu0 %v15530_v24  ;;  %v13744_v24 = vld [vmem:[#allocation8 + $0x128] sm:$0xff]  }
 0x441   : > { %6177 = vmatmul.mubr.bf16.gmra.mrb[204].mxu1 %v5769_v56  ;;  %12772 = vmatprep.subr.bf16.mxu0 %v13731_v58  ;;  %v15653_v56 = vld [vmem:[#allocation3 + $0x158] sm:$0xff] }
 0x442   : > { %6184 = vmatprep.mubr.bf16.mxu1 %v15515_v28  ;;  %v5779_v28 = vld [vmem:[#allocation3 + $0x190] sm:$0xff] }
 0x444   : > { %12773 = vmatpush3.bf16.msra.mxu0 %v13731_v58  ;;  %v3814_v58 = vld [vmem:[#allocation3 + $0x20] sm:$0xff] }
 0x445   : > { %12774 = vmatprep.subr.bf16.mxu0 %v13736_v22 }
 0x447   : > { %4924 = vmatmul.mubr.bf16.gmra.mrb[228].mxu0 %v15534_v36  ;;  %v15602_v36 = vld [vmem:[#allocation3 + $0x90] sm:$0xff] }
 0x448   : > { %4931 = vmatprep.mubr.bf16.mxu0 %v15537_v13  ;;  %12775 = vmatpush3.bf16.msra.mxu0 %v13736_v22  ;;  %v13745_v13 = vld [vmem:[#allocation8 + $0x130] sm:$0xff]  }
 0x449   : > { %6185 = vmatmul.mubr.bf16.gmra.mrb[208].mxu1 %v5774_v61  ;;  %12776 = vmatprep.subr.bf16.mxu0 %v13741_v39 }
 0x44a   : > { %6192 = vmatprep.mubr.bf16.mxu1 %v15520_v55  ;;  %v13748_v55 = vld [vmem:[#allocation8 + $0x580] sm:$0xff]  }
 0x44c   : > { %12777 = vmatpush3.bf16.msra.mxu0 %v13741_v39 }
 0x44d   : > { %12778 = vmatprep.subr.bf16.mxu0 %v13743_v32 }
 0x44f   : > { %4932 = vmatmul.mubr.bf16.gmra.mrb[232].mxu0 %v15545_v25  ;;  %v15607_v25 = vld [vmem:[#allocation3 + $0x88] sm:$0xff] }
 0x450   : > { %4939 = vmatprep.mubr.bf16.mxu0 %v15311_v51  ;;  %12779 = vmatpush3.bf16.msra.mxu0 %v13743_v32  ;;  %v15610_v51 = vld [vmem:[#allocation3 + $0xb8] sm:$0xff] }
 0x451   : > { %6193 = vmatmul.mubr.bf16.gmra.mrb[212].mxu1 %v5779_v28  ;;  %12780 = vmatprep.subr.bf16.mxu0 %v13744_v24 }
 0x452   : > { %6233 = vmatprep.mubr.bf16.mxu1 %v15602_v36 }
 0x454   : > { %12781 = vmatpush3.bf16.msra.mxu0 %v13744_v24 }
 0x455   : > { %12782 = vmatprep.subr.bf16.mxu0 %v13745_v13 }
 0x457   : > { %4940 = vmatmul.mubr.bf16.gmra.mrb[236].mxu0 %v15270_v38  ;;  %v13755_v38 = vld [vmem:[#allocation8 + $0x590] sm:$0xff]  }
 0x458   : > { %4947 = vmatprep.mubr.bf16.mxu0 %v15315_v12  ;;  %12783 = vmatpush3.bf16.msra.mxu0 %v13745_v13  ;;  %v13757_v12 = vld [vmem:[#allocation8 + $0x5d8] sm:$0xff]   ;;  %v13752_v13 = vld [vmem:[#allocation8 + $0x300] sm:$0xff]  }
 0x459   : > { %6234 = vmatmul.mubr.bf16.vlgmr.msra.gmra.mrb[216].mxu1 %v15607_v25  ;;  %12784 = vmatprep.subr.bf16.mxu0 %v13746_v3 }
 0x45a   : > { %6241 = vmatprep.mubr.bf16.mxu1 %v15610_v51  ;;  %12039 = vmatpush3.bf16.msra.mxu1 %v13748_v55 }
 0x45b   : > { %12040 = vmatprep.subr.bf16.mxu1 %v13749_v4  ;;  %v13754_v4 = vld [vmem:[#allocation8 + $0x348] sm:$0xff]  }
 0x45c   : > { %12785 = vmatpush3.bf16.msra.mxu0 %v13746_v3 }
 0x45d   : > { %11750 = vmatprep.subr.bf16.mxu0 %v13750_v62 }
 0x45e   : > { %12041 = vmatpush3.bf16.msra.mxu1 %v13751_v8 }
 0x45f   : > { %4948 = vmatmul.mubr.bf16.gmra.mrb[240].mxu0 %v15275_v42  ;;  %12042 = vmatprep.subr.bf16.mxu1 %v13753_v41 }
 0x460   : > { %4955 = vmatprep.mubr.bf16.mxu0 %v15366_v6  ;;  %v13765_v6 = vld [vmem:[#allocation8 + $0x5e8] sm:$0xff]  }
 0x461   : > { %6242 = vmatmul.mubr.bf16.gmra.mrb[220].mxu1 %v15615_v11 }
 0x462   : > { %6249 = vmatprep.mubr.bf16.mxu1 %v15618_v31  ;;  %12043 = vmatpush3.bf16.msra.mxu1 %v13755_v38  ;;  %v15666_v38 = vld [vmem:[#allocation3 + $0x150] sm:$0xff] }
 0x463   : > { %12044 = vmatprep.subr.bf16.mxu1 %v13757_v12  ;;  %v13756_v12 = vld [vmem:[#allocation8 + $0x308] sm:$0xff]  }
 0x466   : > { %v11558_v20 = vpop.f32.mrb[120].mxu1  ;;  %12045 = vmatpush3.bf16.msra.mxu1 %v13759_v49  ;;  %v15669_v49 = vld [vmem:[#allocation3 + $0x180] sm:$0xff] }
 0x467   : > { %4956 = vmatmul.mubr.bf16.gmra.mrb[244].mxu0 %v15335_v34  ;;  %v11559_v42 = vpop.f32.mrb[121].mxu1  ;;  %12046 = vmatprep.subr.bf16.mxu1 %v13761_v19  ;;  %v13767_v34 = vld [vmem:[#allocation8 + $0x5a8] sm:$0xff]   ;;  %v13758_v19 = vld [vmem:[#allocation8 + $0x350] sm:$0xff]  }
 0x468   : > { %4963 = vmatprep.mubr.bf16.mxu0 %v15370_v5  ;;  %v15625_v17 = vadd.f32 %v11559_v42, %v11558_v20  ;;  %v11561_v63 = vpop.f32.mrb[122].mxu1  ;;  %v13771_v5 = vld [vmem:[#allocation8 + $0x5b0] sm:$0xff]  }
 0x469   : > { %6250 = vmatmul.mubr.bf16.gmra.mrb[224].mxu1 %v15623_v0  ;;  %v11562_v45 = vpop.f32.mrb[123].mxu1 }
 0x46a   : > { %6257 = vmatprep.mubr.bf16.mxu1 %v15628_v47  ;;  %v15631_v59 = vadd.f32 %v11562_v45, %v11561_v63  ;;  %12047 = vmatpush3.bf16.msra.mxu1 %v13763_v29  ;;  %v13760_v63 = vld [vmem:[#allocation8 + $0x310] sm:$0xff]  }
 0x46b   : > { %12048 = vmatprep.subr.bf16.mxu1 %v13765_v6 }
 0x46e   : > { %12049 = vmatpush3.bf16.msra.mxu1 %v13767_v34  ;;  %v13762_v34 = vld [vmem:[#allocation8 + $0x358] sm:$0xff]  }
 0x46f   : > { %4964 = vmatmul.mubr.bf16.gmra.mrb[248].mxu0 %v15342_v44  ;;  %12050 = vmatprep.subr.bf16.mxu1 %v13769_v18 }
 0x470   : > { %4971 = vmatprep.mubr.bf16.mxu0 %v15479_v37 }
 0x471   : > { %6258 = vmatmul.mubr.bf16.gmra.mrb[228].mxu1 %v15635_v26 }
 0x472   : > { %v11414_v33 = vpop.f32.mrb[144].mxu0  ;;  %6265 = vmatprep.mubr.bf16.mxu1 %v15638_v10  ;;  %v11564_v15 = vpop.f32.mrb[124].mxu1  ;;  %12051 = vmatpush3.bf16.msra.mxu1 %v13771_v5 }
 0x473   : > { %v11415_v53 = vpop.f32.mrb[145].mxu0  ;;  %v11565_v50 = vpop.f32.mrb[125].mxu1  ;;  %12052 = vmatprep.subr.bf16.mxu1 %v13773_v52 }
 0x474   : > { %v15641_v44 = vadd.f32 %v11415_v53, %v11414_v33  ;;  %v11417_v40 = vpop.f32.mrb[146].mxu0  ;;  %v15643_v7 = vadd.f32 %v11565_v50, %v11564_v15  ;;  %v11567_v37 = vpop.f32.mrb[126].mxu1  ;;  %v13764_v53 = vld [vmem:[#allocation8 + $0x318] sm:$0xff]   ;;  %v15685_v50 = vld [vmem:[#allocation3 + $0x1a8] sm:$0xff] }
 0x475   : > { %v11418_v43 = vpop.f32.mrb[147].mxu0  ;;  %v11568_v48 = vpop.f32.mrb[127].mxu1 }
 0x476   : > { %v15645_v35 = vadd.f32 %v11418_v43, %v11417_v40  ;;  %v15647_v30 = vadd.f32 %v11568_v48, %v11567_v37  ;;  %12053 = vmatpush3.bf16.msra.mxu1 %v13775_v54  ;;  %v15682_v54 = vld [vmem:[#allocation3 + $0x178] sm:$0xff]  ;;  %v13766_v40 = vld [vmem:[#allocation8 + $0x360] sm:$0xff]  }
 0x477   : > { %4972 = vmatmul.mubr.bf16.gmra.mrb[252].mxu0 %v15438_v46 }
 0x478   : > { %12786 = vmatprep.mubr.bf16.mxu0 %v3814_v58 }
 0x479   : > { %6266 = vmatmul.mubr.bf16.gmra.mrb[232].mxu1 %v15650_v21 }
 0x47a   : > { %v11420_v22 = vpop.f32.mrb[148].mxu0  ;;  %6273 = vmatprep.mubr.bf16.mxu1 %v15653_v56 }
 0x47b   : > { %v11421_v39 = vpop.f32.mrb[149].mxu0  ;;  %v11570_v61 = vpop.f32.mrb[128].mxu1 }
 0x47c   : > { %v15656_v32 = vadd.f32 %v11421_v39, %v11420_v22  ;;  %v11423_v24 = vpop.f32.mrb[150].mxu0  ;;  %v11571_v28 = vpop.f32.mrb[129].mxu1  ;;  %v13768_v22 = vld [vmem:[#allocation8 + $0x320] sm:$0xff]  }
 0x47d   : > { %v11424_v3 = vpop.f32.mrb[151].mxu0  ;;  %v15658_v46 = vadd.f32 %v11571_v28, %v11570_v61  ;;  %v11573_v55 = vpop.f32.mrb[130].mxu1  ;;  %v13770_v61 = vld [vmem:[#allocation8 + $0x368] sm:$0xff]  }
 0x47e   : > { %v15660_v62 = vadd.f32 %v11424_v3, %v11423_v24  ;;  %v11574_v8 = vpop.f32.mrb[131].mxu1 }
 0x47f   : > { %v15662_v41 = vadd.f32 %v11574_v8, %v11573_v55  ;;  %12787 = vmatmul.mubr.bf16.vlgmr.msra.gmra.mrb[208].mxu0 %v15573_v57  ;;  %v13772_v8 = vld [vmem:[#allocation8 + $0x328] sm:$0xff]  }
 0x480   : > { %11751 = vmatpush3.bf16.msra.mxu0 %v13752_v13  ;;  %12790 = vmatprep.mubr.bf16.mxu0 %v15577_v16 }
 0x481   : > { %6274 = vmatmul.mubr.bf16.gmra.mrb[236].mxu1 %v15666_v38  ;;  %11752 = vmatprep.subr.bf16.mxu0 %v13754_v4  ;;  %v15698_v4 = vld [vmem:[#allocation3 + $0x1a0] sm:$0xff] }
 0x482   : > { %v11426_v20 = vpop.f32.mrb[152].mxu0  ;;  %6281 = vmatprep.mubr.bf16.mxu1 %v15669_v49 }
 0x483   : > { %v11427_v29 = vpop.f32.mrb[153].mxu0  ;;  %v11576_v6 = vpop.f32.mrb[132].mxu1 }
 0x484   : > { %v15672_v42 = vadd.f32 %v11427_v29, %v11426_v20  ;;  %11753 = vmatpush3.bf16.msra.mxu0 %v13756_v12  ;;  %v11429_v57 = vpop.f32.mrb[154].mxu0  ;;  %v11577_v45 = vpop.f32.mrb[133].mxu1  ;;  %v13774_v12 = vld [vmem:[#allocation8 + $0x370] sm:$0xff]  }
 0x485   : > { %v11430_v16 = vpop.f32.mrb[155].mxu0  ;;  %11754 = vmatprep.subr.bf16.mxu0 %v13758_v19  ;;  %v15676_v5 = vadd.f32 %v11577_v45, %v11576_v6  ;;  %v11579_v52 = vpop.f32.mrb[134].mxu1  ;;  %v13776_v6 = vld [vmem:[#allocation8 + $0x330] sm:$0xff]  }
 0x486   : > { %v15674_v18 = vadd.f32 %v11430_v16, %v11429_v57  ;;  %v11580_v33 = vpop.f32.mrb[135].mxu1 }
 0x487   : > { %12791 = vmatmul.mubr.bf16.gmra.mrb[212].mxu0 %v15580_v23  ;;  %v15679_v15 = vadd.f32 %v11580_v33, %v11579_v52 }
 0x488   : > { %11755 = vmatpush3.bf16.msra.mxu0 %v13760_v63  ;;  %12794 = vmatprep.mubr.bf16.mxu0 %v15583_v2 }
 0x489   : > { %6282 = vmatmul.mubr.bf16.gmra.mrb[240].mxu1 %v15682_v54  ;;  %11756 = vmatprep.subr.bf16.mxu0 %v13762_v34 }
 0x48a   : > { %v11432_v37 = vpop.f32.mrb[156].mxu0  ;;  %6289 = vmatprep.mubr.bf16.mxu1 %v15685_v50 }
 0x48b   : > { %v11433_v43 = vpop.f32.mrb[157].mxu0 }
 0x48c   : > { %v15688_v48 = vadd.f32 %v11433_v43, %v11432_v37  ;;  %11757 = vmatpush3.bf16.msra.mxu0 %v13764_v53  ;;  %v11435_v23 = vpop.f32.mrb[158].mxu0  ;;  %v11582_v58 = vpop.f32.mrb[136].mxu1  ;;  %v5080_v53 = vld [vmem:[#allocation3 + $0x68] sm:$0xff]  ;;  %v13778_v37 = vld [vmem:[#allocation8 + $0x338] sm:$0xff]  }
 0x48d   : > { %v11436_v2 = vpop.f32.mrb[159].mxu0  ;;  %v11583_v39 = vpop.f32.mrb[137].mxu1  ;;  %11758 = vmatprep.subr.bf16.mxu0 %v13766_v40  ;;  %v13779_v43 = vld [vmem:[#allocation8 + $0x380] sm:$0xff]  }
 0x48e   : > { %v15690_v24 = vadd.f32 %v11436_v2, %v11435_v23  ;;  %v15692_v28 = vadd.f32 %v11583_v39, %v11582_v58  ;;  %v11585_v13 = vpop.f32.mrb[138].mxu1 }
 0x48f   : > { %v11586_v3 = vpop.f32.mrb[139].mxu1  ;;  %12795 = vmatmul.mubr.bf16.gmra.mrb[216].mxu0 %v15586_v9 }
 0x490   : > { %v15695_v55 = vadd.f32 %v11586_v3, %v11585_v13  ;;  %11759 = vmatpush3.bf16.msra.mxu0 %v13768_v22  ;;  %12798 = vmatprep.mubr.bf16.mxu0 %v15590_v14  ;;  %v13777_v14 = vld [vmem:[#allocation8 + $0x378] sm:$0xff]   ;;  %v13780_v13 = vld [vmem:[#allocation8 + $0x388] sm:$0xff]  }
 0x491   : > { %6290 = vmatmul.mubr.bf16.gmra.mrb[244].mxu1 %v15698_v4  ;;  %11760 = vmatprep.subr.bf16.mxu0 %v13770_v61 }
 0x492   : > { %v11438_v19 = vpop.f32.mrb[160].mxu0  ;;  %6900 = vmatprep.mubr.bf16.mxu1 %v15610_v51 }
 0x493   : > { %v11439_v20 = vpop.f32.mrb[161].mxu0 }
 0x494   : > { %v15702_v29 = vadd.f32 %v11439_v20, %v11438_v19  ;;  %11761 = vmatpush3.bf16.msra.mxu0 %v13772_v8  ;;  %v11441_v9 = vpop.f32.mrb[162].mxu0  ;;  %v11588_v57 = vpop.f32.mrb[140].mxu1  ;;  %v5079_v19 = vld [vmem:[#allocation3 + $0x60] sm:$0xff] }
 0x495   : > { %v11442_v63 = vpop.f32.mrb[163].mxu0  ;;  %v11589_v16 = vpop.f32.mrb[141].mxu1  ;;  %11762 = vmatprep.subr.bf16.mxu0 %v13774_v12 }
 0x496   : > { %v15704_v45 = vadd.f32 %v11442_v63, %v11441_v9  ;;  %v15706_v34 = vadd.f32 %v11589_v16, %v11588_v57  ;;  %v11591_v52 = vpop.f32.mrb[142].mxu1  ;;  %v13781_v57 = vld [vmem:[#allocation8 + $0x390] sm:$0xff]  }
 0x497   : > { %v11592_v33 = vpop.f32.mrb[143].mxu1  ;;  %12799 = vmatmul.mubr.bf16.gmra.mrb[220].mxu0 %v15454_v1 }
 0x498   : > { %v15709_v40 = vadd.f32 %v11592_v33, %v11591_v52  ;;  %11763 = vmatpush3.bf16.msra.mxu0 %v13776_v6  ;;  %5566 = vmatprep.mubr.bf16.mxu0 %v5080_v53 }
 0x499   : > { %6901 = vmatmul.mubr.bf16.vlgmr.msra.gmra.mrb[248].mxu1 %v15615_v11  ;;  %11764 = vmatprep.subr.bf16.mxu0 %v13777_v14 }
 0x49a   : > { %v11444_v23 = vpop.f32.mrb[164].mxu0  ;;  %6908 = vmatprep.mubr.bf16.mxu1 %v15618_v31 }
 0x49b   : > { %v11445_v58 = vpop.f32.mrb[165].mxu0 }
 0x49c   : > { %v15713_v22 = vadd.f32 %v11445_v58, %v11444_v23  ;;  %11765 = vmatpush3.bf16.msra.mxu0 %v13778_v37  ;;  %v11447_v2 = vpop.f32.mrb[166].mxu0  ;;  %v11594_v39 = vpop.f32.mrb[144].mxu1  ;;  %v13782_v37 = vld [vmem:[#allocation8 + $0x398] sm:$0xff]  }
 0x49d   : > { %v11448_v1 = vpop.f32.mrb[167].mxu0  ;;  %v11595_v61 = vpop.f32.mrb[145].mxu1  ;;  %12802 = vmatprep.subr.bf16.mxu0 %v13779_v43 }
 0x49e   : > { %v15715_v3 = vadd.f32 %v11448_v1, %v11447_v2  ;;  %v15717_v8 = vadd.f32 %v11595_v61, %v11594_v39  ;;  %v11597_v12 = vpop.f32.mrb[146].mxu1  ;;  %v13783_v39 = vld [vmem:[#allocation8 + $0x3a0] sm:$0xff]  }
 0x49f   : > { %v11598_v20 = vpop.f32.mrb[147].mxu1  ;;  %5567 = vmatmul.mubr.bf16.vlgmr.msra.gmra.mrb[0].mxu0 %v5079_v19 }
 0x4a0   : > { %v15719_v9 = vadd.f32 %v11598_v20, %v11597_v12  ;;  %12803 = vmatpush3.bf16.msra.mxu0 %v13779_v43  ;;  %5574 = vmatprep.mubr.bf16.mxu0 %v15602_v36 }
 0x4a1   : > { %6909 = vmatmul.mubr.bf16.gmra.mrb[252].mxu1 %v15623_v0  ;;  %12804 = vmatprep.subr.bf16.mxu0 %v13780_v13 }
 0x4a2   : > { %v11450_v6 = vpop.f32.mrb[168].mxu0  ;;  %6916 = vmatprep.mubr.bf16.mxu1 %v15628_v47 }
 0x4a3   : > { %v11451_v63 = vpop.f32.mrb[169].mxu0 }
 0x4a4   : > { %v15724_v16 = vadd.f32 %v11451_v63, %v11450_v6  ;;  %v11453_v14 = vpop.f32.mrb[170].mxu0  ;;  %v11600_v52 = vpop.f32.mrb[148].mxu1  ;;  %12805 = vmatpush3.bf16.msra.mxu0 %v13780_v13  ;;  %v13784_v6 = vld [vmem:[#allocation8 + $0x3a8] sm:$0xff]  }
 0x4a5   : > { %v11454_v33 = vpop.f32.mrb[171].mxu0  ;;  %v11601_v53 = vpop.f32.mrb[149].mxu1  ;;  %12806 = vmatprep.subr.bf16.mxu0 %v13781_v57 }
 0x4a6   : > { %v15726_v43 = vadd.f32 %v11454_v33, %v11453_v14  ;;  %v15728_v36 = vadd.f32 %v11601_v53, %v11600_v52  ;;  %v11603_v23 = vpop.f32.mrb[150].mxu1  ;;  %v13785_v33 = vld [vmem:[#allocation8 + $0x3b0] sm:$0xff]  }
 0x4a7   : > { %v11604_v58 = vpop.f32.mrb[151].mxu1  ;;  %5575 = vmatmul.mubr.bf16.gmra.mrb[4].mxu0 %v15607_v25 }
 0x4a8   : > { %v15731_v2 = vadd.f32 %v11604_v58, %v11603_v23  ;;  %5582 = vmatprep.mubr.bf16.mxu0 %v15610_v51  ;;  %12807 = vmatpush3.bf16.msra.mxu0 %v13781_v57 }
 0x4a9   : > { %6917 = vmatmul.mubr.bf16.gmra.mrb[24].mxu1 %v15635_v26  ;;  %12808 = vmatprep.subr.bf16.mxu0 %v13782_v37 }
 0x4aa   : > { %v11456_v1 = vpop.f32.mrb[172].mxu0  ;;  %6924 = vmatprep.mubr.bf16.mxu1 %v15638_v10 }
 0x4ab   : > { %v11457_v61 = vpop.f32.mrb[173].mxu0 }
 0x4ac   : > { %v15736_v13 = vadd.f32 %v11457_v61, %v11456_v1  ;;  %v11459_v12 = vpop.f32.mrb[174].mxu0  ;;  %v11702_v19 = vpop.f32.mrb[152].mxu1  ;;  %12809 = vmatpush3.bf16.msra.mxu0 %v13782_v37 }
 0x4ad   : > { %v11460_v20 = vpop.f32.mrb[175].mxu0  ;;  %v11703_v25 = vpop.f32.mrb[153].mxu1  ;;  %12810 = vmatprep.subr.bf16.mxu0 %v13783_v39 }
 0x4ae   : > { %v15738_v63 = vadd.f32 %v11460_v20, %v11459_v12  ;;  %v15740_v51 = vadd.f32 %v11703_v25, %v11702_v19  ;;  %v11705_v57 = vpop.f32.mrb[154].mxu1 }
 0x4af   : > { %v11706_v14 = vpop.f32.mrb[155].mxu1  ;;  %5583 = vmatmul.mubr.bf16.gmra.mrb[8].mxu0 %v15615_v11  ;;  %v13786_v11 = vld [vmem:[#allocation8 + $0x3b8] sm:$0xff]  }
 0x4b0   : > { %v15743_v52 = vadd.f32 %v11706_v14, %v11705_v57  ;;  %5590 = vmatprep.mubr.bf16.mxu0 %v15618_v31  ;;  %12811 = vmatpush3.bf16.msra.mxu0 %v13783_v39 }
 0x4b1   : > { %6925 = vmatmul.mubr.bf16.gmra.mrb[28].mxu1 %v15650_v21  ;;  %12812 = vmatprep.subr.bf16.mxu0 %v13784_v6 }
 0x4b2   : > { %v11478_v53 = vpop.f32.mrb[176].mxu0  ;;  %6932 = vmatprep.mubr.bf16.mxu1 %v15653_v56 }
 0x4b3   : > { %v11479_v37 = vpop.f32.mrb[177].mxu0 }
 0x4b4   : > { %v11480_v23 = vadd.f32 %v11479_v37, %v11478_v53  ;;  %v11481_v58 = vpop.f32.mrb[178].mxu0  ;;  %v11708_v1 = vpop.f32.mrb[156].mxu1  ;;  %12813 = vmatpush3.bf16.msra.mxu0 %v13784_v6 }
 0x4b5   : > { %v11482_v61 = vpop.f32.mrb[179].mxu0  ;;  %v11709_v12 = vpop.f32.mrb[157].mxu1  ;;  %12814 = vmatprep.subr.bf16.mxu0 %v13785_v33 }
 0x4b6   : > { %v4387_v19 = vadd.f32 %v11480_v23, %v15641_v44  ;;  %v11483_v31 = vadd.f32 %v11482_v61, %v11481_v58  ;;  %v15749_v39 = vadd.f32 %v11709_v12, %v11708_v1  ;;  %v11711_v20 = vpop.f32.mrb[158].mxu1  ;;  %v15760_v44 = vld [vmem:[#allocation8 + $0x4c0] sm:$0xff]  }
 0x4b7   : > { %v11712_v25 = vpop.f32.mrb[159].mxu1  ;;  %5591 = vmatmul.mubr.bf16.gmra.mrb[12].mxu0 %v15623_v0 }
 0x4b8   : > { %v4390_v57 = vadd.f32 %v11483_v31, %v15645_v35  ;;  %v15753_v14 = vadd.f32 %v11712_v25, %v11711_v20  ;;  %5598 = vmatprep.mubr.bf16.mxu0 %v15628_v47  ;;  %12815 = vmatpush3.bf16.msra.mxu0 %v13785_v33  ;;  %v15757_v6 = vadd.f32 %v15625_v17, %v4387_v19 }
 0x4b9   : > { %6933 = vmatmul.mubr.bf16.gmra.mrb[32].mxu1 %v15666_v38  ;;  %12816 = vmatprep.subr.bf16.mxu0 %v13786_v11 }
 0x4ba   : > { %v11484_v53 = vpop.f32.mrb[180].mxu0  ;;  %6940 = vmatprep.mubr.bf16.mxu1 %v15669_v49  ;;  %v15764_v0 = vadd.f32 %v15631_v59, %v4390_v57 }
 0x4bb   : > { %v11485_v35 = vpop.f32.mrb[181].mxu0 }
 0x4bc   : > { %v11486_v37 = vadd.f32 %v11485_v35, %v11484_v53  ;;  %v11487_v23 = vpop.f32.mrb[182].mxu0  ;;  %v11714_v58 = vpop.f32.mrb[160].mxu1  ;;  %12817 = vmatpush3.bf16.msra.mxu0 %v13786_v11 }
 0x4bd   : > { %v11488_v47 = vpop.f32.mrb[183].mxu0  ;;  %v11715_v33 = vpop.f32.mrb[161].mxu1  ;;  %12834 = vmatprep.subr.bf16.mxu0 %v15760_v44 }
 0x4be   : > { %v4395_v17 = vadd.f32 %v11486_v37, %v15656_v32  ;;  %v11489_v1 = vadd.f32 %v11488_v47, %v11487_v23  ;;  %v15768_v61 = vadd.f32 %v11715_v33, %v11714_v58  ;;  %v11717_v12 = vpop.f32.mrb[162].mxu1  ;;  %v6449_v33 = vld [vmem:[#allocation3 + $0x1d0] sm:$0xff] }
 0x4bf   : > { %v11718_v19 = vpop.f32.mrb[163].mxu1  ;;  %5599 = vmatmul.mubr.bf16.gmra.mrb[16].mxu0 %v15635_v26 }
 0x4c0   : > { %v4398_v59 = vadd.f32 %v11489_v1, %v15660_v62  ;;  %v15772_v31 = vadd.f32 %v11718_v19, %v11717_v12  ;;  %5606 = vmatprep.mubr.bf16.mxu0 %v15638_v10  ;;  %v15776_v11 = vadd.f32 %v15643_v7, %v4395_v17 }
 0x4c1   : > { %6941 = vmatmul.mubr.bf16.gmra.mrb[36].mxu1 %v15682_v54 }
 0x4c2   : > { %v11490_v20 = vpop.f32.mrb[184].mxu0  ;;  %6948 = vmatprep.mubr.bf16.mxu1 %v15685_v50  ;;  %v15781_v32 = vadd.f32 %v15647_v30, %v4398_v59 }
 0x4c3   : > { %v11491_v25 = vpop.f32.mrb[185].mxu0 }
 0x4c4   : > { %v11492_v57 = vadd.f32 %v11491_v25, %v11490_v20  ;;  %v11493_v26 = vpop.f32.mrb[186].mxu0  ;;  %v11720_v53 = vpop.f32.mrb[164].mxu1 }
 0x4c5   : > { %v11494_v62 = vpop.f32.mrb[187].mxu0  ;;  %v11721_v35 = vpop.f32.mrb[165].mxu1 }
 0x4c6   : > { %v4403_v37 = vadd.f32 %v11492_v57, %v15672_v42  ;;  %v11495_v10 = vadd.f32 %v11494_v62, %v11493_v26  ;;  %v15784_v23 = vadd.f32 %v11721_v35, %v11720_v53  ;;  %v11723_v7 = vpop.f32.mrb[166].mxu1 }
 0x4c7   : > { %v11724_v58 = vpop.f32.mrb[167].mxu1  ;;  %5607 = vmatmul.mubr.bf16.gmra.mrb[20].mxu0 %v15650_v21 }
 0x4c8   : > { %v4406_v50 = vadd.f32 %v11495_v10, %v15674_v18  ;;  %v15788_v47 = vadd.f32 %v11724_v58, %v11723_v7  ;;  %5614 = vmatprep.mubr.bf16.mxu0 %v15653_v56  ;;  %v15792_v30 = vadd.f32 %v15658_v46, %v4403_v37 }
 0x4c9   : > { %6949 = vmatmul.mubr.bf16.gmra.mrb[40].mxu1 %v15698_v4 }
 0x4ca   : > { %16613 = vst [vmem:[#allocation16_spill] sm:$0xff] %v15788_v47  ;;  %v11496_v42 = vpop.f32.mrb[188].mxu0  ;;  %6956 = vmatprep.mubr.bf16.mxu1 %v6449_v33  ;;  %v15796_v17 = vadd.f32 %v15662_v41, %v4406_v50  ;;  %v6448_v41 = vld [vmem:[#allocation3 + $0x1c8] sm:$0xff] }
 0x4cb   : > { %v11497_v1 = vpop.f32.mrb[189].mxu0 }
 0x4cc   : > { %v11498_v12 = vadd.f32 %v11497_v1, %v11496_v42  ;;  %v11499_v21 = vpop.f32.mrb[190].mxu0  ;;  %v11726_v19 = vpop.f32.mrb[168].mxu1 }
 0x4cd   : > { %v11500_v18 = vpop.f32.mrb[191].mxu0  ;;  %v11727_v59 = vpop.f32.mrb[169].mxu1 }
 0x4ce   : > { %v4411_v20 = vadd.f32 %v11498_v12, %v15688_v48  ;;  %v11501_v56 = vadd.f32 %v11500_v18, %v11499_v21  ;;  %v15799_v25 = vadd.f32 %v11727_v59, %v11726_v19  ;;  %v11729_v46 = vpop.f32.mrb[170].mxu1 }
 0x4cf   : > { %v11730_v57 = vpop.f32.mrb[171].mxu1  ;;  %5615 = vmatmul.mubr.bf16.gmra.mrb[24].mxu0 %v15666_v38 }
 0x4d0   : > { %16614 = vst [vmem:[#allocation17_spill] sm:$0xff] %v15799_v25  ;;  %v4414_v4 = vadd.f32 %v11501_v56, %v15690_v24  ;;  %v15803_v26 = vadd.f32 %v11730_v57, %v11729_v46  ;;  %5622 = vmatprep.mubr.bf16.mxu0 %v15669_v49  ;;  %v15807_v53 = vadd.f32 %v15676_v5, %v4411_v20  ;;  %v5081_v5 = vld [vmem:[#allocation3 + $0x70] sm:$0xff] }
 0x4d1   : > { %6957 = vmatmul.mubr.bf16.gmra.mrb[44].mxu1 %v6448_v41 }
 0x4d2   : > { %16615 = vst [vmem:[#allocation18_spill] sm:$0xff] %v15803_v26  ;;  %v11502_v62 = vpop.f32.mrb[192].mxu0  ;;  %v15810_v48 = vadd.f32 %v15679_v15, %v4414_v4 }
 0x4d3   : > { %v11503_v35 = vpop.f32.mrb[193].mxu0 }
 0x4d4   : > { %v11504_v37 = vadd.f32 %v11503_v35, %v11502_v62  ;;  %v11505_v10 = vpop.f32.mrb[194].mxu0  ;;  %v11732_v7 = vpop.f32.mrb[172].mxu1  ;;  %v15828_v62 = vld [vmem:[#allocation3 + $0x98] sm:$0xff] }
 0x4d5   : > { %v11506_v38 = vpop.f32.mrb[195].mxu0  ;;  %v11733_v58 = vpop.f32.mrb[173].mxu1 }
 0x4d6   : > { %v4419_v24 = vadd.f32 %v11504_v37, %v15702_v29  ;;  %v11507_v50 = vadd.f32 %v11506_v38, %v11505_v10  ;;  %v15813_v33 = vadd.f32 %v11733_v58, %v11732_v7  ;;  %v11735_v49 = vpop.f32.mrb[174].mxu1  ;;  %v13789_v10 = vld [vmem:[#allocation8 + $0x4d0] sm:$0xff]  }
 0x4d7   : > { %v11736_v42 = vpop.f32.mrb[175].mxu1  ;;  %5623 = vmatmul.mubr.bf16.gmra.mrb[28].mxu0 %v15682_v54  ;;  %v13788_v54 = vld [vmem:[#allocation8 + $0x4c8] sm:$0xff]  }
 0x4d8   : > { %16616 = vst [vmem:[#allocation19_spill] sm:$0xff] %v15813_v33  ;;  %v4422_v1 = vadd.f32 %v11507_v50, %v15704_v45  ;;  %v15817_v15 = vadd.f32 %v11736_v42, %v11735_v49  ;;  %12818 = vmatprep.mubr.bf16.mxu0 %v5081_v5  ;;  %v15820_v12 = vadd.f32 %v15692_v28, %v4419_v24 }
 0x4da   : > { %16617 = vst [vmem:[#allocation20_spill] sm:$0xff] %v15817_v15  ;;  %v11508_v21 = vpop.f32.mrb[196].mxu0  ;;  %v15823_v19 = vadd.f32 %v15695_v55, %v4422_v1  ;;  %v15831_v55 = vld [vmem:[#allocation3 + $0xc0] sm:$0xff] }
 0x4db   : > { %v11509_v29 = vpop.f32.mrb[197].mxu0 }
 0x4dc   : > { %v11510_v18 = vadd.f32 %v11509_v29, %v11508_v21  ;;  %v11511_v59 = vpop.f32.mrb[198].mxu0  ;;  %v11738_v20 = vpop.f32.mrb[176].mxu1  ;;  %v15847_v29 = vld [vmem:[#allocation3 + $0xe8] sm:$0xff] }
 0x4dd   : > { %v11512_v56 = vpop.f32.mrb[199].mxu0  ;;  %v11739_v46 = vpop.f32.mrb[177].mxu1 }
 0x4de   : > { %v4427_v57 = vadd.f32 %v11510_v18, %v15713_v22  ;;  %v11513_v45 = vadd.f32 %v11512_v56, %v11511_v59  ;;  %v15826_v4 = vadd.f32 %v11739_v46, %v11738_v20  ;;  %v11741_v41 = vpop.f32.mrb[178].mxu1  ;;  %v13791_v56 = vld [vmem:[#allocation8 + $0x4e0] sm:$0xff]  }
 0x4df   : > { %v11742_v28 = vpop.f32.mrb[179].mxu1  ;;  %12819 = vmatmul.mubr.bf16.vlgmr.msra.gmra.mrb[208].mxu0 %v15828_v62 }
 0x4e0   : > { %16618 = vst [vmem:[#allocation21_spill] sm:$0xff] %v15826_v4  ;;  %v4430_v35 = vadd.f32 %v11513_v45, %v15715_v3  ;;  %v15834_v37 = vadd.f32 %v11742_v28, %v11741_v41  ;;  %12835 = vmatpush3.bf16.msra.mxu0 %v15760_v44  ;;  %12822 = vmatprep.mubr.bf16.mxu0 %v15831_v55  ;;  %v13790_v44 = vld [vmem:[#allocation8 + $0x4d8] sm:$0xff]   ;;  %v13812_v4 = vld [vmem:[#allocation8 + $0x608] sm:$0xff]  }
 0x4e1   : > { %v15839_v22 = vadd.f32 %v15706_v34, %v4427_v57  ;;  %12836 = vmatprep.subr.bf16.mxu0 %v13788_v54 }
 0x4e2   : > { %16619 = vst [vmem:[#allocation22_spill] sm:$0xff] %v15834_v37  ;;  %v11514_v7 = vpop.f32.mrb[200].mxu0  ;;  %v15842_v38 = vadd.f32 %v15709_v40, %v4430_v35  ;;  %v15850_v40 = vld [vmem:[#allocation3 + $0x110] sm:$0xff] }
 0x4e3   : > { %v11515_v58 = vpop.f32.mrb[201].mxu0 }
 0x4e4   : > { %v11516_v24 = vadd.f32 %v11515_v58, %v11514_v7  ;;  %12837 = vmatpush3.bf16.msra.mxu0 %v13788_v54  ;;  %v11517_v50 = vpop.f32.mrb[202].mxu0  ;;  %v11744_v3 = vpop.f32.mrb[180].mxu1 }
 0x4e5   : > { %v11518_v49 = vpop.f32.mrb[203].mxu0  ;;  %v11745_v42 = vpop.f32.mrb[181].mxu1  ;;  %12838 = vmatprep.subr.bf16.mxu0 %v13789_v10 }
 0x4e6   : > { %v4435_v5 = vadd.f32 %v11516_v24, %v15724_v16  ;;  %v11519_v1 = vadd.f32 %v11518_v49, %v11517_v50  ;;  %v15845_v34 = vadd.f32 %v11745_v42, %v11744_v3  ;;  %v11747_v21 = vpop.f32.mrb[182].mxu1  ;;  %v15865_v50 = vld [vmem:[#allocation3 + $0x138] sm:$0xff]  ;;  %v15868_v3 = vld [vmem:[#allocation3 + $0x160] sm:$0xff] }
 0x4e7   : > { %v11748_v18 = vpop.f32.mrb[183].mxu1  ;;  %12823 = vmatmul.mubr.bf16.gmra.mrb[212].mxu0 %v15847_v29 }
 0x4e8   : > { %16620 = vst [vmem:[#allocation23_spill] sm:$0xff] %v15845_v34  ;;  %v4438_v59 = vadd.f32 %v11519_v1, %v15726_v43  ;;  %v15853_v20 = vadd.f32 %v11748_v18, %v11747_v21  ;;  %12839 = vmatpush3.bf16.msra.mxu0 %v13789_v10  ;;  %12826 = vmatprep.mubr.bf16.mxu0 %v15850_v40  ;;  %v13792_v10 = vld [vmem:[#allocation8 + $0x4e8] sm:$0xff]   ;;  %v13794_v18 = vld [vmem:[#allocation8 + $0x4f8] sm:$0xff]  }
 0x4e9   : > { %v15857_v16 = vadd.f32 %v15717_v8, %v4435_v5  ;;  %12840 = vmatprep.subr.bf16.mxu0 %v13790_v44 }
 0x4ea   : > { %16621 = vst [vmem:[#allocation24_spill] sm:$0xff] %v15853_v20  ;;  %v11520_v46 = vpop.f32.mrb[204].mxu0  ;;  %v15860_v54 = vadd.f32 %v15719_v9, %v4438_v59 }
 0x4eb   : > { %v11521_v57 = vpop.f32.mrb[205].mxu0 }
 0x4ec   : > { %v11522_v45 = vadd.f32 %v11521_v57, %v11520_v46  ;;  %12841 = vmatpush3.bf16.msra.mxu0 %v13790_v44  ;;  %v11523_v41 = vpop.f32.mrb[206].mxu0  ;;  %v11846_v28 = vpop.f32.mrb[184].mxu1  ;;  %v13793_v44 = vld [vmem:[#allocation8 + $0x4f0] sm:$0xff]   ;;  %v15882_v46 = vld [vmem:[#allocation3 + $0x188] sm:$0xff] }
 0x4ed   : > { %v11524_v43 = vpop.f32.mrb[207].mxu0  ;;  %v11847_v35 = vpop.f32.mrb[185].mxu1  ;;  %12842 = vmatprep.subr.bf16.mxu0 %v13791_v56 }
 0x4ee   : > { %v4443_v7 = vadd.f32 %v11522_v45, %v15736_v13  ;;  %v11525_v58 = vadd.f32 %v11524_v43, %v11523_v41  ;;  %v15863_v8 = vadd.f32 %v11847_v35, %v11846_v28  ;;  %v11849_v24 = vpop.f32.mrb[186].mxu1  ;;  %v13796_v45 = vld [vmem:[#allocation8 + $0x500] sm:$0xff]   ;;  %v13797_v28 = vld [vmem:[#allocation8 + $0x548] sm:$0xff]  }
 0x4ef   : > { %12827 = vmatmul.mubr.bf16.gmra.mrb[216].mxu0 %v15865_v50  ;;  %v11850_v9 = vpop.f32.mrb[187].mxu1 }
 0x4f0   : > { %v4446_v49 = vadd.f32 %v11525_v58, %v15738_v63  ;;  %v15871_v42 = vadd.f32 %v11850_v9, %v11849_v24  ;;  %12843 = vmatpush3.bf16.msra.mxu0 %v13791_v56  ;;  %12830 = vmatprep.mubr.bf16.mxu0 %v15868_v3  ;;  %v15875_v13 = vadd.f32 %v15728_v36, %v4443_v7  ;;  %v13799_v58 = vld [vmem:[#allocation8 + $0x550] sm:$0xff]  }
 0x4f1   : > { %12844 = vmatprep.subr.bf16.mxu0 %v13792_v10  ;;  %v13800_v9 = vld [vmem:[#allocation8 + $0x510] sm:$0xff]  }
 0x4f2   : > { %v15878_v5 = vadd.f32 %v15731_v2, %v4446_v49  ;;  %v13795_v2 = vld [vmem:[#allocation8 + $0x540] sm:$0xff]  }
 0x4f4   : > { %12845 = vmatpush3.bf16.msra.mxu0 %v13792_v10  ;;  %v11852_v1 = vpop.f32.mrb[188].mxu1 }
 0x4f5   : > { %v11853_v21 = vpop.f32.mrb[189].mxu1  ;;  %12846 = vmatprep.subr.bf16.mxu0 %v13793_v44 }
 0x4f6   : > { %v15880_v59 = vadd.f32 %v11853_v21, %v11852_v1  ;;  %v11855_v63 = vpop.f32.mrb[190].mxu1 }
 0x4f7   : > { %12831 = vmatmul.mubr.bf16.gmra.mrb[220].mxu0 %v15882_v46  ;;  %v11856_v56 = vpop.f32.mrb[191].mxu1 }
 0x4f8   : > { %v15885_v36 = vadd.f32 %v11856_v56, %v11855_v63  ;;  %12847 = vmatpush3.bf16.msra.mxu0 %v13793_v44  ;;  %12850 = vmatprep.mubr.bf16.mxu0 %v15828_v62  ;;  %v13798_v62 = vld [vmem:[#allocation8 + $0x508] sm:$0xff]   ;;  %v13801_v44 = vld [vmem:[#allocation8 + $0x558] sm:$0xff]  }
 0x4f9   : > { %12848 = vmatprep.subr.bf16.mxu0 %v13794_v18  ;;  %v13802_v56 = vld [vmem:[#allocation8 + $0x518] sm:$0xff]  }
 0x4fc   : > { %12849 = vmatpush3.bf16.msra.mxu0 %v13794_v18  ;;  %v11858_v57 = vpop.f32.mrb[192].mxu1 }
 0x4fd   : > { %v11859_v41 = vpop.f32.mrb[193].mxu1  ;;  %11974 = vmatprep.subr.bf16.mxu0 %v13795_v2  ;;  %v13803_v2 = vld [vmem:[#allocation8 + $0x560] sm:$0xff]  }
 0x4fe   : > { %v15888_v43 = vadd.f32 %v11859_v41, %v11858_v57  ;;  %v11861_v35 = vpop.f32.mrb[194].mxu1 }
 0x4ff   : > { %v11862_v10 = vpop.f32.mrb[195].mxu1  ;;  %12851 = vmatmul.mubr.bf16.vlgmr.msra.gmra.mrb[208].mxu0 %v15831_v55 }
 0x500   : > { %v15891_v7 = vadd.f32 %v11862_v10, %v11861_v35  ;;  %11975 = vmatpush3.bf16.msra.mxu0 %v13796_v45  ;;  %12854 = vmatprep.mubr.bf16.mxu0 %v15847_v29  ;;  %v13804_v45 = vld [vmem:[#allocation8 + $0x520] sm:$0xff]  }
 0x501   : > { %11976 = vmatprep.subr.bf16.mxu0 %v13797_v28  ;;  %v13805_v28 = vld [vmem:[#allocation8 + $0x568] sm:$0xff]  }
 0x504   : > { %11977 = vmatpush3.bf16.msra.mxu0 %v13798_v62  ;;  %v11864_v24 = vpop.f32.mrb[196].mxu1 }
 0x505   : > { %v11865_v49 = vpop.f32.mrb[197].mxu1  ;;  %11978 = vmatprep.subr.bf16.mxu0 %v13799_v58 }
 0x506   : > { %v15894_v1 = vadd.f32 %v11865_v49, %v11864_v24  ;;  %v11867_v21 = vpop.f32.mrb[198].mxu1  ;;  %v13806_v24 = vld [vmem:[#allocation8 + $0x528] sm:$0xff]  }
 0x507   : > { %v11868_v18 = vpop.f32.mrb[199].mxu1  ;;  %12855 = vmatmul.mubr.bf16.gmra.mrb[212].mxu0 %v15850_v40 }
 0x508   : > { %v15897_v63 = vadd.f32 %v11868_v18, %v11867_v21  ;;  %11979 = vmatpush3.bf16.msra.mxu0 %v13800_v9  ;;  %12858 = vmatprep.mubr.bf16.mxu0 %v15865_v50  ;;  %v13807_v9 = vld [vmem:[#allocation8 + $0x570] sm:$0xff]  }
 0x509   : > { %11980 = vmatprep.subr.bf16.mxu0 %v13801_v44 }
 0x50c   : > { %11981 = vmatpush3.bf16.msra.mxu0 %v13802_v56  ;;  %v11870_v57 = vpop.f32.mrb[200].mxu1 }
 0x50d   : > { %v11871_v41 = vpop.f32.mrb[201].mxu1  ;;  %11982 = vmatprep.subr.bf16.mxu0 %v13803_v2  ;;  %v13808_v2 = vld [vmem:[#allocation8 + $0x530] sm:$0xff]  }
 0x50e   : > { %v15900_v35 = vadd.f32 %v11871_v41, %v11870_v57  ;;  %v11873_v10 = vpop.f32.mrb[202].mxu1 }
 0x50f   : > { %v11874_v62 = vpop.f32.mrb[203].mxu1  ;;  %12859 = vmatmul.mubr.bf16.gmra.mrb[216].mxu0 %v15868_v3 }
 0x510   : > { %v15903_v58 = vadd.f32 %v11874_v62, %v11873_v10  ;;  %11983 = vmatpush3.bf16.msra.mxu0 %v13804_v45  ;;  %12862 = vmatprep.mubr.bf16.mxu0 %v15882_v46 }
 0x511   : > { %11984 = vmatprep.subr.bf16.mxu0 %v13805_v28  ;;  %v15911_v28 = vld [vmem:[#allocation3 + $0x1b0] sm:$0xff] }
 0x512   : > { %v11622_v49 = vpop.f32.mrb[224].mxu0 }
 0x513   : > { %v11623_v44 = vpop.f32.mrb[225].mxu0 }
 0x514   : > { %v11624_v21 = vadd.f32 %v11623_v44, %v11622_v49  ;;  %11985 = vmatpush3.bf16.msra.mxu0 %v13806_v24  ;;  %v11625_v18 = vpop.f32.mrb[226].mxu0  ;;  %v11876_v56 = vpop.f32.mrb[204].mxu1  ;;  %v6412_v24 = vld [vmem:[#allocation3 + $0xa8] sm:$0xff] }
 0x515   : > { %v11626_v57 = vpop.f32.mrb[227].mxu0  ;;  %v11877_v41 = vpop.f32.mrb[205].mxu1  ;;  %11986 = vmatprep.subr.bf16.mxu0 %v13807_v9  ;;  %v13810_v9 = vld [vmem:[#allocation8 + $0x538] sm:$0xff]  }
 0x516   : > { %v15907_v10 = vadd.f32 %v15757_v6, %v11624_v21  ;;  %v11627_v45 = vadd.f32 %v11626_v57, %v11625_v18  ;;  %v15909_v62 = vadd.f32 %v11877_v41, %v11876_v56  ;;  %v11879_v27 = vpop.f32.mrb[206].mxu1  ;;  %v13811_v6 = vld [vmem:[#allocation8 + $0x600] sm:$0xff]  }
 0x517   : > { %v11880_v20 = vpop.f32.mrb[207].mxu1  ;;  %12863 = vmatmul.mubr.bf16.gmra.mrb[220].mxu0 %v15911_v28 }
 0x518   : > { %v15915_v49 = vadd.f32 %v15764_v0, %v11627_v45  ;;  %v15917_v44 = vadd.f32 %v11880_v20, %v11879_v27  ;;  %11987 = vmatpush3.bf16.msra.mxu0 %v13808_v2  ;;  %6803 = vmatprep.mubr.bf16.mxu0 %v6412_v24  ;;  %v6411_v45 = vld [vmem:[#allocation3 + $0xa0] sm:$0xff]  ;;  %v6417_v24 = vld [vmem:[#allocation3 + $0xd0] sm:$0xff] }
 0x519   : > { %11988 = vmatprep.subr.bf16.mxu0 %v13809_v60 }
 0x51a   : > { %v11628_v21 = vpop.f32.mrb[228].mxu0 }
 0x51b   : > { %v11629_v18 = vpop.f32.mrb[229].mxu0 }
 0x51c   : > { %v11630_v56 = vadd.f32 %v11629_v18, %v11628_v21  ;;  %11989 = vmatpush3.bf16.msra.mxu0 %v13810_v9  ;;  %v11631_v57 = vpop.f32.mrb[230].mxu0  ;;  %v11882_v41 = vpop.f32.mrb[208].mxu1  ;;  %v13813_v18 = vld [vmem:[#allocation8 + $0x610] sm:$0xff]  }
 0x51d   : > { %v11632_v34 = vpop.f32.mrb[231].mxu0  ;;  %v11883_v37 = vpop.f32.mrb[209].mxu1  ;;  %12866 = vmatprep.subr.bf16.mxu0 %v13811_v6 }
 0x51e   : > { %v15920_v0 = vadd.f32 %v15776_v11, %v11630_v56  ;;  %v11633_v27 = vadd.f32 %v11632_v34, %v11631_v57  ;;  %v15922_v20 = vadd.f32 %v11883_v37, %v11882_v41  ;;  %v11885_v2 = vpop.f32.mrb[210].mxu1 }
 0x51f   : > { %v11886_v60 = vpop.f32.mrb[211].mxu1  ;;  %6804 = vmatmul.mubr.bf16.vlgmr.msra.gmra.mrb[32].mxu0 %v6411_v45  ;;  %v13814_v45 = vld [vmem:[#allocation8 + $0x618] sm:$0xff]  }
 0x520   : > { %v15925_v21 = vadd.f32 %v15781_v32, %v11633_v27  ;;  %v15927_v9 = vadd.f32 %v11886_v60, %v11885_v2  ;;  %12867 = vmatpush3.bf16.msra.mxu0 %v13811_v6  ;;  %6811 = vmatprep.mubr.bf16.mxu0 %v6417_v24  ;;  %v6416_v2 = vld [vmem:[#allocation3 + $0xc8] sm:$0xff]  ;;  %v6422_v24 = vld [vmem:[#allocation3 + $0xf8] sm:$0xff] }
 0x521   : > { %12868 = vmatprep.subr.bf16.mxu0 %v13812_v4 }
 0x522   : > { %v11634_v15 = vpop.f32.mrb[232].mxu0 }
 0x523   : > { %v11635_v11 = vpop.f32.mrb[233].mxu0 }
 0x524   : > { %v11636_v56 = vadd.f32 %v11635_v11, %v11634_v15  ;;  %v11637_v34 = vpop.f32.mrb[234].mxu0  ;;  %v11888_v37 = vpop.f32.mrb[212].mxu1  ;;  %12869 = vmatpush3.bf16.msra.mxu0 %v13812_v4  ;;  %v13815_v4 = vld [vmem:[#allocation8 + $0x620] sm:$0xff]  }
 0x525   : > { %v11638_v57 = vpop.f32.mrb[235].mxu0  ;;  %v11889_v41 = vpop.f32.mrb[213].mxu1  ;;  %12870 = vmatprep.subr.bf16.mxu0 %v13813_v18 }
 0x526   : > { %v15930_v33 = vadd.f32 %v15792_v30, %v11636_v56  ;;  %v11639_v32 = vadd.f32 %v11638_v57, %v11637_v34  ;;  %v15932_v27 = vadd.f32 %v11889_v41, %v11888_v37  ;;  %v11891_v6 = vpop.f32.mrb[214].mxu1 }
 0x527   : > { %v11892_v60 = vpop.f32.mrb[215].mxu1  ;;  %6812 = vmatmul.mubr.bf16.gmra.mrb[36].mxu0 %v6416_v2  ;;  %v13816_v2 = vld [vmem:[#allocation8 + $0x628] sm:$0xff]  }
 0x528   : > { %v15935_v15 = vadd.f32 %v15796_v17, %v11639_v32  ;;  %v15937_v11 = vadd.f32 %v11892_v60, %v11891_v6  ;;  %6819 = vmatprep.mubr.bf16.mxu0 %v6422_v24  ;;  %12871 = vmatpush3.bf16.msra.mxu0 %v13813_v18  ;;  %v6421_v60 = vld [vmem:[#allocation3 + $0xf0] sm:$0xff]  ;;  %v6427_v24 = vld [vmem:[#allocation3 + $0x120] sm:$0xff] }
 0x529   : > { %12872 = vmatprep.subr.bf16.mxu0 %v13814_v45 }
 0x52a   : > { %v11640_v26 = vpop.f32.mrb[236].mxu0 }
 0x52b   : > { %v11641_v30 = vpop.f32.mrb[237].mxu0 }
 0x52c   : > { %v11642_v56 = vadd.f32 %v11641_v30, %v11640_v26  ;;  %v11643_v34 = vpop.f32.mrb[238].mxu0  ;;  %v11910_v37 = vpop.f32.mrb[216].mxu1  ;;  %12873 = vmatpush3.bf16.msra.mxu0 %v13814_v45  ;;  %v13817_v30 = vld [vmem:[#allocation8 + $0x630] sm:$0xff]  }
 0x52d   : > { %v11644_v57 = vpop.f32.mrb[239].mxu0  ;;  %v11911_v41 = vpop.f32.mrb[217].mxu1  ;;  %12874 = vmatprep.subr.bf16.mxu0 %v13815_v4 }
 0x52e   : > { %v15940_v25 = vadd.f32 %v15807_v53, %v11642_v56  ;;  %v11645_v17 = vadd.f32 %v11644_v57, %v11643_v34  ;;  %v11912_v32 = vadd.f32 %v11911_v41, %v11910_v37  ;;  %v11913_v6 = vpop.f32.mrb[218].mxu1 }
 0x52f   : > { %v11914_v18 = vpop.f32.mrb[219].mxu1  ;;  %6820 = vmatmul.mubr.bf16.gmra.mrb[40].mxu0 %v6421_v60 }
 0x530   : > { %v15943_v47 = vadd.f32 %v15810_v48, %v11645_v17  ;;  %v15946_v26 = vadd.f32 %v11912_v32, %v15863_v8  ;;  %v11915_v45 = vadd.f32 %v11914_v18, %v11913_v6  ;;  %6827 = vmatprep.mubr.bf16.mxu0 %v6427_v24  ;;  %12875 = vmatpush3.bf16.msra.mxu0 %v13815_v4  ;;  %v13818_v17 = vld [vmem:[#allocation8 + $0x638] sm:$0xff]   ;;  %v6426_v18 = vld [vmem:[#allocation3 + $0x118] sm:$0xff] }
 0x531   : > { %12876 = vmatprep.subr.bf16.mxu0 %v13816_v2 }
 0x532   : > { %v15949_v53 = vadd.f32 %v11915_v45, %v15871_v42  ;;  %v11646_v56 = vpop.f32.mrb[240].mxu0  ;;  %v6432_v42 = vld [vmem:[#allocation3 + $0x148] sm:$0xff] }
 0x533   : > { %v11647_v34 = vpop.f32.mrb[241].mxu0 }
 0x534   : > { %v11648_v37 = vadd.f32 %v11647_v34, %v11646_v56  ;;  %v11649_v57 = vpop.f32.mrb[242].mxu0  ;;  %v11916_v41 = vpop.f32.mrb[220].mxu1  ;;  %12877 = vmatpush3.bf16.msra.mxu0 %v13816_v2 }
 0x535   : > { %v11650_v60 = vpop.f32.mrb[243].mxu0  ;;  %v11917_v48 = vpop.f32.mrb[221].mxu1  ;;  %12878 = vmatprep.subr.bf16.mxu0 %v13817_v30 }
 0x536   : > { %v15952_v8 = vadd.f32 %v15820_v12, %v11648_v37  ;;  %v11651_v32 = vadd.f32 %v11650_v60, %v11649_v57  ;;  %v11918_v4 = vadd.f32 %v11917_v48, %v11916_v41  ;;  %v11919_v6 = vpop.f32.mrb[222].mxu1 }
 0x537   : > { %v11920_v24 = vpop.f32.mrb[223].mxu1  ;;  %6828 = vmatmul.mubr.bf16.gmra.mrb[44].mxu0 %v6426_v18 }
 0x538   : > { %v15955_v45 = vadd.f32 %v15823_v19, %v11651_v32  ;;  %v15958_v56 = vadd.f32 %v11918_v4, %v15880_v59  ;;  %v11921_v2 = vadd.f32 %v11920_v24, %v11919_v6  ;;  %6835 = vmatprep.mubr.bf16.mxu0 %v6432_v42  ;;  %12879 = vmatpush3.bf16.msra.mxu0 %v13817_v30  ;;  %v6431_v6 = vld [vmem:[#allocation3 + $0x140] sm:$0xff]  ;;  %v6437_v24 = vld [vmem:[#allocation3 + $0x170] sm:$0xff] }
 0x539   : > { %12880 = vmatprep.subr.bf16.mxu0 %v13818_v17 }
 0x53a   : > { %v15961_v12 = vadd.f32 %v11921_v2, %v15885_v36  ;;  %v11652_v34 = vpop.f32.mrb[244].mxu0 }
 0x53b   : > { %v11653_v37 = vpop.f32.mrb[245].mxu0 }
 0x53c   : > { %v11654_v57 = vadd.f32 %v11653_v37, %v11652_v34  ;;  %v11655_v41 = vpop.f32.mrb[246].mxu0  ;;  %v11922_v60 = vpop.f32.mrb[224].mxu1  ;;  %12881 = vmatpush3.bf16.msra.mxu0 %v13818_v17 }
 0x53d   : > { %v11656_v48 = vpop.f32.mrb[247].mxu0  ;;  %v11923_v18 = vpop.f32.mrb[225].mxu1 }
 0x53e   : > { %v15964_v19 = vadd.f32 %v15839_v22, %v11654_v57  ;;  %v11657_v59 = vadd.f32 %v11656_v48, %v11655_v41  ;;  %v11924_v32 = vadd.f32 %v11923_v18, %v11922_v60  ;;  %v11925_v4 = vpop.f32.mrb[226].mxu1 }
 0x53f   : > { %v11926_v30 = vpop.f32.mrb[227].mxu1  ;;  %6836 = vmatmul.mubr.bf16.gmra.mrb[48].mxu0 %v6431_v6 }
 0x540   : > { %v15967_v36 = vadd.f32 %v15842_v38, %v11657_v59  ;;  %v15970_v42 = vadd.f32 %v11924_v32, %v15888_v43  ;;  %v11927_v2 = vadd.f32 %v11926_v30, %v11925_v4  ;;  %6843 = vmatprep.mubr.bf16.mxu0 %v6437_v24  ;;  %v6436_v43 = vld [vmem:[#allocation3 + $0x168] sm:$0xff]  ;;  %v6442_v4 = vld [vmem:[#allocation3 + $0x198] sm:$0xff] }
 0x542   : > { %v15973_v17 = vadd.f32 %v11927_v2, %v15891_v7  ;;  %v11658_v22 = vpop.f32.mrb[248].mxu0 }
 0x543   : > { %v11659_v34 = vpop.f32.mrb[249].mxu0 }
 0x544   : > { %v11660_v37 = vadd.f32 %v11659_v34, %v11658_v22  ;;  %v11661_v57 = vpop.f32.mrb[250].mxu0  ;;  %v11928_v41 = vpop.f32.mrb[228].mxu1 }
 0x545   : > { %v11662_v60 = vpop.f32.mrb[251].mxu0  ;;  %v11929_v48 = vpop.f32.mrb[229].mxu1 }
 0x546   : > { %v15976_v18 = vadd.f32 %v15857_v16, %v11660_v37  ;;  %v11663_v38 = vadd.f32 %v11662_v60, %v11661_v57  ;;  %v11930_v59 = vadd.f32 %v11929_v48, %v11928_v41  ;;  %v11931_v6 = vpop.f32.mrb[230].mxu1 }
 0x547   : > { %v11932_v32 = vpop.f32.mrb[231].mxu1  ;;  %6844 = vmatmul.mubr.bf16.gmra.mrb[52].mxu0 %v6436_v43 }
 0x548   : > { %v15979_v7 = vadd.f32 %v15860_v54, %v11663_v38  ;;  %v15982_v30 = vadd.f32 %v11930_v59, %v15894_v1  ;;  %v11933_v24 = vadd.f32 %v11932_v32, %v11931_v6  ;;  %6851 = vmatprep.mubr.bf16.mxu0 %v6442_v4  ;;  %v6441_v1 = vld [vmem:[#allocation3 + $0x190] sm:$0xff]  ;;  %v6447_v6 = vld [vmem:[#allocation3 + $0x1c0] sm:$0xff] }
 0x54a   : > { %v15985_v2 = vadd.f32 %v11933_v24, %v15897_v63  ;;  %v11664_v16 = vpop.f32.mrb[252].mxu0 }
 0x54b   : > { %v11665_v22 = vpop.f32.mrb[253].mxu0 }
 0x54c   : > { %v11666_v34 = vadd.f32 %v11665_v22, %v11664_v16  ;;  %v11667_v37 = vpop.f32.mrb[254].mxu0  ;;  %v11934_v57 = vpop.f32.mrb[232].mxu1 }
 0x54d   : > { %v11668_v41 = vpop.f32.mrb[255].mxu0  ;;  %v11935_v60 = vpop.f32.mrb[233].mxu1 }
 0x54e   : > { %v15988_v48 = vadd.f32 %v15875_v13, %v11666_v34  ;;  %v11669_v54 = vadd.f32 %v11668_v41, %v11667_v37  ;;  %v11936_v38 = vadd.f32 %v11935_v60, %v11934_v57  ;;  %v11937_v43 = vpop.f32.mrb[234].mxu1  ;;  %v6446_v37 = vld [vmem:[#allocation3 + $0x1b8] sm:$0xff] }
 0x54f   : > { %v11938_v59 = vpop.f32.mrb[235].mxu1  ;;  %6852 = vmatmul.mubr.bf16.gmra.mrb[56].mxu0 %v6441_v1 }
 0x550   : > { %v15991_v63 = vadd.f32 %v15878_v5, %v11669_v54  ;;  %v15994_v32 = vadd.f32 %v11936_v38, %v15900_v35  ;;  %v11939_v4 = vadd.f32 %v11938_v59, %v11937_v43  ;;  %6859 = vmatprep.mubr.bf16.mxu0 %v6447_v6 }
 0x552   : > { %v15997_v24 = vadd.f32 %v11939_v4, %v15903_v58 }
 0x554   : > { %v11940_v13 = vpop.f32.mrb[236].mxu1 }
 0x555   : > { %v11941_v16 = vpop.f32.mrb[237].mxu1 }
 0x556   : > { %v11942_v22 = vadd.f32 %v11941_v16, %v11940_v13  ;;  %v11943_v34 = vpop.f32.mrb[238].mxu1 }
 0x557   : > { %v11944_v57 = vpop.f32.mrb[239].mxu1  ;;  %6860 = vmatmul.mubr.bf16.gmra.mrb[60].mxu0 %v6446_v37 }
 0x558   : > { %v16000_v41 = vadd.f32 %v11942_v22, %v15909_v62  ;;  %v11945_v5 = vadd.f32 %v11944_v57, %v11943_v34  ;;  %12882 = vmatprep.mubr.bf16.mxu0 %v15831_v55 }
 0x55a   : > { %v16004_v35 = vadd.f32 %v11945_v5, %v15917_v44 }
 0x55c   : > { %v11946_v60 = vpop.f32.mrb[240].mxu1 }
 0x55d   : > { %v11947_v54 = vpop.f32.mrb[241].mxu1 }
 0x55e   : > { %v11948_v58 = vadd.f32 %v11947_v54, %v11946_v60  ;;  %v11949_v38 = vpop.f32.mrb[242].mxu1 }
 0x55f   : > { %v11950_v43 = vpop.f32.mrb[243].mxu1  ;;  %12883 = vmatmul.mubr.bf16.vlgmr.msra.gmra.mrb[208].mxu0 %v15847_v29 }
 0x560   : > { %v16008_v1 = vadd.f32 %v11948_v58, %v15922_v20  ;;  %v11951_v59 = vadd.f32 %v11950_v43, %v11949_v38  ;;  %12886 = vmatprep.mubr.bf16.mxu0 %v15850_v40 }
 0x562   : > { %v16012_v62 = vadd.f32 %v11951_v59, %v15927_v9 }
 0x564   : > { %v11952_v55 = vpop.f32.mrb[244].mxu1 }
 0x565   : > { %v11953_v6 = vpop.f32.mrb[245].mxu1 }
 0x566   : > { %v11954_v44 = vadd.f32 %v11953_v6, %v11952_v55  ;;  %v11955_v4 = vpop.f32.mrb[246].mxu1  ;;  %v6450_v55 = vld [vmem:[#allocation3 + $0x1d8] sm:$0xff] }
 0x567   : > { %v11956_v13 = vpop.f32.mrb[247].mxu1  ;;  %12887 = vmatmul.mubr.bf16.gmra.mrb[212].mxu0 %v15865_v50 }
 0x568   : > { %v16016_v16 = vadd.f32 %v11954_v44, %v15932_v27  ;;  %v11957_v29 = vadd.f32 %v11956_v13, %v11955_v4  ;;  %12890 = vmatprep.mubr.bf16.mxu0 %v15868_v3 }
 0x56a   : > { %v16020_v20 = vadd.f32 %v11957_v29, %v15937_v11 }
 0x56c   : > { %v12054_v40 = vpop.f32.mrb[248].mxu1 }
 0x56d   : > { %v12055_v22 = vpop.f32.mrb[249].mxu1 }
 0x56e   : > { %v16022_v9 = vadd.f32 %v12055_v22, %v12054_v40  ;;  %v12057_v34 = vpop.f32.mrb[250].mxu1 }
 0x56f   : > { %v12058_v37 = vpop.f32.mrb[251].mxu1  ;;  %12891 = vmatmul.mubr.bf16.gmra.mrb[216].mxu0 %v15882_v46 }
 0x570   : > { %v16025_v57 = vadd.f32 %v12058_v37, %v12057_v34  ;;  %12894 = vmatprep.mubr.bf16.mxu0 %v15911_v28 }
 0x572   : > { %v11766_v50 = vpop.f32.mrb[0].mxu0 }
 0x573   : > { %v11767_v27 = vpop.f32.mrb[1].mxu0 }
 0x574   : > { %v11768_v5 = vadd.f32 %v11767_v27, %v11766_v50  ;;  %v11769_v60 = vpop.f32.mrb[2].mxu0  ;;  %v12060_v3 = vpop.f32.mrb[252].mxu1 }
 0x575   : > { %v11770_v54 = vpop.f32.mrb[3].mxu0  ;;  %v12061_v11 = vpop.f32.mrb[253].mxu1 }
 0x576   : > { %v5569_v58 = vadd.f32 %v11768_v5, %v15740_v51  ;;  %v11771_v38 = vadd.f32 %v11770_v54, %v11769_v60  ;;  %v16029_v43 = vadd.f32 %v12061_v11, %v12060_v3  ;;  %v12063_v59 = vpop.f32.mrb[254].mxu1 }
 0x577   : > { %v12064_v6 = vpop.f32.mrb[255].mxu1  ;;  %12895 = vmatmul.mubr.bf16.gmra.mrb[220].mxu0 %v6450_v55 }
 0x578   : > { %v13146_v46 = vadd.f32 %v15907_v10, %v5569_v58  ;;  %v5572_v28 = vadd.f32 %v11771_v38, %v15743_v52  ;;  %v16033_v44 = vadd.f32 %v12064_v6, %v12063_v59 }
 0x57a   : > { %v13158_v4 = vadd.f32 %v15915_v49, %v5572_v28  ;;  %v11772_v13 = vpop.f32.mrb[4].mxu0  ;;  %v16037_v29 = vadd.f32 %v13146_v46, %v15946_v26 }
 0x57b   : > { %v11773_v51 = vpop.f32.mrb[5].mxu0 }
 0x57c   : > { %v11774_v40 = vadd.f32 %v11773_v51, %v11772_v13  ;;  %v11775_v22 = vpop.f32.mrb[6].mxu0  ;;  %v12066_v34 = vpop.f32.mrb[24].mxu1  ;;  %v16040_v37 = vadd.f32 %v13158_v4, %v15949_v53 }
 0x57d   : > { %v11776_v50 = vpop.f32.mrb[7].mxu0  ;;  %v12067_v27 = vpop.f32.mrb[25].mxu1 }
 0x57e   : > { %v5577_v10 = vadd.f32 %v11774_v40, %v15749_v39  ;;  %v11777_v52 = vadd.f32 %v11776_v50, %v11775_v22  ;;  %v16043_v5 = vadd.f32 %v12067_v27, %v12066_v34  ;;  %v12069_v60 = vpop.f32.mrb[26].mxu1 }
 0x57f   : > { %v12070_v49 = vpop.f32.mrb[27].mxu1 }
 0x580   : > { %v13140_v3 = vadd.f32 %v15920_v0, %v5577_v10  ;;  %v5580_v26 = vadd.f32 %v11777_v52, %v15753_v14  ;;  %v16047_v54 = vadd.f32 %v12070_v49, %v12069_v60 }
 0x582   : > { %v13152_v11 = vadd.f32 %v15925_v21, %v5580_v26  ;;  %v11778_v58 = vpop.f32.mrb[8].mxu0  ;;  %v16051_v53 = vadd.f32 %v13140_v3, %v15958_v56 }
 0x583   : > { %v11779_v38 = vpop.f32.mrb[9].mxu0 }
 0x584   : > { %v11780_v59 = vadd.f32 %v11779_v38, %v11778_v58  ;;  %v11781_v39 = vpop.f32.mrb[10].mxu0  ;;  %v12072_v55 = vpop.f32.mrb[28].mxu1  ;;  %v16054_v6 = vadd.f32 %v13152_v11, %v15961_v12 }
 0x585   : > { %v11782_v46 = vpop.f32.mrb[11].mxu0  ;;  %v12073_v28 = vpop.f32.mrb[29].mxu1 }
 0x586   : > { %v5585_v0 = vadd.f32 %v11780_v59, %v15768_v61  ;;  %v11783_v14 = vadd.f32 %v11782_v46, %v11781_v39  ;;  %v16057_v4 = vadd.f32 %v12073_v28, %v12072_v55  ;;  %v12075_v13 = vpop.f32.mrb[30].mxu1 }
 0x587   : > { %v12076_v21 = vpop.f32.mrb[31].mxu1 }
 0x588   : > { %v13170_v51 = vadd.f32 %v15930_v33, %v5585_v0  ;;  %v5588_v56 = vadd.f32 %v11783_v14, %v15772_v31  ;;  %v16061_v40 = vadd.f32 %v12076_v21, %v12075_v13 }
 0x58a   : > { %v13182_v22 = vadd.f32 %v15935_v15, %v5588_v56  ;;  %v11784_v34 = vpop.f32.mrb[12].mxu0  ;;  %v16065_v12 = vadd.f32 %v13170_v51, %v15970_v42  ;;  %v16622_v42 = vld [vmem:[#allocation16_spill] sm:$0xff] }
 0x58b   : > { %v11785_v50 = vpop.f32.mrb[13].mxu0 }
 0x58c   : > { %v11786_v27 = vadd.f32 %v11785_v50, %v11784_v34  ;;  %v11787_v61 = vpop.f32.mrb[14].mxu0  ;;  %v12078_v10 = vpop.f32.mrb[32].mxu1  ;;  %v16068_v52 = vadd.f32 %v13182_v22, %v15973_v17 }
 0x58d   : > { %v11788_v60 = vpop.f32.mrb[15].mxu0  ;;  %v12079_v49 = vpop.f32.mrb[33].mxu1 }
 0x58e   : > { %v5593_v33 = vadd.f32 %v11786_v27, %v15784_v23  ;;  %v11789_v31 = vadd.f32 %v11788_v60, %v11787_v61  ;;  %v16071_v3 = vadd.f32 %v12079_v49, %v12078_v10  ;;  %v12081_v26 = vpop.f32.mrb[34].mxu1  ;;  %v13819_v61 = vld [vmem:[#allocation10 + $0x180] sm:$0xff]  }
 0x58f   : > { %v12082_v15 = vpop.f32.mrb[35].mxu1  ;;  %v13820_v10 = vld [vmem:[#allocation10 + $0x140] sm:$0xff]   ;;  %12118 = vmatprep.subr.bf16.mxu1 %v13819_v61 }
 0x590   : > { %v13164_v11 = vadd.f32 %v15940_v25, %v5593_v33  ;;  %v5596_v58 = vadd.f32 %v11789_v31, %v16622_v42  ;;  %v16075_v38 = vadd.f32 %v12082_v15, %v12081_v26  ;;  %v16623_v25 = vld [vmem:[#allocation17_spill] sm:$0xff]  ;;  %12119 = vmatpush3.bf16.msra.mxu1 %v13820_v10 }
 0x591   : > { %v16627_v10 = vld [vmem:[#allocation21_spill] sm:$0xff] }
 0x592   : > { %v13176_v59 = vadd.f32 %v15943_v47, %v5596_v58  ;;  %v11790_v39 = vpop.f32.mrb[16].mxu0  ;;  %v16079_v17 = vadd.f32 %v13164_v11, %v15982_v30  ;;  %v16624_v30 = vld [vmem:[#allocation18_spill] sm:$0xff]  ;;  %v16625_v58 = vld [vmem:[#allocation19_spill] sm:$0xff] }
 0x593   : > { %v11791_v55 = vpop.f32.mrb[17].mxu0 }
 0x594   : > { %v11792_v46 = vadd.f32 %v11791_v55, %v11790_v39  ;;  %v11793_v23 = vpop.f32.mrb[18].mxu0  ;;  %v12084_v28 = vpop.f32.mrb[36].mxu1  ;;  %v16082_v0 = vadd.f32 %v13176_v59, %v15985_v2 }
 0x595   : > { %v11794_v14 = vpop.f32.mrb[19].mxu0  ;;  %v12085_v13 = vpop.f32.mrb[37].mxu1 }
 0x596   : > { %v5601_v21 = vadd.f32 %v11792_v46, %v16623_v25  ;;  %v11795_v51 = vadd.f32 %v11794_v14, %v11793_v23  ;;  %v16085_v56 = vadd.f32 %v12085_v13, %v12084_v28  ;;  %v12087_v22 = vpop.f32.mrb[38].mxu1  ;;  %v16626_v23 = vld [vmem:[#allocation20_spill] sm:$0xff]  ;;  %v13821_v13 = vld [vmem:[#allocation10 + $0x188] sm:$0xff]  }
 0x597   : > { %v12088_v47 = vpop.f32.mrb[39].mxu1  ;;  %v13822_v25 = vld [vmem:[#allocation10 + $0x148] sm:$0xff]   ;;  %12120 = vmatprep.subr.bf16.mxu1 %v13821_v13 }
 0x598   : > { %v13194_v34 = vadd.f32 %v15952_v8, %v5601_v21  ;;  %v5604_v50 = vadd.f32 %v11795_v51, %v16624_v30  ;;  %v16089_v27 = vadd.f32 %v12088_v47, %v12087_v22  ;;  %12121 = vmatpush3.bf16.msra.mxu1 %v13822_v25 }
 0x59a   : > { %v13206_v2 = vadd.f32 %v15955_v45, %v5604_v50  ;;  %v11796_v60 = vpop.f32.mrb[20].mxu0  ;;  %v16093_v49 = vadd.f32 %v13194_v34, %v15994_v32 }
 0x59b   : > { %v11797_v33 = vpop.f32.mrb[21].mxu0 }
 0x59c   : > { %v11798_v31 = vadd.f32 %v11797_v33, %v11796_v60  ;;  %v11799_v26 = vpop.f32.mrb[22].mxu0  ;;  %v12090_v15 = vpop.f32.mrb[40].mxu1  ;;  %v16096_v8 = vadd.f32 %v13206_v2, %v15997_v24 }
 0x59d   : > { %v11800_v11 = vpop.f32.mrb[23].mxu0  ;;  %v12091_v42 = vpop.f32.mrb[41].mxu1 }
 0x59e   : > { %v5609_v59 = vadd.f32 %v11798_v31, %v16625_v58  ;;  %v11801_v39 = vadd.f32 %v11800_v11, %v11799_v26  ;;  %v16099_v55 = vadd.f32 %v12091_v42, %v12090_v15  ;;  %v12093_v45 = vpop.f32.mrb[42].mxu1  ;;  %v16628_v26 = vld [vmem:[#allocation22_spill] sm:$0xff]  ;;  %v13823_v42 = vld [vmem:[#allocation10 + $0x190] sm:$0xff]  }
 0x59f   : > { %v12094_v46 = vpop.f32.mrb[43].mxu1  ;;  %v13824_v58 = vld [vmem:[#allocation10 + $0x150] sm:$0xff]   ;;  %12122 = vmatprep.subr.bf16.mxu1 %v13823_v42 }
 0x5a0   : > { %v13188_v32 = vadd.f32 %v15964_v19, %v5609_v59  ;;  %v5612_v28 = vadd.f32 %v11801_v39, %v16626_v23  ;;  %v16103_v14 = vadd.f32 %v12094_v46, %v12093_v45  ;;  %12123 = vmatpush3.bf16.msra.mxu1 %v13824_v58  ;;  %v13838_v42 = vld [vmem:[#allocation10 + $0x1b0] sm:$0xff]   ;;  %v13845_v58 = vld [vmem:[#allocation10 + $0x1e8] sm:$0xff]  }
 0x5a2   : > { %v13200_v24 = vadd.f32 %v15967_v36, %v5612_v28  ;;  %v11802_v21 = vpop.f32.mrb[24].mxu0  ;;  %v16107_v51 = vadd.f32 %v13188_v32, %v16000_v41  ;;  %v16629_v28 = vld [vmem:[#allocation23_spill] sm:$0xff] }
 0x5a3   : > { %v11803_v22 = vpop.f32.mrb[25].mxu0 }
 0x5a4   : > { %v11804_v47 = vadd.f32 %v11803_v22, %v11802_v21  ;;  %v11805_v34 = vpop.f32.mrb[26].mxu0  ;;  %v12096_v30 = vpop.f32.mrb[44].mxu1  ;;  %v16110_v19 = vadd.f32 %v13200_v24, %v16004_v35  ;;  %v16630_v21 = vld [vmem:[#allocation24_spill] sm:$0xff]  ;;  %v13825_v22 = vld [vmem:[#allocation10 + $0x198] sm:$0xff]  }
 0x5a5   : > { %v11806_v50 = vpop.f32.mrb[27].mxu0  ;;  %v12097_v61 = vpop.f32.mrb[45].mxu1  ;;  %12124 = vmatprep.subr.bf16.mxu1 %v13825_v22 }
 0x5a6   : > { %v5617_v2 = vadd.f32 %v11804_v47, %v16627_v10  ;;  %v11807_v60 = vadd.f32 %v11806_v50, %v11805_v34  ;;  %v16113_v33 = vadd.f32 %v12097_v61, %v12096_v30  ;;  %v12099_v36 = vpop.f32.mrb[46].mxu1  ;;  %v13826_v47 = vld [vmem:[#allocation10 + $0x158] sm:$0xff]   ;;  %v13829_v30 = vld [vmem:[#allocation10 + $0x200] sm:$0xff]   ;;  %v13831_v61 = vld [vmem:[#allocation10 + $0x208] sm:$0xff]  }
 0x5a7   : > { %v12100_v31 = vpop.f32.mrb[47].mxu1  ;;  %12125 = vmatpush3.bf16.msra.mxu1 %v13826_v47  ;;  %v13830_v50 = vld [vmem:[#allocation10 + $0x1c0] sm:$0xff]   ;;  %12158 = vmatprep.subr.bf16.mxu0 %v13829_v30 }
 0x5a8   : > { %v13218_v41 = vadd.f32 %v15976_v18, %v5617_v2  ;;  %v5620_v15 = vadd.f32 %v11807_v60, %v16628_v26  ;;  %v16117_v11 = vadd.f32 %v12100_v31, %v12099_v36  ;;  %12159 = vmatpush3.bf16.msra.mxu0 %v13830_v50  ;;  %v13827_v10 = vld [vmem:[#allocation10 + $0x1a0] sm:$0xff]   ;;  %v13836_v60 = vld [vmem:[#allocation10 + $0x1d0] sm:$0xff]   ;;  %v13839_v36 = vld [vmem:[#allocation10 + $0x1d8] sm:$0xff]  }
 0x5a9   : > { %v13828_v2 = vld [vmem:[#allocation10 + $0x160] sm:$0xff]   ;;  %12160 = vmatprep.subr.bf16.mxu0 %v13831_v61  ;;  %12126 = vmatprep.subr.bf16.mxu1 %v13827_v10  ;;  %v13832_v31 = vld [vmem:[#allocation10 + $0x1a8] sm:$0xff]  }
 0x5aa   : > { %v13230_v35 = vadd.f32 %v15979_v7, %v5620_v15  ;;  %v11808_v59 = vpop.f32.mrb[28].mxu0  ;;  %v16121_v39 = vadd.f32 %v13218_v41, %v16008_v1  ;;  %v13842_v41 = vld [vmem:[#allocation10 + $0x1e0] sm:$0xff]   ;;  %v13834_v26 = vld [vmem:[#allocation10 + $0x168] sm:$0xff]  }
 0x5ab   : > { %v11809_v45 = vpop.f32.mrb[29].mxu0  ;;  %12127 = vmatpush3.bf16.msra.mxu1 %v13828_v2  ;;  %v13843_v15 = vld [vmem:[#allocation10 + $0x228] sm:$0xff]  }
 0x5ac   : > { %v11810_v46 = vadd.f32 %v11809_v45, %v11808_v59  ;;  %v11811_v32 = vpop.f32.mrb[30].mxu0  ;;  %v16124_v23 = vadd.f32 %v13230_v35, %v16012_v62  ;;  %12128 = vmatprep.subr.bf16.mxu1 %v13832_v31  ;;  %v13840_v35 = vld [vmem:[#allocation10 + $0x170] sm:$0xff]   ;;  %v13844_v45 = vld [vmem:[#allocation10 + $0x1b8] sm:$0xff]  }
 0x5ad   : > { %v11812_v18 = vpop.f32.mrb[31].mxu0  ;;  %v13847_v59 = vld [vmem:[#allocation10 + $0x230] sm:$0xff]  }
 0x5ae   : > { %v5625_v13 = vadd.f32 %v11810_v46, %v16629_v28  ;;  %v11813_v25 = vadd.f32 %v11812_v18, %v11811_v32  ;;  %v13848_v46 = vld [vmem:[#allocation10 + $0x1f0] sm:$0xff]   ;;  %v13846_v32 = vld [vmem:[#allocation10 + $0x178] sm:$0xff]  }
 0x5af   : > { %12129 = vmatpush3.bf16.msra.mxu1 %v13834_v26  ;;  %v13849_v18 = vld [vmem:[#allocation10 + $0x238] sm:$0xff]  }
 0x5b0   : > { %v13212_v24 = vadd.f32 %v15988_v48, %v5625_v13  ;;  %v5628_v7 = vadd.f32 %v11813_v25, %v16630_v21  ;;  %v13833_v48 = vld [vmem:[#allocation10 + $0x1c8] sm:$0xff]   ;;  %12130 = vmatprep.subr.bf16.mxu1 %v13838_v42  ;;  %v13850_v28 = vld [vmem:[#allocation10 + $0x1f8] sm:$0xff]   ;;  %v16136_v13 = vld [vmem:[#allocation10 + $0x240] sm:$0xff]  }
 0x5b1   : > { %12161 = vmatpush3.bf16.msra.mxu0 %v13833_v48  ;;  %v13852_v25 = vld [vmem:[#allocation10 + $0x40] sm:$0xff]  }
 0x5b2   : > { %v13224_v1 = vadd.f32 %v15991_v63, %v5628_v7  ;;  %v16131_v34 = vadd.f32 %v13212_v24, %v16016_v16  ;;  %v13835_v63 = vld [vmem:[#allocation10 + $0x210] sm:$0xff]   ;;  %v13837_v16 = vld [vmem:[#allocation10 + $0x218] sm:$0xff]  }
 0x5b3   : > { %12162 = vmatprep.subr.bf16.mxu0 %v13835_v63  ;;  %12131 = vmatpush3.bf16.msra.mxu1 %v13840_v35 }
 0x5b4   : > { %v16134_v62 = vadd.f32 %v13224_v1, %v16020_v20  ;;  %v13841_v20 = vld [vmem:[#allocation10 + $0x220] sm:$0xff]   ;;  %12132 = vmatprep.subr.bf16.mxu1 %v13844_v45 }
 0x5b5   : > { %12163 = vmatpush3.bf16.msra.mxu0 %v13836_v60 }
 0x5b6   : > { %12164 = vmatprep.subr.bf16.mxu0 %v13837_v16 }
 0x5b7   : > { %12133 = vmatpush3.bf16.msra.mxu1 %v13846_v32 }
 0x5b8   : > { %12898 = vmatprep.subr.bf16.mxu1 %v16136_v13 }
 0x5b9   : > { %12165 = vmatpush3.bf16.msra.mxu0 %v13839_v36 }
 0x5ba   : > { %12166 = vmatprep.subr.bf16.mxu0 %v13841_v20 }
 0x5bd   : > { %12167 = vmatpush3.bf16.msra.mxu0 %v13842_v41 }
 0x5be   : > { %12168 = vmatprep.subr.bf16.mxu0 %v13843_v15 }
 0x5c1   : > { %12169 = vmatpush3.bf16.msra.mxu0 %v13845_v58 }
 0x5c2   : > { %12170 = vmatprep.subr.bf16.mxu0 %v13847_v59 }
 0x5c5   : > { %12171 = vmatpush3.bf16.msra.mxu0 %v13848_v46 }
 0x5c6   : > { %12172 = vmatprep.subr.bf16.mxu0 %v13849_v18 }
 0x5c9   : > { %12173 = vmatpush3.bf16.msra.mxu0 %v13850_v28 }
 0x5ca   : > { %12210 = vmatprep.subr.bf16.mxu0 %v13852_v25 }
 0x5f2   : > { %v11990_v24 = vpop.f32.mrb[32].mxu0 }
 0x5f3   : > { %v11991_v21 = vpop.f32.mrb[33].mxu0 }
 0x5f4   : > { %v11992_v7 = vadd.f32 %v11991_v21, %v11990_v24  ;;  %v11993_v22 = vpop.f32.mrb[34].mxu0 }
 0x5f5   : > { %v11994_v47 = vpop.f32.mrb[35].mxu0 }
 0x5f6   : > { %v6903_v1 = vadd.f32 %v16022_v9, %v11992_v7  ;;  %v11995_v30 = vadd.f32 %v11994_v47, %v11993_v22 }
 0x5f8   : > { %v6906_v50 = vadd.f32 %v16025_v57, %v11995_v30  ;;  %v16142_v61 = vadd.f32 %v16037_v29, %v6903_v1 }
 0x5fa   : > { %v11996_v48 = vpop.f32.mrb[36].mxu0  ;;  %v16145_v10 = vadd.f32 %v16040_v37, %v6906_v50 }
 0x5fb   : > { %v11997_v2 = vpop.f32.mrb[37].mxu0 }
 0x5fc   : > { %v11998_v63 = vadd.f32 %v11997_v2, %v11996_v48  ;;  %v11999_v60 = vpop.f32.mrb[38].mxu0 }
 0x5fd   : > { %v12000_v16 = vpop.f32.mrb[39].mxu0 }
 0x5fe   : > { %v6911_v36 = vadd.f32 %v16029_v43, %v11998_v63  ;;  %v12001_v20 = vadd.f32 %v12000_v16, %v11999_v60 }
 0x600   : > { %v6914_v31 = vadd.f32 %v16033_v44, %v12001_v20  ;;  %v16150_v9 = vadd.f32 %v16051_v53, %v6911_v36 }
 0x602   : > { %v12002_v57 = vpop.f32.mrb[40].mxu0  ;;  %v16153_v29 = vadd.f32 %v16054_v6, %v6914_v31 }
 0x603   : > { %v12003_v41 = vpop.f32.mrb[41].mxu0 }
 0x604   : > { %v12004_v26 = vadd.f32 %v12003_v41, %v12002_v57  ;;  %v12005_v37 = vpop.f32.mrb[42].mxu0 }
 0x605   : > { %v12006_v15 = vpop.f32.mrb[43].mxu0 }
 0x606   : > { %v6919_v42 = vadd.f32 %v16043_v5, %v12004_v26  ;;  %v12007_v58 = vadd.f32 %v12006_v15, %v12005_v37 }
 0x608   : > { %v6922_v35 = vadd.f32 %v16047_v54, %v12007_v58  ;;  %v16158_v43 = vadd.f32 %v16065_v12, %v6919_v42 }
 0x60a   : > { %v12008_v44 = vpop.f32.mrb[44].mxu0  ;;  %v16161_v53 = vadd.f32 %v16068_v52, %v6922_v35 }
 0x60b   : > { %v12009_v59 = vpop.f32.mrb[45].mxu0 }
 0x60c   : > { %v12010_v45 = vadd.f32 %v12009_v59, %v12008_v44  ;;  %v12011_v6 = vpop.f32.mrb[46].mxu0 }
 0x60d   : > { %v12012_v46 = vpop.f32.mrb[47].mxu0 }
 0x60e   : > { %v6927_v32 = vadd.f32 %v16057_v4, %v12010_v45  ;;  %v12013_v18 = vadd.f32 %v12012_v46, %v12011_v6 }
 0x610   : > { %v6930_v28 = vadd.f32 %v16061_v40, %v12013_v18  ;;  %v16166_v5 = vadd.f32 %v16079_v17, %v6927_v32 }
 0x612   : > { %v12014_v54 = vpop.f32.mrb[48].mxu0  ;;  %v16169_v12 = vadd.f32 %v16082_v0, %v6930_v28 }
 0x613   : > { %v12015_v25 = vpop.f32.mrb[49].mxu0 }
 0x614   : > { %v12016_v24 = vadd.f32 %v12015_v25, %v12014_v54  ;;  %v12017_v52 = vpop.f32.mrb[50].mxu0 }
 0x615   : > { %v12018_v21 = vpop.f32.mrb[51].mxu0 }
 0x616   : > { %v6935_v7 = vadd.f32 %v16071_v3, %v12016_v24  ;;  %v12019_v22 = vadd.f32 %v12018_v21, %v12017_v52 }
 0x618   : > { %v6938_v47 = vadd.f32 %v16075_v38, %v12019_v22  ;;  %v16174_v4 = vadd.f32 %v16093_v49, %v6935_v7 }
 0x61a   : > { %v12020_v40 = vpop.f32.mrb[52].mxu0  ;;  %v16177_v17 = vadd.f32 %v16096_v8, %v6938_v47 }
 0x61b   : > { %v12021_v1 = vpop.f32.mrb[53].mxu0 }
 0x61c   : > { %v12022_v30 = vadd.f32 %v12021_v1, %v12020_v40  ;;  %v12023_v0 = vpop.f32.mrb[54].mxu0 }
 0x61d   : > { %v12024_v50 = vpop.f32.mrb[55].mxu0 }
 0x61e   : > { %v6943_v48 = vadd.f32 %v16085_v56, %v12022_v30  ;;  %v12025_v2 = vadd.f32 %v12024_v50, %v12023_v0 }
 0x620   : > { %v6946_v63 = vadd.f32 %v16089_v27, %v12025_v2  ;;  %v16182_v3 = vadd.f32 %v16107_v51, %v6943_v48 }
 0x622   : > { %v12026_v38 = vpop.f32.mrb[56].mxu0  ;;  %v16185_v49 = vadd.f32 %v16110_v19, %v6946_v63 }
 0x623   : > { %v12027_v60 = vpop.f32.mrb[57].mxu0 }
 0x624   : > { %v12028_v16 = vadd.f32 %v12027_v60, %v12026_v38  ;;  %v12029_v8 = vpop.f32.mrb[58].mxu0 }
 0x625   : > { %v12030_v36 = vpop.f32.mrb[59].mxu0 }
 0x626   : > { %v6951_v20 = vadd.f32 %v16099_v55, %v12028_v16  ;;  %v12031_v31 = vadd.f32 %v12030_v36, %v12029_v8 }
 0x628   : > { %v6954_v57 = vadd.f32 %v16103_v14, %v12031_v31  ;;  %v16190_v56 = vadd.f32 %v16121_v39, %v6951_v20  ;;  %v16203_v39 = vld [vmem:[%s16587_s7] ss:$0 sm:$0xff] }
 0x62a   : > { %v12032_v27 = vpop.f32.mrb[60].mxu0  ;;  %v16193_v51 = vadd.f32 %v16124_v23, %v6954_v57 }
 0x62b   : > { %v12033_v41 = vpop.f32.mrb[61].mxu0 }
 0x62c   : > { %v12034_v26 = vadd.f32 %v12033_v41, %v12032_v27  ;;  %v12035_v19 = vpop.f32.mrb[62].mxu0 }
 0x62d   : > { %v12036_v37 = vpop.f32.mrb[63].mxu0 }
 0x62e   : > { %v6959_v15 = vadd.f32 %v16113_v33, %v12034_v26  ;;  %v12037_v42 = vadd.f32 %v12036_v37, %v12035_v19  ;;  %v16212_v33 = vld [vmem:[%s16588_s8] ss:$0 sm:$0xff] }
 0x630   : > { %v6962_v58 = vadd.f32 %v16117_v11, %v12037_v42  ;;  %v16198_v55 = vadd.f32 %v16131_v34, %v6959_v15 }
 0x632   : > { %v12884_v14 = vpop.f32.mrb[208].mxu0  ;;  %v16206_v23 = vadd.f32 %v16134_v62, %v6962_v58 }
 0x633   : > { %v13143_v35 = vadd.f32 %v16150_v9, %v12884_v14  ;;  %v6999_v44 = vpop.f32.mrb[209].mxu0 }
 0x634   : > { %v13149_v11 = vadd.f32 %v16142_v61, %v6999_v44  ;;  %v12885_v34 = vpop.f32.mrb[210].mxu0 }
 0x635   : > { %v7087_v59 = vmul.f32 %v13143_v35, %v16203_v39  ;;  %v13155_v45 = vadd.f32 %v16153_v29, %v12885_v34  ;;  %v7002_v6 = vpop.f32.mrb[211].mxu0 }
 0x636   : > { %v7085_v46 = vmul.f32 %v13149_v11, %v16203_v39  ;;  %v13161_v62 = vadd.f32 %v16145_v10, %v7002_v6 }
 0x637   : > { %v7110_v9 = vadd.f32 %v16212_v33, %v7087_v59  ;;  %v7088_v32 = vmul.f32 %v13155_v45, %v16203_v39 }
 0x638   : > { %v7108_v18 = vadd.f32 %v16212_v33, %v7085_v46  ;;  %v7086_v28 = vmul.f32 %v13161_v62, %v16203_v39 }
 0x639   : > { %v7126_v54 = vmul.f32 0.01, %v7110_v9  ;;  %v7111_v61 = vadd.f32 %v16212_v33, %v7088_v32 }
 0x63a   : > { %v7124_v25 = vmul.f32 0.01, %v7108_v18  ;;  %v7109_v24 = vadd.f32 %v16212_v33, %v7086_v28  ;;  %v12888_v29 = vpop.f32.mrb[212].mxu0 }
 0x63b   : > { %v7127_v52 = vmul.f32 0.01, %v7111_v61  ;;  %v13167_v21 = vadd.f32 %v16166_v5, %v12888_v29  ;;  %v7015_v7 = vpop.f32.mrb[213].mxu0  ;;  %v7142_v40 = vmax.f32 %v7110_v9, %v7126_v54 }
 0x63c   : > { %v7125_v10 = vmul.f32 0.01, %v7109_v24  ;;  %v13173_v22 = vadd.f32 %v16158_v43, %v7015_v7  ;;  %v12889_v47 = vpop.f32.mrb[214].mxu0  ;;  %v7140_v48 = vmax.f32 %v7108_v18, %v7124_v25 }
 0x63d   : > { %v7143_v1 = vmax.f32 %v7111_v61, %v7127_v52  ;;  %v7091_v30 = vmul.f32 %v13167_v21, %v16203_v39  ;;  %v13179_v0 = vadd.f32 %v16169_v12, %v12889_v47  ;;  %v7018_v50 = vpop.f32.mrb[215].mxu0 }
 0x63e   : > { %v7141_v2 = vmax.f32 %v7109_v24, %v7125_v10  ;;  %v7089_v63 = vmul.f32 %v13173_v22, %v16203_v39  ;;  %v13185_v38 = vadd.f32 %v16161_v53, %v7018_v50 }
 0x63f   : > { %v16231_v60 = vpack.c.bf16 %v7143_v1, %v7142_v40  ;;  %v7114_v43 = vadd.f32 %v16212_v33, %v7091_v30  ;;  %v7092_v8 = vmul.f32 %v13179_v0, %v16203_v39 }
 0x640   : > { %v16233_v5 = vpack.c.bf16 %v7141_v2, %v7140_v48  ;;  %v7112_v16 = vadd.f32 %v16212_v33, %v7089_v63  ;;  %v7090_v15 = vmul.f32 %v13185_v38, %v16203_v39 }
 0x641   : > { %v7180_v36 = vshll.u32 %v16231_v60, 16  ;;  %v7184_v12 = vshrl.u32 %v16231_v60, 16  ;;  %v7262_v20 = vrot.slane %v16231_v60, 1  ;;  %v7342_v31 = vrot.slane %v16231_v60, 2 }
 0x642   : > { %v7173_v53 = vshrl.u32 %v16233_v5, 16  ;;  %v7175_v57 = vshll.u32 %v16233_v5, 16  ;;  %v7261_v27 = vrot.slane %v16233_v5, 1  ;;  %v7341_v41 = vrot.slane %v16233_v5, 2  ;;  %v12892_v26 = vpop.f32.mrb[216].mxu0 }
 0x643   : > { %v7295_v19 = vrot.slane %v7184_v12, 1  ;;  %v7296_v37 = vrot.slane %v7180_v36, 2  ;;  %v7031_v42 = vpop.f32.mrb[217].mxu0  ;;  %v7182_v34 = vrot.slane %v7180_v36, 1  ;;  %v7130_v6 = vmul.f32 0.01, %v7114_v43 }
 0x644   : > { %v7177_v58 = vrot.slane %v7175_v57, 1  ;;  %v7263_v14 = vsel %vm783_vm5, %v7261_v27, %v7262_v20  ;;  %v7292_v35 = vrot.slane %v7173_v53, 1  ;;  %v7293_v44 = vrot.slane %v7175_v57, 2  ;;  %v12893_v11 = vpop.f32.mrb[218].mxu0 }
 0x645   : > { %v16250_v59 = vor.u32 %v7296_v37, %v7295_v19  ;;  %7284 = vst [vmem:[#allocation4 + $0x10] sm:$0xff] %v7263_v14  ;;  %v7343_v45 = vsel %vm884_vm1, %v7341_v41, %v7342_v31  ;;  %v7034_v46 = vpop.f32.mrb[219].mxu0  ;;  %v7128_v32 = vmul.f32 0.01, %v7112_v16  ;;  %v7115_v18 = vadd.f32 %v16212_v33, %v7092_v8 }
 0x646   : > { %v7178_v62 = vor.u32 %v7177_v58, %v7173_v53  ;;  %v7294_v9 = vor.u32 %v7293_v44, %v7292_v35  ;;  %7364 = vst [vmem:[#allocation4 + $0x20] sm:$0xff] %v7343_v45  ;;  %v7113_v28 = vadd.f32 %v16212_v33, %v7090_v15  ;;  %v13191_v54 = vadd.f32 %v16182_v3, %v12892_v26 }
 0x647   : > { %v13197_v61 = vadd.f32 %v16174_v4, %v7031_v42  ;;  %v13203_v25 = vadd.f32 %v16185_v49, %v12893_v11  ;;  %v7131_v52 = vmul.f32 0.01, %v7115_v18  ;;  %v7146_v3 = vmax.f32 %v7114_v43, %v7130_v6 }
 0x648   : > { %v16261_v24 = vsel %vm674_vm3, %v7178_v62, %v7182_v34  ;;  %v16265_v29 = vsel %vm816_vm2, %v7294_v9, %v16250_v59  ;;  %v7129_v21 = vmul.f32 0.01, %v7113_v28  ;;  %v7095_v7 = vmul.f32 %v13191_v54, %v16203_v39 }
 0x649   : > { %v7093_v10 = vmul.f32 %v13197_v61, %v16203_v39  ;;  %v7096_v22 = vmul.f32 %v13203_v25, %v16203_v39  ;;  %v7147_v47 = vmax.f32 %v7115_v18, %v7131_v52  ;;  %v13209_v4 = vadd.f32 %v16177_v17, %v7034_v46 }
 0x64a   : > { %v12896_v49 = vpop.f32.mrb[220].mxu0  ;;  %v7144_v40 = vmax.f32 %v7112_v16, %v7128_v32  ;;  %v7145_v1 = vmax.f32 %v7113_v28, %v7129_v21  ;;  %v7118_v30 = vadd.f32 %v16212_v33, %v7095_v7  ;;  %v7186_v8 = vor.u32 %v7184_v12, %v7182_v34 }
 0x64b   : > { %v16273_v0 = vadd.f32 %v16212_v33, %v7093_v10  ;;  %v7047_v50 = vpop.f32.mrb[221].mxu0  ;;  %v16275_v48 = vpack.c.bf16 %v7147_v47, %v7146_v3  ;;  %v7119_v2 = vadd.f32 %v16212_v33, %v7096_v22  ;;  %v13215_v63 = vadd.f32 %v16198_v55, %v12896_v49  ;;  %v13854_v10 = vld [vmem:[#allocation10] sm:$0xff]  }
 0x64c   : > { %v13221_v38 = vadd.f32 %v16190_v56, %v7047_v50  ;;  %v12897_v43 = vpop.f32.mrb[222].mxu0  ;;  %v16280_v17 = vpack.c.bf16 %v7145_v1, %v7144_v40  ;;  %v7134_v16 = vmul.f32 0.01, %v7118_v30  ;;  %v7094_v36 = vmul.f32 %v13209_v4, %v16203_v39  ;;  %v13856_v1 = vld [vmem:[#allocation10 + $0x250] sm:$0xff]  }
 0x64d   : > { %7167 = vst [vmem:[#allocation4 + $0x78] sm:$0xff] %v16275_v48  ;;  %v7196_v53 = vshll.u32 %v16275_v48, 16  ;;  %v7200_v57 = vshrl.u32 %v16275_v48, 16  ;;  %v7266_v27 = vrot.slane %v16275_v48, 1  ;;  %v7346_v41 = vrot.slane %v16275_v48, 2  ;;  %v7050_v55 = vpop.f32.mrb[223].mxu0 }
 0x64e   : > { %7166 = vst [vmem:[#allocation4 + $0x50] sm:$0xff] %v16280_v17  ;;  %v7188_v56 = vshll.u32 %v16280_v17, 16  ;;  %v7192_v12 = vshrl.u32 %v16280_v17, 16  ;;  %v7264_v26 = vrot.slane %v16280_v17, 1  ;;  %v7344_v19 = vrot.slane %v16280_v17, 2 }
 0x64f   : > { %v7303_v37 = vrot.slane %v7200_v57, 1  ;;  %v7304_v15 = vrot.slane %v7196_v53, 2  ;;  %v16296_v42 = vmul.f32 0.01, %v16273_v0  ;;  %v7135_v58 = vmul.f32 0.01, %v7119_v2 }
 0x650   : > { %v7190_v14 = vrot.slane %v7188_v56, 1  ;;  %v16301_v35 = vsel %vm783_vm5, %v7262_v20, %v7264_v26  ;;  %v16306_v44 = vsel %vm783_vm5, %v7264_v26, %v7266_v27  ;;  %v7299_v11 = vrot.slane %v7192_v12, 1 }
 0x651   : > { %v7198_v34 = vrot.slane %v7196_v53, 1  ;;  %v16308_v45 = vor.u32 %v7304_v15, %v7303_v37  ;;  %7286 = vst [vmem:[#allocation4 + $0x60] sm:$0xff] %v16306_v44  ;;  %v7300_v6 = vrot.slane %v7188_v56, 2  ;;  %v16314_v46 = vsel %vm884_vm1, %v7342_v31, %v7344_v19  ;;  %v13853_v31 = vld [vmem:[#allocation10 + $0x248] sm:$0xff]   ;;  %v13858_v53 = vld [vmem:[#allocation10 + $0x50] sm:$0xff]  }
 0x652   : > { %v16317_v20 = vsel %vm674_vm3, %v7186_v8, %v7190_v14  ;;  %v7194_v62 = vor.u32 %v7192_v12, %v7190_v14  ;;  %v16322_v9 = vsel %vm884_vm1, %v7344_v19, %v7346_v41  ;;  %v7150_v32 = vmax.f32 %v7118_v30, %v7134_v16  ;;  %v13859_v19 = vld [vmem:[#allocation10 + $0x258] sm:$0xff]  }
 0x653   : > { %v7301_v18 = vor.u32 %v7300_v6, %v7299_v11  ;;  %7366 = vst [vmem:[#allocation4 + $0x70] sm:$0xff] %v16322_v9  ;;  %v7151_v28 = vmax.f32 %v7119_v2, %v7135_v58  ;;  %v7117_v54 = vadd.f32 %v16212_v33, %v7094_v36  ;;  %v7099_v61 = vmul.f32 %v13215_v63, %v16203_v39 }
 0x654   : > { %7829 = vmatprep.mubr.bf16.mxu1 %v16317_v20  ;;  %v16329_v25 = vsel %vm674_vm3, %v7194_v62, %v7198_v34  ;;  %v7097_v52 = vmul.f32 %v13221_v38, %v16203_v39  ;;  %v13227_v21 = vadd.f32 %v16206_v23, %v12897_v43  ;;  %v13233_v7 = vadd.f32 %v16193_v51, %v7050_v55  ;;  %v13855_v51 = vld [vmem:[#allocation10 + $0x48] sm:$0xff]  }
 0x655   : > { %7830 = vmatmul.mubr.bf16.vlgmr.msra.gmra.mrb[48].mxu1 %v16231_v60  ;;  %7245 = vst [vmem:[#allocation4 + $0x58] sm:$0xff] %v16329_v25  ;;  %v16338_v22 = vsel %vm816_vm2, %v16250_v59, %v7301_v18  ;;  %v16342_v3 = vsel %vm816_vm2, %v7301_v18, %v16308_v45  ;;  %v16344_v47 = vpack.c.bf16 %v7151_v28, %v7150_v32  ;;  %v7133_v4 = vmul.f32 0.01, %v7117_v54  ;;  %v13857_v43 = vld [vmem:[#allocation10 + $0x8] sm:$0xff]  }
 0x656   : > { %12899 = vmatpush3.bf16.msra.mxu1 %v16136_v13  ;;  %7837 = vmatprep.mubr.bf16.mxu1 %v16329_v25  ;;  %7333 = vst [vmem:[#allocation4 + $0x68] sm:$0xff] %v16342_v3  ;;  %v7122_v23 = vadd.f32 %v16212_v33, %v7099_v61  ;;  %v16351_v49 = vadd.f32 %v16212_v33, %v7097_v52  ;;  %v13862_v52 = vld [vmem:[#allocation10 + $0x260] sm:$0xff]  }
 0x657   : > { %v7100_v59 = vmul.f32 %v13227_v21, %v16203_v39  ;;  %v7098_v40 = vmul.f32 %v13233_v7, %v16203_v39  ;;  %7894 = vmatprep.mubr.bf16.mxu0 %v16338_v22  ;;  %v7148_v13 = vmax.f32 %v16273_v0, %v16296_v42  ;;  %7169 = vst [vmem:[#allocation4 + $0xc8] sm:$0xff] %v16344_v47  ;;  %v7212_v30 = vshll.u32 %v16344_v47, 16 }
 0x658   : > { %v7216_v50 = vshrl.u32 %v16344_v47, 16  ;;  %7895 = vmatmul.mubr.bf16.vlgmr.msra.gmra.mrb[64].mxu0 %v16301_v35  ;;  %12900 = vmatprep.subr.bf16.mxu1 %v13853_v31  ;;  %v7149_v2 = vmax.f32 %v7117_v54, %v7133_v4  ;;  %v7138_v63 = vmul.f32 0.01, %v7122_v23  ;;  %v7136_v38 = vmul.f32 0.01, %v16351_v49 }
 0x659   : > { %v7123_v39 = vadd.f32 %v16212_v33, %v7100_v59  ;;  %7902 = vmatprep.mubr.bf16.mxu0 %v16342_v3  ;;  %12211 = vmatpush3.bf16.msra.mxu0 %v13854_v10  ;;  %v7202_v0 = vor.u32 %v7200_v57, %v7198_v34  ;;  %v7312_v16 = vrot.slane %v7212_v30, 2  ;;  %v7121_v36 = vadd.f32 %v16212_v33, %v7098_v40  ;;  %v13860_v34 = vld [vmem:[#allocation10 + $0x10] sm:$0xff]  }
 0x65a   : > { %v7311_v8 = vrot.slane %v7216_v50, 1  ;;  %12901 = vmatpush3.bf16.msra.mxu1 %v13853_v31  ;;  %12212 = vmatprep.subr.bf16.mxu0 %v13855_v51  ;;  %v7270_v55 = vrot.slane %v16344_v47, 1  ;;  %v7350_v56 = vrot.slane %v16344_v47, 2  ;;  %v16370_v12 = vpack.c.bf16 %v7149_v2, %v7148_v13  ;;  %v13861_v31 = vld [vmem:[#allocation10 + $0x58] sm:$0xff]  }
 0x65b   : > { %v7139_v26 = vmul.f32 0.01, %v7123_v39  ;;  %12902 = vmatprep.subr.bf16.mxu1 %v13856_v1  ;;  %v7214_v37 = vrot.slane %v7212_v30, 1  ;;  %v7154_v15 = vmax.f32 %v7122_v23, %v7138_v63  ;;  %v7152_v57 = vmax.f32 %v16351_v49, %v7136_v38  ;;  %v13863_v49 = vld [vmem:[#allocation10 + $0x18] sm:$0xff]   ;;  %v13864_v30 = vld [vmem:[#allocation10 + $0x60] sm:$0xff]  }
 0x65c   : > { %v7137_v42 = vmul.f32 0.01, %v7121_v36  ;;  %7168 = vst [vmem:[#allocation4 + $0xa0] sm:$0xff] %v16370_v12  ;;  %v7204_v33 = vshll.u32 %v16370_v12, 16  ;;  %v7208_v58 = vshrl.u32 %v16370_v12, 16  ;;  %v7268_v14 = vrot.slane %v16370_v12, 1 }
 0x65d   : > { %v7348_v11 = vrot.slane %v16370_v12, 2  ;;  %12213 = vmatpush3.bf16.msra.mxu0 %v13857_v43  ;;  %7838 = vmatmul.mubr.bf16.gmra.mrb[52].mxu1 %v16280_v17  ;;  %v16379_v6 = vor.u32 %v7312_v16, %v7311_v8  ;;  %v7155_v62 = vmax.f32 %v7123_v39, %v7139_v26  ;;  %v7218_v4 = vor.u32 %v7216_v50, %v7214_v37  ;;  %v7250_v16 = vld [vmem:[#allocation4 + $0x120] sm:$0xff] }
 0x65e   : > { %v7153_v32 = vmax.f32 %v7121_v36, %v7137_v42  ;;  %12903 = vmatpush3.bf16.msra.mxu1 %v13856_v1  ;;  %12214 = vmatprep.subr.bf16.mxu0 %v13858_v53  ;;  %v7206_v18 = vrot.slane %v7204_v33, 1  ;;  %v16384_v28 = vsel %vm783_vm5, %v7266_v27, %v7268_v14  ;;  %v16389_v54 = vsel %vm783_vm5, %v7268_v14, %v7270_v55 }
 0x65f   : > { %v7307_v61 = vrot.slane %v7208_v58, 1  ;;  %12904 = vmatprep.subr.bf16.mxu1 %v13859_v19  ;;  %7287 = vst [vmem:[#allocation4 + $0x88] sm:$0xff] %v16384_v28  ;;  %7288 = vst [vmem:[#allocation4 + $0xb0] sm:$0xff] %v16389_v54  ;;  %v7308_v21 = vrot.slane %v7204_v33, 2  ;;  %v16396_v7 = vsel %vm884_vm1, %v7346_v41, %v7348_v11  ;;  %v16401_v27 = vsel %vm884_vm1, %v7348_v11, %v7350_v56  ;;  %v13866_v33 = vld [vmem:[#allocation10 + $0x20] sm:$0xff]  }
 0x660   : > { %v16403_v10 = vpack.c.bf16 %v7155_v62, %v7154_v15  ;;  %7903 = vmatmul.mubr.bf16.gmra.mrb[68].mxu0 %v16306_v44  ;;  %v16407_v51 = vsel %vm674_vm3, %v7202_v0, %v7206_v18  ;;  %v7210_v23 = vor.u32 %v7208_v58, %v7206_v18  ;;  %7367 = vst [vmem:[#allocation4 + $0x98] sm:$0xff] %v16396_v7  ;;  %7368 = vst [vmem:[#allocation4 + $0xc0] sm:$0xff] %v16401_v27  ;;  %v7338_v15 = vld [vmem:[#allocation4 + $0x130] sm:$0x7f] }
 0x661   : > { %v16411_v41 = vpack.c.bf16 %v7153_v32, %v7152_v57  ;;  %12215 = vmatpush3.bf16.msra.mxu0 %v13860_v34  ;;  %7246 = vst [vmem:[#allocation4 + $0x80] sm:$0xff] %v16407_v51  ;;  %v7309_v59 = vor.u32 %v7308_v21, %v7307_v61  ;;  %7845 = vmatprep.mubr.bf16.mxu1 %v16407_v51  ;;  %v13867_v62 = vld [vmem:[#allocation10 + $0x68] sm:$0xff]   ;;  %v13907_v32 = vld [vmem:[#allocation10 + $0x2b8] sm:$0xff]  }
 0x662   : > { %7171 = vst [vmem:[#allocation4 + $0x118] sm:$0xff] %v16403_v10  ;;  %v7228_v40 = vshll.u32 %v16403_v10, 16  ;;  %v7232_v1 = vshrl.u32 %v16403_v10, 16  ;;  %v7274_v13 = vrot.slane %v16403_v10, 1  ;;  %12905 = vmatpush3.bf16.msra.mxu1 %v13859_v19  ;;  %v16420_v50 = vsel %vm674_vm3, %v7210_v23, %v7214_v37  ;;  %12216 = vmatprep.subr.bf16.mxu0 %v13861_v31 }
 0x663   : > { %v7354_v2 = vrot.slane %v16403_v10, 2  ;;  %7170 = vst [vmem:[#allocation4 + $0xf0] sm:$0xff] %v16411_v41  ;;  %v7220_v63 = vshll.u32 %v16411_v41, 16  ;;  %v7224_v38 = vshrl.u32 %v16411_v41, 16  ;;  %12906 = vmatprep.subr.bf16.mxu1 %v13862_v52  ;;  %7247 = vst [vmem:[#allocation4 + $0xa8] sm:$0xff] %v16420_v50  ;;  %v16429_v39 = vsel %vm816_vm2, %v16308_v45, %v7309_v59  ;;  %v13865_v45 = vld [vmem:[#allocation10 + $0x268] sm:$0xff]  }
 0x664   : > { %v7314_v43 = vsel %vm816_vm2, %v7309_v59, %v16379_v6  ;;  %v7230_v0 = vrot.slane %v7228_v40, 1  ;;  %7291 = vst [vmem:[#allocation4 + $0x128] sm:$0x7f] %v7274_v13  ;;  %v7319_v8 = vrot.slane %v7232_v1, 1  ;;  %7334 = vst [vmem:[#allocation4 + $0x90] sm:$0xff] %v16429_v39  ;;  %v7320_v36 = vrot.slane %v7228_v40, 2  ;;  %7910 = vmatprep.mubr.bf16.mxu0 %v16429_v39 }
 0x665   : > { %7335 = vst [vmem:[#allocation4 + $0xb8] sm:$0xff] %v7314_v43  ;;  %7371 = vst [vmem:[#allocation4 + $0x138] sm:$0x3f] %v7354_v2  ;;  %v7222_v53 = vrot.slane %v7220_v63, 1  ;;  %v7272_v26 = vrot.slane %v16411_v41, 1  ;;  %v7315_v19 = vrot.slane %v7224_v38, 1  ;;  %12217 = vmatpush3.bf16.msra.mxu0 %v13863_v49  ;;  %7846 = vmatmul.mubr.bf16.gmra.mrb[56].mxu1 %v16275_v48 }
 0x666   : > { %v7234_v37 = vor.u32 %v7232_v1, %v7230_v0  ;;  %v7316_v57 = vrot.slane %v7220_v63, 2  ;;  %v7352_v42 = vrot.slane %v16411_v41, 2  ;;  %12218 = vmatprep.subr.bf16.mxu0 %v13864_v30  ;;  %v7321_v58 = vor.u32 %v7320_v36, %v7319_v8  ;;  %12907 = vmatpush3.bf16.msra.mxu1 %v13862_v52  ;;  %v13868_v10 = vld [vmem:[#allocation10 + $0x270] sm:$0xff]   ;;  %v13869_v41 = vld [vmem:[#allocation10 + $0x28] sm:$0xff]   ;;  %v13871_v59 = vld [vmem:[#allocation10 + $0x278] sm:$0xff]  }
 0x667   : > { %v16439_v14 = vsel %vm674_vm3, %v7218_v4, %v7222_v53  ;;  %v7226_v11 = vor.u32 %v7224_v38, %v7222_v53  ;;  %v7273_v34 = vsel %vm783_vm5, %v7270_v55, %v7272_v26  ;;  %v7275_v61 = vsel %vm783_vm5, %v7272_v26, %v7274_v13  ;;  %7853 = vmatprep.mubr.bf16.mxu1 %v16420_v50  ;;  %v13870_v49 = vld [vmem:[#allocation10 + $0x70] sm:$0xff]   ;;  %v13875_v1 = vld [vmem:[#allocation10 + $0xc0] sm:$0xff]   ;;  %v13874_v13 = vld [vmem:[#allocation10 + $0x38] sm:$0xff]  }
 0x668   : > { %v7251_v18 = vsel %vm15487_vm12, %v7234_v37, %v7250_v16  ;;  %7248 = vst [vmem:[#allocation4 + $0xd0] sm:$0xff] %v16439_v14  ;;  %7289 = vst [vmem:[#allocation4 + $0xd8] sm:$0xff] %v7273_v34  ;;  %v7317_v31 = vor.u32 %v7316_v57, %v7315_v19  ;;  %v7353_v21 = vsel %vm884_vm1, %v7350_v56, %v7352_v42  ;;  %7911 = vmatmul.mubr.bf16.gmra.mrb[72].mxu0 %v16384_v28  ;;  %v13872_v40 = vld [vmem:[#allocation10 + $0x30] sm:$0xff]   ;;  %v13876_v30 = vld [vmem:[#allocation10 + $0x80] sm:$0xff]  }
 0x669   : > { %7252 = vst [vmem:[#allocation4 + $0x120] sm:$0xff] %v7251_v18  ;;  %v7339_v52 = vsel %vm15495_vm13, %v7321_v58, %v7338_v15  ;;  %v7231_v4 = vsel %vm674_vm3, %v7226_v11, %v7230_v0  ;;  %7290 = vst [vmem:[#allocation4 + $0x100] sm:$0xff] %v7275_v61  ;;  %v7355_v23 = vsel %vm884_vm1, %v7352_v42, %v7354_v2  ;;  %12908 = vmatprep.subr.bf16.mxu1 %v13865_v45  ;;  %v13877_v2 = vld [vmem:[#allocation10 + $0x2c0] sm:$0xff]   ;;  %v13880_v38 = vld [vmem:[#allocation10 + $0x88] sm:$0xff]  }
 0x66a   : > { %7369 = vst [vmem:[#allocation4 + $0xe8] sm:$0xff] %v7353_v21  ;;  %7340 = vst [vmem:[#allocation4 + $0x130] sm:$0x7f] %v7339_v52  ;;  %v7318_v47 = vsel %vm816_vm2, %v16379_v6, %v7317_v31  ;;  %v7322_v56 = vsel %vm816_vm2, %v7317_v31, %v7321_v58  ;;  %7918 = vmatprep.mubr.bf16.mxu0 %v7314_v43  ;;  %12219 = vmatpush3.bf16.msra.mxu0 %v13866_v33  ;;  %v13873_v6 = vld [vmem:[#allocation10 + $0x78] sm:$0xff]   ;;  %v13879_v63 = vld [vmem:[#allocation10 + $0x280] sm:$0xff]  }
 0x66b   : > { %7249 = vst [vmem:[#allocation4 + $0xf8] sm:$0xff] %v7231_v4  ;;  %7370 = vst [vmem:[#allocation4 + $0x110] sm:$0xff] %v7355_v23  ;;  %12909 = vmatpush3.bf16.msra.mxu1 %v13865_v45  ;;  %12220 = vmatprep.subr.bf16.mxu0 %v13867_v62  ;;  %v13881_v43 = vld [vmem:[#allocation10 + $0x2c8] sm:$0xff]   ;;  %v13884_v0 = vld [vmem:[#allocation10 + $0x90] sm:$0xff]  }
 0x66c   : > { %7336 = vst [vmem:[#allocation4 + $0xe0] sm:$0xff] %v7318_v47  ;;  %7337 = vst [vmem:[#allocation4 + $0x108] sm:$0xff] %v7322_v56  ;;  %12910 = vmatprep.subr.bf16.mxu1 %v13868_v10  ;;  %v13885_v8 = vld [vmem:[#allocation10 + $0x2d0] sm:$0xff]   ;;  %v13886_v16 = vld [vmem:[#allocation10 + $0xd8] sm:$0xff]  }
 0x66d   : > { %7854 = vmatmul.mubr.bf16.gmra.mrb[60].mxu1 %v16370_v12  ;;  %v13878_v12 = vld [vmem:[#allocation10 + $0xc8] sm:$0xff]   ;;  %v13887_v36 = vld [vmem:[#allocation10 + $0x290] sm:$0xff]   ;;  %v13888_v53 = vld [vmem:[#allocation10 + $0x98] sm:$0xff]  }
 0x66e   : > { %12221 = vmatpush3.bf16.msra.mxu0 %v13869_v41  ;;  %12914 = vmatprep.mubr.bf16.mxu1 %v16314_v46  ;;  %v13889_v26 = vld [vmem:[#allocation10 + $0x2d8] sm:$0xff]   ;;  %v13892_v19 = vld [vmem:[#allocation10 + $0xa0] sm:$0xff]   ;;  %v13897_v15 = vld [vmem:[#allocation10 + $0x2e8] sm:$0xff]  }
 0x66f   : > { %12911 = vmatpush3.bf16.msra.mxu1 %v13868_v10  ;;  %12222 = vmatprep.subr.bf16.mxu0 %v13870_v49  ;;  %v13893_v45 = vld [vmem:[#allocation10 + $0x2e0] sm:$0xff]   ;;  %v13898_v57 = vld [vmem:[#allocation10 + $0xf0] sm:$0xff]   ;;  %v13902_v33 = vld [vmem:[#allocation10 + $0xf8] sm:$0xff]  }
 0x670   : > { %12912 = vmatprep.subr.bf16.mxu1 %v13871_v59  ;;  %7919 = vmatmul.mubr.bf16.gmra.mrb[76].mxu0 %v16389_v54  ;;  %v13882_v54 = vld [vmem:[#allocation10 + $0xd0] sm:$0xff]   ;;  %v13895_v37 = vld [vmem:[#allocation10 + $0x2a0] sm:$0xff]   ;;  %v13904_v11 = vld [vmem:[#allocation10 + $0xb8] sm:$0xff]  }
 0x671   : > { %8264 = vmatprep.mubr.bf16.mxu0 %v16261_v24  ;;  %v13883_v24 = vld [vmem:[#allocation10 + $0x288] sm:$0xff]   ;;  %v13901_v42 = vld [vmem:[#allocation10 + $0x2f0] sm:$0xff]   ;;  %v13905_v34 = vld [vmem:[#allocation10 + $0x2f8] sm:$0xff]  }
 0x672   : > { %12223 = vmatpush3.bf16.msra.mxu0 %v13872_v40  ;;  %v13903_v58 = vld [vmem:[#allocation10 + $0x2b0] sm:$0xff]   ;;  %v13906_v62 = vld [vmem:[#allocation10 + $0x100] sm:$0xff]   ;;  %v13909_v61 = vld [vmem:[#allocation10 + $0x108] sm:$0xff]  }
 0x673   : > { %12913 = vmatpush3.bf16.msra.mxu1 %v13871_v59  ;;  %12224 = vmatprep.subr.bf16.mxu0 %v13873_v6  ;;  %v13908_v18 = vld [vmem:[#allocation10 + $0x340] sm:$0xff]   ;;  %v7374_v31 = vld [vmem:[#allocation4 + $0x10] sm:$0xff]  ;;  %v13914_v4 = vld [vmem:[#allocation10 + $0x350] sm:$0xff]  }
 0x674   : > { %12250 = vmatprep.subr.bf16.mxu1 %v13875_v1  ;;  %v13910_v21 = vld [vmem:[#allocation10 + $0x300] sm:$0xff]   ;;  %v13911_v10 = vld [vmem:[#allocation10 + $0x348] sm:$0xff]   ;;  %v13915_v23 = vld [vmem:[#allocation10 + $0x118] sm:$0xff]  }
 0x675   : > { %v8427_v55 = vld [vmem:[#allocation4 + $0x50] sm:$0xff]  ;;  %v13917_v47 = vld [vmem:[#allocation10 + $0x358] sm:$0xff]   ;;  %v16479_v56 = vld [vmem:[#allocation4 + $0x78] sm:$0xff] }
 0x676   : > { %12225 = vmatpush3.bf16.msra.mxu0 %v13874_v13  ;;  %12915 = vmatmul.mubr.bf16.vlgmr.msra.gmra.mrb[64].mxu1 %v16322_v9  ;;  %v13913_v52 = vld [vmem:[#allocation10 + $0x308] sm:$0xff]   ;;  %v13919_v41 = vld [vmem:[#allocation10 + $0x318] sm:$0xff]   ;;  %v13928_v13 = vld [vmem:[#allocation10 + $0x330] sm:$0xff]  }
 0x677   : > { %12251 = vmatpush3.bf16.msra.mxu1 %v13876_v30  ;;  %12918 = vmatprep.mubr.bf16.mxu1 %v16396_v7  ;;  %v13921_v49 = vld [vmem:[#allocation10 + $0x128] sm:$0xff]   ;;  %v16485_v40 = vld [vmem:[#allocation4 + $0xa0] sm:$0xff] }
 0x678   : > { %12302 = vmatprep.subr.bf16.mxu0 %v13877_v2  ;;  %12252 = vmatprep.subr.bf16.mxu1 %v13878_v12  ;;  %v13923_v59 = vld [vmem:[#allocation10 + $0x368] sm:$0xff]   ;;  %v13927_v1 = vld [vmem:[#allocation10 + $0x138] sm:$0xff]   ;;  %v16490_v2 = vld [vmem:[#allocation4 + $0xc8] sm:$0xff] }
 0x679   : > { %8265 = vmatmul.mubr.bf16.vlgmr.msra.gmra.mrb[80].mxu0 %v16233_v5  ;;  %v13890_v5 = vld [vmem:[#allocation10 + $0xe0] sm:$0xff]   ;;  %v13925_v6 = vld [vmem:[#allocation10 + $0x328] sm:$0xff]   ;;  %v13929_v30 = vld [vmem:[#allocation10 + $0x378] sm:$0xff]  }
 0x67a   : > { %8272 = vmatprep.mubr.bf16.mxu0 %v16317_v20  ;;  %12303 = vmatpush3.bf16.msra.mxu0 %v13879_v63  ;;  %v13891_v20 = vld [vmem:[#allocation10 + $0x298] sm:$0xff]   ;;  %v8430_v12 = vld [vmem:[#allocation4 + $0x68] sm:$0xff] }
 0x67b   : > { %12253 = vmatpush3.bf16.msra.mxu1 %v13880_v38  ;;  %12304 = vmatprep.subr.bf16.mxu0 %v13881_v43  ;;  %v13930_v63 = vld [vmem:[#allocation10 + $0x338] sm:$0xff]   ;;  %v13933_v38 = vld [vmem:[#allocation10 + $0x388] sm:$0xff]   ;;  %v13934_v43 = vld [vmem:[#allocation10 + $0x3c0] sm:$0xff]  }
 0x67c   : > { %12254 = vmatprep.subr.bf16.mxu1 %v13882_v54  ;;  %v13935_v54 = vld [vmem:[#allocation10 + $0x408] sm:$0xff]  }
 0x67e   : > { %12305 = vmatpush3.bf16.msra.mxu0 %v13883_v24  ;;  %12919 = vmatmul.mubr.bf16.gmra.mrb[68].mxu1 %v16401_v27  ;;  %v13894_v27 = vld [vmem:[#allocation10 + $0xe8] sm:$0xff]   ;;  %v8429_v24 = vld [vmem:[#allocation4 + $0x60] sm:$0xff] }
 0x67f   : > { %12255 = vmatpush3.bf16.msra.mxu1 %v13884_v0  ;;  %8329 = vmatprep.mubr.bf16.mxu1 %v16265_v29  ;;  %v13896_v29 = vld [vmem:[#allocation10 + $0xa8] sm:$0xff]   ;;  %v13936_v0 = vld [vmem:[#allocation10 + $0x390] sm:$0xff]  }
 0x680   : > { %12306 = vmatprep.subr.bf16.mxu0 %v13885_v8  ;;  %12256 = vmatprep.subr.bf16.mxu1 %v13886_v16  ;;  %v16495_v8 = vld [vmem:[#allocation4 + $0x90] sm:$0xff] }
 0x681   : > { %8273 = vmatmul.mubr.bf16.gmra.mrb[84].mxu0 %v16231_v60  ;;  %v13899_v60 = vld [vmem:[#allocation10 + $0x2a8] sm:$0xff]  }
 0x682   : > { %8280 = vmatprep.mubr.bf16.mxu0 %v16329_v25  ;;  %12307 = vmatpush3.bf16.msra.mxu0 %v13887_v36  ;;  %v13900_v25 = vld [vmem:[#allocation10 + $0xb0] sm:$0xff]   ;;  %v13937_v16 = vld [vmem:[#allocation10 + $0x3c8] sm:$0xff]   ;;  %v13939_v36 = vld [vmem:[#allocation10 + $0x398] sm:$0xff]  }
 0x683   : > { %12257 = vmatpush3.bf16.msra.mxu1 %v13888_v53  ;;  %12308 = vmatprep.subr.bf16.mxu0 %v13889_v26  ;;  %v13940_v53 = vld [vmem:[#allocation10 + $0x3d0] sm:$0xff]   ;;  %v13941_v26 = vld [vmem:[#allocation10 + $0x418] sm:$0xff]  }
 0x684   : > { %12258 = vmatprep.subr.bf16.mxu1 %v13890_v5  ;;  %v16499_v5 = vld [vmem:[#allocation4 + $0x88] sm:$0xff] }
 0x686   : > { %12309 = vmatpush3.bf16.msra.mxu0 %v13891_v20  ;;  %v13942_v20 = vld [vmem:[#allocation10 + $0x3a0] sm:$0xff]  }
 0x687   : > { %12259 = vmatpush3.bf16.msra.mxu1 %v13892_v19  ;;  %12310 = vmatprep.subr.bf16.mxu0 %v13893_v45  ;;  %v16502_v19 = vld [vmem:[#allocation4 + $0xb8] sm:$0xff]  ;;  %v13943_v45 = vld [vmem:[#allocation10 + $0x3d8] sm:$0xff]  }
 0x688   : > { %12260 = vmatprep.subr.bf16.mxu1 %v13894_v27  ;;  %v13945_v27 = vld [vmem:[#allocation10 + $0x3a8] sm:$0xff]  }
 0x689   : > { %8281 = vmatmul.mubr.bf16.gmra.mrb[88].mxu0 %v16280_v17  ;;  %v8428_v17 = vld [vmem:[#allocation4 + $0x58] sm:$0xff] }
 0x68a   : > { %8288 = vmatprep.mubr.bf16.mxu0 %v16407_v51  ;;  %12311 = vmatpush3.bf16.msra.mxu0 %v13895_v37  ;;  %v13946_v37 = vld [vmem:[#allocation10 + $0x3e0] sm:$0xff]  }
 0x68b   : > { %12261 = vmatpush3.bf16.msra.mxu1 %v13896_v29  ;;  %12312 = vmatprep.subr.bf16.mxu0 %v13897_v15  ;;  %v13947_v29 = vld [vmem:[#allocation10 + $0x428] sm:$0xff]  }
 0x68c   : > { %12262 = vmatprep.subr.bf16.mxu1 %v13898_v57  ;;  %v16505_v15 = vld [vmem:[#allocation4 + $0xb0] sm:$0xff]  ;;  %v13948_v57 = vld [vmem:[#allocation10 + $0x3b0] sm:$0xff]  }
 0x68e   : > { %12313 = vmatpush3.bf16.msra.mxu0 %v13899_v60  ;;  %v16508_v60 = vld [vmem:[#allocation4 + $0xe0] sm:$0xff] }
 0x68f   : > { %12263 = vmatpush3.bf16.msra.mxu1 %v13900_v25  ;;  %12314 = vmatprep.subr.bf16.mxu0 %v13901_v42  ;;  %v13949_v25 = vld [vmem:[#allocation10 + $0x3e8] sm:$0xff]   ;;  %v13950_v42 = vld [vmem:[#allocation10 + $0x430] sm:$0xff]  }
 0x690   : > { %12264 = vmatprep.subr.bf16.mxu1 %v13902_v33  ;;  %v13951_v33 = vld [vmem:[#allocation10 + $0x3b8] sm:$0xff]  }
 0x691   : > { %8289 = vmatmul.mubr.bf16.gmra.mrb[92].mxu0 %v16275_v48  ;;  %v13912_v48 = vld [vmem:[#allocation10 + $0x110] sm:$0xff]  }
 0x692   : > { %12315 = vmatpush3.bf16.msra.mxu0 %v13903_v58  ;;  %8799 = vmatprep.mubr.bf16.mxu0 %v8428_v17  ;;  %v13952_v58 = vld [vmem:[#allocation10 + $0x3f0] sm:$0xff]   ;;  %v8971_v17 = vld [vmem:[#allocation4 + $0x80] sm:$0xff] }
 0x693   : > { %12265 = vmatpush3.bf16.msra.mxu1 %v13904_v11  ;;  %12316 = vmatprep.subr.bf16.mxu0 %v13905_v34  ;;  %v13953_v11 = vld [vmem:[#allocation10 + $0x438] sm:$0xff]   ;;  %v16511_v34 = vld [vmem:[#allocation4 + $0xd8] sm:$0xff] }
 0x694   : > { %12922 = vmatprep.subr.bf16.mxu1 %v13906_v62 }
 0x696   : > { %8330 = vmatmul.mubr.bf16.vlgmr.msra.gmra.mrb[72].mxu1 %v7374_v31  ;;  %12317 = vmatpush3.bf16.msra.mxu0 %v13907_v32  ;;  %v13954_v32 = vld [vmem:[#allocation10 + $0x3f8] sm:$0xff]   ;;  %v13958_v31 = vld [vmem:[#allocation10 + $0x488] sm:$0xff]  }
 0x697   : > { %8337 = vmatprep.mubr.bf16.mxu1 %v16338_v22  ;;  %12923 = vmatpush3.bf16.msra.mxu1 %v13906_v62  ;;  %v13916_v22 = vld [vmem:[#allocation10 + $0x310] sm:$0xff]   ;;  %v13955_v62 = vld [vmem:[#allocation10 + $0x480] sm:$0xff]  }
 0x698   : > { %12342 = vmatprep.subr.bf16.mxu0 %v13908_v18  ;;  %12924 = vmatprep.subr.bf16.mxu1 %v13909_v61  ;;  %v13956_v18 = vld [vmem:[#allocation10 + $0x440] sm:$0xff]  }
 0x699   : > { %8800 = vmatmul.mubr.bf16.vlgmr.msra.gmra.mrb[96].mxu0 %v8427_v55  ;;  %v13959_v55 = vld [vmem:[#allocation10 + $0x500] sm:$0xff]  }
 0x69a   : > { %8807 = vmatprep.mubr.bf16.mxu0 %v16407_v51  ;;  %12343 = vmatpush3.bf16.msra.mxu0 %v13910_v21  ;;  %v13918_v51 = vld [vmem:[#allocation10 + $0x120] sm:$0xff]   ;;  %v16514_v21 = vld [vmem:[#allocation4 + $0x98] sm:$0xff] }
 0x69b   : > { %12925 = vmatpush3.bf16.msra.mxu1 %v13909_v61  ;;  %12344 = vmatprep.subr.bf16.mxu0 %v13911_v10  ;;  %v13957_v61 = vld [vmem:[#allocation10 + $0x540] sm:$0xff]   ;;  %v16517_v10 = vld [vmem:[#allocation4 + $0xc0] sm:$0xff] }
 0x69c   : > { %12926 = vmatprep.subr.bf16.mxu1 %v13912_v48 }
 0x69e   : > { %8338 = vmatmul.mubr.bf16.gmra.mrb[76].mxu1 %v16301_v35  ;;  %12345 = vmatpush3.bf16.msra.mxu0 %v13913_v52  ;;  %v13920_v35 = vld [vmem:[#allocation10 + $0x360] sm:$0xff]   ;;  %v13961_v52 = vld [vmem:[#allocation10 + $0x548] sm:$0xff]  }
 0x69f   : > { %8345 = vmatprep.mubr.bf16.mxu1 %v16342_v3  ;;  %12927 = vmatpush3.bf16.msra.mxu1 %v13912_v48  ;;  %v13922_v3 = vld [vmem:[#allocation10 + $0x320] sm:$0xff]   ;;  %v13960_v48 = vld [vmem:[#allocation10 + $0x448] sm:$0xff]  }
 0x6a0   : > { %12346 = vmatprep.subr.bf16.mxu0 %v13914_v4  ;;  %12928 = vmatprep.subr.bf16.mxu1 %v13915_v23  ;;  %v13962_v4 = vld [vmem:[#allocation10 + $0x490] sm:$0xff]  }
 0x6a1   : > { %8808 = vmatmul.mubr.bf16.gmra.mrb[100].mxu0 %v16479_v56 }
 0x6a2   : > { %8815 = vmatprep.mubr.bf16.mxu0 %v16420_v50  ;;  %12347 = vmatpush3.bf16.msra.mxu0 %v13916_v22  ;;  %v13924_v50 = vld [vmem:[#allocation10 + $0x130] sm:$0xff]   ;;  %v13963_v22 = vld [vmem:[#allocation10 + $0x508] sm:$0xff]  }
 0x6a3   : > { %12929 = vmatpush3.bf16.msra.mxu1 %v13915_v23  ;;  %12348 = vmatprep.subr.bf16.mxu0 %v13917_v47  ;;  %v8976_v23 = vld [vmem:[#allocation4 + $0xa8] sm:$0xff]  ;;  %v13964_v47 = vld [vmem:[#allocation10 + $0x450] sm:$0xff]  }
 0x6a4   : > { %12930 = vmatprep.subr.bf16.mxu1 %v13918_v51 }
 0x6a6   : > { %8346 = vmatmul.mubr.bf16.gmra.mrb[80].mxu1 %v16306_v44  ;;  %12349 = vmatpush3.bf16.msra.mxu0 %v13919_v41  ;;  %v13926_v44 = vld [vmem:[#allocation10 + $0x370] sm:$0xff]   ;;  %v13966_v41 = vld [vmem:[#allocation10 + $0x498] sm:$0xff]  }
 0x6a7   : > { %8353 = vmatprep.mubr.bf16.mxu1 %v16429_v39  ;;  %12931 = vmatpush3.bf16.msra.mxu1 %v13918_v51  ;;  %v7376_v39 = vld [vmem:[#allocation4 + $0x20] sm:$0xff]  ;;  %v13965_v51 = vld [vmem:[#allocation10 + $0x550] sm:$0xff]  }
 0x6a8   : > { %12350 = vmatprep.subr.bf16.mxu0 %v13920_v35  ;;  %12932 = vmatprep.subr.bf16.mxu1 %v13921_v49  ;;  %v16521_v35 = vld [vmem:[#allocation4 + $0xe8] sm:$0xff] }
 0x6a9   : > { %8816 = vmatmul.mubr.bf16.gmra.mrb[104].mxu0 %v16485_v40 }
 0x6aa   : > { %8823 = vmatprep.mubr.bf16.mxu0 %v16439_v14  ;;  %12351 = vmatpush3.bf16.msra.mxu0 %v13922_v3  ;;  %v13931_v14 = vld [vmem:[#allocation10 + $0x380] sm:$0xff]   ;;  %v13969_v3 = vld [vmem:[#allocation10 + $0x558] sm:$0xff]  }
 0x6ab   : > { %12933 = vmatpush3.bf16.msra.mxu1 %v13921_v49  ;;  %12352 = vmatprep.subr.bf16.mxu0 %v13923_v59  ;;  %v13967_v49 = vld [vmem:[#allocation10 + $0x510] sm:$0xff]   ;;  %v13970_v59 = vld [vmem:[#allocation10 + $0x4a0] sm:$0xff]  }
 0x6ac   : > { %12934 = vmatprep.subr.bf16.mxu1 %v13924_v50 }
 0x6ae   : > { %8354 = vmatmul.mubr.bf16.gmra.mrb[84].mxu1 %v16384_v28  ;;  %12353 = vmatpush3.bf16.msra.mxu0 %v13925_v6  ;;  %v13932_v28 = vld [vmem:[#allocation10 + $0x400] sm:$0xff]   ;;  %v13971_v6 = vld [vmem:[#allocation10 + $0x518] sm:$0xff]  }
 0x6af   : > { %12935 = vmatpush3.bf16.msra.mxu1 %v13924_v50  ;;  %12938 = vmatprep.mubr.bf16.mxu1 %v7376_v39  ;;  %v8981_v50 = vld [vmem:[#allocation4 + $0xd0] sm:$0xff] }
 0x6b0   : > { %12354 = vmatprep.subr.bf16.mxu0 %v13926_v44  ;;  %12936 = vmatprep.subr.bf16.mxu1 %v13927_v1  ;;  %v13972_v44 = vld [vmem:[#allocation10 + $0x460] sm:$0xff]   ;;  %v13974_v39 = vld [vmem:[#allocation10 + $0x4a8] sm:$0xff]  }
 0x6b1   : > { %8824 = vmatmul.mubr.bf16.gmra.mrb[108].mxu0 %v16490_v2 }
 0x6b2   : > { %12355 = vmatpush3.bf16.msra.mxu0 %v13928_v13  ;;  %8864 = vmatprep.mubr.bf16.mxu0 %v8430_v12  ;;  %v13975_v13 = vld [vmem:[#allocation10 + $0x520] sm:$0xff]   ;;  %v13978_v12 = vld [vmem:[#allocation10 + $0x4b0] sm:$0xff]  }
 0x6b3   : > { %12937 = vmatpush3.bf16.msra.mxu1 %v13927_v1  ;;  %12356 = vmatprep.subr.bf16.mxu0 %v13929_v30  ;;  %v13973_v1 = vld [vmem:[#allocation10 + $0x560] sm:$0xff]   ;;  %v13976_v30 = vld [vmem:[#allocation10 + $0x468] sm:$0xff]  }
 0x6b4   : > { %12946 = vmatprep.subr.bf16.mxu1 %v13931_v14 }
 0x6b6   : > { %12939 = vmatmul.mubr.bf16.vlgmr.msra.gmra.mrb[64].mxu1 %v16314_v46  ;;  %12357 = vmatpush3.bf16.msra.mxu0 %v13930_v63  ;;  %v13938_v46 = vld [vmem:[#allocation10 + $0x410] sm:$0xff]  }
 0x6b7   : > { %12942 = vmatprep.mubr.bf16.mxu1 %v16322_v9  ;;  %12947 = vmatpush3.bf16.msra.mxu1 %v13931_v14  ;;  %v8431_v9 = vld [vmem:[#allocation4 + $0x70] sm:$0xff]  ;;  %v8986_v63 = vld [vmem:[#allocation4 + $0xf8] sm:$0xff] }
 0x6b8   : > { %12394 = vmatprep.subr.bf16.mxu0 %v13932_v28  ;;  %12948 = vmatprep.subr.bf16.mxu1 %v13933_v38  ;;  %v13977_v14 = vld [vmem:[#allocation10 + $0x568] sm:$0xff]  }
 0x6b9   : > { %8865 = vmatmul.mubr.bf16.vlgmr.msra.gmra.mrb[112].mxu0 %v8429_v24  ;;  %v13979_v28 = vld [vmem:[#allocation10 + $0x528] sm:$0xff]   ;;  %v13983_v24 = vld [vmem:[#allocation10 + $0x530] sm:$0xff]  }
 0x6ba   : > { %8872 = vmatprep.mubr.bf16.mxu0 %v16495_v8  ;;  %12395 = vmatpush3.bf16.msra.mxu0 %v13934_v43  ;;  %v13981_v43 = vld [vmem:[#allocation10 + $0x570] sm:$0xff]  }
 0x6bb   : > { %12949 = vmatpush3.bf16.msra.mxu1 %v13933_v38  ;;  %12396 = vmatprep.subr.bf16.mxu0 %v13935_v54  ;;  %v13980_v38 = vld [vmem:[#allocation10 + $0x470] sm:$0xff]   ;;  %v13982_v54 = vld [vmem:[#allocation10 + $0x4b8] sm:$0xff]  }
 0x6bc   : > { %12950 = vmatprep.subr.bf16.mxu1 %v13936_v0 }
 0x6be   : > { %12943 = vmatmul.mubr.bf16.gmra.mrb[68].mxu1 %v16396_v7  ;;  %12397 = vmatpush3.bf16.msra.mxu0 %v13937_v16  ;;  %v13944_v7 = vld [vmem:[#allocation10 + $0x420] sm:$0xff]   ;;  %v8985_v16 = vld [vmem:[#allocation4 + $0xf0] sm:$0xff] }
 0x6bf   : > { %12951 = vmatpush3.bf16.msra.mxu1 %v13936_v0  ;;  %12962 = vmatprep.mubr.bf16.mxu1 %v8431_v9  ;;  %v13984_v0 = vld [vmem:[#allocation10 + $0x478] sm:$0xff]   ;;  %v13988_v9 = vld [vmem:[#allocation10 + $0x5c0] sm:$0xff]  }
 0x6c0   : > { %12398 = vmatprep.subr.bf16.mxu0 %v13938_v46  ;;  %12952 = vmatprep.subr.bf16.mxu1 %v13939_v36  ;;  %v13986_v46 = vld [vmem:[#allocation10 + $0x4c0] sm:$0xff]  }
 0x6c1   : > { %8873 = vmatmul.mubr.bf16.gmra.mrb[116].mxu0 %v16499_v5 }
 0x6c2   : > { %8880 = vmatprep.mubr.bf16.mxu0 %v16502_v19  ;;  %12399 = vmatpush3.bf16.msra.mxu0 %v13940_v53  ;;  %v13989_v53 = vld [vmem:[#allocation10 + $0x4c8] sm:$0xff]  }
 0x6c3   : > { %12953 = vmatpush3.bf16.msra.mxu1 %v13939_v36  ;;  %12400 = vmatprep.subr.bf16.mxu0 %v13941_v26  ;;  %v13987_v36 = vld [vmem:[#allocation10 + $0x538] sm:$0xff]   ;;  %v13990_v26 = vld [vmem:[#allocation10 + $0x580] sm:$0xff]  }
 0x6c4   : > { %12954 = vmatprep.subr.bf16.mxu1 %v13942_v20 }
 0x6c6   : > { %12401 = vmatpush3.bf16.msra.mxu0 %v13943_v45  ;;  %v13992_v45 = vld [vmem:[#allocation10 + $0x4d0] sm:$0xff]  }
 0x6c7   : > { %12955 = vmatpush3.bf16.msra.mxu1 %v13942_v20  ;;  %12402 = vmatprep.subr.bf16.mxu0 %v13944_v7  ;;  %v13991_v20 = vld [vmem:[#allocation10 + $0x5c8] sm:$0xff]  }
 0x6c8   : > { %12956 = vmatprep.subr.bf16.mxu1 %v13945_v27  ;;  %v13993_v7 = vld [vmem:[#allocation10 + $0x588] sm:$0xff]  }
 0x6c9   : > { %8881 = vmatmul.mubr.bf16.gmra.mrb[120].mxu0 %v16505_v15 }
 0x6ca   : > { %8888 = vmatprep.mubr.bf16.mxu0 %v16508_v60  ;;  %12403 = vmatpush3.bf16.msra.mxu0 %v13946_v37  ;;  %v13995_v37 = vld [vmem:[#allocation10 + $0x4d8] sm:$0xff]  }
 0x6cb   : > { %12957 = vmatpush3.bf16.msra.mxu1 %v13945_v27  ;;  %12404 = vmatprep.subr.bf16.mxu0 %v13947_v29  ;;  %v13994_v27 = vld [vmem:[#allocation10 + $0x5d0] sm:$0xff]   ;;  %v13997_v29 = vld [vmem:[#allocation10 + $0x5d8] sm:$0xff]  }
 0x6cc   : > { %12958 = vmatprep.subr.bf16.mxu1 %v13948_v57 }
 0x6ce   : > { %12405 = vmatpush3.bf16.msra.mxu0 %v13949_v25  ;;  %v14000_v25 = vld [vmem:[#allocation10 + $0x5e0] sm:$0xff]  }
 0x6cf   : > { %12959 = vmatpush3.bf16.msra.mxu1 %v13948_v57  ;;  %12406 = vmatprep.subr.bf16.mxu0 %v13950_v42  ;;  %v13998_v57 = vld [vmem:[#allocation10 + $0x4e0] sm:$0xff]   ;;  %v14001_v42 = vld [vmem:[#allocation10 + $0x4e8] sm:$0xff]  }
 0x6d0   : > { %12960 = vmatprep.subr.bf16.mxu1 %v13951_v33 }
 0x6d1   : > { %8889 = vmatmul.mubr.bf16.gmra.mrb[124].mxu0 %v16511_v34 }
 0x6d2   : > { %12407 = vmatpush3.bf16.msra.mxu0 %v13952_v58  ;;  %9342 = vmatprep.mubr.bf16.mxu0 %v8971_v17  ;;  %v14002_v58 = vld [vmem:[#allocation10 + $0x5a0] sm:$0xff]   ;;  %v14005_v17 = vld [vmem:[#allocation10 + $0x5a8] sm:$0xff]  }
 0x6d3   : > { %12961 = vmatpush3.bf16.msra.mxu1 %v13951_v33  ;;  %12408 = vmatprep.subr.bf16.mxu0 %v13953_v11  ;;  %v8988_v33 = vld [vmem:[#allocation4 + $0x108] sm:$0xff]  ;;  %v14003_v11 = vld [vmem:[#allocation10 + $0x5e8] sm:$0xff]  }
 0x6d4   : > { %12434 = vmatprep.subr.bf16.mxu1 %v13955_v62  ;;  %v14004_v62 = vld [vmem:[#allocation10 + $0x4f0] sm:$0xff]  }
 0x6d6   : > { %12963 = vmatmul.mubr.bf16.vlgmr.msra.gmra.mrb[64].mxu1 %v16514_v21  ;;  %12409 = vmatpush3.bf16.msra.mxu0 %v13954_v32  ;;  %v14006_v32 = vld [vmem:[#allocation10 + $0x5f0] sm:$0xff]  }
 0x6d7   : > { %12966 = vmatprep.mubr.bf16.mxu1 %v16517_v10  ;;  %12435 = vmatpush3.bf16.msra.mxu1 %v13956_v18  ;;  %v14007_v18 = vld [vmem:[#allocation10 + $0x4f8] sm:$0xff]  }
 0x6d8   : > { %12486 = vmatprep.subr.bf16.mxu0 %v13957_v61  ;;  %12436 = vmatprep.subr.bf16.mxu1 %v13958_v31  ;;  %v8987_v61 = vld [vmem:[#allocation4 + $0x100] sm:$0xff]  ;;  %v14008_v31 = vld [vmem:[#allocation10 + $0x5b0] sm:$0xff]  }
 0x6d9   : > { %9343 = vmatmul.mubr.bf16.vlgmr.msra.gmra.mrb[128].mxu0 %v16479_v56  ;;  %v13968_v56 = vld [vmem:[#allocation10 + $0x458] sm:$0xff]  }
 0x6da   : > { %9350 = vmatprep.mubr.bf16.mxu0 %v8976_v23  ;;  %12487 = vmatpush3.bf16.msra.mxu0 %v13959_v55  ;;  %v14009_v55 = vld [vmem:[#allocation10 + $0x5f8] sm:$0xff]  }
 0x6db   : > { %12437 = vmatpush3.bf16.msra.mxu1 %v13960_v48  ;;  %12488 = vmatprep.subr.bf16.mxu0 %v13961_v52  ;;  %v9528_v48 = vld [vmem:[#allocation4 + $0x118] sm:$0xff]  ;;  %v14011_v52 = vld [vmem:[#allocation10 + $0x600] sm:$0xff]  }
 0x6dc   : > { %12438 = vmatprep.subr.bf16.mxu1 %v13962_v4  ;;  %v14010_v4 = vld [vmem:[#allocation10 + $0x5b8] sm:$0xff]  }
 0x6de   : > { %12967 = vmatmul.mubr.bf16.gmra.mrb[68].mxu1 %v16521_v35  ;;  %12489 = vmatpush3.bf16.msra.mxu0 %v13963_v22  ;;  %v8989_v22 = vld [vmem:[#allocation4 + $0x110] sm:$0xff] }
 0x6df   : > { %12439 = vmatpush3.bf16.msra.mxu1 %v13964_v47  ;;  %9407 = vmatprep.mubr.bf16.mxu1 %v16495_v8  ;;  %v13985_v8 = vld [vmem:[#allocation10 + $0x578] sm:$0xff]   ;;  %v14015_v47 = vld [vmem:[#allocation10 + $0x620] sm:$0xff]  }
 0x6e0   : > { %12490 = vmatprep.subr.bf16.mxu0 %v13965_v51  ;;  %12440 = vmatprep.subr.bf16.mxu1 %v13966_v41  ;;  %v14016_v51 = vld [vmem:[#allocation10 + $0x628] sm:$0xff]  }
 0x6e1   : > { %9351 = vmatmul.mubr.bf16.gmra.mrb[132].mxu0 %v16485_v40  ;;  %v9531_v41 = vld [vmem:[#allocation4 + $0x130] sm:$0xff] }
 0x6e2   : > { %9358 = vmatprep.mubr.bf16.mxu0 %v8981_v50  ;;  %12491 = vmatpush3.bf16.msra.mxu0 %v13967_v49 }
 0x6e3   : > { %12441 = vmatpush3.bf16.msra.mxu1 %v13968_v56  ;;  %12492 = vmatprep.subr.bf16.mxu0 %v13969_v3 }
 0x6e4   : > { %12442 = vmatprep.subr.bf16.mxu1 %v13970_v59 }
 0x6e6   : > { %12493 = vmatpush3.bf16.msra.mxu0 %v13971_v6 }
 0x6e7   : > { %12443 = vmatpush3.bf16.msra.mxu1 %v13972_v44  ;;  %12494 = vmatprep.subr.bf16.mxu0 %v13973_v1 }
 0x6e8   : > { %12444 = vmatprep.subr.bf16.mxu1 %v13974_v39 }
 0x6e9   : > { %9359 = vmatmul.mubr.bf16.gmra.mrb[136].mxu0 %v16490_v2 }
 0x6ea   : > { %9366 = vmatprep.mubr.bf16.mxu0 %v8986_v63  ;;  %12495 = vmatpush3.bf16.msra.mxu0 %v13975_v13 }
 0x6eb   : > { %12445 = vmatpush3.bf16.msra.mxu1 %v13976_v30  ;;  %12496 = vmatprep.subr.bf16.mxu0 %v13977_v14  ;;  %v9530_v14 = vld [vmem:[#allocation4 + $0x128] sm:$0xff] }
 0x6ec   : > { %12446 = vmatprep.subr.bf16.mxu1 %v13978_v12 }
 0x6ee   : > { %12497 = vmatpush3.bf16.msra.mxu0 %v13979_v28 }
 0x6ef   : > { %12447 = vmatpush3.bf16.msra.mxu1 %v13980_v38  ;;  %12498 = vmatprep.subr.bf16.mxu0 %v13981_v43 }
 0x6f0   : > { %12448 = vmatprep.subr.bf16.mxu1 %v13982_v54 }
 0x6f1   : > { %9367 = vmatmul.mubr.bf16.gmra.mrb[140].mxu0 %v8985_v16 }
 0x6f2   : > { %12499 = vmatpush3.bf16.msra.mxu0 %v13983_v24  ;;  %9885 = vmatprep.mubr.bf16.mxu0 %v8976_v23  ;;  %v14012_v23 = vld [vmem:[#allocation10 + $0x608] sm:$0xff]  }
 0x6f3   : > { %12449 = vmatpush3.bf16.msra.mxu1 %v13984_v0  ;;  %12500 = vmatprep.subr.bf16.mxu0 %v13985_v8 }
 0x6f4   : > { %12970 = vmatprep.subr.bf16.mxu1 %v13986_v46 }
 0x6f6   : > { %9408 = vmatmul.mubr.bf16.vlgmr.msra.gmra.mrb[88].mxu1 %v16499_v5  ;;  %12501 = vmatpush3.bf16.msra.mxu0 %v13987_v36  ;;  %v13996_v5 = vld [vmem:[#allocation10 + $0x590] sm:$0xff]  }
 0x6f7   : > { %9415 = vmatprep.mubr.bf16.mxu1 %v16502_v19  ;;  %12971 = vmatpush3.bf16.msra.mxu1 %v13986_v46 }
 0x6f8   : > { %12526 = vmatprep.subr.bf16.mxu0 %v13988_v9  ;;  %12972 = vmatprep.subr.bf16.mxu1 %v13989_v53 }
 0x6f9   : > { %9886 = vmatmul.mubr.bf16.vlgmr.msra.gmra.mrb[144].mxu0 %v16485_v40  ;;  %v13999_v40 = vld [vmem:[#allocation10 + $0x598] sm:$0xff]  }
 0x6fa   : > { %9893 = vmatprep.mubr.bf16.mxu0 %v8981_v50  ;;  %12527 = vmatpush3.bf16.msra.mxu0 %v13990_v26 }
 0x6fb   : > { %12973 = vmatpush3.bf16.msra.mxu1 %v13989_v53  ;;  %12528 = vmatprep.subr.bf16.mxu0 %v13991_v20 }
 0x6fc   : > { %12974 = vmatprep.subr.bf16.mxu1 %v13992_v45 }
 0x6fe   : > { %9416 = vmatmul.mubr.bf16.gmra.mrb[92].mxu1 %v16505_v15  ;;  %12529 = vmatpush3.bf16.msra.mxu0 %v13993_v7 }
 0x6ff   : > { %9423 = vmatprep.mubr.bf16.mxu1 %v16508_v60  ;;  %12975 = vmatpush3.bf16.msra.mxu1 %v13992_v45 }
 0x700   : > { %12530 = vmatprep.subr.bf16.mxu0 %v13994_v27  ;;  %12976 = vmatprep.subr.bf16.mxu1 %v13995_v37 }
 0x701   : > { %9894 = vmatmul.mubr.bf16.gmra.mrb[148].mxu0 %v16490_v2  ;;  %v9529_v2 = vld [vmem:[#allocation4 + $0x120] sm:$0xff] }
 0x702   : > { %9901 = vmatprep.mubr.bf16.mxu0 %v8986_v63  ;;  %12531 = vmatpush3.bf16.msra.mxu0 %v13996_v5 }
 0x703   : > { %12977 = vmatpush3.bf16.msra.mxu1 %v13995_v37  ;;  %12532 = vmatprep.subr.bf16.mxu0 %v13997_v29 }
 0x704   : > { %12978 = vmatprep.subr.bf16.mxu1 %v13998_v57 }
 0x706   : > { %9424 = vmatmul.mubr.bf16.gmra.mrb[96].mxu1 %v16511_v34  ;;  %12533 = vmatpush3.bf16.msra.mxu0 %v13999_v40  ;;  %v9532_v40 = vld [vmem:[#allocation4 + $0x138] sm:$0xff] }
 0x707   : > { %9431 = vmatprep.mubr.bf16.mxu1 %v8988_v33  ;;  %12979 = vmatpush3.bf16.msra.mxu1 %v13998_v57 }
 0x708   : > { %12534 = vmatprep.subr.bf16.mxu0 %v14000_v25  ;;  %12980 = vmatprep.subr.bf16.mxu1 %v14001_v42 }
 0x709   : > { %9902 = vmatmul.mubr.bf16.gmra.mrb[152].mxu0 %v8985_v16 }
 0x70a   : > { %9909 = vmatprep.mubr.bf16.mxu0 %v9529_v2  ;;  %12535 = vmatpush3.bf16.msra.mxu0 %v14002_v58 }
 0x70b   : > { %12981 = vmatpush3.bf16.msra.mxu1 %v14001_v42  ;;  %12536 = vmatprep.subr.bf16.mxu0 %v14003_v11 }
 0x70c   : > { %12982 = vmatprep.subr.bf16.mxu1 %v14004_v62 }
 0x70e   : > { %9432 = vmatmul.mubr.bf16.gmra.mrb[100].mxu1 %v8987_v61  ;;  %12537 = vmatpush3.bf16.msra.mxu0 %v14005_v17 }
 0x70f   : > { %12983 = vmatpush3.bf16.msra.mxu1 %v14004_v62  ;;  %12986 = vmatprep.mubr.bf16.mxu1 %v16514_v21  ;;  %v14013_v21 = vld [vmem:[#allocation10 + $0x610] sm:$0xff]  }
 0x710   : > { %12538 = vmatprep.subr.bf16.mxu0 %v14006_v32  ;;  %12984 = vmatprep.subr.bf16.mxu1 %v14007_v18 }
 0x711   : > { %9910 = vmatmul.mubr.bf16.gmra.mrb[156].mxu0 %v9528_v48 }
 0x712   : > { %12539 = vmatpush3.bf16.msra.mxu0 %v14008_v31  ;;  %9950 = vmatprep.mubr.bf16.mxu0 %v16502_v19  ;;  %v14014_v19 = vld [vmem:[#allocation10 + $0x618] sm:$0xff]  }
 0x713   : > { %12985 = vmatpush3.bf16.msra.mxu1 %v14007_v18  ;;  %12540 = vmatprep.subr.bf16.mxu0 %v14009_v55 }
 0x714   : > { %12994 = vmatprep.subr.bf16.mxu1 %v14011_v52 }
 0x716   : > { %12987 = vmatmul.mubr.bf16.vlgmr.msra.gmra.mrb[64].mxu1 %v16517_v10  ;;  %12541 = vmatpush3.bf16.msra.mxu0 %v14010_v4 }
 0x717   : > { %12990 = vmatprep.mubr.bf16.mxu1 %v16521_v35  ;;  %12995 = vmatpush3.bf16.msra.mxu1 %v14011_v52 }
 0x718   : > { %12996 = vmatprep.subr.bf16.mxu1 %v14012_v23 }
 0x719   : > { %9951 = vmatmul.mubr.bf16.vlgmr.msra.gmra.mrb[160].mxu0 %v16505_v15 }
 0x71a   : > { %9958 = vmatprep.mubr.bf16.mxu0 %v16508_v60  ;;  %v14017_v60 = vld [vmem:[#allocation10 + $0x630] sm:$0xff]  }
 0x71b   : > { %12997 = vmatpush3.bf16.msra.mxu1 %v14012_v23 }
 0x71c   : > { %12998 = vmatprep.subr.bf16.mxu1 %v14013_v21 }
 0x71e   : > { %12991 = vmatmul.mubr.bf16.gmra.mrb[68].mxu1 %v8989_v22 }
 0x71f   : > { %12999 = vmatpush3.bf16.msra.mxu1 %v14013_v21  ;;  %13010 = vmatprep.mubr.bf16.mxu1 %v16517_v10 }
 0x720   : > { %13000 = vmatprep.subr.bf16.mxu1 %v14014_v19 }
 0x721   : > { %9959 = vmatmul.mubr.bf16.gmra.mrb[164].mxu0 %v16511_v34  ;;  %v14018_v34 = vld [vmem:[#allocation10 + $0x638] sm:$0xff]  }
 0x722   : > { %9966 = vmatprep.mubr.bf16.mxu0 %v8988_v33 }
 0x723   : > { %13001 = vmatpush3.bf16.msra.mxu1 %v14014_v19 }
 0x724   : > { %13002 = vmatprep.subr.bf16.mxu1 %v14015_v47 }
 0x727   : > { %13003 = vmatpush3.bf16.msra.mxu1 %v14015_v47 }
 0x728   : > { %v12134_v15 = vpop.f32.mrb[48].mxu1  ;;  %13004 = vmatprep.subr.bf16.mxu1 %v14016_v51 }
 0x729   : > { %9967 = vmatmul.mubr.bf16.gmra.mrb[168].mxu0 %v8987_v61  ;;  %v12135_v49 = vpop.f32.mrb[49].mxu1 }
 0x72a   : > { %9974 = vmatprep.mubr.bf16.mxu0 %v9531_v41  ;;  %v12136_v56 = vadd.f32 %v12135_v49, %v12134_v15  ;;  %v12137_v3 = vpop.f32.mrb[50].mxu1 }
 0x72b   : > { %13005 = vmatpush3.bf16.msra.mxu1 %v14016_v51  ;;  %v12174_v10 = vpop.f32.mrb[64].mxu0  ;;  %v12138_v59 = vpop.f32.mrb[51].mxu1 }
 0x72c   : > { %v12139_v50 = vadd.f32 %v12138_v59, %v12137_v3  ;;  %v12175_v6 = vpop.f32.mrb[65].mxu0  ;;  %13006 = vmatprep.subr.bf16.mxu1 %v14017_v60 }
 0x72d   : > { %v12176_v44 = vadd.f32 %v12175_v6, %v12174_v10  ;;  %v12177_v1 = vpop.f32.mrb[66].mxu0 }
 0x72e   : > { %v12178_v39 = vpop.f32.mrb[67].mxu0 }
 0x72f   : > { %v7897_v13 = vadd.f32 %v12176_v44, %v12136_v56  ;;  %v12179_v30 = vadd.f32 %v12178_v39, %v12177_v1  ;;  %13007 = vmatpush3.bf16.msra.mxu1 %v14017_v60 }
 0x730   : > { %v12140_v12 = vpop.f32.mrb[52].mxu1  ;;  %13008 = vmatprep.subr.bf16.mxu1 %v14018_v34 }
 0x731   : > { %v7900_v63 = vadd.f32 %v12179_v30, %v12139_v50  ;;  %9975 = vmatmul.mubr.bf16.gmra.mrb[172].mxu0 %v9530_v14  ;;  %v12141_v28 = vpop.f32.mrb[53].mxu1 }
 0x732   : > { %v12142_v38 = vadd.f32 %v12141_v28, %v12140_v12  ;;  %v12143_v43 = vpop.f32.mrb[54].mxu1 }
 0x733   : > { %13009 = vmatpush3.bf16.msra.mxu1 %v14018_v34  ;;  %v12180_v54 = vpop.f32.mrb[68].mxu0  ;;  %v12144_v24 = vpop.f32.mrb[55].mxu1 }
 0x734   : > { %v12145_v0 = vadd.f32 %v12144_v24, %v12143_v43  ;;  %v12181_v8 = vpop.f32.mrb[69].mxu0 }
 0x735   : > { %v12182_v16 = vadd.f32 %v12181_v8, %v12180_v54  ;;  %v12183_v46 = vpop.f32.mrb[70].mxu0 }
 0x736   : > { %13011 = vmatmul.mubr.bf16.vlgmr.msra.gmra.mrb[64].mxu1 %v16521_v35  ;;  %v12184_v36 = vpop.f32.mrb[71].mxu0 }
 0x737   : > { %v7905_v9 = vadd.f32 %v12182_v16, %v12142_v38  ;;  %v12185_v53 = vadd.f32 %v12184_v36, %v12183_v46  ;;  %13014 = vmatprep.mubr.bf16.mxu1 %v8989_v22 }
 0x738   : > { %v12146_v20 = vpop.f32.mrb[56].mxu1 }
 0x739   : > { %v7908_v26 = vadd.f32 %v12185_v53, %v12145_v0  ;;  %v12147_v45 = vpop.f32.mrb[57].mxu1 }
 0x73a   : > { %v12148_v7 = vadd.f32 %v12147_v45, %v12146_v20  ;;  %v12149_v27 = vpop.f32.mrb[58].mxu1 }
 0x73b   : > { %v12186_v37 = vpop.f32.mrb[72].mxu0  ;;  %v12150_v5 = vpop.f32.mrb[59].mxu1 }
 0x73c   : > { %v12151_v29 = vadd.f32 %v12150_v5, %v12149_v27  ;;  %v12187_v57 = vpop.f32.mrb[73].mxu0 }
 0x73d   : > { %v12188_v25 = vadd.f32 %v12187_v57, %v12186_v37  ;;  %v12189_v42 = vpop.f32.mrb[74].mxu0 }
 0x73e   : > { %13015 = vmatmul.mubr.bf16.gmra.mrb[68].mxu1 %v9532_v40  ;;  %v12190_v33 = vpop.f32.mrb[75].mxu0 }
 0x73f   : > { %v7913_v58 = vadd.f32 %v12188_v25, %v12148_v7  ;;  %v12191_v35 = vadd.f32 %v12190_v33, %v12189_v42 }
 0x740   : > { %v12152_v11 = vpop.f32.mrb[60].mxu1 }
 0x741   : > { %v7916_v62 = vadd.f32 %v12191_v35, %v12151_v29  ;;  %v12153_v2 = vpop.f32.mrb[61].mxu1 }
 0x742   : > { %v12154_v17 = vadd.f32 %v12153_v2, %v12152_v11  ;;  %v12155_v32 = vpop.f32.mrb[62].mxu1 }
 0x743   : > { %v12192_v18 = vpop.f32.mrb[76].mxu0  ;;  %v12156_v61 = vpop.f32.mrb[63].mxu1 }
 0x744   : > { %v12157_v31 = vadd.f32 %v12156_v61, %v12155_v32  ;;  %v12193_v55 = vpop.f32.mrb[77].mxu0 }
 0x745   : > { %v12194_v48 = vadd.f32 %v12193_v55, %v12192_v18  ;;  %v12195_v52 = vpop.f32.mrb[78].mxu0 }
 0x746   : > { %v12196_v4 = vpop.f32.mrb[79].mxu0 }
 0x747   : > { %v7921_v23 = vadd.f32 %v12194_v48, %v12154_v17  ;;  %v12197_v21 = vadd.f32 %v12196_v4, %v12195_v52 }
 0x749   : > { %v7924_v19 = vadd.f32 %v12197_v21, %v12157_v31 }
 0x74c   : > { %v12226_v22 = vpop.f32.mrb[80].mxu0 }
 0x74d   : > { %v12227_v47 = vpop.f32.mrb[81].mxu0 }
 0x74e   : > { %v12228_v51 = vadd.f32 %v12227_v47, %v12226_v22  ;;  %v12229_v15 = vpop.f32.mrb[82].mxu0 }
 0x74f   : > { %v12230_v60 = vpop.f32.mrb[83].mxu0 }
 0x750   : > { %v13240_v41 = vadd.f32 %v12228_v51, %v7897_v13  ;;  %v12231_v49 = vadd.f32 %v12230_v60, %v12229_v15 }
 0x752   : > { %v13252_v56 = vadd.f32 %v12231_v49, %v7900_v63 }
 0x754   : > { %v12232_v3 = vpop.f32.mrb[84].mxu0 }
 0x755   : > { %v12233_v10 = vpop.f32.mrb[85].mxu0 }
 0x756   : > { %v12234_v59 = vadd.f32 %v12233_v10, %v12232_v3  ;;  %v12235_v50 = vpop.f32.mrb[86].mxu0 }
 0x757   : > { %v12236_v6 = vpop.f32.mrb[87].mxu0 }
 0x758   : > { %v13234_v34 = vadd.f32 %v12234_v59, %v7905_v9  ;;  %v12237_v44 = vadd.f32 %v12236_v6, %v12235_v50 }
 0x75a   : > { %v13246_v1 = vadd.f32 %v12237_v44, %v7908_v26 }
 0x75c   : > { %v12238_v39 = vpop.f32.mrb[88].mxu0 }
 0x75d   : > { %v12239_v30 = vpop.f32.mrb[89].mxu0 }
 0x75e   : > { %v12240_v14 = vadd.f32 %v12239_v30, %v12238_v39  ;;  %v12241_v12 = vpop.f32.mrb[90].mxu0 }
 0x75f   : > { %v12242_v28 = vpop.f32.mrb[91].mxu0 }
 0x760   : > { %v13264_v38 = vadd.f32 %v12240_v14, %v7913_v58  ;;  %v12243_v43 = vadd.f32 %v12242_v28, %v12241_v12 }
 0x762   : > { %v13276_v54 = vadd.f32 %v12243_v43, %v7916_v62 }
 0x764   : > { %v12244_v24 = vpop.f32.mrb[92].mxu0 }
 0x765   : > { %v12245_v13 = vpop.f32.mrb[93].mxu0 }
 0x766   : > { %v12246_v0 = vadd.f32 %v12245_v13, %v12244_v24  ;;  %v12247_v63 = vpop.f32.mrb[94].mxu0 }
 0x767   : > { %v12248_v8 = vpop.f32.mrb[95].mxu0 }
 0x768   : > { %v13258_v16 = vadd.f32 %v12246_v0, %v7921_v23  ;;  %v12249_v46 = vadd.f32 %v12248_v8, %v12247_v63 }
 0x769   : > { %v12266_v36 = vpop.f32.mrb[72].mxu1 }
 0x76a   : > { %v13270_v53 = vadd.f32 %v12249_v46, %v7924_v19  ;;  %v12267_v9 = vpop.f32.mrb[73].mxu1 }
 0x76b   : > { %v12268_v20 = vadd.f32 %v12267_v9, %v12266_v36  ;;  %v12269_v26 = vpop.f32.mrb[74].mxu1 }
 0x76c   : > { %v12270_v45 = vpop.f32.mrb[75].mxu1  ;;  %v12318_v7 = vpop.f32.mrb[96].mxu0 }
 0x76d   : > { %v13241_v27 = vadd.f32 %v13240_v41, %v12268_v20  ;;  %v12271_v37 = vadd.f32 %v12270_v45, %v12269_v26  ;;  %v12319_v5 = vpop.f32.mrb[97].mxu0 }
 0x76e   : > { %v12320_v29 = vadd.f32 %v12319_v5, %v12318_v7  ;;  %v12321_v57 = vpop.f32.mrb[98].mxu0 }
 0x76f   : > { %v13253_v40 = vadd.f32 %v13252_v56, %v12271_v37  ;;  %v12322_v25 = vpop.f32.mrb[99].mxu0 }
 0x770   : > { %v12323_v42 = vadd.f32 %v12322_v25, %v12321_v57 }
 0x771   : > { %v12272_v33 = vpop.f32.mrb[76].mxu1 }
 0x772   : > { %v12273_v58 = vpop.f32.mrb[77].mxu1 }
 0x773   : > { %v12274_v35 = vadd.f32 %v12273_v58, %v12272_v33  ;;  %v12275_v11 = vpop.f32.mrb[78].mxu1 }
 0x774   : > { %v12276_v62 = vpop.f32.mrb[79].mxu1  ;;  %v12324_v2 = vpop.f32.mrb[100].mxu0 }
 0x775   : > { %v13235_v17 = vadd.f32 %v13234_v34, %v12274_v35  ;;  %v12277_v32 = vadd.f32 %v12276_v62, %v12275_v11  ;;  %v12325_v18 = vpop.f32.mrb[101].mxu0 }
 0x776   : > { %v12326_v61 = vadd.f32 %v12325_v18, %v12324_v2  ;;  %v12327_v31 = vpop.f32.mrb[102].mxu0 }
 0x777   : > { %v13247_v55 = vadd.f32 %v13246_v1, %v12277_v32  ;;  %v12328_v48 = vpop.f32.mrb[103].mxu0 }
 0x778   : > { %v12329_v52 = vadd.f32 %v12328_v48, %v12327_v31 }
 0x779   : > { %v12278_v4 = vpop.f32.mrb[80].mxu1 }
 0x77a   : > { %v12279_v23 = vpop.f32.mrb[81].mxu1 }
 0x77b   : > { %v12280_v21 = vadd.f32 %v12279_v23, %v12278_v4  ;;  %v12281_v19 = vpop.f32.mrb[82].mxu1 }
 0x77c   : > { %v12282_v22 = vpop.f32.mrb[83].mxu1  ;;  %v12330_v47 = vpop.f32.mrb[104].mxu0 }
 0x77d   : > { %v13265_v51 = vadd.f32 %v13264_v38, %v12280_v21  ;;  %v12283_v15 = vadd.f32 %v12282_v22, %v12281_v19  ;;  %v12331_v60 = vpop.f32.mrb[105].mxu0 }
 0x77e   : > { %v12332_v41 = vadd.f32 %v12331_v60, %v12330_v47  ;;  %v12333_v49 = vpop.f32.mrb[106].mxu0 }
 0x77f   : > { %v13277_v56 = vadd.f32 %v13276_v54, %v12283_v15  ;;  %v12334_v3 = vpop.f32.mrb[107].mxu0 }
 0x780   : > { %v12335_v10 = vadd.f32 %v12334_v3, %v12333_v49 }
 0x781   : > { %v12284_v59 = vpop.f32.mrb[84].mxu1 }
 0x782   : > { %v12285_v50 = vpop.f32.mrb[85].mxu1 }
 0x783   : > { %v12286_v6 = vadd.f32 %v12285_v50, %v12284_v59  ;;  %v12287_v34 = vpop.f32.mrb[86].mxu1 }
 0x784   : > { %v12288_v44 = vpop.f32.mrb[87].mxu1  ;;  %v12336_v1 = vpop.f32.mrb[108].mxu0 }
 0x785   : > { %v13259_v39 = vadd.f32 %v13258_v16, %v12286_v6  ;;  %v12289_v30 = vadd.f32 %v12288_v44, %v12287_v34  ;;  %v12337_v14 = vpop.f32.mrb[109].mxu0 }
 0x786   : > { %v12338_v12 = vadd.f32 %v12337_v14, %v12336_v1  ;;  %v12339_v28 = vpop.f32.mrb[110].mxu0 }
 0x787   : > { %v13271_v43 = vadd.f32 %v13270_v53, %v12289_v30  ;;  %v12340_v38 = vpop.f32.mrb[111].mxu0 }
 0x788   : > { %v12341_v24 = vadd.f32 %v12340_v38, %v12339_v28 }
 0x78c   : > { %v12358_v13 = vpop.f32.mrb[112].mxu0 }
 0x78d   : > { %v12359_v0 = vpop.f32.mrb[113].mxu0 }
 0x78e   : > { %v12360_v63 = vadd.f32 %v12359_v0, %v12358_v13  ;;  %v12361_v54 = vpop.f32.mrb[114].mxu0 }
 0x78f   : > { %v12362_v8 = vpop.f32.mrb[115].mxu0 }
 0x790   : > { %v8867_v46 = vadd.f32 %v12360_v63, %v12320_v29  ;;  %v12363_v36 = vadd.f32 %v12362_v8, %v12361_v54 }
 0x792   : > { %v16543_v9 = vadd.f32 %v13241_v27, %v8867_v46  ;;  %v8870_v20 = vadd.f32 %v12363_v36, %v12323_v42 }
 0x794   : > { %v16545_v26 = vadd.f32 %v13253_v40, %v8870_v20  ;;  %v12364_v16 = vpop.f32.mrb[116].mxu0 }
 0x795   : > { %v12365_v45 = vpop.f32.mrb[117].mxu0 }
 0x796   : > { %v12366_v7 = vadd.f32 %v12365_v45, %v12364_v16  ;;  %v12367_v37 = vpop.f32.mrb[118].mxu0 }
 0x797   : > { %v12368_v5 = vpop.f32.mrb[119].mxu0 }
 0x798   : > { %v8875_v53 = vadd.f32 %v12366_v7, %v12326_v61  ;;  %v12369_v57 = vadd.f32 %v12368_v5, %v12367_v37 }
 0x79a   : > { %v16547_v25 = vadd.f32 %v13235_v17, %v8875_v53  ;;  %v8878_v33 = vadd.f32 %v12369_v57, %v12329_v52 }
 0x79c   : > { %v16549_v58 = vadd.f32 %v13247_v55, %v8878_v33  ;;  %v12370_v35 = vpop.f32.mrb[120].mxu0 }
 0x79d   : > { %v12371_v29 = vpop.f32.mrb[121].mxu0 }
 0x79e   : > { %v12372_v11 = vadd.f32 %v12371_v29, %v12370_v35  ;;  %v12373_v27 = vpop.f32.mrb[122].mxu0 }
 0x79f   : > { %v12374_v62 = vpop.f32.mrb[123].mxu0 }
 0x7a0   : > { %v8883_v42 = vadd.f32 %v12372_v11, %v12332_v41  ;;  %v12375_v40 = vadd.f32 %v12374_v62, %v12373_v27 }
 0x7a2   : > { %v16551_v2 = vadd.f32 %v13265_v51, %v8883_v42  ;;  %v8886_v32 = vadd.f32 %v12375_v40, %v12335_v10 }
 0x7a4   : > { %v16553_v18 = vadd.f32 %v13277_v56, %v8886_v32  ;;  %v12376_v31 = vpop.f32.mrb[124].mxu0 }
 0x7a5   : > { %v12377_v61 = vpop.f32.mrb[125].mxu0 }
 0x7a6   : > { %v12378_v48 = vadd.f32 %v12377_v61, %v12376_v31  ;;  %v12379_v17 = vpop.f32.mrb[126].mxu0 }
 0x7a7   : > { %v12380_v4 = vpop.f32.mrb[127].mxu0 }
 0x7a8   : > { %v8891_v52 = vadd.f32 %v12378_v48, %v12338_v12  ;;  %v12381_v55 = vadd.f32 %v12380_v4, %v12379_v17 }
 0x7aa   : > { %v16555_v23 = vadd.f32 %v13259_v39, %v8891_v52  ;;  %v8894_v21 = vadd.f32 %v12381_v55, %v12341_v24 }
 0x7ac   : > { %v16557_v19 = vadd.f32 %v13271_v43, %v8894_v21  ;;  %v12410_v22 = vpop.f32.mrb[128].mxu0 }
 0x7ad   : > { %v12411_v47 = vpop.f32.mrb[129].mxu0 }
 0x7ae   : > { %v12412_v15 = vadd.f32 %v12411_v47, %v12410_v22  ;;  %v12413_v51 = vpop.f32.mrb[130].mxu0 }
 0x7af   : > { %v12414_v60 = vpop.f32.mrb[131].mxu0 }
 0x7b0   : > { %v12415_v41 = vadd.f32 %v12414_v60, %v12413_v51 }
 0x7b4   : > { %v12416_v49 = vpop.f32.mrb[132].mxu0 }
 0x7b5   : > { %v12417_v56 = vpop.f32.mrb[133].mxu0 }
 0x7b6   : > { %v12418_v3 = vadd.f32 %v12417_v56, %v12416_v49  ;;  %v12419_v10 = vpop.f32.mrb[134].mxu0 }
 0x7b7   : > { %v12420_v59 = vpop.f32.mrb[135].mxu0 }
 0x7b8   : > { %v12421_v50 = vadd.f32 %v12420_v59, %v12419_v10 }
 0x7bc   : > { %v12422_v6 = vpop.f32.mrb[136].mxu0 }
 0x7bd   : > { %v12423_v34 = vpop.f32.mrb[137].mxu0 }
 0x7be   : > { %v12424_v44 = vadd.f32 %v12423_v34, %v12422_v6  ;;  %v12425_v1 = vpop.f32.mrb[138].mxu0 }
 0x7bf   : > { %v12426_v39 = vpop.f32.mrb[139].mxu0 }
 0x7c0   : > { %v12427_v30 = vadd.f32 %v12426_v39, %v12425_v1 }
 0x7c4   : > { %v12428_v14 = vpop.f32.mrb[140].mxu0 }
 0x7c5   : > { %v12429_v12 = vpop.f32.mrb[141].mxu0 }
 0x7c6   : > { %v12430_v28 = vadd.f32 %v12429_v12, %v12428_v14  ;;  %v12431_v43 = vpop.f32.mrb[142].mxu0 }
 0x7c7   : > { %v12432_v38 = vpop.f32.mrb[143].mxu0 }
 0x7c8   : > { %v12433_v24 = vadd.f32 %v12432_v38, %v12431_v43 }
 0x7c9   : > { %v12450_v13 = vpop.f32.mrb[88].mxu1 }
 0x7ca   : > { %v12451_v0 = vpop.f32.mrb[89].mxu1 }
 0x7cb   : > { %v12452_v63 = vadd.f32 %v12451_v0, %v12450_v13  ;;  %v12453_v54 = vpop.f32.mrb[90].mxu1 }
 0x7cc   : > { %v12454_v8 = vpop.f32.mrb[91].mxu1  ;;  %v12502_v46 = vpop.f32.mrb[144].mxu0 }
 0x7cd   : > { %v9410_v36 = vadd.f32 %v12452_v63, %v12412_v15  ;;  %v12455_v20 = vadd.f32 %v12454_v8, %v12453_v54  ;;  %v12503_v16 = vpop.f32.mrb[145].mxu0 }
 0x7ce   : > { %v12504_v45 = vadd.f32 %v12503_v16, %v12502_v46  ;;  %v12505_v7 = vpop.f32.mrb[146].mxu0 }
 0x7cf   : > { %v9413_v37 = vadd.f32 %v12455_v20, %v12415_v41  ;;  %v12506_v5 = vpop.f32.mrb[147].mxu0  ;;  %v13243_v53 = vadd.f32 %v16543_v9, %v9410_v36 }
 0x7d0   : > { %v12507_v57 = vadd.f32 %v12506_v5, %v12505_v7 }
 0x7d1   : > { %v12456_v33 = vpop.f32.mrb[92].mxu1  ;;  %v13255_v35 = vadd.f32 %v16545_v26, %v9413_v37 }
 0x7d2   : > { %v12457_v29 = vpop.f32.mrb[93].mxu1 }
 0x7d3   : > { %v12458_v11 = vadd.f32 %v12457_v29, %v12456_v33  ;;  %v12459_v27 = vpop.f32.mrb[94].mxu1 }
 0x7d4   : > { %v12460_v62 = vpop.f32.mrb[95].mxu1  ;;  %v12508_v42 = vpop.f32.mrb[148].mxu0 }
 0x7d5   : > { %v9418_v40 = vadd.f32 %v12458_v11, %v12418_v3  ;;  %v12461_v32 = vadd.f32 %v12460_v62, %v12459_v27  ;;  %v12509_v31 = vpop.f32.mrb[149].mxu0 }
 0x7d6   : > { %v12510_v61 = vadd.f32 %v12509_v31, %v12508_v42  ;;  %v12511_v48 = vpop.f32.mrb[150].mxu0 }
 0x7d7   : > { %v9421_v17 = vadd.f32 %v12461_v32, %v12421_v50  ;;  %v12512_v4 = vpop.f32.mrb[151].mxu0  ;;  %v13237_v52 = vadd.f32 %v16547_v25, %v9418_v40 }
 0x7d8   : > { %v12513_v55 = vadd.f32 %v12512_v4, %v12511_v48 }
 0x7d9   : > { %v12462_v9 = vpop.f32.mrb[96].mxu1  ;;  %v13249_v21 = vadd.f32 %v16549_v58, %v9421_v17 }
 0x7da   : > { %v12463_v22 = vpop.f32.mrb[97].mxu1 }
 0x7db   : > { %v12464_v26 = vadd.f32 %v12463_v22, %v12462_v9  ;;  %v12465_v47 = vpop.f32.mrb[98].mxu1 }
 0x7dc   : > { %v12466_v15 = vpop.f32.mrb[99].mxu1  ;;  %v12514_v51 = vpop.f32.mrb[152].mxu0 }
 0x7dd   : > { %v9426_v60 = vadd.f32 %v12464_v26, %v12424_v44  ;;  %v12467_v41 = vadd.f32 %v12466_v15, %v12465_v47  ;;  %v12515_v49 = vpop.f32.mrb[153].mxu0 }
 0x7de   : > { %v12516_v56 = vadd.f32 %v12515_v49, %v12514_v51  ;;  %v12517_v3 = vpop.f32.mrb[154].mxu0 }
 0x7df   : > { %v9429_v10 = vadd.f32 %v12467_v41, %v12427_v30  ;;  %v12518_v59 = vpop.f32.mrb[155].mxu0  ;;  %v13267_v50 = vadd.f32 %v16551_v2, %v9426_v60 }
 0x7e0   : > { %v12519_v6 = vadd.f32 %v12518_v59, %v12517_v3 }
 0x7e1   : > { %v12468_v25 = vpop.f32.mrb[100].mxu1  ;;  %v13279_v34 = vadd.f32 %v16553_v18, %v9429_v10  ;;  %v10854_v10 = vld [vmem:[%s16591_s11] ss:$0 sm:$0xff] }
 0x7e2   : > { %v12469_v1 = vpop.f32.mrb[101].mxu1 }
 0x7e3   : > { %v12470_v58 = vadd.f32 %v12469_v1, %v12468_v25  ;;  %v12471_v39 = vpop.f32.mrb[102].mxu1 }
 0x7e4   : > { %v12472_v14 = vpop.f32.mrb[103].mxu1  ;;  %v12520_v12 = vpop.f32.mrb[156].mxu0 }
 0x7e5   : > { %v9434_v43 = vadd.f32 %v12470_v58, %v12430_v28  ;;  %v12473_v38 = vadd.f32 %v12472_v14, %v12471_v39  ;;  %v12521_v44 = vpop.f32.mrb[157].mxu0 }
 0x7e6   : > { %v12522_v13 = vadd.f32 %v12521_v44, %v12520_v12  ;;  %v12523_v0 = vpop.f32.mrb[158].mxu0 }
 0x7e7   : > { %v9437_v63 = vadd.f32 %v12473_v38, %v12433_v24  ;;  %v12524_v54 = vpop.f32.mrb[159].mxu0  ;;  %v13261_v30 = vadd.f32 %v16555_v23, %v9434_v43 }
 0x7e8   : > { %v12525_v8 = vadd.f32 %v12524_v54, %v12523_v0 }
 0x7e9   : > { %v13273_v2 = vadd.f32 %v16557_v19, %v9437_v63 }
 0x7ec   : > { %v12542_v46 = vpop.f32.mrb[160].mxu0 }
 0x7ed   : > { %v12543_v36 = vpop.f32.mrb[161].mxu0 }
 0x7ee   : > { %v12544_v18 = vadd.f32 %v12543_v36, %v12542_v46  ;;  %v12545_v20 = vpop.f32.mrb[162].mxu0 }
 0x7ef   : > { %v12546_v16 = vpop.f32.mrb[163].mxu0 }
 0x7f0   : > { %v9953_v7 = vadd.f32 %v12544_v18, %v12504_v45  ;;  %v12547_v37 = vadd.f32 %v12546_v16, %v12545_v20 }
 0x7f2   : > { %v9956_v5 = vadd.f32 %v12547_v37, %v12507_v57  ;;  %v13244_v28 = vadd.f32 %v13243_v53, %v9953_v7 }
 0x7f4   : > { %v12548_v33 = vpop.f32.mrb[164].mxu0  ;;  %v13256_v29 = vadd.f32 %v13255_v35, %v9956_v5 }
 0x7f5   : > { %v12549_v11 = vpop.f32.mrb[165].mxu0 }
 0x7f6   : > { %v12550_v27 = vadd.f32 %v12549_v11, %v12548_v33  ;;  %v12551_v24 = vpop.f32.mrb[166].mxu0 }
 0x7f7   : > { %v12552_v62 = vpop.f32.mrb[167].mxu0 }
 0x7f8   : > { %v9961_v42 = vadd.f32 %v12550_v27, %v12510_v61  ;;  %v12553_v23 = vadd.f32 %v12552_v62, %v12551_v24 }
 0x7fa   : > { %v9964_v40 = vadd.f32 %v12553_v23, %v12513_v55  ;;  %v13238_v32 = vadd.f32 %v13237_v52, %v9961_v42  ;;  %v10853_v52 = vld [vmem:[%s16590_s10] ss:$0 sm:$0xff] }
 0x7fc   : > { %v12554_v19 = vpop.f32.mrb[168].mxu0  ;;  %v13250_v31 = vadd.f32 %v13249_v21, %v9964_v40 }
 0x7fd   : > { %v12555_v48 = vpop.f32.mrb[169].mxu0 }
 0x7fe   : > { %v12556_v17 = vadd.f32 %v12555_v48, %v12554_v19  ;;  %v12557_v4 = vpop.f32.mrb[170].mxu0 }
 0x7ff   : > { %v12558_v9 = vpop.f32.mrb[171].mxu0 }
 0x800   : > { %v9969_v45 = vadd.f32 %v12556_v17, %v12516_v56  ;;  %v12559_v22 = vadd.f32 %v12558_v9, %v12557_v4 }
 0x802   : > { %v9972_v57 = vadd.f32 %v12559_v22, %v12519_v6  ;;  %v13268_v53 = vadd.f32 %v13267_v50, %v9969_v45 }
 0x804   : > { %v12560_v26 = vpop.f32.mrb[172].mxu0  ;;  %v13280_v35 = vadd.f32 %v13279_v34, %v9972_v57 }
 0x805   : > { %v12561_v47 = vpop.f32.mrb[173].mxu0 }
 0x806   : > { %v12562_v15 = vadd.f32 %v12561_v47, %v12560_v26  ;;  %v12563_v51 = vpop.f32.mrb[174].mxu0 }
 0x807   : > { %v12564_v60 = vpop.f32.mrb[175].mxu0 }
 0x808   : > { %v9977_v61 = vadd.f32 %v12562_v15, %v12522_v13  ;;  %v12565_v41 = vadd.f32 %v12564_v60, %v12563_v51 }
 0x809   : > { %v13012_v55 = vpop.f32.mrb[64].mxu1 }
 0x80a   : > { %v9980_v21 = vadd.f32 %v12565_v41, %v12525_v8  ;;  %v13239_v49 = vadd.f32 %v13238_v32, %v13012_v55  ;;  %v10017_v3 = vpop.f32.mrb[65].mxu1  ;;  %v13262_v56 = vadd.f32 %v13261_v30, %v9977_v61 }
 0x80b   : > { %v13245_v59 = vadd.f32 %v13244_v28, %v10017_v3  ;;  %v13013_v50 = vpop.f32.mrb[66].mxu1 }
 0x80c   : > { %v10065_v6 = vmul.f32 %v13239_v49, %v10853_v52  ;;  %v13251_v25 = vadd.f32 %v13250_v31, %v13013_v50  ;;  %v10020_v34 = vpop.f32.mrb[67].mxu1  ;;  %v13274_v1 = vadd.f32 %v13273_v2, %v9980_v21 }
 0x80d   : > { %v10063_v58 = vmul.f32 %v13245_v59, %v10853_v52  ;;  %v13257_v39 = vadd.f32 %v13256_v29, %v10020_v34 }
 0x80e   : > { %v10080_v14 = vadd.f32 %v10854_v10, %v10065_v6  ;;  %v10066_v12 = vmul.f32 %v13251_v25, %v10853_v52 }
 0x80f   : > { %v10078_v43 = vadd.f32 %v10854_v10, %v10063_v58  ;;  %v10064_v38 = vmul.f32 %v13257_v39, %v10853_v52 }
 0x810   : > { %v10088_v44 = vmul.f32 0.01, %v10080_v14  ;;  %v10081_v13 = vadd.f32 %v10854_v10, %v10066_v12 }
 0x811   : > { %v10086_v0 = vmul.f32 0.01, %v10078_v43  ;;  %v10079_v63 = vadd.f32 %v10854_v10, %v10064_v38  ;;  %v13016_v54 = vpop.f32.mrb[68].mxu1 }
 0x812   : > { %v10096_v30 = vmax.f32 %v10080_v14, %v10088_v44  ;;  %v10089_v8 = vmul.f32 0.01, %v10081_v13  ;;  %v13263_v46 = vadd.f32 %v13262_v56, %v13016_v54  ;;  %v10033_v36 = vpop.f32.mrb[69].mxu1 }
 0x813   : > { %v10094_v18 = vmax.f32 %v10078_v43, %v10086_v0  ;;  %v10087_v20 = vmul.f32 0.01, %v10079_v63  ;;  %v13269_v16 = vadd.f32 %v13268_v53, %v10033_v36  ;;  %v13017_v7 = vpop.f32.mrb[70].mxu1 }
 0x814   : > { %10104 = vst [vmem:[#allocation5 + $0x10] sm:$0xff] %v10096_v30  ;;  %v10097_v2 = vmax.f32 %v10081_v13, %v10089_v8  ;;  %v10069_v37 = vmul.f32 %v13263_v46, %v10853_v52  ;;  %v13275_v5 = vadd.f32 %v13274_v1, %v13017_v7  ;;  %v10036_v28 = vpop.f32.mrb[71].mxu1 }
 0x815   : > { %10102 = vst [vmem:[#allocation5] sm:$0xff] %v10094_v18  ;;  %v10095_v33 = vmax.f32 %v10079_v63, %v10087_v20  ;;  %v10067_v29 = vmul.f32 %v13269_v16, %v10853_v52  ;;  %v13281_v11 = vadd.f32 %v13280_v35, %v10036_v28 }
 0x816   : > { %10105 = vst [vmem:[#allocation5 + $0x18] sm:$0xff] %v10097_v2  ;;  %v10084_v27 = vadd.f32 %v10854_v10, %v10069_v37  ;;  %v10070_v24 = vmul.f32 %v13275_v5, %v10853_v52 }
 0x817   : > { %10103 = vst [vmem:[#allocation5 + $0x8] sm:$0xff] %v10095_v33  ;;  %v10082_v62 = vadd.f32 %v10854_v10, %v10067_v29  ;;  %v10068_v42 = vmul.f32 %v13281_v11, %v10853_v52 }
 0x818   : > { %v10092_v23 = vmul.f32 0.01, %v10084_v27  ;;  %v10085_v40 = vadd.f32 %v10854_v10, %v10070_v24 }
 0x819   : > { %v10090_v32 = vmul.f32 0.01, %v10082_v62  ;;  %v10083_v19 = vadd.f32 %v10854_v10, %v10068_v42 }
 0x81a   : > { %v10100_v31 = vmax.f32 %v10084_v27, %v10092_v23  ;;  %v10093_v48 = vmul.f32 0.01, %v10085_v40 }
 0x81b   : > { %v10098_v17 = vmax.f32 %v10082_v62, %v10090_v32  ;;  %v10091_v4 = vmul.f32 0.01, %v10083_v19 }
 0x81c   : > { %10108 = vst [vmem:[#allocation5 + $0x30] sm:$0xff] %v10100_v31  ;;  %v10101_v9 = vmax.f32 %v10085_v40, %v10093_v48 }
 0x81d   : > { %v10116_v45 = vld [vmem:[#allocation5 + $0x11] sm:$0xff]  ;;  %10106 = vst [vmem:[#allocation5 + $0x20] sm:$0xff] %v10098_v17  ;;  %v10099_v22 = vmax.f32 %v10083_v19, %v10091_v4 }
 0x81e   : > { %v10120_v57 = vmax.f32 %v10096_v30, %v10116_v45  ;;  %v10114_v53 = vld [vmem:[#allocation5 + $0x1] sm:$0xff]  ;;  %v10115_v26 = vld [vmem:[#allocation5 + $0x9] sm:$0xff]  ;;  %10109 = vst [vmem:[#allocation5 + $0x38] sm:$0xff] %v10101_v9  ;;  %v10124_v35 = vld [vmem:[#allocation5 + $0x12] sm:$0xff] }
 0x81f   : > { %v10118_v47 = vmax.f32 %v10094_v18, %v10114_v53  ;;  %v10119_v15 = vmax.f32 %v10095_v33, %v10115_v26  ;;  %10107 = vst [vmem:[#allocation5 + $0x28] sm:$0xff] %v10099_v22  ;;  %v10122_v60 = vld [vmem:[#allocation5 + $0x2] sm:$0xff]  ;;  %v10123_v61 = vld [vmem:[#allocation5 + $0xa] sm:$0xff] }
 0x820   : > { %v10128_v51 = vmax.f32 %v10120_v57, %v10124_v35 }
 0x821   : > { %v10126_v41 = vmax.f32 %v10118_v47, %v10122_v60  ;;  %v10127_v55 = vmax.f32 %v10119_v15, %v10123_v61 }
 0x822   : > { %v10134_v52 = vmax.f32 %v10128_v51, %v10098_v17 }
 0x823   : > { %v10132_v21 = vmax.f32 %v10126_v41, %v10096_v30  ;;  %v10133_v49 = vmax.f32 %v10127_v55, %v10097_v2 }
 0x824   : > { %v10117_v3 = vld [vmem:[#allocation5 + $0x19] sm:$0xff] }
 0x825   : > { %v10121_v56 = vmax.f32 %v10097_v2, %v10117_v3  ;;  %v10138_v10 = vmax.f32 %v10132_v21, %v10116_v45  ;;  %v10139_v59 = vmax.f32 %v10133_v49, %v10117_v3  ;;  %v10125_v50 = vld [vmem:[#allocation5 + $0x1a] sm:$0xff]  ;;  %v10154_v18 = vld [vmem:[#allocation5 + $0x31] sm:$0xff] }
 0x826   : > { %v10136_v6 = vld [vmem:[#allocation5 + $0x21] sm:$0xff]  ;;  %v10137_v44 = vld [vmem:[#allocation5 + $0x29] sm:$0xff]  ;;  %v10155_v2 = vld [vmem:[#allocation5 + $0x39] sm:$0xff] }
 0x827   : > { %v10129_v25 = vmax.f32 %v10121_v56, %v10125_v50  ;;  %v10144_v34 = vmax.f32 %v10138_v10, %v10124_v35  ;;  %v10145_v1 = vmax.f32 %v10139_v59, %v10125_v50  ;;  %v10140_v58 = vmax.f32 %v10134_v52, %v10136_v6  ;;  %v10142_v39 = vld [vmem:[#allocation5 + $0x22] sm:$0xff]  ;;  %v10143_v30 = vld [vmem:[#allocation5 + $0x2a] sm:$0xff]  ;;  %v10160_v5 = vld [vmem:[#allocation5 + $0x32] sm:$0xff] }
 0x828   : > { %v10161_v28 = vld [vmem:[#allocation5 + $0x3a] sm:$0xff] }
 0x829   : > { %v10150_v14 = vmax.f32 %v10144_v34, %v10098_v17  ;;  %v10135_v12 = vmax.f32 %v10129_v25, %v10099_v22  ;;  %v10146_v43 = vmax.f32 %v10140_v58, %v10142_v39  ;;  %v10151_v38 = vmax.f32 %v10145_v1, %v10099_v22 }
 0x82b   : > { %v10141_v13 = vmax.f32 %v10135_v12, %v10137_v44  ;;  %v10152_v0 = vmax.f32 %v10146_v43, %v10100_v31  ;;  %v10156_v63 = vmax.f32 %v10150_v14, %v10136_v6  ;;  %v10157_v54 = vmax.f32 %v10151_v38, %v10137_v44 }
 0x82d   : > { %v10147_v8 = vmax.f32 %v10141_v13, %v10143_v30  ;;  %v10162_v46 = vmax.f32 %v10156_v63, %v10142_v39  ;;  %v10163_v36 = vmax.f32 %v10157_v54, %v10143_v30  ;;  %v10158_v16 = vmax.f32 %v10152_v0, %v10154_v18 }
 0x82f   : > { %v10153_v20 = vmax.f32 %v10147_v8, %v10101_v9  ;;  %v10870_v7 = vpack.c.bf16 %v10163_v36, %v10162_v46  ;;  %v10164_v33 = vmax.f32 %v10158_v16, %v10160_v5 }
 0x831   : > { %v10159_v37 = vmax.f32 %v10153_v20, %v10155_v2  ;;  %10871 = vst [vmem:[%s457_s14] sm:$0xff] %v10870_v7  }
 0x833   : > { %v10165_v29 = vmax.f32 %v10159_v37, %v10161_v28 }
 0x835   : > { %v10875_v11 = vpack.c.bf16 %v10165_v29, %v10164_v33 }
 0x837   : > { %10877 = vst [vmem:[%s457_s14 + $0x8] sm:$0xff] %v10875_v11  }
 0x838 PF: > { %s16633_s22 = sld [smem:[#allocation13_spill]] }
 0x83e   : > { %s24_s21 = sadd.s32 1, %s16633_s22  }
 0x83f   : > { %p21_p5 = scmp.ge.s32.totalorder %s24_s21, 4  }
 0x841   :  { %23 = sbr.rel (!%p21_p5) target bundleno = 2 (0x2), region = 111 }
 0x848   :  { %10207 = vsyncpa [#allocation7], 1 }
 0x849   :  { %10209 = vsyncpa [#allocation7 + $0x1], 1 }
 0x84a   :  { %10210 = vsyncpa [#allocation9], 1 }

</bundles_post_ra>
